<compile_context>
chip_gen: v7x
topology: tpu7x:2x2x1
jax: 0.10.0
libtpu: 0.0.40
codegen_flags: <defaults>
</compile_context>

<pallas_src>
import functools

import jax
import jax.numpy as jnp
from jax.experimental import pallas as pl
from jax.experimental.pallas import tpu as pltpu


_VMEM = functools.partial(pl.BlockSpec, memory_space=pltpu.MemorySpace.VMEM)


# ---------------------------------------------------------------------------
# Pallas kernels
# ---------------------------------------------------------------------------

def _proj_norm_kernel(x_ref, w1_ref, b1_ref, w2_ref, b2_ref, o_ref):
    """Fused Projection_Head_Conv.net + F.normalize(dim=1) on (M, C_in) pixel rows.

    Conv1x1 -> ReLU -> Conv1x1 as two MXU matmuls (bf16 operands, f32 accumulate),
    then a row-wise L2 normalize as an epilogue (XLU reduce + EUP rsqrt).
    Activations arrive f32 and are cast to bf16 AFTER the VMEM load (no extra HBM pass);
    weights are already bf16.
    """
    x = x_ref[...].astype(jnp.bfloat16)
    h = jnp.dot(x, w1_ref[...], preferred_element_type=jnp.float32) + b1_ref[...]
    h = jnp.maximum(h, 0.0)                                   # ReLU(inplace=True)
    y = jnp.dot(h.astype(jnp.bfloat16), w2_ref[...],
                preferred_element_type=jnp.float32) + b2_ref[...]
    # F.normalize: x / max(||x||, 1e-12)  ==  x * rsqrt(max(sum(x^2), 1e-24))
    ss = jnp.sum(y * y, axis=1, keepdims=True)
    o_ref[...] = y * jax.lax.rsqrt(jnp.maximum(ss, 1e-24))


def _neg_logits_kernel(qg_ref, ql_ref, queue_ref, mqueue_ref, og_ref, ol_ref, *, inv_t):
    """Column-tiled negative-queue logits; both queues are streamed exactly once.

    qg_ref : (2N, dim) f32  — stacked [m_q ; n_q]           (global pairs)
    ql_ref : (4N, dim) f32  — stacked 4-group predictions    (local pairs)
    queue_ref / mqueue_ref : (dim, TK) bf16 column tiles of queue / motion_queue
    og_ref : (2N, TK) f32   — global l_neg tile (lane-dense, column 0 aligned)
    ol_ref : (4N, TK) f32   — local  l_neg tile (one M=4N matmul, full sublane group)
    """
    qg = qg_ref[...].astype(jnp.bfloat16)
    ql = ql_ref[...].astype(jnp.bfloat16)
    og_ref[...] = jnp.dot(qg, queue_ref[...],
                          preferred_element_type=jnp.float32) * inv_t
    ol_ref[...] = jnp.dot(ql, mqueue_ref[...],
                          preferred_element_type=jnp.float32) * inv_t


def _prefix_kernel(qg_ref, kg_ref, ql_ref, kl_ref, posg_ref, patch_ref, prel_ref,
                   *, inv_t, n):
    """All the tiny per-pair terms in one launch.

    qg/kg : (2N, dim) f32  — [m_q ; n_q] and [n_k ; m_k]
    ql/kl : (4N, dim) f32  — 4-group predictions and local keys [n_k_l1;n_k_l2;m_k_l1;m_k_l2]
    posg  : (2N, 1)  f32   — l_pos for logits_1 / logits_2
    patch : (N, N)   f32   — n_q @ n_k^T / T  (logits_2 columns of the just-enqueued n_k)
    prel  : (4, N, 1+3N) f32 — per-group [l_pos | in-batch negatives] (reference ordering)
    """
    qg = qg_ref[...]
    kg = kg_ref[...]
    ql = ql_ref[...]
    kl = kl_ref[...]
    dn_t = (((1,), (1,)), ((), ()))          # contract on feature dim of both operands

    posg_ref[...] = jnp.sum(qg * kg, axis=1, keepdims=True) * inv_t
    patch_ref[...] = jax.lax.dot_general(
        qg[n:], kg[:n], dn_t, preferred_element_type=jnp.float32) * inv_t

    # All-pairs similarity between the 4 prediction groups and the 4 local key sets.
    s = jax.lax.dot_general(ql, kl, dn_t,
                            preferred_element_type=jnp.float32) * inv_t      # (4N, 4N)
    pos_l = jnp.sum(ql * kl, axis=1, keepdims=True) * inv_t                  # (4N, 1)
    n2, n3, n4 = 2 * n, 3 * n, 4 * n

    # group n1 (pred_nk_l1 vs n_k_l1): negatives [n_k_l2, m_k_l1, m_k_l2]
    prel_ref[0, :, 0:1] = pos_l[0:n]
    prel_ref[0, :, 1:] = s[0:n, n:n4]
    # group n2 (pred_nk_l2 vs n_k_l2): negatives [n_k_l1, m_k_l1, m_k_l2]
    prel_ref[1, :, 0:1] = pos_l[n:n2]
    prel_ref[1, :, 1:1 + n] = s[n:n2, 0:n]
    prel_ref[1, :, 1 + n:] = s[n:n2, n2:n4]
    # group m1 (pred_mk_l1 vs m_k_l1): negatives [m_k_l2, n_k_l1, n_k_l2]
    prel_ref[2, :, 0:1] = pos_l[n2:n3]
    prel_ref[2, :, 1:1 + n] = s[n2:n3, n3:n4]
    prel_ref[2, :, 1 + n:] = s[n2:n3, 0:n2]
    # group m2 (pred_mk_l2 vs m_k_l2): negatives [m_k_l1, n_k_l1, n_k_l2]
    prel_ref[3, :, 0:1] = pos_l[n3:n4]
    prel_ref[3, :, 1:1 + n] = s[n3:n4, n2:n3]
    prel_ref[3, :, 1 + n:] = s[n3:n4, 0:n2]


def _momentum_kernel(q_ref, k_ref, ok_ref, okb_ref, *, m):
    """param_k = param_k * m + param_q * (1 - m); also emits the bf16 copy in-kernel."""
    new_k = k_ref[...] * m + q_ref[...] * (1.0 - m)
    ok_ref[...] = new_k
    okb_ref[...] = new_k.astype(jnp.bfloat16)


# ---------------------------------------------------------------------------
# Wrappers (plain-JAX glue)
# ---------------------------------------------------------------------------

def proj_head_normalize(x_rows, w1_bf16, b1, w2_bf16, b2):
    """Fused projection head + row-wise L2 normalize for (M, C_in) rows -> (M, dim)."""
    M, C = x_rows.shape
    hidden = w1_bf16.shape[1]
    dim = w2_bf16.shape[1]
    flops = int(2 * M * (C * hidden + hidden * dim))
    bytes_acc = int(x_rows.size * 4 + (w1_bf16.size + w2_bf16.size) * 2
                    + (b1.size + b2.size) * 4 + M * dim * 4)
    # TODO(synk): for very large M (full dense feature maps) add an M-row grid with a
    # constant weight index_map so the weights stay resident while rows are pipelined.
    return pl.pallas_call(
        _proj_norm_kernel,
        out_shape=jax.ShapeDtypeStruct((M, dim), jnp.float32),
        in_specs=[_VMEM()] * 5,
        out_specs=_VMEM(),
        cost_estimate=pl.CostEstimate(flops=flops, transcendentals=int(M),
                                      bytes_accessed=bytes_acc),
    )(x_rows, w1_bf16, b1.reshape(1, -1), w2_bf16, b2.reshape(1, -1))


def queue_neg_logits(qg, ql, queue_bf16, motion_queue_bf16, temperature, tk=1024):
    """Both negative-queue matmuls in one K-column-tiled, pipelined, megacore-parallel call."""
    mg, dim = qg.shape
    ml = ql.shape[0]
    K = queue_bf16.shape[1]
    tk = min(int(tk), K)
    assert tk % 128 == 0 and K % tk == 0
    grid = (K // tk,)
    flops = int(2 * (mg + ml) * dim * K)
    bytes_acc = int(2 * dim * K * 2 + (mg + ml) * K * 4 + (mg + ml) * dim * 4)
    og, ol = pl.pallas_call(
        functools.partial(_neg_logits_kernel, inv_t=float(1.0 / temperature)),
        out_shape=(jax.ShapeDtypeStruct((mg, K), jnp.float32),
                   jax.ShapeDtypeStruct((ml, K), jnp.float32)),
        grid=grid,
        in_specs=[pl.BlockSpec((mg, dim), lambda j: (0, 0)),
                  pl.BlockSpec((ml, dim), lambda j: (0, 0)),
                  pl.BlockSpec((dim, tk), lambda j: (0, j)),
                  pl.BlockSpec((dim, tk), lambda j: (0, j))],
        out_specs=(pl.BlockSpec((mg, tk), lambda j: (0, j)),
                   pl.BlockSpec((ml, tk), lambda j: (0, j))),
        compiler_params=pltpu.CompilerParams(
            dimension_semantics=("parallel",),
            vmem_limit_bytes=32 * 1024 * 1024),   # safe on v5e/v6e/v7x; tune per chip
        cost_estimate=pl.CostEstimate(flops=flops, transcendentals=0,
                                      bytes_accessed=bytes_acc),
    )(qg, ql, queue_bf16, motion_queue_bf16)
    return og, ol


def prefix_logits(qg, kg, ql, kl, temperature):
    """l_pos terms, in-batch negatives (reference column order) and the logits_2 patch."""
    n = qg.shape[0] // 2
    return pl.pallas_call(
        functools.partial(_prefix_kernel, inv_t=float(1.0 / temperature), n=int(n)),
        out_shape=(jax.ShapeDtypeStruct((2 * n, 1), jnp.float32),
                   jax.ShapeDtypeStruct((n, n), jnp.float32),
                   jax.ShapeDtypeStruct((4, n, 1 + 3 * n), jnp.float32)),
        in_specs=[_VMEM()] * 4,
        out_specs=(_VMEM(), _VMEM(), _VMEM()),
    )(qg, kg, ql, kl)


def momentum_update_param(p_q, p_k, m):
    """One aliased pallas_call per parameter: updates param_k and emits its bf16 copy."""
    shape2d = p_q.shape if p_q.ndim >= 2 else (1, p_q.shape[0])
    q2 = p_q.reshape(shape2d)
    k2 = p_k.reshape(shape2d)
    # TODO(synk): the real encoder_q/encoder_k params would need a row grid here
    # (blocks ~ (2048, 1024), 'parallel') to fit v7x VMEM and pipeline the DMA.
    new_k, new_k_bf16 = pl.pallas_call(
        functools.partial(_momentum_kernel, m=float(m)),
        out_shape=(jax.ShapeDtypeStruct(shape2d, jnp.float32),
                   jax.ShapeDtypeStruct(shape2d, jnp.bfloat16)),
        in_specs=[_VMEM(), _VMEM()],
        out_specs=(_VMEM(), _VMEM()),
        input_output_aliases={1: 0},             # param_k buffer updated in place
    )(q2, k2)
    return new_k.reshape(p_q.shape), new_k_bf16.reshape(p_q.shape)


def dequeue_and_enqueue(queue, keys, ptr, K):
    """queue[:, ptr:ptr+bs] = keys.T ; ptr = (ptr+bs) % K.
    concat_all_gather is torch.distributed all_gather; single-device world -> identity.
    TODO(synk): at production K this small column write should alias/donate the queue
    buffer instead of letting XLA copy the whole bank."""
    bs = keys.shape[0]
    assert K % bs == 0
    queue = jax.lax.dynamic_update_slice(queue, keys.T.astype(queue.dtype), (0, ptr))
    return queue, (ptr + bs) % K


# ---------------------------------------------------------------------------
# MoCo forward (contrastive core) on synthetic encoder features
# ---------------------------------------------------------------------------

if __name__ == "__main__":
    # Small shapes consistent with the R2PLUS1D branch of MoCo.__init__
    B, C_base, Tclip, H, W = 2, 512, 2, 4, 4
    hidden, dim = 1024, 128
    Kq = 256            # queue size (65536 in the paper; small synthetic queue here)
    T_temp = 0.07
    m_mom = 0.999
    P = 1 + H * W       # CLS + dense positions per prediction tensor
    TK = 128            # queue column tile; use 1024-2048 at production K=65536

    root = jax.random.PRNGKey(0)
    keys_iter = iter(jax.random.split(root, 32))

    def rnd(shape):
        return jax.random.normal(next(keys_iter), shape, dtype=jnp.float32)

    # Projection_Head_Conv params (query head); key head starts as an exact copy.
    w1 = rnd((C_base, hidden)) / jnp.sqrt(float(C_base))
    b1 = jnp.zeros((hidden,), jnp.float32)
    w2 = rnd((hidden, dim)) / jnp.sqrt(float(hidden))
    b2 = jnp.zeros((dim,), jnp.float32)
    params_q = (w1, b1, w2, b2)
    params_k = tuple(jnp.array(p) for p in params_q)
    # Query-head weights stored persistently in bf16 (cast once, outside the forward).
    w1_q_bf, w2_q_bf = w1.astype(jnp.bfloat16), w2.astype(jnp.bfloat16)

    # register_buffer('queue', randn(dim, K)); normalize(dim=0)  (same for motion_queue)
    # Stored bf16 for MXU-friendly negative-bank matmuls (f32 accumulation in-kernel).
    queue = rnd((dim, Kq))
    queue = (queue / jnp.linalg.norm(queue, axis=0, keepdims=True)).astype(jnp.bfloat16)
    motion_queue = rnd((dim, Kq))
    motion_queue = (motion_queue / jnp.linalg.norm(motion_queue, axis=0, keepdims=True)
                    ).astype(jnp.bfloat16)
    queue_ptr = 0
    motion_queue_ptr = 0

    # TODO(synk): encoder_q/encoder_k (I3D / R2PLUS1D video backbones), Augment_GPU_pre,
    # Gen_Static_Diff, Gen_CAAM_MSAK, the TransformerDecoder/PositionalEncoding and
    # Dense_Contrastive_Loss are external modules not provided; their outputs are replaced
    # by deterministic random feature tensors with the shapes MoCo.forward expects.
    g_m_q = rnd((B, C_base, Tclip, 1, 1))      # encoder_q(vi_m) pooled feature
    g_n_q = rnd((B, C_base, Tclip, 1, 1))
    g_m_k = rnd((B, C_base, Tclip, 1, 1))      # encoder_k(vi_m) pooled feature
    g_n_k = rnd((B, C_base, Tclip, 1, 1))
    g_m_k_l1 = rnd((B, C_base, Tclip, 1, 1))   # local-clip key features
    g_m_k_l2 = rnd((B, C_base, Tclip, 1, 1))
    g_n_k_l1 = rnd((B, C_base, Tclip, 1, 1))
    g_n_k_l2 = rnd((B, C_base, Tclip, 1, 1))
    # transformer-decoder predictions after embedding2, reshaped to (B, C_base, 1, 1+H*W, 1)
    pred_dnk1 = rnd((B, C_base, 1, P, 1))
    pred_dnk2 = rnd((B, C_base, 1, P, 1))
    pred_dmk1 = rnd((B, C_base, 1, P, 1))
    pred_dmk2 = rnd((B, C_base, 1, P, 1))

    # ---- self._momentum_update_key_encoder() for the key projection head ----
    # One aliased call per param; the weight calls also emit the bf16 copies used below.
    new_k, k_bf = [], []
    for pq, pk in zip(params_q, params_k):
        nk_f32, nk_bf16 = momentum_update_param(pq, pk, m_mom)
        new_k.append(nk_f32)
        k_bf.append(nk_bf16)
    params_k = tuple(new_k)
    w1_k_bf, w2_k_bf = k_bf[0], k_bf[2]
    b1_k, b2_k = params_k[1], params_k[3]

    # ---- Projection head + normalize, BATCHED per parameter set ----
    def global_rows(feat5d):
        # aap((1,None,None)) -> mean over T; globals have H=W=1 -> one row per sample.
        return jnp.mean(feat5d, axis=2).reshape(feat5d.shape[0], feat5d.shape[1])

    def pred_rows(pred5d):
        # (B, C, 1, P, 1) -> (B*P, C): one row per (sample, position).
        x = jnp.mean(pred5d, axis=2)                       # (B, C, P, 1)
        return jnp.transpose(x, (0, 2, 3, 1)).reshape(-1, x.shape[1])

    # key head: 6 global branches in ONE call (weights DMA'd once, M = 6B rows)
    xk = jnp.concatenate([global_rows(f) for f in
                          (g_m_k, g_n_k, g_m_k_l1, g_m_k_l2, g_n_k_l1, g_n_k_l2)], axis=0)
    yk = proj_head_normalize(xk, w1_k_bf, b1_k, w2_k_bf, b2_k)   # (6B, dim), normalized
    m_k, n_k, m_k_l1, m_k_l2, n_k_l1, n_k_l2 = jnp.split(yk, 6, axis=0)

    # query head: 2 globals + 4 prediction tensors in ONE call (M = 2B + 4*B*P rows)
    xq = jnp.concatenate([global_rows(g_m_q), global_rows(g_n_q),
                          pred_rows(pred_dnk1), pred_rows(pred_dnk2),
                          pred_rows(pred_dmk1), pred_rows(pred_dmk2)], axis=0)
    yq = proj_head_normalize(xq, w1_q_bf, b1, w2_q_bf, b2)       # (2B + 4BP, dim)
    m_q = yq[0:B]
    n_q = yq[B:2 * B]

    def split_pred(block):
        # block: (B*P, dim) normalized rows -> CLS vector + dense (B, dim, H, W)
        y = block.reshape(B, P, dim)
        cls_feat = y[:, 0, :]                                            # (B, dim)
        dense = jnp.transpose(y[:, 1:, :], (0, 2, 1)).reshape(B, dim, H, W)
        return cls_feat, dense

    off = 2 * B
    step = B * P
    pred_nk_l1, pred_dnk_dense1 = split_pred(yq[off + 0 * step: off + 1 * step])
    pred_nk_l2, pred_dnk_dense2 = split_pred(yq[off + 1 * step: off + 2 * step])
    pred_mk_l1, pred_dmk_dense1 = split_pred(yq[off + 2 * step: off + 3 * step])
    pred_mk_l2, pred_dmk_dense2 = split_pred(yq[off + 3 * step: off + 4 * step])

    # ---- Row stacks shared by the prefix and the queue-negative kernels ----
    qg = jnp.concatenate([m_q, n_q], axis=0)                               # (2B, dim)
    kg = jnp.concatenate([n_k, m_k], axis=0)                               # (2B, dim)
    ql = jnp.concatenate([pred_nk_l1, pred_nk_l2, pred_mk_l1, pred_mk_l2], axis=0)  # (4B, dim)
    kl = jnp.concatenate([n_k_l1, n_k_l2, m_k_l1, m_k_l2], axis=0)                   # (4B, dim)

    # ---- tiny terms: l_pos, in-batch negatives, logits_2 patch (one small kernel) ----
    posg, patch, prel = prefix_logits(qg, kg, ql, kl, T_temp)

    # ---- queue negatives: BOTH queues read once, K-column tiled + pipelined ----
    og, ol = queue_neg_logits(qg, ql, queue, motion_queue, T_temp, tk=TK)

    # ---- compute_logits (same queue semantics/ordering as the module) ----
    logits_1 = jnp.concatenate([posg[0:B], og[0:B]], axis=1)               # (B, 1+K)
    # logits_2 must "see" n_k already enqueued at [queue_ptr : queue_ptr+B]:
    l_neg_2 = jax.lax.dynamic_update_slice(og[B:2 * B], patch, (0, queue_ptr))
    logits_2 = jnp.concatenate([posg[B:2 * B], l_neg_2], axis=1)
    labels_1 = labels_2 = jnp.zeros((B,), dtype=jnp.int32)   # torch.long -> int32

    queue, queue_ptr = dequeue_and_enqueue(queue, n_k, queue_ptr, Kq)
    queue, queue_ptr = dequeue_and_enqueue(queue, m_k, queue_ptr, Kq)

    # ---- compute_logits_local: prefix columns + lane-dense motion-queue slab ----
    local_logits = jnp.concatenate([prel, ol.reshape(4, B, Kq)], axis=-1)  # (4,B,1+3B+K)
    logits_local_n1, logits_local_n2 = local_logits[0], local_logits[1]
    logits_local_m1, logits_local_m2 = local_logits[2], local_logits[3]
    labels_local_n1 = labels_local_n2 = jnp.zeros((B,), dtype=jnp.int32)
    labels_local_m1 = labels_local_m2 = labels_local_n1

    motion_queue, motion_queue_ptr = dequeue_and_enqueue(
        motion_queue, kl, motion_queue_ptr, Kq)

    # TODO(synk): loss_dense_1 / loss_dense_2 require Dense_Contrastive_Loss and the CAAM
    # motion masks, which are not provided, so they are not reproduced here.

    outputs = (logits_1, labels_1, logits_2, labels_2,
               logits_local_n1, labels_local_n1, logits_local_n2, labels_local_n2,
               logits_local_m1, labels_local_m1, logits_local_m2, labels_local_m2,
               pred_dnk_dense1, pred_dnk_dense2, pred_dmk_dense1, pred_dmk_dense2,
               queue, motion_queue, params_k)
    jax.block_until_ready(outputs)

    assert logits_1.shape == (B, 1 + Kq)
    assert logits_2.shape == (B, 1 + Kq)
    assert logits_local_n1.shape == (B, 1 + 3 * B + Kq)
    assert pred_dnk_dense1.shape == (B, dim, H, W)
    assert m_q.shape == (B, dim) and n_k.shape == (B, dim)
    assert queue_ptr == 2 * B and motion_queue_ptr == 4 * B
    print("KERNEL_OK")
</pallas_src>

<mosaic_0001>
module attributes {stable_mosaic.version = 11 : i64} {
  func.func @_momentum_kernel(%arg0: memref<512x1024xf32, #tpu.memory_space<vmem>>, %arg1: memref<512x1024xf32, #tpu.memory_space<vmem>>, %arg2: memref<512x1024xf32, #tpu.memory_space<vmem>>, %arg3: memref<512x1024xbf16, #tpu.memory_space<vmem>>) attributes {dimension_semantics = [], scalar_prefetch = 0 : i64, scratch_operands = 0 : i64, tpu.core_type = #tpu.core_type<tc>} {
    %c0 = arith.constant 0 : index
    %c0_0 = arith.constant 0 : index
    %0 = vector.load %arg1[%c0, %c0_0] : memref<512x1024xf32, #tpu.memory_space<vmem>>, vector<512x1024xf32>
    %cst = arith.constant 9.990000e-01 : f32
    %1 = vector.broadcast %cst : f32 to vector<512x1024xf32>
    %2 = arith.mulf %0, %1 : vector<512x1024xf32>
    %c0_1 = arith.constant 0 : index
    %c0_2 = arith.constant 0 : index
    %3 = vector.load %arg0[%c0_1, %c0_2] : memref<512x1024xf32, #tpu.memory_space<vmem>>, vector<512x1024xf32>
    %cst_3 = arith.constant 1.000000e-03 : f32
    %4 = vector.broadcast %cst_3 : f32 to vector<512x1024xf32>
    %5 = arith.mulf %3, %4 : vector<512x1024xf32>
    %6 = arith.addf %2, %5 : vector<512x1024xf32>
    %c0_4 = arith.constant 0 : index
    %c0_5 = arith.constant 0 : index
    %7 = vector.load %arg2[%c0_4, %c0_5] : memref<512x1024xf32, #tpu.memory_space<vmem>>, vector<512x1024xf32>
    tpu.vector_store %arg2[%c0_4, %c0_5], %6 {strides = array<i32>} : memref<512x1024xf32, #tpu.memory_space<vmem>>, vector<512x1024xf32>,
    %8 = arith.truncf %6 : vector<512x1024xf32> to vector<512x1024xbf16>
    %c0_6 = arith.constant 0 : index
    %c0_7 = arith.constant 0 : index
    %9 = vector.load %arg3[%c0_6, %c0_7] : memref<512x1024xbf16, #tpu.memory_space<vmem>>, vector<512x1024xbf16>
    tpu.vector_store %arg3[%c0_6, %c0_7], %8 {strides = array<i32>} : memref<512x1024xbf16, #tpu.memory_space<vmem>>, vector<512x1024xbf16>,
    return
  }
}

</mosaic_0001>

<bundles_post_ra>
// kernel: tpu_custom_call.1
= control target key start
LH: loop header
LB: loop body
LE: loop exit
PB: predicated region body
PF: predicated region fallthrough
CT: control target
= control target key end

     0   :  { %9 = vsyncpa [#allocation3], 0  ;;  %s7866_s0 = inlined_call_operand.vmem [shape: f32[512,1024], index: 0, kind: input, shape index: {}]   ;;  %s7867_s1 = inlined_call_operand.hbm [shape: f32[512,1024], index: 1, kind: input, shape index: {}, may-alias: {1,2}]   ;;  %s7868_s2 = inlined_call_operand.hbm [shape: f32[512,1024], index: 2, kind: output, shape index: {0}, may-alias: {1,2}]   ;;  %s7869_s3 = inlined_call_operand.hbm [shape: bf16[512,1024], index: 3, kind: output, shape index: {1}]  }
   0x1   :  { %10 = vsyncpa [#allocation4], 0 }
   0x2   :  { %11 = vsyncpa [#allocation7], 0  ;;  %s5955_s12 = smov [#allocation2]   ;;  %s5883_s16 = scalar_lea.hbm %s7867_s1, 65536 }
   0x3   :  { %s19_s13 = sshll.u32 %s5955_s12, 4  ;;  %p5884_p0 = scmp.ne.s32.totalorder %s7867_s1, %s5883_s16  ;;  %s20_s13 = int_to_ptr.vmem [resolvable:$true] %s19_s13 }
   0x4   :  { %p5887_p1 = scmp.lt.u32.totalorder %s5883_s16, %s7867_s1 }
   0x6   :  { %p5889_p2 = pnand %p5887_p1, %p5884_p0 }
   0x8   :  { %5892 = shalt.err (!%p5889_p2)
}
   0x9   :  { %s5893_s21 = scalar_lea.vmem %s20_s13, 65536  ;;  %p5898_p4 = scmp.lt.s32.totalorder %s20_s13, %s20_s13 }
   0xa   :  { %p5894_p3 = scmp.ne.s32.totalorder %s20_s13, %s5893_s21  ;;  %p5899_p5 = scmp.lt.s32.totalorder %s5893_s21, %s5893_s21 }
   0xc   :  { %p5900_p6 = por %p5899_p5, %p5898_p4 }
   0xe   :  { %p5901_p7 = pnand %p5900_p6, %p5894_p3 }
  0x10   :  { %5904 = shalt.err (!%p5901_p7)
}
  0x11   :  { %s5956_s22 = smov 1024   ;;  %s5957_s23 = smov 64  }
  0x12   :  { %25 = dma.hbm_to_vmem [thread:$0]  %s7867_s1, 65536, %s20_s13, [#allocation3], %s5956_s22, %s5956_s22, %s5957_s23  }
  0x13   :  { %5949 = dma.done.wait [#allocation3], 65536  }
  0x14   :  { %5950 = vsyncadd [#allocation3], 4294901760  ;;  %v29_v0 = vld [vmem:[#allocation2] sm:$0xff]  ;;  %v30_v2 = vld [vmem:[#allocation2 + $0x8] sm:$0xff]  ;;  %s5958_s8 = smov [#allocation5]  }
  0x15   :  { %v1053_v1 = vld [vmem:[%s7866_s0] sm:$0xff]  ;;  %v541_v3 = vmul.f32 0.999, %v29_v0  ;;  %v542_v5 = vmul.f32 0.999, %v30_v2  ;;  %v1054_v6 = vld [vmem:[%s7866_s0 + $0x8] sm:$0xff] }
  0x16   :  { %v1565_v4 = vmul.f32 0.001, %v1053_v1  ;;  %v31_v7 = vld [vmem:[#allocation2 + $0x10] sm:$0xff]  ;;  %v1566_v10 = vmul.f32 0.001, %v1054_v6  ;;  %v32_v13 = vld [vmem:[#allocation2 + $0x18] sm:$0xff] }
  0x17   :  { %v1055_v8 = vld [vmem:[%s7866_s0 + $0x10] sm:$0xff]  ;;  %v543_v11 = vmul.f32 0.999, %v31_v7  ;;  %v1056_v14 = vld [vmem:[%s7866_s0 + $0x18] sm:$0xff]  ;;  %v33_v15 = vld [vmem:[#allocation2 + $0x20] sm:$0xff]  ;;  %s7745_s9 = sshll.u32 %s5958_s8, 4  ;;  %s7757_s9 = int_to_ptr.vmem [resolvable:$true] %s7745_s9 }
  0x18   :  { %v2077_v9 = vadd.f32 %v1565_v4, %v541_v3  ;;  %v1567_v12 = vmul.f32 0.001, %v1055_v8  ;;  %v2078_v16 = vadd.f32 %v1566_v10, %v542_v5  ;;  %v544_v18 = vmul.f32 0.999, %v32_v13  ;;  %v1057_v20 = vld [vmem:[%s7866_s0 + $0x20] sm:$0xff]  ;;  %v34_v21 = vld [vmem:[#allocation2 + $0x28] sm:$0xff]  ;;  %p5910_p9 = scmp.lt.s32.totalorder %s7757_s9, %s7757_s9 }
  0x19   :  { %v1568_v19 = vmul.f32 0.001, %v1056_v14  ;;  %v545_v22 = vmul.f32 0.999, %v33_v15  ;;  %v1569_v23 = vmul.f32 0.001, %v1057_v20 }
  0x1a   :  { %2589 = vst [vmem:[#allocation5] sm:$0xff] %v2077_v9  ;;  %v2079_v17 = vadd.f32 %v1567_v12, %v543_v11  ;;  %v546_v24 = vmul.f32 0.999, %v34_v21  ;;  %2590 = vst [vmem:[#allocation5 + $0x8] sm:$0xff] %v2078_v16  ;;  %v1058_v26 = vld [vmem:[%s7866_s0 + $0x28] sm:$0xff]  ;;  %v35_v27 = vld [vmem:[#allocation2 + $0x30] sm:$0xff] }
  0x1b   :  { %v2080_v25 = vadd.f32 %v1568_v19, %v544_v18  ;;  %v1059_v28 = vld [vmem:[%s7866_s0 + $0x30] sm:$0xff]  ;;  %v2081_v29 = vadd.f32 %v1569_v23, %v545_v22  ;;  %v1570_v30 = vmul.f32 0.001, %v1058_v26  ;;  %v547_v31 = vmul.f32 0.999, %v35_v27  ;;  %v36_v33 = vld [vmem:[#allocation2 + $0x38] sm:$0xff] }
  0x1c   :  { %2591 = vst [vmem:[#allocation5 + $0x10] sm:$0xff] %v2079_v17  ;;  %v1571_v32 = vmul.f32 0.001, %v1059_v28  ;;  %v1060_v34 = vld [vmem:[%s7866_s0 + $0x38] sm:$0xff]  ;;  %v37_v35 = vld [vmem:[#allocation2 + $0x40] sm:$0xff]  ;;  %v38_v41 = vld [vmem:[#allocation2 + $0x48] sm:$0xff] }
  0x1d   :  { %2592 = vst [vmem:[#allocation5 + $0x18] sm:$0xff] %v2080_v25  ;;  %2593 = vst [vmem:[#allocation5 + $0x20] sm:$0xff] %v2081_v29  ;;  %v2082_v36 = vadd.f32 %v1570_v30, %v546_v24  ;;  %v548_v38 = vmul.f32 0.999, %v36_v33  ;;  %v1572_v39 = vmul.f32 0.001, %v1060_v34 }
  0x1e   :  { %v2083_v37 = vadd.f32 %v1571_v32, %v547_v31  ;;  %v1061_v40 = vld [vmem:[%s7866_s0 + $0x40] sm:$0xff]  ;;  %v549_v42 = vmul.f32 0.999, %v37_v35  ;;  %v550_v44 = vmul.f32 0.999, %v38_v41  ;;  %v1062_v46 = vld [vmem:[%s7866_s0 + $0x48] sm:$0xff] }
  0x1f   :  { %v1573_v43 = vmul.f32 0.001, %v1061_v40  ;;  %2594 = vst [vmem:[#allocation5 + $0x28] sm:$0xff] %v2082_v36  ;;  %v2084_v45 = vadd.f32 %v1572_v39, %v548_v38  ;;  %v39_v47 = vld [vmem:[#allocation2 + $0x50] sm:$0xff]  ;;  %v1574_v50 = vmul.f32 0.001, %v1062_v46 }
  0x20   :  { %2595 = vst [vmem:[#allocation5 + $0x30] sm:$0xff] %v2083_v37  ;;  %v1063_v48 = vld [vmem:[%s7866_s0 + $0x50] sm:$0xff]  ;;  %v551_v51 = vmul.f32 0.999, %v39_v47  ;;  %v40_v53 = vld [vmem:[#allocation2 + $0x58] sm:$0xff]  ;;  %v41_v55 = vld [vmem:[#allocation2 + $0x60] sm:$0xff] }
  0x21   :  { %v2085_v49 = vadd.f32 %v1573_v43, %v549_v42  ;;  %v1575_v52 = vmul.f32 0.001, %v1063_v48  ;;  %2596 = vst [vmem:[#allocation5 + $0x38] sm:$0xff] %v2084_v45  ;;  %v1064_v54 = vld [vmem:[%s7866_s0 + $0x58] sm:$0xff]  ;;  %v2086_v56 = vadd.f32 %v1574_v50, %v550_v44  ;;  %v552_v58 = vmul.f32 0.999, %v40_v53 }
  0x22   :  { %v1576_v59 = vmul.f32 0.001, %v1064_v54  ;;  %v1065_v60 = vld [vmem:[%s7866_s0 + $0x60] sm:$0xff]  ;;  %v42_v61 = vld [vmem:[#allocation2 + $0x68] sm:$0xff]  ;;  %v553_v62 = vmul.f32 0.999, %v41_v55 }
  0x23   :  { %2597 = vst [vmem:[#allocation5 + $0x40] sm:$0xff] %v2085_v49  ;;  %v2087_v57 = vadd.f32 %v1575_v52, %v551_v51  ;;  %v1577_v63 = vmul.f32 0.001, %v1065_v60  ;;  %v554_v0 = vmul.f32 0.999, %v42_v61  ;;  %2598 = vst [vmem:[#allocation5 + $0x48] sm:$0xff] %v2086_v56 }
  0x24   :  { %v2088_v1 = vadd.f32 %v1576_v59, %v552_v58  ;;  %v1066_v2 = vld [vmem:[%s7866_s0 + $0x68] sm:$0xff]  ;;  %v43_v3 = vld [vmem:[#allocation2 + $0x70] sm:$0xff]  ;;  %v44_v9 = vld [vmem:[#allocation2 + $0x78] sm:$0xff] }
  0x25   :  { %2599 = vst [vmem:[#allocation5 + $0x50] sm:$0xff] %v2087_v57  ;;  %v1067_v4 = vld [vmem:[%s7866_s0 + $0x70] sm:$0xff]  ;;  %v2089_v5 = vadd.f32 %v1577_v63, %v553_v62  ;;  %v1578_v6 = vmul.f32 0.001, %v1066_v2  ;;  %v555_v7 = vmul.f32 0.999, %v43_v3 }
  0x26   :  { %v1579_v8 = vmul.f32 0.001, %v1067_v4  ;;  %2600 = vst [vmem:[#allocation5 + $0x58] sm:$0xff] %v2088_v1  ;;  %v1068_v10 = vld [vmem:[%s7866_s0 + $0x78] sm:$0xff]  ;;  %v45_v11 = vld [vmem:[#allocation2 + $0x80] sm:$0xff]  ;;  %v46_v17 = vld [vmem:[#allocation2 + $0x88] sm:$0xff] }
  0x27   :  { %2601 = vst [vmem:[#allocation5 + $0x60] sm:$0xff] %v2089_v5  ;;  %v2090_v12 = vadd.f32 %v1578_v6, %v554_v0  ;;  %v556_v14 = vmul.f32 0.999, %v44_v9  ;;  %v1580_v15 = vmul.f32 0.001, %v1068_v10  ;;  %v1069_v16 = vld [vmem:[%s7866_s0 + $0x80] sm:$0xff] }
  0x28   :  { %v2091_v13 = vadd.f32 %v1579_v8, %v555_v7  ;;  %v557_v18 = vmul.f32 0.999, %v45_v11  ;;  %v1581_v19 = vmul.f32 0.001, %v1069_v16  ;;  %v558_v20 = vmul.f32 0.999, %v46_v17 }
  0x29   :  { %2602 = vst [vmem:[#allocation5 + $0x68] sm:$0xff] %v2090_v12  ;;  %v2092_v21 = vadd.f32 %v1580_v15, %v556_v14  ;;  %v1070_v22 = vld [vmem:[%s7866_s0 + $0x88] sm:$0xff]  ;;  %v47_v23 = vld [vmem:[#allocation2 + $0x90] sm:$0xff]  ;;  %v48_v29 = vld [vmem:[#allocation2 + $0x98] sm:$0xff] }
  0x2a   :  { %2603 = vst [vmem:[#allocation5 + $0x70] sm:$0xff] %v2091_v13  ;;  %v1071_v24 = vld [vmem:[%s7866_s0 + $0x90] sm:$0xff]  ;;  %v2093_v25 = vadd.f32 %v1581_v19, %v557_v18  ;;  %v1582_v26 = vmul.f32 0.001, %v1070_v22  ;;  %v559_v27 = vmul.f32 0.999, %v47_v23 }
  0x2b   :  { %v1583_v28 = vmul.f32 0.001, %v1071_v24  ;;  %2604 = vst [vmem:[#allocation5 + $0x78] sm:$0xff] %v2092_v21  ;;  %v1072_v30 = vld [vmem:[%s7866_s0 + $0x98] sm:$0xff]  ;;  %v49_v31 = vld [vmem:[#allocation2 + $0xa0] sm:$0xff]  ;;  %v50_v37 = vld [vmem:[#allocation2 + $0xa8] sm:$0xff] }
  0x2c   :  { %2605 = vst [vmem:[#allocation5 + $0x80] sm:$0xff] %v2093_v25  ;;  %v2094_v32 = vadd.f32 %v1582_v26, %v558_v20  ;;  %v560_v34 = vmul.f32 0.999, %v48_v29  ;;  %v1584_v35 = vmul.f32 0.001, %v1072_v30  ;;  %v1073_v36 = vld [vmem:[%s7866_s0 + $0xa0] sm:$0xff] }
  0x2d   :  { %v2095_v33 = vadd.f32 %v1583_v28, %v559_v27  ;;  %v561_v38 = vmul.f32 0.999, %v49_v31  ;;  %v1585_v39 = vmul.f32 0.001, %v1073_v36  ;;  %v562_v40 = vmul.f32 0.999, %v50_v37 }
  0x2e   :  { %2606 = vst [vmem:[#allocation5 + $0x88] sm:$0xff] %v2094_v32  ;;  %v2096_v41 = vadd.f32 %v1584_v35, %v560_v34  ;;  %v1074_v42 = vld [vmem:[%s7866_s0 + $0xa8] sm:$0xff]  ;;  %v51_v43 = vld [vmem:[#allocation2 + $0xb0] sm:$0xff]  ;;  %v52_v49 = vld [vmem:[#allocation2 + $0xb8] sm:$0xff] }
  0x2f   :  { %2607 = vst [vmem:[#allocation5 + $0x90] sm:$0xff] %v2095_v33  ;;  %v1075_v44 = vld [vmem:[%s7866_s0 + $0xb0] sm:$0xff]  ;;  %v2097_v45 = vadd.f32 %v1585_v39, %v561_v38  ;;  %v1586_v46 = vmul.f32 0.001, %v1074_v42  ;;  %v563_v47 = vmul.f32 0.999, %v51_v43 }
  0x30   :  { %v1587_v48 = vmul.f32 0.001, %v1075_v44  ;;  %2608 = vst [vmem:[#allocation5 + $0x98] sm:$0xff] %v2096_v41  ;;  %v1076_v50 = vld [vmem:[%s7866_s0 + $0xb8] sm:$0xff]  ;;  %v53_v51 = vld [vmem:[#allocation2 + $0xc0] sm:$0xff]  ;;  %v54_v57 = vld [vmem:[#allocation2 + $0xc8] sm:$0xff] }
  0x31   :  { %2609 = vst [vmem:[#allocation5 + $0xa0] sm:$0xff] %v2097_v45  ;;  %v2098_v52 = vadd.f32 %v1586_v46, %v562_v40  ;;  %v564_v54 = vmul.f32 0.999, %v52_v49  ;;  %v1588_v55 = vmul.f32 0.001, %v1076_v50  ;;  %v1077_v56 = vld [vmem:[%s7866_s0 + $0xc0] sm:$0xff] }
  0x32   :  { %v2099_v53 = vadd.f32 %v1587_v48, %v563_v47  ;;  %v565_v58 = vmul.f32 0.999, %v53_v51  ;;  %v1589_v59 = vmul.f32 0.001, %v1077_v56  ;;  %v566_v60 = vmul.f32 0.999, %v54_v57 }
  0x33   :  { %2610 = vst [vmem:[#allocation5 + $0xa8] sm:$0xff] %v2098_v52  ;;  %v2100_v61 = vadd.f32 %v1588_v55, %v564_v54  ;;  %v1078_v62 = vld [vmem:[%s7866_s0 + $0xc8] sm:$0xff]  ;;  %v55_v63 = vld [vmem:[#allocation2 + $0xd0] sm:$0xff]  ;;  %v56_v5 = vld [vmem:[#allocation2 + $0xd8] sm:$0xff] }
  0x34   :  { %2611 = vst [vmem:[#allocation5 + $0xb0] sm:$0xff] %v2099_v53  ;;  %v1079_v0 = vld [vmem:[%s7866_s0 + $0xd0] sm:$0xff]  ;;  %v2101_v1 = vadd.f32 %v1589_v59, %v565_v58  ;;  %v1590_v2 = vmul.f32 0.001, %v1078_v62  ;;  %v567_v3 = vmul.f32 0.999, %v55_v63 }
  0x35   :  { %v1591_v4 = vmul.f32 0.001, %v1079_v0  ;;  %2612 = vst [vmem:[#allocation5 + $0xb8] sm:$0xff] %v2100_v61  ;;  %v1080_v6 = vld [vmem:[%s7866_s0 + $0xd8] sm:$0xff]  ;;  %v57_v7 = vld [vmem:[#allocation2 + $0xe0] sm:$0xff]  ;;  %v58_v13 = vld [vmem:[#allocation2 + $0xe8] sm:$0xff] }
  0x36   :  { %2613 = vst [vmem:[#allocation5 + $0xc0] sm:$0xff] %v2101_v1  ;;  %v2102_v8 = vadd.f32 %v1590_v2, %v566_v60  ;;  %v568_v10 = vmul.f32 0.999, %v56_v5  ;;  %v1592_v11 = vmul.f32 0.001, %v1080_v6  ;;  %v1081_v12 = vld [vmem:[%s7866_s0 + $0xe0] sm:$0xff] }
  0x37   :  { %v2103_v9 = vadd.f32 %v1591_v4, %v567_v3  ;;  %v569_v14 = vmul.f32 0.999, %v57_v7  ;;  %v1593_v15 = vmul.f32 0.001, %v1081_v12  ;;  %v570_v16 = vmul.f32 0.999, %v58_v13 }
  0x38   :  { %2614 = vst [vmem:[#allocation5 + $0xc8] sm:$0xff] %v2102_v8  ;;  %v2104_v17 = vadd.f32 %v1592_v11, %v568_v10  ;;  %v1082_v18 = vld [vmem:[%s7866_s0 + $0xe8] sm:$0xff]  ;;  %v59_v19 = vld [vmem:[#allocation2 + $0xf0] sm:$0xff]  ;;  %v60_v25 = vld [vmem:[#allocation2 + $0xf8] sm:$0xff] }
  0x39   :  { %2615 = vst [vmem:[#allocation5 + $0xd0] sm:$0xff] %v2103_v9  ;;  %v1083_v20 = vld [vmem:[%s7866_s0 + $0xf0] sm:$0xff]  ;;  %v2105_v21 = vadd.f32 %v1593_v15, %v569_v14  ;;  %v1594_v22 = vmul.f32 0.001, %v1082_v18  ;;  %v571_v23 = vmul.f32 0.999, %v59_v19 }
  0x3a   :  { %v1595_v24 = vmul.f32 0.001, %v1083_v20  ;;  %2616 = vst [vmem:[#allocation5 + $0xd8] sm:$0xff] %v2104_v17  ;;  %v1084_v26 = vld [vmem:[%s7866_s0 + $0xf8] sm:$0xff]  ;;  %v61_v27 = vld [vmem:[#allocation2 + $0x100] sm:$0xff]  ;;  %v62_v33 = vld [vmem:[#allocation2 + $0x108] sm:$0xff] }
  0x3b   :  { %2617 = vst [vmem:[#allocation5 + $0xe0] sm:$0xff] %v2105_v21  ;;  %v2106_v28 = vadd.f32 %v1594_v22, %v570_v16  ;;  %v572_v30 = vmul.f32 0.999, %v60_v25  ;;  %v1596_v31 = vmul.f32 0.001, %v1084_v26  ;;  %v1085_v32 = vld [vmem:[%s7866_s0 + $0x100] sm:$0xff] }
  0x3c   :  { %v2107_v29 = vadd.f32 %v1595_v24, %v571_v23  ;;  %v573_v34 = vmul.f32 0.999, %v61_v27  ;;  %v1597_v35 = vmul.f32 0.001, %v1085_v32  ;;  %v574_v36 = vmul.f32 0.999, %v62_v33 }
  0x3d   :  { %2618 = vst [vmem:[#allocation5 + $0xe8] sm:$0xff] %v2106_v28  ;;  %v2108_v37 = vadd.f32 %v1596_v31, %v572_v30  ;;  %v1086_v38 = vld [vmem:[%s7866_s0 + $0x108] sm:$0xff]  ;;  %v63_v39 = vld [vmem:[#allocation2 + $0x110] sm:$0xff]  ;;  %v64_v45 = vld [vmem:[#allocation2 + $0x118] sm:$0xff] }
  0x3e   :  { %2619 = vst [vmem:[#allocation5 + $0xf0] sm:$0xff] %v2107_v29  ;;  %v1087_v40 = vld [vmem:[%s7866_s0 + $0x110] sm:$0xff]  ;;  %v2109_v41 = vadd.f32 %v1597_v35, %v573_v34  ;;  %v1598_v42 = vmul.f32 0.001, %v1086_v38  ;;  %v575_v43 = vmul.f32 0.999, %v63_v39 }
  0x3f   :  { %v1599_v44 = vmul.f32 0.001, %v1087_v40  ;;  %2620 = vst [vmem:[#allocation5 + $0xf8] sm:$0xff] %v2108_v37  ;;  %v1088_v46 = vld [vmem:[%s7866_s0 + $0x118] sm:$0xff]  ;;  %v65_v47 = vld [vmem:[#allocation2 + $0x120] sm:$0xff]  ;;  %v66_v53 = vld [vmem:[#allocation2 + $0x128] sm:$0xff] }
  0x40   :  { %2621 = vst [vmem:[#allocation5 + $0x100] sm:$0xff] %v2109_v41  ;;  %v2110_v48 = vadd.f32 %v1598_v42, %v574_v36  ;;  %v576_v50 = vmul.f32 0.999, %v64_v45  ;;  %v1600_v51 = vmul.f32 0.001, %v1088_v46  ;;  %v1089_v52 = vld [vmem:[%s7866_s0 + $0x120] sm:$0xff] }
  0x41   :  { %v2111_v49 = vadd.f32 %v1599_v44, %v575_v43  ;;  %v577_v54 = vmul.f32 0.999, %v65_v47  ;;  %v1601_v55 = vmul.f32 0.001, %v1089_v52  ;;  %v578_v56 = vmul.f32 0.999, %v66_v53 }
  0x42   :  { %2622 = vst [vmem:[#allocation5 + $0x108] sm:$0xff] %v2110_v48  ;;  %v2112_v57 = vadd.f32 %v1600_v51, %v576_v50  ;;  %v1090_v58 = vld [vmem:[%s7866_s0 + $0x128] sm:$0xff]  ;;  %v67_v59 = vld [vmem:[#allocation2 + $0x130] sm:$0xff]  ;;  %v68_v1 = vld [vmem:[#allocation2 + $0x138] sm:$0xff] }
  0x43   :  { %2623 = vst [vmem:[#allocation5 + $0x110] sm:$0xff] %v2111_v49  ;;  %v1091_v60 = vld [vmem:[%s7866_s0 + $0x130] sm:$0xff]  ;;  %v2113_v61 = vadd.f32 %v1601_v55, %v577_v54  ;;  %v1602_v62 = vmul.f32 0.001, %v1090_v58  ;;  %v579_v63 = vmul.f32 0.999, %v67_v59 }
  0x44   :  { %v1603_v0 = vmul.f32 0.001, %v1091_v60  ;;  %2624 = vst [vmem:[#allocation5 + $0x118] sm:$0xff] %v2112_v57  ;;  %v1092_v2 = vld [vmem:[%s7866_s0 + $0x138] sm:$0xff]  ;;  %v69_v3 = vld [vmem:[#allocation2 + $0x140] sm:$0xff]  ;;  %v70_v9 = vld [vmem:[#allocation2 + $0x148] sm:$0xff] }
  0x45   :  { %2625 = vst [vmem:[#allocation5 + $0x120] sm:$0xff] %v2113_v61  ;;  %v2114_v4 = vadd.f32 %v1602_v62, %v578_v56  ;;  %v580_v6 = vmul.f32 0.999, %v68_v1  ;;  %v1604_v7 = vmul.f32 0.001, %v1092_v2  ;;  %v1093_v8 = vld [vmem:[%s7866_s0 + $0x140] sm:$0xff] }
  0x46   :  { %v2115_v5 = vadd.f32 %v1603_v0, %v579_v63  ;;  %v581_v10 = vmul.f32 0.999, %v69_v3  ;;  %v1605_v11 = vmul.f32 0.001, %v1093_v8  ;;  %v582_v12 = vmul.f32 0.999, %v70_v9 }
  0x47   :  { %2626 = vst [vmem:[#allocation5 + $0x128] sm:$0xff] %v2114_v4  ;;  %v2116_v13 = vadd.f32 %v1604_v7, %v580_v6  ;;  %v1094_v14 = vld [vmem:[%s7866_s0 + $0x148] sm:$0xff]  ;;  %v71_v15 = vld [vmem:[#allocation2 + $0x150] sm:$0xff]  ;;  %v72_v21 = vld [vmem:[#allocation2 + $0x158] sm:$0xff] }
  0x48   :  { %2627 = vst [vmem:[#allocation5 + $0x130] sm:$0xff] %v2115_v5  ;;  %v1095_v16 = vld [vmem:[%s7866_s0 + $0x150] sm:$0xff]  ;;  %v2117_v17 = vadd.f32 %v1605_v11, %v581_v10  ;;  %v1606_v18 = vmul.f32 0.001, %v1094_v14  ;;  %v583_v19 = vmul.f32 0.999, %v71_v15 }
  0x49   :  { %v1607_v20 = vmul.f32 0.001, %v1095_v16  ;;  %2628 = vst [vmem:[#allocation5 + $0x138] sm:$0xff] %v2116_v13  ;;  %v1096_v22 = vld [vmem:[%s7866_s0 + $0x158] sm:$0xff]  ;;  %v73_v23 = vld [vmem:[#allocation2 + $0x160] sm:$0xff]  ;;  %v74_v29 = vld [vmem:[#allocation2 + $0x168] sm:$0xff] }
  0x4a   :  { %2629 = vst [vmem:[#allocation5 + $0x140] sm:$0xff] %v2117_v17  ;;  %v2118_v24 = vadd.f32 %v1606_v18, %v582_v12  ;;  %v584_v26 = vmul.f32 0.999, %v72_v21  ;;  %v1608_v27 = vmul.f32 0.001, %v1096_v22  ;;  %v1097_v28 = vld [vmem:[%s7866_s0 + $0x160] sm:$0xff] }
  0x4b   :  { %v2119_v25 = vadd.f32 %v1607_v20, %v583_v19  ;;  %v585_v30 = vmul.f32 0.999, %v73_v23  ;;  %v1609_v31 = vmul.f32 0.001, %v1097_v28  ;;  %v586_v32 = vmul.f32 0.999, %v74_v29 }
  0x4c   :  { %2630 = vst [vmem:[#allocation5 + $0x148] sm:$0xff] %v2118_v24  ;;  %v2120_v33 = vadd.f32 %v1608_v27, %v584_v26  ;;  %v1098_v34 = vld [vmem:[%s7866_s0 + $0x168] sm:$0xff]  ;;  %v75_v35 = vld [vmem:[#allocation2 + $0x170] sm:$0xff]  ;;  %v76_v41 = vld [vmem:[#allocation2 + $0x178] sm:$0xff] }
  0x4d   :  { %2631 = vst [vmem:[#allocation5 + $0x150] sm:$0xff] %v2119_v25  ;;  %v1099_v36 = vld [vmem:[%s7866_s0 + $0x170] sm:$0xff]  ;;  %v2121_v37 = vadd.f32 %v1609_v31, %v585_v30  ;;  %v1610_v38 = vmul.f32 0.001, %v1098_v34  ;;  %v587_v39 = vmul.f32 0.999, %v75_v35 }
  0x4e   :  { %v1611_v40 = vmul.f32 0.001, %v1099_v36  ;;  %2632 = vst [vmem:[#allocation5 + $0x158] sm:$0xff] %v2120_v33  ;;  %v1100_v42 = vld [vmem:[%s7866_s0 + $0x178] sm:$0xff]  ;;  %v77_v43 = vld [vmem:[#allocation2 + $0x180] sm:$0xff]  ;;  %v78_v49 = vld [vmem:[#allocation2 + $0x188] sm:$0xff] }
  0x4f   :  { %2633 = vst [vmem:[#allocation5 + $0x160] sm:$0xff] %v2121_v37  ;;  %v2122_v44 = vadd.f32 %v1610_v38, %v586_v32  ;;  %v588_v46 = vmul.f32 0.999, %v76_v41  ;;  %v1612_v47 = vmul.f32 0.001, %v1100_v42  ;;  %v1101_v48 = vld [vmem:[%s7866_s0 + $0x180] sm:$0xff] }
  0x50   :  { %v2123_v45 = vadd.f32 %v1611_v40, %v587_v39  ;;  %v589_v50 = vmul.f32 0.999, %v77_v43  ;;  %v1613_v51 = vmul.f32 0.001, %v1101_v48  ;;  %v590_v52 = vmul.f32 0.999, %v78_v49 }
  0x51   :  { %2634 = vst [vmem:[#allocation5 + $0x168] sm:$0xff] %v2122_v44  ;;  %v2124_v53 = vadd.f32 %v1612_v47, %v588_v46  ;;  %v1102_v54 = vld [vmem:[%s7866_s0 + $0x188] sm:$0xff]  ;;  %v79_v55 = vld [vmem:[#allocation2 + $0x190] sm:$0xff]  ;;  %v80_v61 = vld [vmem:[#allocation2 + $0x198] sm:$0xff] }
  0x52   :  { %2635 = vst [vmem:[#allocation5 + $0x170] sm:$0xff] %v2123_v45  ;;  %v1103_v56 = vld [vmem:[%s7866_s0 + $0x190] sm:$0xff]  ;;  %v2125_v57 = vadd.f32 %v1613_v51, %v589_v50  ;;  %v1614_v58 = vmul.f32 0.001, %v1102_v54  ;;  %v591_v59 = vmul.f32 0.999, %v79_v55 }
  0x53   :  { %v1615_v60 = vmul.f32 0.001, %v1103_v56  ;;  %2636 = vst [vmem:[#allocation5 + $0x178] sm:$0xff] %v2124_v53  ;;  %v1104_v62 = vld [vmem:[%s7866_s0 + $0x198] sm:$0xff]  ;;  %v81_v63 = vld [vmem:[#allocation2 + $0x1a0] sm:$0xff]  ;;  %v82_v5 = vld [vmem:[#allocation2 + $0x1a8] sm:$0xff] }
  0x54   :  { %2637 = vst [vmem:[#allocation5 + $0x180] sm:$0xff] %v2125_v57  ;;  %v2126_v0 = vadd.f32 %v1614_v58, %v590_v52  ;;  %v592_v2 = vmul.f32 0.999, %v80_v61  ;;  %v1616_v3 = vmul.f32 0.001, %v1104_v62  ;;  %v1105_v4 = vld [vmem:[%s7866_s0 + $0x1a0] sm:$0xff] }
  0x55   :  { %v2127_v1 = vadd.f32 %v1615_v60, %v591_v59  ;;  %v593_v6 = vmul.f32 0.999, %v81_v63  ;;  %v1617_v7 = vmul.f32 0.001, %v1105_v4  ;;  %v594_v8 = vmul.f32 0.999, %v82_v5 }
  0x56   :  { %2638 = vst [vmem:[#allocation5 + $0x188] sm:$0xff] %v2126_v0  ;;  %v2128_v9 = vadd.f32 %v1616_v3, %v592_v2  ;;  %v1106_v10 = vld [vmem:[%s7866_s0 + $0x1a8] sm:$0xff]  ;;  %v83_v11 = vld [vmem:[#allocation2 + $0x1b0] sm:$0xff]  ;;  %v84_v17 = vld [vmem:[#allocation2 + $0x1b8] sm:$0xff] }
  0x57   :  { %2639 = vst [vmem:[#allocation5 + $0x190] sm:$0xff] %v2127_v1  ;;  %v1107_v12 = vld [vmem:[%s7866_s0 + $0x1b0] sm:$0xff]  ;;  %v2129_v13 = vadd.f32 %v1617_v7, %v593_v6  ;;  %v1618_v14 = vmul.f32 0.001, %v1106_v10  ;;  %v595_v15 = vmul.f32 0.999, %v83_v11 }
  0x58   :  { %v1619_v16 = vmul.f32 0.001, %v1107_v12  ;;  %2640 = vst [vmem:[#allocation5 + $0x198] sm:$0xff] %v2128_v9  ;;  %v1108_v18 = vld [vmem:[%s7866_s0 + $0x1b8] sm:$0xff]  ;;  %v85_v19 = vld [vmem:[#allocation2 + $0x1c0] sm:$0xff]  ;;  %v86_v25 = vld [vmem:[#allocation2 + $0x1c8] sm:$0xff] }
  0x59   :  { %2641 = vst [vmem:[#allocation5 + $0x1a0] sm:$0xff] %v2129_v13  ;;  %v2130_v20 = vadd.f32 %v1618_v14, %v594_v8  ;;  %v596_v22 = vmul.f32 0.999, %v84_v17  ;;  %v1620_v23 = vmul.f32 0.001, %v1108_v18  ;;  %v1109_v24 = vld [vmem:[%s7866_s0 + $0x1c0] sm:$0xff] }
  0x5a   :  { %v2131_v21 = vadd.f32 %v1619_v16, %v595_v15  ;;  %v597_v26 = vmul.f32 0.999, %v85_v19  ;;  %v1621_v27 = vmul.f32 0.001, %v1109_v24  ;;  %v598_v28 = vmul.f32 0.999, %v86_v25 }
  0x5b   :  { %2642 = vst [vmem:[#allocation5 + $0x1a8] sm:$0xff] %v2130_v20  ;;  %v2132_v29 = vadd.f32 %v1620_v23, %v596_v22  ;;  %v1110_v30 = vld [vmem:[%s7866_s0 + $0x1c8] sm:$0xff]  ;;  %v87_v31 = vld [vmem:[#allocation2 + $0x1d0] sm:$0xff]  ;;  %v88_v37 = vld [vmem:[#allocation2 + $0x1d8] sm:$0xff] }
  0x5c   :  { %2643 = vst [vmem:[#allocation5 + $0x1b0] sm:$0xff] %v2131_v21  ;;  %v1111_v32 = vld [vmem:[%s7866_s0 + $0x1d0] sm:$0xff]  ;;  %v2133_v33 = vadd.f32 %v1621_v27, %v597_v26  ;;  %v1622_v34 = vmul.f32 0.001, %v1110_v30  ;;  %v599_v35 = vmul.f32 0.999, %v87_v31 }
  0x5d   :  { %v1623_v36 = vmul.f32 0.001, %v1111_v32  ;;  %2644 = vst [vmem:[#allocation5 + $0x1b8] sm:$0xff] %v2132_v29  ;;  %v1112_v38 = vld [vmem:[%s7866_s0 + $0x1d8] sm:$0xff]  ;;  %v89_v39 = vld [vmem:[#allocation2 + $0x1e0] sm:$0xff]  ;;  %v90_v45 = vld [vmem:[#allocation2 + $0x1e8] sm:$0xff] }
  0x5e   :  { %2645 = vst [vmem:[#allocation5 + $0x1c0] sm:$0xff] %v2133_v33  ;;  %v2134_v40 = vadd.f32 %v1622_v34, %v598_v28  ;;  %v600_v42 = vmul.f32 0.999, %v88_v37  ;;  %v1624_v43 = vmul.f32 0.001, %v1112_v38  ;;  %v1113_v44 = vld [vmem:[%s7866_s0 + $0x1e0] sm:$0xff] }
  0x5f   :  { %v2135_v41 = vadd.f32 %v1623_v36, %v599_v35  ;;  %v601_v46 = vmul.f32 0.999, %v89_v39  ;;  %v1625_v47 = vmul.f32 0.001, %v1113_v44  ;;  %v602_v48 = vmul.f32 0.999, %v90_v45 }
  0x60   :  { %2646 = vst [vmem:[#allocation5 + $0x1c8] sm:$0xff] %v2134_v40  ;;  %v2136_v49 = vadd.f32 %v1624_v43, %v600_v42  ;;  %v1114_v50 = vld [vmem:[%s7866_s0 + $0x1e8] sm:$0xff]  ;;  %v91_v51 = vld [vmem:[#allocation2 + $0x1f0] sm:$0xff]  ;;  %v92_v57 = vld [vmem:[#allocation2 + $0x1f8] sm:$0xff] }
  0x61   :  { %2647 = vst [vmem:[#allocation5 + $0x1d0] sm:$0xff] %v2135_v41  ;;  %v1115_v52 = vld [vmem:[%s7866_s0 + $0x1f0] sm:$0xff]  ;;  %v2137_v53 = vadd.f32 %v1625_v47, %v601_v46  ;;  %v1626_v54 = vmul.f32 0.001, %v1114_v50  ;;  %v603_v55 = vmul.f32 0.999, %v91_v51 }
  0x62   :  { %v1627_v56 = vmul.f32 0.001, %v1115_v52  ;;  %2648 = vst [vmem:[#allocation5 + $0x1d8] sm:$0xff] %v2136_v49  ;;  %v1116_v58 = vld [vmem:[%s7866_s0 + $0x1f8] sm:$0xff]  ;;  %v93_v59 = vld [vmem:[#allocation2 + $0x200] sm:$0xff]  ;;  %v94_v1 = vld [vmem:[#allocation2 + $0x208] sm:$0xff] }
  0x63   :  { %2649 = vst [vmem:[#allocation5 + $0x1e0] sm:$0xff] %v2137_v53  ;;  %v2138_v60 = vadd.f32 %v1626_v54, %v602_v48  ;;  %v604_v62 = vmul.f32 0.999, %v92_v57  ;;  %v1628_v63 = vmul.f32 0.001, %v1116_v58  ;;  %v1117_v0 = vld [vmem:[%s7866_s0 + $0x200] sm:$0xff] }
  0x64   :  { %v2139_v61 = vadd.f32 %v1627_v56, %v603_v55  ;;  %v605_v2 = vmul.f32 0.999, %v93_v59  ;;  %v1629_v3 = vmul.f32 0.001, %v1117_v0  ;;  %v606_v4 = vmul.f32 0.999, %v94_v1 }
  0x65   :  { %2650 = vst [vmem:[#allocation5 + $0x1e8] sm:$0xff] %v2138_v60  ;;  %v2140_v5 = vadd.f32 %v1628_v63, %v604_v62  ;;  %v1118_v6 = vld [vmem:[%s7866_s0 + $0x208] sm:$0xff]  ;;  %v95_v7 = vld [vmem:[#allocation2 + $0x210] sm:$0xff]  ;;  %v96_v13 = vld [vmem:[#allocation2 + $0x218] sm:$0xff] }
  0x66   :  { %2651 = vst [vmem:[#allocation5 + $0x1f0] sm:$0xff] %v2139_v61  ;;  %v1119_v8 = vld [vmem:[%s7866_s0 + $0x210] sm:$0xff]  ;;  %v2141_v9 = vadd.f32 %v1629_v3, %v605_v2  ;;  %v1630_v10 = vmul.f32 0.001, %v1118_v6  ;;  %v607_v11 = vmul.f32 0.999, %v95_v7 }
  0x67   :  { %v1631_v12 = vmul.f32 0.001, %v1119_v8  ;;  %2652 = vst [vmem:[#allocation5 + $0x1f8] sm:$0xff] %v2140_v5  ;;  %v1120_v14 = vld [vmem:[%s7866_s0 + $0x218] sm:$0xff]  ;;  %v97_v15 = vld [vmem:[#allocation2 + $0x220] sm:$0xff]  ;;  %v98_v21 = vld [vmem:[#allocation2 + $0x228] sm:$0xff] }
  0x68   :  { %2653 = vst [vmem:[#allocation5 + $0x200] sm:$0xff] %v2141_v9  ;;  %v2142_v16 = vadd.f32 %v1630_v10, %v606_v4  ;;  %v608_v18 = vmul.f32 0.999, %v96_v13  ;;  %v1632_v19 = vmul.f32 0.001, %v1120_v14  ;;  %v1121_v20 = vld [vmem:[%s7866_s0 + $0x220] sm:$0xff] }
  0x69   :  { %v2143_v17 = vadd.f32 %v1631_v12, %v607_v11  ;;  %v609_v22 = vmul.f32 0.999, %v97_v15  ;;  %v1633_v23 = vmul.f32 0.001, %v1121_v20  ;;  %v610_v24 = vmul.f32 0.999, %v98_v21 }
  0x6a   :  { %2654 = vst [vmem:[#allocation5 + $0x208] sm:$0xff] %v2142_v16  ;;  %v2144_v25 = vadd.f32 %v1632_v19, %v608_v18  ;;  %v1122_v26 = vld [vmem:[%s7866_s0 + $0x228] sm:$0xff]  ;;  %v99_v27 = vld [vmem:[#allocation2 + $0x230] sm:$0xff]  ;;  %v100_v33 = vld [vmem:[#allocation2 + $0x238] sm:$0xff] }
  0x6b   :  { %2655 = vst [vmem:[#allocation5 + $0x210] sm:$0xff] %v2143_v17  ;;  %v1123_v28 = vld [vmem:[%s7866_s0 + $0x230] sm:$0xff]  ;;  %v2145_v29 = vadd.f32 %v1633_v23, %v609_v22  ;;  %v1634_v30 = vmul.f32 0.001, %v1122_v26  ;;  %v611_v31 = vmul.f32 0.999, %v99_v27 }
  0x6c   :  { %v1635_v32 = vmul.f32 0.001, %v1123_v28  ;;  %2656 = vst [vmem:[#allocation5 + $0x218] sm:$0xff] %v2144_v25  ;;  %v1124_v34 = vld [vmem:[%s7866_s0 + $0x238] sm:$0xff]  ;;  %v101_v35 = vld [vmem:[#allocation2 + $0x240] sm:$0xff]  ;;  %v102_v41 = vld [vmem:[#allocation2 + $0x248] sm:$0xff] }
  0x6d   :  { %2657 = vst [vmem:[#allocation5 + $0x220] sm:$0xff] %v2145_v29  ;;  %v2146_v36 = vadd.f32 %v1634_v30, %v610_v24  ;;  %v612_v38 = vmul.f32 0.999, %v100_v33  ;;  %v1636_v39 = vmul.f32 0.001, %v1124_v34  ;;  %v1125_v40 = vld [vmem:[%s7866_s0 + $0x240] sm:$0xff] }
  0x6e   :  { %v2147_v37 = vadd.f32 %v1635_v32, %v611_v31  ;;  %v613_v42 = vmul.f32 0.999, %v101_v35  ;;  %v1637_v43 = vmul.f32 0.001, %v1125_v40  ;;  %v614_v44 = vmul.f32 0.999, %v102_v41 }
  0x6f   :  { %2658 = vst [vmem:[#allocation5 + $0x228] sm:$0xff] %v2146_v36  ;;  %v2148_v45 = vadd.f32 %v1636_v39, %v612_v38  ;;  %v1126_v46 = vld [vmem:[%s7866_s0 + $0x248] sm:$0xff]  ;;  %v103_v47 = vld [vmem:[#allocation2 + $0x250] sm:$0xff]  ;;  %v104_v53 = vld [vmem:[#allocation2 + $0x258] sm:$0xff] }
  0x70   :  { %2659 = vst [vmem:[#allocation5 + $0x230] sm:$0xff] %v2147_v37  ;;  %v1127_v48 = vld [vmem:[%s7866_s0 + $0x250] sm:$0xff]  ;;  %v2149_v49 = vadd.f32 %v1637_v43, %v613_v42  ;;  %v1638_v50 = vmul.f32 0.001, %v1126_v46  ;;  %v615_v51 = vmul.f32 0.999, %v103_v47 }
  0x71   :  { %v1639_v52 = vmul.f32 0.001, %v1127_v48  ;;  %2660 = vst [vmem:[#allocation5 + $0x238] sm:$0xff] %v2148_v45  ;;  %v1128_v54 = vld [vmem:[%s7866_s0 + $0x258] sm:$0xff]  ;;  %v105_v55 = vld [vmem:[#allocation2 + $0x260] sm:$0xff]  ;;  %v106_v61 = vld [vmem:[#allocation2 + $0x268] sm:$0xff] }
  0x72   :  { %2661 = vst [vmem:[#allocation5 + $0x240] sm:$0xff] %v2149_v49  ;;  %v2150_v56 = vadd.f32 %v1638_v50, %v614_v44  ;;  %v616_v58 = vmul.f32 0.999, %v104_v53  ;;  %v1640_v59 = vmul.f32 0.001, %v1128_v54  ;;  %v1129_v60 = vld [vmem:[%s7866_s0 + $0x260] sm:$0xff] }
  0x73   :  { %v2151_v57 = vadd.f32 %v1639_v52, %v615_v51  ;;  %v617_v62 = vmul.f32 0.999, %v105_v55  ;;  %v1641_v63 = vmul.f32 0.001, %v1129_v60  ;;  %v618_v0 = vmul.f32 0.999, %v106_v61 }
  0x74   :  { %2662 = vst [vmem:[#allocation5 + $0x248] sm:$0xff] %v2150_v56  ;;  %v2152_v1 = vadd.f32 %v1640_v59, %v616_v58  ;;  %v1130_v2 = vld [vmem:[%s7866_s0 + $0x268] sm:$0xff]  ;;  %v107_v3 = vld [vmem:[#allocation2 + $0x270] sm:$0xff]  ;;  %v108_v9 = vld [vmem:[#allocation2 + $0x278] sm:$0xff] }
  0x75   :  { %2663 = vst [vmem:[#allocation5 + $0x250] sm:$0xff] %v2151_v57  ;;  %v1131_v4 = vld [vmem:[%s7866_s0 + $0x270] sm:$0xff]  ;;  %v2153_v5 = vadd.f32 %v1641_v63, %v617_v62  ;;  %v1642_v6 = vmul.f32 0.001, %v1130_v2  ;;  %v619_v7 = vmul.f32 0.999, %v107_v3 }
  0x76   :  { %v1643_v8 = vmul.f32 0.001, %v1131_v4  ;;  %2664 = vst [vmem:[#allocation5 + $0x258] sm:$0xff] %v2152_v1  ;;  %v1132_v10 = vld [vmem:[%s7866_s0 + $0x278] sm:$0xff]  ;;  %v109_v11 = vld [vmem:[#allocation2 + $0x280] sm:$0xff]  ;;  %v110_v17 = vld [vmem:[#allocation2 + $0x288] sm:$0xff] }
  0x77   :  { %2665 = vst [vmem:[#allocation5 + $0x260] sm:$0xff] %v2153_v5  ;;  %v2154_v12 = vadd.f32 %v1642_v6, %v618_v0  ;;  %v620_v14 = vmul.f32 0.999, %v108_v9  ;;  %v1644_v15 = vmul.f32 0.001, %v1132_v10  ;;  %v1133_v16 = vld [vmem:[%s7866_s0 + $0x280] sm:$0xff] }
  0x78   :  { %v2155_v13 = vadd.f32 %v1643_v8, %v619_v7  ;;  %v621_v18 = vmul.f32 0.999, %v109_v11  ;;  %v1645_v19 = vmul.f32 0.001, %v1133_v16  ;;  %v622_v20 = vmul.f32 0.999, %v110_v17 }
  0x79   :  { %2666 = vst [vmem:[#allocation5 + $0x268] sm:$0xff] %v2154_v12  ;;  %v2156_v21 = vadd.f32 %v1644_v15, %v620_v14  ;;  %v1134_v22 = vld [vmem:[%s7866_s0 + $0x288] sm:$0xff]  ;;  %v111_v23 = vld [vmem:[#allocation2 + $0x290] sm:$0xff]  ;;  %v112_v29 = vld [vmem:[#allocation2 + $0x298] sm:$0xff] }
  0x7a   :  { %2667 = vst [vmem:[#allocation5 + $0x270] sm:$0xff] %v2155_v13  ;;  %v1135_v24 = vld [vmem:[%s7866_s0 + $0x290] sm:$0xff]  ;;  %v2157_v25 = vadd.f32 %v1645_v19, %v621_v18  ;;  %v1646_v26 = vmul.f32 0.001, %v1134_v22  ;;  %v623_v27 = vmul.f32 0.999, %v111_v23 }
  0x7b   :  { %v1647_v28 = vmul.f32 0.001, %v1135_v24  ;;  %2668 = vst [vmem:[#allocation5 + $0x278] sm:$0xff] %v2156_v21  ;;  %v1136_v30 = vld [vmem:[%s7866_s0 + $0x298] sm:$0xff]  ;;  %v113_v31 = vld [vmem:[#allocation2 + $0x2a0] sm:$0xff]  ;;  %v114_v37 = vld [vmem:[#allocation2 + $0x2a8] sm:$0xff] }
  0x7c   :  { %2669 = vst [vmem:[#allocation5 + $0x280] sm:$0xff] %v2157_v25  ;;  %v2158_v32 = vadd.f32 %v1646_v26, %v622_v20  ;;  %v624_v34 = vmul.f32 0.999, %v112_v29  ;;  %v1648_v35 = vmul.f32 0.001, %v1136_v30  ;;  %v1137_v36 = vld [vmem:[%s7866_s0 + $0x2a0] sm:$0xff] }
  0x7d   :  { %v2159_v33 = vadd.f32 %v1647_v28, %v623_v27  ;;  %v625_v38 = vmul.f32 0.999, %v113_v31  ;;  %v1649_v39 = vmul.f32 0.001, %v1137_v36  ;;  %v626_v40 = vmul.f32 0.999, %v114_v37 }
  0x7e   :  { %2670 = vst [vmem:[#allocation5 + $0x288] sm:$0xff] %v2158_v32  ;;  %v2160_v41 = vadd.f32 %v1648_v35, %v624_v34  ;;  %v1138_v42 = vld [vmem:[%s7866_s0 + $0x2a8] sm:$0xff]  ;;  %v115_v43 = vld [vmem:[#allocation2 + $0x2b0] sm:$0xff]  ;;  %v116_v49 = vld [vmem:[#allocation2 + $0x2b8] sm:$0xff] }
  0x7f   :  { %2671 = vst [vmem:[#allocation5 + $0x290] sm:$0xff] %v2159_v33  ;;  %v1139_v44 = vld [vmem:[%s7866_s0 + $0x2b0] sm:$0xff]  ;;  %v2161_v45 = vadd.f32 %v1649_v39, %v625_v38  ;;  %v1650_v46 = vmul.f32 0.001, %v1138_v42  ;;  %v627_v47 = vmul.f32 0.999, %v115_v43 }
  0x80   :  { %v1651_v48 = vmul.f32 0.001, %v1139_v44  ;;  %2672 = vst [vmem:[#allocation5 + $0x298] sm:$0xff] %v2160_v41  ;;  %v1140_v50 = vld [vmem:[%s7866_s0 + $0x2b8] sm:$0xff]  ;;  %v117_v51 = vld [vmem:[#allocation2 + $0x2c0] sm:$0xff]  ;;  %v118_v57 = vld [vmem:[#allocation2 + $0x2c8] sm:$0xff] }
  0x81   :  { %2673 = vst [vmem:[#allocation5 + $0x2a0] sm:$0xff] %v2161_v45  ;;  %v2162_v52 = vadd.f32 %v1650_v46, %v626_v40  ;;  %v628_v54 = vmul.f32 0.999, %v116_v49  ;;  %v1652_v55 = vmul.f32 0.001, %v1140_v50  ;;  %v1141_v56 = vld [vmem:[%s7866_s0 + $0x2c0] sm:$0xff] }
  0x82   :  { %v2163_v53 = vadd.f32 %v1651_v48, %v627_v47  ;;  %v629_v58 = vmul.f32 0.999, %v117_v51  ;;  %v1653_v59 = vmul.f32 0.001, %v1141_v56  ;;  %v630_v60 = vmul.f32 0.999, %v118_v57 }
  0x83   :  { %2674 = vst [vmem:[#allocation5 + $0x2a8] sm:$0xff] %v2162_v52  ;;  %v2164_v61 = vadd.f32 %v1652_v55, %v628_v54  ;;  %v1142_v62 = vld [vmem:[%s7866_s0 + $0x2c8] sm:$0xff]  ;;  %v119_v63 = vld [vmem:[#allocation2 + $0x2d0] sm:$0xff]  ;;  %v120_v5 = vld [vmem:[#allocation2 + $0x2d8] sm:$0xff] }
  0x84   :  { %2675 = vst [vmem:[#allocation5 + $0x2b0] sm:$0xff] %v2163_v53  ;;  %v1143_v0 = vld [vmem:[%s7866_s0 + $0x2d0] sm:$0xff]  ;;  %v2165_v1 = vadd.f32 %v1653_v59, %v629_v58  ;;  %v1654_v2 = vmul.f32 0.001, %v1142_v62  ;;  %v631_v3 = vmul.f32 0.999, %v119_v63 }
  0x85   :  { %v1655_v4 = vmul.f32 0.001, %v1143_v0  ;;  %2676 = vst [vmem:[#allocation5 + $0x2b8] sm:$0xff] %v2164_v61  ;;  %v1144_v6 = vld [vmem:[%s7866_s0 + $0x2d8] sm:$0xff]  ;;  %v121_v7 = vld [vmem:[#allocation2 + $0x2e0] sm:$0xff]  ;;  %v122_v13 = vld [vmem:[#allocation2 + $0x2e8] sm:$0xff] }
  0x86   :  { %2677 = vst [vmem:[#allocation5 + $0x2c0] sm:$0xff] %v2165_v1  ;;  %v2166_v8 = vadd.f32 %v1654_v2, %v630_v60  ;;  %v632_v10 = vmul.f32 0.999, %v120_v5  ;;  %v1656_v11 = vmul.f32 0.001, %v1144_v6  ;;  %v1145_v12 = vld [vmem:[%s7866_s0 + $0x2e0] sm:$0xff] }
  0x87   :  { %v2167_v9 = vadd.f32 %v1655_v4, %v631_v3  ;;  %v633_v14 = vmul.f32 0.999, %v121_v7  ;;  %v1657_v15 = vmul.f32 0.001, %v1145_v12  ;;  %v634_v16 = vmul.f32 0.999, %v122_v13 }
  0x88   :  { %2678 = vst [vmem:[#allocation5 + $0x2c8] sm:$0xff] %v2166_v8  ;;  %v2168_v17 = vadd.f32 %v1656_v11, %v632_v10  ;;  %v1146_v18 = vld [vmem:[%s7866_s0 + $0x2e8] sm:$0xff]  ;;  %v123_v19 = vld [vmem:[#allocation2 + $0x2f0] sm:$0xff]  ;;  %v124_v25 = vld [vmem:[#allocation2 + $0x2f8] sm:$0xff] }
  0x89   :  { %2679 = vst [vmem:[#allocation5 + $0x2d0] sm:$0xff] %v2167_v9  ;;  %v1147_v20 = vld [vmem:[%s7866_s0 + $0x2f0] sm:$0xff]  ;;  %v2169_v21 = vadd.f32 %v1657_v15, %v633_v14  ;;  %v1658_v22 = vmul.f32 0.001, %v1146_v18  ;;  %v635_v23 = vmul.f32 0.999, %v123_v19 }
  0x8a   :  { %v1659_v24 = vmul.f32 0.001, %v1147_v20  ;;  %2680 = vst [vmem:[#allocation5 + $0x2d8] sm:$0xff] %v2168_v17  ;;  %v1148_v26 = vld [vmem:[%s7866_s0 + $0x2f8] sm:$0xff]  ;;  %v125_v27 = vld [vmem:[#allocation2 + $0x300] sm:$0xff]  ;;  %v126_v33 = vld [vmem:[#allocation2 + $0x308] sm:$0xff] }
  0x8b   :  { %2681 = vst [vmem:[#allocation5 + $0x2e0] sm:$0xff] %v2169_v21  ;;  %v2170_v28 = vadd.f32 %v1658_v22, %v634_v16  ;;  %v636_v30 = vmul.f32 0.999, %v124_v25  ;;  %v1660_v31 = vmul.f32 0.001, %v1148_v26  ;;  %v1149_v32 = vld [vmem:[%s7866_s0 + $0x300] sm:$0xff] }
  0x8c   :  { %v2171_v29 = vadd.f32 %v1659_v24, %v635_v23  ;;  %v637_v34 = vmul.f32 0.999, %v125_v27  ;;  %v1661_v35 = vmul.f32 0.001, %v1149_v32  ;;  %v638_v36 = vmul.f32 0.999, %v126_v33 }
  0x8d   :  { %2682 = vst [vmem:[#allocation5 + $0x2e8] sm:$0xff] %v2170_v28  ;;  %v2172_v37 = vadd.f32 %v1660_v31, %v636_v30  ;;  %v1150_v38 = vld [vmem:[%s7866_s0 + $0x308] sm:$0xff]  ;;  %v127_v39 = vld [vmem:[#allocation2 + $0x310] sm:$0xff]  ;;  %v128_v45 = vld [vmem:[#allocation2 + $0x318] sm:$0xff] }
  0x8e   :  { %2683 = vst [vmem:[#allocation5 + $0x2f0] sm:$0xff] %v2171_v29  ;;  %v1151_v40 = vld [vmem:[%s7866_s0 + $0x310] sm:$0xff]  ;;  %v2173_v41 = vadd.f32 %v1661_v35, %v637_v34  ;;  %v1662_v42 = vmul.f32 0.001, %v1150_v38  ;;  %v639_v43 = vmul.f32 0.999, %v127_v39 }
  0x8f   :  { %v1663_v44 = vmul.f32 0.001, %v1151_v40  ;;  %2684 = vst [vmem:[#allocation5 + $0x2f8] sm:$0xff] %v2172_v37  ;;  %v1152_v46 = vld [vmem:[%s7866_s0 + $0x318] sm:$0xff]  ;;  %v129_v47 = vld [vmem:[#allocation2 + $0x320] sm:$0xff]  ;;  %v130_v53 = vld [vmem:[#allocation2 + $0x328] sm:$0xff] }
  0x90   :  { %2685 = vst [vmem:[#allocation5 + $0x300] sm:$0xff] %v2173_v41  ;;  %v2174_v48 = vadd.f32 %v1662_v42, %v638_v36  ;;  %v640_v50 = vmul.f32 0.999, %v128_v45  ;;  %v1664_v51 = vmul.f32 0.001, %v1152_v46  ;;  %v1153_v52 = vld [vmem:[%s7866_s0 + $0x320] sm:$0xff] }
  0x91   :  { %v2175_v49 = vadd.f32 %v1663_v44, %v639_v43  ;;  %v641_v54 = vmul.f32 0.999, %v129_v47  ;;  %v1665_v55 = vmul.f32 0.001, %v1153_v52  ;;  %v642_v56 = vmul.f32 0.999, %v130_v53 }
  0x92   :  { %2686 = vst [vmem:[#allocation5 + $0x308] sm:$0xff] %v2174_v48  ;;  %v2176_v57 = vadd.f32 %v1664_v51, %v640_v50  ;;  %v1154_v58 = vld [vmem:[%s7866_s0 + $0x328] sm:$0xff]  ;;  %v131_v59 = vld [vmem:[#allocation2 + $0x330] sm:$0xff]  ;;  %v132_v1 = vld [vmem:[#allocation2 + $0x338] sm:$0xff] }
  0x93   :  { %2687 = vst [vmem:[#allocation5 + $0x310] sm:$0xff] %v2175_v49  ;;  %v1155_v60 = vld [vmem:[%s7866_s0 + $0x330] sm:$0xff]  ;;  %v2177_v61 = vadd.f32 %v1665_v55, %v641_v54  ;;  %v1666_v62 = vmul.f32 0.001, %v1154_v58  ;;  %v643_v63 = vmul.f32 0.999, %v131_v59 }
  0x94   :  { %v1667_v0 = vmul.f32 0.001, %v1155_v60  ;;  %2688 = vst [vmem:[#allocation5 + $0x318] sm:$0xff] %v2176_v57  ;;  %v1156_v2 = vld [vmem:[%s7866_s0 + $0x338] sm:$0xff]  ;;  %v133_v3 = vld [vmem:[#allocation2 + $0x340] sm:$0xff]  ;;  %v134_v9 = vld [vmem:[#allocation2 + $0x348] sm:$0xff] }
  0x95   :  { %2689 = vst [vmem:[#allocation5 + $0x320] sm:$0xff] %v2177_v61  ;;  %v2178_v4 = vadd.f32 %v1666_v62, %v642_v56  ;;  %v644_v6 = vmul.f32 0.999, %v132_v1  ;;  %v1668_v7 = vmul.f32 0.001, %v1156_v2  ;;  %v1157_v8 = vld [vmem:[%s7866_s0 + $0x340] sm:$0xff] }
  0x96   :  { %v2179_v5 = vadd.f32 %v1667_v0, %v643_v63  ;;  %v645_v10 = vmul.f32 0.999, %v133_v3  ;;  %v1669_v11 = vmul.f32 0.001, %v1157_v8  ;;  %v646_v12 = vmul.f32 0.999, %v134_v9 }
  0x97   :  { %2690 = vst [vmem:[#allocation5 + $0x328] sm:$0xff] %v2178_v4  ;;  %v2180_v13 = vadd.f32 %v1668_v7, %v644_v6  ;;  %v1158_v14 = vld [vmem:[%s7866_s0 + $0x348] sm:$0xff]  ;;  %v135_v15 = vld [vmem:[#allocation2 + $0x350] sm:$0xff]  ;;  %v136_v21 = vld [vmem:[#allocation2 + $0x358] sm:$0xff] }
  0x98   :  { %2691 = vst [vmem:[#allocation5 + $0x330] sm:$0xff] %v2179_v5  ;;  %v1159_v16 = vld [vmem:[%s7866_s0 + $0x350] sm:$0xff]  ;;  %v2181_v17 = vadd.f32 %v1669_v11, %v645_v10  ;;  %v1670_v18 = vmul.f32 0.001, %v1158_v14  ;;  %v647_v19 = vmul.f32 0.999, %v135_v15 }
  0x99   :  { %v1671_v20 = vmul.f32 0.001, %v1159_v16  ;;  %2692 = vst [vmem:[#allocation5 + $0x338] sm:$0xff] %v2180_v13  ;;  %v1160_v22 = vld [vmem:[%s7866_s0 + $0x358] sm:$0xff]  ;;  %v137_v23 = vld [vmem:[#allocation2 + $0x360] sm:$0xff]  ;;  %v138_v29 = vld [vmem:[#allocation2 + $0x368] sm:$0xff] }
  0x9a   :  { %2693 = vst [vmem:[#allocation5 + $0x340] sm:$0xff] %v2181_v17  ;;  %v2182_v24 = vadd.f32 %v1670_v18, %v646_v12  ;;  %v648_v26 = vmul.f32 0.999, %v136_v21  ;;  %v1672_v27 = vmul.f32 0.001, %v1160_v22  ;;  %v1161_v28 = vld [vmem:[%s7866_s0 + $0x360] sm:$0xff] }
  0x9b   :  { %v2183_v25 = vadd.f32 %v1671_v20, %v647_v19  ;;  %v649_v30 = vmul.f32 0.999, %v137_v23  ;;  %v1673_v31 = vmul.f32 0.001, %v1161_v28  ;;  %v650_v32 = vmul.f32 0.999, %v138_v29 }
  0x9c   :  { %2694 = vst [vmem:[#allocation5 + $0x348] sm:$0xff] %v2182_v24  ;;  %v2184_v33 = vadd.f32 %v1672_v27, %v648_v26  ;;  %v1162_v34 = vld [vmem:[%s7866_s0 + $0x368] sm:$0xff]  ;;  %v139_v35 = vld [vmem:[#allocation2 + $0x370] sm:$0xff]  ;;  %v140_v41 = vld [vmem:[#allocation2 + $0x378] sm:$0xff] }
  0x9d   :  { %2695 = vst [vmem:[#allocation5 + $0x350] sm:$0xff] %v2183_v25  ;;  %v1163_v36 = vld [vmem:[%s7866_s0 + $0x370] sm:$0xff]  ;;  %v2185_v37 = vadd.f32 %v1673_v31, %v649_v30  ;;  %v1674_v38 = vmul.f32 0.001, %v1162_v34  ;;  %v651_v39 = vmul.f32 0.999, %v139_v35 }
  0x9e   :  { %v1675_v40 = vmul.f32 0.001, %v1163_v36  ;;  %2696 = vst [vmem:[#allocation5 + $0x358] sm:$0xff] %v2184_v33  ;;  %v1164_v42 = vld [vmem:[%s7866_s0 + $0x378] sm:$0xff]  ;;  %v141_v43 = vld [vmem:[#allocation2 + $0x380] sm:$0xff]  ;;  %v142_v49 = vld [vmem:[#allocation2 + $0x388] sm:$0xff] }
  0x9f   :  { %2697 = vst [vmem:[#allocation5 + $0x360] sm:$0xff] %v2185_v37  ;;  %v2186_v44 = vadd.f32 %v1674_v38, %v650_v32  ;;  %v652_v46 = vmul.f32 0.999, %v140_v41  ;;  %v1676_v47 = vmul.f32 0.001, %v1164_v42  ;;  %v1165_v48 = vld [vmem:[%s7866_s0 + $0x380] sm:$0xff] }
  0xa0   :  { %v2187_v45 = vadd.f32 %v1675_v40, %v651_v39  ;;  %v653_v50 = vmul.f32 0.999, %v141_v43  ;;  %v1677_v51 = vmul.f32 0.001, %v1165_v48  ;;  %v654_v52 = vmul.f32 0.999, %v142_v49 }
  0xa1   :  { %2698 = vst [vmem:[#allocation5 + $0x368] sm:$0xff] %v2186_v44  ;;  %v2188_v53 = vadd.f32 %v1676_v47, %v652_v46  ;;  %v1166_v54 = vld [vmem:[%s7866_s0 + $0x388] sm:$0xff]  ;;  %v143_v55 = vld [vmem:[#allocation2 + $0x390] sm:$0xff]  ;;  %v144_v61 = vld [vmem:[#allocation2 + $0x398] sm:$0xff] }
  0xa2   :  { %2699 = vst [vmem:[#allocation5 + $0x370] sm:$0xff] %v2187_v45  ;;  %v1167_v56 = vld [vmem:[%s7866_s0 + $0x390] sm:$0xff]  ;;  %v2189_v57 = vadd.f32 %v1677_v51, %v653_v50  ;;  %v1678_v58 = vmul.f32 0.001, %v1166_v54  ;;  %v655_v59 = vmul.f32 0.999, %v143_v55 }
  0xa3   :  { %v1679_v60 = vmul.f32 0.001, %v1167_v56  ;;  %2700 = vst [vmem:[#allocation5 + $0x378] sm:$0xff] %v2188_v53  ;;  %v1168_v62 = vld [vmem:[%s7866_s0 + $0x398] sm:$0xff]  ;;  %v145_v63 = vld [vmem:[#allocation2 + $0x3a0] sm:$0xff]  ;;  %v146_v5 = vld [vmem:[#allocation2 + $0x3a8] sm:$0xff] }
  0xa4   :  { %2701 = vst [vmem:[#allocation5 + $0x380] sm:$0xff] %v2189_v57  ;;  %v2190_v0 = vadd.f32 %v1678_v58, %v654_v52  ;;  %v656_v2 = vmul.f32 0.999, %v144_v61  ;;  %v1680_v3 = vmul.f32 0.001, %v1168_v62  ;;  %v1169_v4 = vld [vmem:[%s7866_s0 + $0x3a0] sm:$0xff] }
  0xa5   :  { %v2191_v1 = vadd.f32 %v1679_v60, %v655_v59  ;;  %v657_v6 = vmul.f32 0.999, %v145_v63  ;;  %v1681_v7 = vmul.f32 0.001, %v1169_v4  ;;  %v658_v8 = vmul.f32 0.999, %v146_v5 }
  0xa6   :  { %2702 = vst [vmem:[#allocation5 + $0x388] sm:$0xff] %v2190_v0  ;;  %v2192_v9 = vadd.f32 %v1680_v3, %v656_v2  ;;  %v1170_v10 = vld [vmem:[%s7866_s0 + $0x3a8] sm:$0xff]  ;;  %v147_v11 = vld [vmem:[#allocation2 + $0x3b0] sm:$0xff]  ;;  %v148_v17 = vld [vmem:[#allocation2 + $0x3b8] sm:$0xff] }
  0xa7   :  { %2703 = vst [vmem:[#allocation5 + $0x390] sm:$0xff] %v2191_v1  ;;  %v1171_v12 = vld [vmem:[%s7866_s0 + $0x3b0] sm:$0xff]  ;;  %v2193_v13 = vadd.f32 %v1681_v7, %v657_v6  ;;  %v1682_v14 = vmul.f32 0.001, %v1170_v10  ;;  %v659_v15 = vmul.f32 0.999, %v147_v11 }
  0xa8   :  { %v1683_v16 = vmul.f32 0.001, %v1171_v12  ;;  %2704 = vst [vmem:[#allocation5 + $0x398] sm:$0xff] %v2192_v9  ;;  %v1172_v18 = vld [vmem:[%s7866_s0 + $0x3b8] sm:$0xff]  ;;  %v149_v19 = vld [vmem:[#allocation2 + $0x3c0] sm:$0xff]  ;;  %v150_v25 = vld [vmem:[#allocation2 + $0x3c8] sm:$0xff] }
  0xa9   :  { %2705 = vst [vmem:[#allocation5 + $0x3a0] sm:$0xff] %v2193_v13  ;;  %v2194_v20 = vadd.f32 %v1682_v14, %v658_v8  ;;  %v660_v22 = vmul.f32 0.999, %v148_v17  ;;  %v1684_v23 = vmul.f32 0.001, %v1172_v18  ;;  %v1173_v24 = vld [vmem:[%s7866_s0 + $0x3c0] sm:$0xff] }
  0xaa   :  { %v2195_v21 = vadd.f32 %v1683_v16, %v659_v15  ;;  %v661_v26 = vmul.f32 0.999, %v149_v19  ;;  %v1685_v27 = vmul.f32 0.001, %v1173_v24  ;;  %v662_v28 = vmul.f32 0.999, %v150_v25 }
  0xab   :  { %2706 = vst [vmem:[#allocation5 + $0x3a8] sm:$0xff] %v2194_v20  ;;  %v2196_v29 = vadd.f32 %v1684_v23, %v660_v22  ;;  %v1174_v30 = vld [vmem:[%s7866_s0 + $0x3c8] sm:$0xff]  ;;  %v151_v31 = vld [vmem:[#allocation2 + $0x3d0] sm:$0xff]  ;;  %v152_v37 = vld [vmem:[#allocation2 + $0x3d8] sm:$0xff] }
  0xac   :  { %2707 = vst [vmem:[#allocation5 + $0x3b0] sm:$0xff] %v2195_v21  ;;  %v1175_v32 = vld [vmem:[%s7866_s0 + $0x3d0] sm:$0xff]  ;;  %v2197_v33 = vadd.f32 %v1685_v27, %v661_v26  ;;  %v1686_v34 = vmul.f32 0.001, %v1174_v30  ;;  %v663_v35 = vmul.f32 0.999, %v151_v31 }
  0xad   :  { %v1687_v36 = vmul.f32 0.001, %v1175_v32  ;;  %2708 = vst [vmem:[#allocation5 + $0x3b8] sm:$0xff] %v2196_v29  ;;  %v1176_v38 = vld [vmem:[%s7866_s0 + $0x3d8] sm:$0xff]  ;;  %v153_v39 = vld [vmem:[#allocation2 + $0x3e0] sm:$0xff]  ;;  %v154_v45 = vld [vmem:[#allocation2 + $0x3e8] sm:$0xff] }
  0xae   :  { %2709 = vst [vmem:[#allocation5 + $0x3c0] sm:$0xff] %v2197_v33  ;;  %v2198_v40 = vadd.f32 %v1686_v34, %v662_v28  ;;  %v664_v42 = vmul.f32 0.999, %v152_v37  ;;  %v1688_v43 = vmul.f32 0.001, %v1176_v38  ;;  %v1177_v44 = vld [vmem:[%s7866_s0 + $0x3e0] sm:$0xff] }
  0xaf   :  { %v2199_v41 = vadd.f32 %v1687_v36, %v663_v35  ;;  %v665_v46 = vmul.f32 0.999, %v153_v39  ;;  %v1689_v47 = vmul.f32 0.001, %v1177_v44  ;;  %v666_v48 = vmul.f32 0.999, %v154_v45 }
  0xb0   :  { %2710 = vst [vmem:[#allocation5 + $0x3c8] sm:$0xff] %v2198_v40  ;;  %v2200_v49 = vadd.f32 %v1688_v43, %v664_v42  ;;  %v1178_v50 = vld [vmem:[%s7866_s0 + $0x3e8] sm:$0xff]  ;;  %v155_v51 = vld [vmem:[#allocation2 + $0x3f0] sm:$0xff]  ;;  %v156_v57 = vld [vmem:[#allocation2 + $0x3f8] sm:$0xff] }
  0xb1   :  { %2711 = vst [vmem:[#allocation5 + $0x3d0] sm:$0xff] %v2199_v41  ;;  %v1179_v52 = vld [vmem:[%s7866_s0 + $0x3f0] sm:$0xff]  ;;  %v2201_v53 = vadd.f32 %v1689_v47, %v665_v46  ;;  %v1690_v54 = vmul.f32 0.001, %v1178_v50  ;;  %v667_v55 = vmul.f32 0.999, %v155_v51 }
  0xb2   :  { %v1691_v56 = vmul.f32 0.001, %v1179_v52  ;;  %2712 = vst [vmem:[#allocation5 + $0x3d8] sm:$0xff] %v2200_v49  ;;  %v1180_v58 = vld [vmem:[%s7866_s0 + $0x3f8] sm:$0xff]  ;;  %v157_v59 = vld [vmem:[#allocation2 + $0x400] sm:$0xff]  ;;  %v158_v1 = vld [vmem:[#allocation2 + $0x408] sm:$0xff] }
  0xb3   :  { %2713 = vst [vmem:[#allocation5 + $0x3e0] sm:$0xff] %v2201_v53  ;;  %v2202_v60 = vadd.f32 %v1690_v54, %v666_v48  ;;  %v668_v62 = vmul.f32 0.999, %v156_v57  ;;  %v1692_v63 = vmul.f32 0.001, %v1180_v58  ;;  %v1181_v0 = vld [vmem:[%s7866_s0 + $0x400] sm:$0xff] }
  0xb4   :  { %v2203_v61 = vadd.f32 %v1691_v56, %v667_v55  ;;  %v669_v2 = vmul.f32 0.999, %v157_v59  ;;  %v1693_v3 = vmul.f32 0.001, %v1181_v0  ;;  %v670_v4 = vmul.f32 0.999, %v158_v1 }
  0xb5   :  { %2714 = vst [vmem:[#allocation5 + $0x3e8] sm:$0xff] %v2202_v60  ;;  %v2204_v5 = vadd.f32 %v1692_v63, %v668_v62  ;;  %v1182_v6 = vld [vmem:[%s7866_s0 + $0x408] sm:$0xff]  ;;  %v159_v7 = vld [vmem:[#allocation2 + $0x410] sm:$0xff]  ;;  %v160_v13 = vld [vmem:[#allocation2 + $0x418] sm:$0xff] }
  0xb6   :  { %2715 = vst [vmem:[#allocation5 + $0x3f0] sm:$0xff] %v2203_v61  ;;  %v1183_v8 = vld [vmem:[%s7866_s0 + $0x410] sm:$0xff]  ;;  %v2205_v9 = vadd.f32 %v1693_v3, %v669_v2  ;;  %v1694_v10 = vmul.f32 0.001, %v1182_v6  ;;  %v671_v11 = vmul.f32 0.999, %v159_v7 }
  0xb7   :  { %v1695_v12 = vmul.f32 0.001, %v1183_v8  ;;  %2716 = vst [vmem:[#allocation5 + $0x3f8] sm:$0xff] %v2204_v5  ;;  %v1184_v14 = vld [vmem:[%s7866_s0 + $0x418] sm:$0xff]  ;;  %v161_v15 = vld [vmem:[#allocation2 + $0x420] sm:$0xff]  ;;  %v162_v21 = vld [vmem:[#allocation2 + $0x428] sm:$0xff] }
  0xb8   :  { %2717 = vst [vmem:[#allocation5 + $0x400] sm:$0xff] %v2205_v9  ;;  %v2206_v16 = vadd.f32 %v1694_v10, %v670_v4  ;;  %v672_v18 = vmul.f32 0.999, %v160_v13  ;;  %v1696_v19 = vmul.f32 0.001, %v1184_v14  ;;  %v1185_v20 = vld [vmem:[%s7866_s0 + $0x420] sm:$0xff] }
  0xb9   :  { %v2207_v17 = vadd.f32 %v1695_v12, %v671_v11  ;;  %v673_v22 = vmul.f32 0.999, %v161_v15  ;;  %v1697_v23 = vmul.f32 0.001, %v1185_v20  ;;  %v674_v24 = vmul.f32 0.999, %v162_v21 }
  0xba   :  { %2718 = vst [vmem:[#allocation5 + $0x408] sm:$0xff] %v2206_v16  ;;  %v2208_v25 = vadd.f32 %v1696_v19, %v672_v18  ;;  %v1186_v26 = vld [vmem:[%s7866_s0 + $0x428] sm:$0xff]  ;;  %v163_v27 = vld [vmem:[#allocation2 + $0x430] sm:$0xff]  ;;  %v164_v33 = vld [vmem:[#allocation2 + $0x438] sm:$0xff] }
  0xbb   :  { %2719 = vst [vmem:[#allocation5 + $0x410] sm:$0xff] %v2207_v17  ;;  %v1187_v28 = vld [vmem:[%s7866_s0 + $0x430] sm:$0xff]  ;;  %v2209_v29 = vadd.f32 %v1697_v23, %v673_v22  ;;  %v1698_v30 = vmul.f32 0.001, %v1186_v26  ;;  %v675_v31 = vmul.f32 0.999, %v163_v27 }
  0xbc   :  { %v1699_v32 = vmul.f32 0.001, %v1187_v28  ;;  %2720 = vst [vmem:[#allocation5 + $0x418] sm:$0xff] %v2208_v25  ;;  %v1188_v34 = vld [vmem:[%s7866_s0 + $0x438] sm:$0xff]  ;;  %v165_v35 = vld [vmem:[#allocation2 + $0x440] sm:$0xff]  ;;  %v166_v41 = vld [vmem:[#allocation2 + $0x448] sm:$0xff] }
  0xbd   :  { %2721 = vst [vmem:[#allocation5 + $0x420] sm:$0xff] %v2209_v29  ;;  %v2210_v36 = vadd.f32 %v1698_v30, %v674_v24  ;;  %v676_v38 = vmul.f32 0.999, %v164_v33  ;;  %v1700_v39 = vmul.f32 0.001, %v1188_v34  ;;  %v1189_v40 = vld [vmem:[%s7866_s0 + $0x440] sm:$0xff] }
  0xbe   :  { %v2211_v37 = vadd.f32 %v1699_v32, %v675_v31  ;;  %v677_v42 = vmul.f32 0.999, %v165_v35  ;;  %v1701_v43 = vmul.f32 0.001, %v1189_v40  ;;  %v678_v44 = vmul.f32 0.999, %v166_v41 }
  0xbf   :  { %2722 = vst [vmem:[#allocation5 + $0x428] sm:$0xff] %v2210_v36  ;;  %v2212_v45 = vadd.f32 %v1700_v39, %v676_v38  ;;  %v1190_v46 = vld [vmem:[%s7866_s0 + $0x448] sm:$0xff]  ;;  %v167_v47 = vld [vmem:[#allocation2 + $0x450] sm:$0xff]  ;;  %v168_v53 = vld [vmem:[#allocation2 + $0x458] sm:$0xff] }
  0xc0   :  { %2723 = vst [vmem:[#allocation5 + $0x430] sm:$0xff] %v2211_v37  ;;  %v1191_v48 = vld [vmem:[%s7866_s0 + $0x450] sm:$0xff]  ;;  %v2213_v49 = vadd.f32 %v1701_v43, %v677_v42  ;;  %v1702_v50 = vmul.f32 0.001, %v1190_v46  ;;  %v679_v51 = vmul.f32 0.999, %v167_v47 }
  0xc1   :  { %v1703_v52 = vmul.f32 0.001, %v1191_v48  ;;  %2724 = vst [vmem:[#allocation5 + $0x438] sm:$0xff] %v2212_v45  ;;  %v1192_v54 = vld [vmem:[%s7866_s0 + $0x458] sm:$0xff]  ;;  %v169_v55 = vld [vmem:[#allocation2 + $0x460] sm:$0xff]  ;;  %v170_v61 = vld [vmem:[#allocation2 + $0x468] sm:$0xff] }
  0xc2   :  { %2725 = vst [vmem:[#allocation5 + $0x440] sm:$0xff] %v2213_v49  ;;  %v2214_v56 = vadd.f32 %v1702_v50, %v678_v44  ;;  %v680_v58 = vmul.f32 0.999, %v168_v53  ;;  %v1704_v59 = vmul.f32 0.001, %v1192_v54  ;;  %v1193_v60 = vld [vmem:[%s7866_s0 + $0x460] sm:$0xff] }
  0xc3   :  { %v2215_v57 = vadd.f32 %v1703_v52, %v679_v51  ;;  %v681_v62 = vmul.f32 0.999, %v169_v55  ;;  %v1705_v63 = vmul.f32 0.001, %v1193_v60  ;;  %v682_v0 = vmul.f32 0.999, %v170_v61 }
  0xc4   :  { %2726 = vst [vmem:[#allocation5 + $0x448] sm:$0xff] %v2214_v56  ;;  %v2216_v1 = vadd.f32 %v1704_v59, %v680_v58  ;;  %v1194_v2 = vld [vmem:[%s7866_s0 + $0x468] sm:$0xff]  ;;  %v171_v3 = vld [vmem:[#allocation2 + $0x470] sm:$0xff]  ;;  %v172_v9 = vld [vmem:[#allocation2 + $0x478] sm:$0xff] }
  0xc5   :  { %2727 = vst [vmem:[#allocation5 + $0x450] sm:$0xff] %v2215_v57  ;;  %v1195_v4 = vld [vmem:[%s7866_s0 + $0x470] sm:$0xff]  ;;  %v2217_v5 = vadd.f32 %v1705_v63, %v681_v62  ;;  %v1706_v6 = vmul.f32 0.001, %v1194_v2  ;;  %v683_v7 = vmul.f32 0.999, %v171_v3 }
  0xc6   :  { %v1707_v8 = vmul.f32 0.001, %v1195_v4  ;;  %2728 = vst [vmem:[#allocation5 + $0x458] sm:$0xff] %v2216_v1  ;;  %v1196_v10 = vld [vmem:[%s7866_s0 + $0x478] sm:$0xff]  ;;  %v173_v11 = vld [vmem:[#allocation2 + $0x480] sm:$0xff]  ;;  %v174_v17 = vld [vmem:[#allocation2 + $0x488] sm:$0xff] }
  0xc7   :  { %2729 = vst [vmem:[#allocation5 + $0x460] sm:$0xff] %v2217_v5  ;;  %v2218_v12 = vadd.f32 %v1706_v6, %v682_v0  ;;  %v684_v14 = vmul.f32 0.999, %v172_v9  ;;  %v1708_v15 = vmul.f32 0.001, %v1196_v10  ;;  %v1197_v16 = vld [vmem:[%s7866_s0 + $0x480] sm:$0xff] }
  0xc8   :  { %v2219_v13 = vadd.f32 %v1707_v8, %v683_v7  ;;  %v685_v18 = vmul.f32 0.999, %v173_v11  ;;  %v1709_v19 = vmul.f32 0.001, %v1197_v16  ;;  %v686_v20 = vmul.f32 0.999, %v174_v17 }
  0xc9   :  { %2730 = vst [vmem:[#allocation5 + $0x468] sm:$0xff] %v2218_v12  ;;  %v2220_v21 = vadd.f32 %v1708_v15, %v684_v14  ;;  %v1198_v22 = vld [vmem:[%s7866_s0 + $0x488] sm:$0xff]  ;;  %v175_v23 = vld [vmem:[#allocation2 + $0x490] sm:$0xff]  ;;  %v176_v29 = vld [vmem:[#allocation2 + $0x498] sm:$0xff] }
  0xca   :  { %2731 = vst [vmem:[#allocation5 + $0x470] sm:$0xff] %v2219_v13  ;;  %v1199_v24 = vld [vmem:[%s7866_s0 + $0x490] sm:$0xff]  ;;  %v2221_v25 = vadd.f32 %v1709_v19, %v685_v18  ;;  %v1710_v26 = vmul.f32 0.001, %v1198_v22  ;;  %v687_v27 = vmul.f32 0.999, %v175_v23 }
  0xcb   :  { %v1711_v28 = vmul.f32 0.001, %v1199_v24  ;;  %2732 = vst [vmem:[#allocation5 + $0x478] sm:$0xff] %v2220_v21  ;;  %v1200_v30 = vld [vmem:[%s7866_s0 + $0x498] sm:$0xff]  ;;  %v177_v31 = vld [vmem:[#allocation2 + $0x4a0] sm:$0xff]  ;;  %v178_v37 = vld [vmem:[#allocation2 + $0x4a8] sm:$0xff] }
  0xcc   :  { %2733 = vst [vmem:[#allocation5 + $0x480] sm:$0xff] %v2221_v25  ;;  %v2222_v32 = vadd.f32 %v1710_v26, %v686_v20  ;;  %v688_v34 = vmul.f32 0.999, %v176_v29  ;;  %v1712_v35 = vmul.f32 0.001, %v1200_v30  ;;  %v1201_v36 = vld [vmem:[%s7866_s0 + $0x4a0] sm:$0xff] }
  0xcd   :  { %v2223_v33 = vadd.f32 %v1711_v28, %v687_v27  ;;  %v689_v38 = vmul.f32 0.999, %v177_v31  ;;  %v1713_v39 = vmul.f32 0.001, %v1201_v36  ;;  %v690_v40 = vmul.f32 0.999, %v178_v37 }
  0xce   :  { %2734 = vst [vmem:[#allocation5 + $0x488] sm:$0xff] %v2222_v32  ;;  %v2224_v41 = vadd.f32 %v1712_v35, %v688_v34  ;;  %v1202_v42 = vld [vmem:[%s7866_s0 + $0x4a8] sm:$0xff]  ;;  %v179_v43 = vld [vmem:[#allocation2 + $0x4b0] sm:$0xff]  ;;  %v180_v49 = vld [vmem:[#allocation2 + $0x4b8] sm:$0xff] }
  0xcf   :  { %2735 = vst [vmem:[#allocation5 + $0x490] sm:$0xff] %v2223_v33  ;;  %v1203_v44 = vld [vmem:[%s7866_s0 + $0x4b0] sm:$0xff]  ;;  %v2225_v45 = vadd.f32 %v1713_v39, %v689_v38  ;;  %v1714_v46 = vmul.f32 0.001, %v1202_v42  ;;  %v691_v47 = vmul.f32 0.999, %v179_v43 }
  0xd0   :  { %v1715_v48 = vmul.f32 0.001, %v1203_v44  ;;  %2736 = vst [vmem:[#allocation5 + $0x498] sm:$0xff] %v2224_v41  ;;  %v1204_v50 = vld [vmem:[%s7866_s0 + $0x4b8] sm:$0xff]  ;;  %v181_v51 = vld [vmem:[#allocation2 + $0x4c0] sm:$0xff]  ;;  %v182_v57 = vld [vmem:[#allocation2 + $0x4c8] sm:$0xff] }
  0xd1   :  { %2737 = vst [vmem:[#allocation5 + $0x4a0] sm:$0xff] %v2225_v45  ;;  %v2226_v52 = vadd.f32 %v1714_v46, %v690_v40  ;;  %v692_v54 = vmul.f32 0.999, %v180_v49  ;;  %v1716_v55 = vmul.f32 0.001, %v1204_v50  ;;  %v1205_v56 = vld [vmem:[%s7866_s0 + $0x4c0] sm:$0xff] }
  0xd2   :  { %v2227_v53 = vadd.f32 %v1715_v48, %v691_v47  ;;  %v693_v58 = vmul.f32 0.999, %v181_v51  ;;  %v1717_v59 = vmul.f32 0.001, %v1205_v56  ;;  %v694_v60 = vmul.f32 0.999, %v182_v57 }
  0xd3   :  { %2738 = vst [vmem:[#allocation5 + $0x4a8] sm:$0xff] %v2226_v52  ;;  %v2228_v61 = vadd.f32 %v1716_v55, %v692_v54  ;;  %v1206_v62 = vld [vmem:[%s7866_s0 + $0x4c8] sm:$0xff]  ;;  %v183_v63 = vld [vmem:[#allocation2 + $0x4d0] sm:$0xff]  ;;  %v184_v5 = vld [vmem:[#allocation2 + $0x4d8] sm:$0xff] }
  0xd4   :  { %2739 = vst [vmem:[#allocation5 + $0x4b0] sm:$0xff] %v2227_v53  ;;  %v1207_v0 = vld [vmem:[%s7866_s0 + $0x4d0] sm:$0xff]  ;;  %v2229_v1 = vadd.f32 %v1717_v59, %v693_v58  ;;  %v1718_v2 = vmul.f32 0.001, %v1206_v62  ;;  %v695_v3 = vmul.f32 0.999, %v183_v63 }
  0xd5   :  { %v1719_v4 = vmul.f32 0.001, %v1207_v0  ;;  %2740 = vst [vmem:[#allocation5 + $0x4b8] sm:$0xff] %v2228_v61  ;;  %v1208_v6 = vld [vmem:[%s7866_s0 + $0x4d8] sm:$0xff]  ;;  %v185_v7 = vld [vmem:[#allocation2 + $0x4e0] sm:$0xff]  ;;  %v186_v13 = vld [vmem:[#allocation2 + $0x4e8] sm:$0xff] }
  0xd6   :  { %2741 = vst [vmem:[#allocation5 + $0x4c0] sm:$0xff] %v2229_v1  ;;  %v2230_v8 = vadd.f32 %v1718_v2, %v694_v60  ;;  %v696_v10 = vmul.f32 0.999, %v184_v5  ;;  %v1720_v11 = vmul.f32 0.001, %v1208_v6  ;;  %v1209_v12 = vld [vmem:[%s7866_s0 + $0x4e0] sm:$0xff] }
  0xd7   :  { %v2231_v9 = vadd.f32 %v1719_v4, %v695_v3  ;;  %v697_v14 = vmul.f32 0.999, %v185_v7  ;;  %v1721_v15 = vmul.f32 0.001, %v1209_v12  ;;  %v698_v16 = vmul.f32 0.999, %v186_v13 }
  0xd8   :  { %2742 = vst [vmem:[#allocation5 + $0x4c8] sm:$0xff] %v2230_v8  ;;  %v2232_v17 = vadd.f32 %v1720_v11, %v696_v10  ;;  %v1210_v18 = vld [vmem:[%s7866_s0 + $0x4e8] sm:$0xff]  ;;  %v187_v19 = vld [vmem:[#allocation2 + $0x4f0] sm:$0xff]  ;;  %v188_v25 = vld [vmem:[#allocation2 + $0x4f8] sm:$0xff] }
  0xd9   :  { %2743 = vst [vmem:[#allocation5 + $0x4d0] sm:$0xff] %v2231_v9  ;;  %v1211_v20 = vld [vmem:[%s7866_s0 + $0x4f0] sm:$0xff]  ;;  %v2233_v21 = vadd.f32 %v1721_v15, %v697_v14  ;;  %v1722_v22 = vmul.f32 0.001, %v1210_v18  ;;  %v699_v23 = vmul.f32 0.999, %v187_v19 }
  0xda   :  { %v1723_v24 = vmul.f32 0.001, %v1211_v20  ;;  %2744 = vst [vmem:[#allocation5 + $0x4d8] sm:$0xff] %v2232_v17  ;;  %v1212_v26 = vld [vmem:[%s7866_s0 + $0x4f8] sm:$0xff]  ;;  %v189_v27 = vld [vmem:[#allocation2 + $0x500] sm:$0xff]  ;;  %v190_v33 = vld [vmem:[#allocation2 + $0x508] sm:$0xff] }
  0xdb   :  { %2745 = vst [vmem:[#allocation5 + $0x4e0] sm:$0xff] %v2233_v21  ;;  %v2234_v28 = vadd.f32 %v1722_v22, %v698_v16  ;;  %v700_v30 = vmul.f32 0.999, %v188_v25  ;;  %v1724_v31 = vmul.f32 0.001, %v1212_v26  ;;  %v1213_v32 = vld [vmem:[%s7866_s0 + $0x500] sm:$0xff] }
  0xdc   :  { %v2235_v29 = vadd.f32 %v1723_v24, %v699_v23  ;;  %v701_v34 = vmul.f32 0.999, %v189_v27  ;;  %v1725_v35 = vmul.f32 0.001, %v1213_v32  ;;  %v702_v36 = vmul.f32 0.999, %v190_v33 }
  0xdd   :  { %2746 = vst [vmem:[#allocation5 + $0x4e8] sm:$0xff] %v2234_v28  ;;  %v2236_v37 = vadd.f32 %v1724_v31, %v700_v30  ;;  %v1214_v38 = vld [vmem:[%s7866_s0 + $0x508] sm:$0xff]  ;;  %v191_v39 = vld [vmem:[#allocation2 + $0x510] sm:$0xff]  ;;  %v192_v45 = vld [vmem:[#allocation2 + $0x518] sm:$0xff] }
  0xde   :  { %2747 = vst [vmem:[#allocation5 + $0x4f0] sm:$0xff] %v2235_v29  ;;  %v1215_v40 = vld [vmem:[%s7866_s0 + $0x510] sm:$0xff]  ;;  %v2237_v41 = vadd.f32 %v1725_v35, %v701_v34  ;;  %v1726_v42 = vmul.f32 0.001, %v1214_v38  ;;  %v703_v43 = vmul.f32 0.999, %v191_v39 }
  0xdf   :  { %v1727_v44 = vmul.f32 0.001, %v1215_v40  ;;  %2748 = vst [vmem:[#allocation5 + $0x4f8] sm:$0xff] %v2236_v37  ;;  %v1216_v46 = vld [vmem:[%s7866_s0 + $0x518] sm:$0xff]  ;;  %v193_v47 = vld [vmem:[#allocation2 + $0x520] sm:$0xff]  ;;  %v194_v53 = vld [vmem:[#allocation2 + $0x528] sm:$0xff] }
  0xe0   :  { %2749 = vst [vmem:[#allocation5 + $0x500] sm:$0xff] %v2237_v41  ;;  %v2238_v48 = vadd.f32 %v1726_v42, %v702_v36  ;;  %v704_v50 = vmul.f32 0.999, %v192_v45  ;;  %v1728_v51 = vmul.f32 0.001, %v1216_v46  ;;  %v1217_v52 = vld [vmem:[%s7866_s0 + $0x520] sm:$0xff] }
  0xe1   :  { %v2239_v49 = vadd.f32 %v1727_v44, %v703_v43  ;;  %v705_v54 = vmul.f32 0.999, %v193_v47  ;;  %v1729_v55 = vmul.f32 0.001, %v1217_v52  ;;  %v706_v56 = vmul.f32 0.999, %v194_v53 }
  0xe2   :  { %2750 = vst [vmem:[#allocation5 + $0x508] sm:$0xff] %v2238_v48  ;;  %v2240_v57 = vadd.f32 %v1728_v51, %v704_v50  ;;  %v1218_v58 = vld [vmem:[%s7866_s0 + $0x528] sm:$0xff]  ;;  %v195_v59 = vld [vmem:[#allocation2 + $0x530] sm:$0xff]  ;;  %v196_v1 = vld [vmem:[#allocation2 + $0x538] sm:$0xff] }
  0xe3   :  { %2751 = vst [vmem:[#allocation5 + $0x510] sm:$0xff] %v2239_v49  ;;  %v1219_v60 = vld [vmem:[%s7866_s0 + $0x530] sm:$0xff]  ;;  %v2241_v61 = vadd.f32 %v1729_v55, %v705_v54  ;;  %v1730_v62 = vmul.f32 0.001, %v1218_v58  ;;  %v707_v63 = vmul.f32 0.999, %v195_v59 }
  0xe4   :  { %v1731_v0 = vmul.f32 0.001, %v1219_v60  ;;  %2752 = vst [vmem:[#allocation5 + $0x518] sm:$0xff] %v2240_v57  ;;  %v1220_v2 = vld [vmem:[%s7866_s0 + $0x538] sm:$0xff]  ;;  %v197_v3 = vld [vmem:[#allocation2 + $0x540] sm:$0xff]  ;;  %v198_v9 = vld [vmem:[#allocation2 + $0x548] sm:$0xff] }
  0xe5   :  { %2753 = vst [vmem:[#allocation5 + $0x520] sm:$0xff] %v2241_v61  ;;  %v2242_v4 = vadd.f32 %v1730_v62, %v706_v56  ;;  %v708_v6 = vmul.f32 0.999, %v196_v1  ;;  %v1732_v7 = vmul.f32 0.001, %v1220_v2  ;;  %v1221_v8 = vld [vmem:[%s7866_s0 + $0x540] sm:$0xff] }
  0xe6   :  { %v2243_v5 = vadd.f32 %v1731_v0, %v707_v63  ;;  %v709_v10 = vmul.f32 0.999, %v197_v3  ;;  %v1733_v11 = vmul.f32 0.001, %v1221_v8  ;;  %v710_v12 = vmul.f32 0.999, %v198_v9 }
  0xe7   :  { %2754 = vst [vmem:[#allocation5 + $0x528] sm:$0xff] %v2242_v4  ;;  %v2244_v13 = vadd.f32 %v1732_v7, %v708_v6  ;;  %v1222_v14 = vld [vmem:[%s7866_s0 + $0x548] sm:$0xff]  ;;  %v199_v15 = vld [vmem:[#allocation2 + $0x550] sm:$0xff]  ;;  %v200_v21 = vld [vmem:[#allocation2 + $0x558] sm:$0xff] }
  0xe8   :  { %2755 = vst [vmem:[#allocation5 + $0x530] sm:$0xff] %v2243_v5  ;;  %v1223_v16 = vld [vmem:[%s7866_s0 + $0x550] sm:$0xff]  ;;  %v2245_v17 = vadd.f32 %v1733_v11, %v709_v10  ;;  %v1734_v18 = vmul.f32 0.001, %v1222_v14  ;;  %v711_v19 = vmul.f32 0.999, %v199_v15 }
  0xe9   :  { %v1735_v20 = vmul.f32 0.001, %v1223_v16  ;;  %2756 = vst [vmem:[#allocation5 + $0x538] sm:$0xff] %v2244_v13  ;;  %v1224_v22 = vld [vmem:[%s7866_s0 + $0x558] sm:$0xff]  ;;  %v201_v23 = vld [vmem:[#allocation2 + $0x560] sm:$0xff]  ;;  %v202_v29 = vld [vmem:[#allocation2 + $0x568] sm:$0xff] }
  0xea   :  { %2757 = vst [vmem:[#allocation5 + $0x540] sm:$0xff] %v2245_v17  ;;  %v2246_v24 = vadd.f32 %v1734_v18, %v710_v12  ;;  %v712_v26 = vmul.f32 0.999, %v200_v21  ;;  %v1736_v27 = vmul.f32 0.001, %v1224_v22  ;;  %v1225_v28 = vld [vmem:[%s7866_s0 + $0x560] sm:$0xff] }
  0xeb   :  { %v2247_v25 = vadd.f32 %v1735_v20, %v711_v19  ;;  %v713_v30 = vmul.f32 0.999, %v201_v23  ;;  %v1737_v31 = vmul.f32 0.001, %v1225_v28  ;;  %v714_v32 = vmul.f32 0.999, %v202_v29 }
  0xec   :  { %2758 = vst [vmem:[#allocation5 + $0x548] sm:$0xff] %v2246_v24  ;;  %v2248_v33 = vadd.f32 %v1736_v27, %v712_v26  ;;  %v1226_v34 = vld [vmem:[%s7866_s0 + $0x568] sm:$0xff]  ;;  %v203_v35 = vld [vmem:[#allocation2 + $0x570] sm:$0xff]  ;;  %v204_v41 = vld [vmem:[#allocation2 + $0x578] sm:$0xff] }
  0xed   :  { %2759 = vst [vmem:[#allocation5 + $0x550] sm:$0xff] %v2247_v25  ;;  %v1227_v36 = vld [vmem:[%s7866_s0 + $0x570] sm:$0xff]  ;;  %v2249_v37 = vadd.f32 %v1737_v31, %v713_v30  ;;  %v1738_v38 = vmul.f32 0.001, %v1226_v34  ;;  %v715_v39 = vmul.f32 0.999, %v203_v35 }
  0xee   :  { %v1739_v40 = vmul.f32 0.001, %v1227_v36  ;;  %2760 = vst [vmem:[#allocation5 + $0x558] sm:$0xff] %v2248_v33  ;;  %v1228_v42 = vld [vmem:[%s7866_s0 + $0x578] sm:$0xff]  ;;  %v205_v43 = vld [vmem:[#allocation2 + $0x580] sm:$0xff]  ;;  %v206_v49 = vld [vmem:[#allocation2 + $0x588] sm:$0xff] }
  0xef   :  { %2761 = vst [vmem:[#allocation5 + $0x560] sm:$0xff] %v2249_v37  ;;  %v2250_v44 = vadd.f32 %v1738_v38, %v714_v32  ;;  %v716_v46 = vmul.f32 0.999, %v204_v41  ;;  %v1740_v47 = vmul.f32 0.001, %v1228_v42  ;;  %v1229_v48 = vld [vmem:[%s7866_s0 + $0x580] sm:$0xff] }
  0xf0   :  { %v2251_v45 = vadd.f32 %v1739_v40, %v715_v39  ;;  %v717_v50 = vmul.f32 0.999, %v205_v43  ;;  %v1741_v51 = vmul.f32 0.001, %v1229_v48  ;;  %v718_v52 = vmul.f32 0.999, %v206_v49 }
  0xf1   :  { %2762 = vst [vmem:[#allocation5 + $0x568] sm:$0xff] %v2250_v44  ;;  %v2252_v53 = vadd.f32 %v1740_v47, %v716_v46  ;;  %v1230_v54 = vld [vmem:[%s7866_s0 + $0x588] sm:$0xff]  ;;  %v207_v55 = vld [vmem:[#allocation2 + $0x590] sm:$0xff]  ;;  %v208_v61 = vld [vmem:[#allocation2 + $0x598] sm:$0xff] }
  0xf2   :  { %2763 = vst [vmem:[#allocation5 + $0x570] sm:$0xff] %v2251_v45  ;;  %v1231_v56 = vld [vmem:[%s7866_s0 + $0x590] sm:$0xff]  ;;  %v2253_v57 = vadd.f32 %v1741_v51, %v717_v50  ;;  %v1742_v58 = vmul.f32 0.001, %v1230_v54  ;;  %v719_v59 = vmul.f32 0.999, %v207_v55 }
  0xf3   :  { %v1743_v60 = vmul.f32 0.001, %v1231_v56  ;;  %2764 = vst [vmem:[#allocation5 + $0x578] sm:$0xff] %v2252_v53  ;;  %v1232_v62 = vld [vmem:[%s7866_s0 + $0x598] sm:$0xff]  ;;  %v209_v63 = vld [vmem:[#allocation2 + $0x5a0] sm:$0xff]  ;;  %v210_v5 = vld [vmem:[#allocation2 + $0x5a8] sm:$0xff] }
  0xf4   :  { %2765 = vst [vmem:[#allocation5 + $0x580] sm:$0xff] %v2253_v57  ;;  %v2254_v0 = vadd.f32 %v1742_v58, %v718_v52  ;;  %v720_v2 = vmul.f32 0.999, %v208_v61  ;;  %v1744_v3 = vmul.f32 0.001, %v1232_v62  ;;  %v1233_v4 = vld [vmem:[%s7866_s0 + $0x5a0] sm:$0xff] }
  0xf5   :  { %v2255_v1 = vadd.f32 %v1743_v60, %v719_v59  ;;  %v721_v6 = vmul.f32 0.999, %v209_v63  ;;  %v1745_v7 = vmul.f32 0.001, %v1233_v4  ;;  %v722_v8 = vmul.f32 0.999, %v210_v5 }
  0xf6   :  { %2766 = vst [vmem:[#allocation5 + $0x588] sm:$0xff] %v2254_v0  ;;  %v2256_v9 = vadd.f32 %v1744_v3, %v720_v2  ;;  %v1234_v10 = vld [vmem:[%s7866_s0 + $0x5a8] sm:$0xff]  ;;  %v211_v11 = vld [vmem:[#allocation2 + $0x5b0] sm:$0xff]  ;;  %v212_v17 = vld [vmem:[#allocation2 + $0x5b8] sm:$0xff] }
  0xf7   :  { %2767 = vst [vmem:[#allocation5 + $0x590] sm:$0xff] %v2255_v1  ;;  %v1235_v12 = vld [vmem:[%s7866_s0 + $0x5b0] sm:$0xff]  ;;  %v2257_v13 = vadd.f32 %v1745_v7, %v721_v6  ;;  %v1746_v14 = vmul.f32 0.001, %v1234_v10  ;;  %v723_v15 = vmul.f32 0.999, %v211_v11 }
  0xf8   :  { %v1747_v16 = vmul.f32 0.001, %v1235_v12  ;;  %2768 = vst [vmem:[#allocation5 + $0x598] sm:$0xff] %v2256_v9  ;;  %v1236_v18 = vld [vmem:[%s7866_s0 + $0x5b8] sm:$0xff]  ;;  %v213_v19 = vld [vmem:[#allocation2 + $0x5c0] sm:$0xff]  ;;  %v214_v25 = vld [vmem:[#allocation2 + $0x5c8] sm:$0xff] }
  0xf9   :  { %2769 = vst [vmem:[#allocation5 + $0x5a0] sm:$0xff] %v2257_v13  ;;  %v2258_v20 = vadd.f32 %v1746_v14, %v722_v8  ;;  %v724_v22 = vmul.f32 0.999, %v212_v17  ;;  %v1748_v23 = vmul.f32 0.001, %v1236_v18  ;;  %v1237_v24 = vld [vmem:[%s7866_s0 + $0x5c0] sm:$0xff] }
  0xfa   :  { %v2259_v21 = vadd.f32 %v1747_v16, %v723_v15  ;;  %v725_v26 = vmul.f32 0.999, %v213_v19  ;;  %v1749_v27 = vmul.f32 0.001, %v1237_v24  ;;  %v726_v28 = vmul.f32 0.999, %v214_v25 }
  0xfb   :  { %2770 = vst [vmem:[#allocation5 + $0x5a8] sm:$0xff] %v2258_v20  ;;  %v2260_v29 = vadd.f32 %v1748_v23, %v724_v22  ;;  %v1238_v30 = vld [vmem:[%s7866_s0 + $0x5c8] sm:$0xff]  ;;  %v215_v31 = vld [vmem:[#allocation2 + $0x5d0] sm:$0xff]  ;;  %v216_v37 = vld [vmem:[#allocation2 + $0x5d8] sm:$0xff] }
  0xfc   :  { %2771 = vst [vmem:[#allocation5 + $0x5b0] sm:$0xff] %v2259_v21  ;;  %v1239_v32 = vld [vmem:[%s7866_s0 + $0x5d0] sm:$0xff]  ;;  %v2261_v33 = vadd.f32 %v1749_v27, %v725_v26  ;;  %v1750_v34 = vmul.f32 0.001, %v1238_v30  ;;  %v727_v35 = vmul.f32 0.999, %v215_v31 }
  0xfd   :  { %v1751_v36 = vmul.f32 0.001, %v1239_v32  ;;  %2772 = vst [vmem:[#allocation5 + $0x5b8] sm:$0xff] %v2260_v29  ;;  %v1240_v38 = vld [vmem:[%s7866_s0 + $0x5d8] sm:$0xff]  ;;  %v217_v39 = vld [vmem:[#allocation2 + $0x5e0] sm:$0xff]  ;;  %v218_v45 = vld [vmem:[#allocation2 + $0x5e8] sm:$0xff] }
  0xfe   :  { %2773 = vst [vmem:[#allocation5 + $0x5c0] sm:$0xff] %v2261_v33  ;;  %v2262_v40 = vadd.f32 %v1750_v34, %v726_v28  ;;  %v728_v42 = vmul.f32 0.999, %v216_v37  ;;  %v1752_v43 = vmul.f32 0.001, %v1240_v38  ;;  %v1241_v44 = vld [vmem:[%s7866_s0 + $0x5e0] sm:$0xff] }
  0xff   :  { %v2263_v41 = vadd.f32 %v1751_v36, %v727_v35  ;;  %v729_v46 = vmul.f32 0.999, %v217_v39  ;;  %v1753_v47 = vmul.f32 0.001, %v1241_v44  ;;  %v730_v48 = vmul.f32 0.999, %v218_v45 }
 0x100   :  { %2774 = vst [vmem:[#allocation5 + $0x5c8] sm:$0xff] %v2262_v40  ;;  %v2264_v49 = vadd.f32 %v1752_v43, %v728_v42  ;;  %v1242_v50 = vld [vmem:[%s7866_s0 + $0x5e8] sm:$0xff]  ;;  %v219_v51 = vld [vmem:[#allocation2 + $0x5f0] sm:$0xff]  ;;  %v220_v57 = vld [vmem:[#allocation2 + $0x5f8] sm:$0xff] }
 0x101   :  { %2775 = vst [vmem:[#allocation5 + $0x5d0] sm:$0xff] %v2263_v41  ;;  %v1243_v52 = vld [vmem:[%s7866_s0 + $0x5f0] sm:$0xff]  ;;  %v2265_v53 = vadd.f32 %v1753_v47, %v729_v46  ;;  %v1754_v54 = vmul.f32 0.001, %v1242_v50  ;;  %v731_v55 = vmul.f32 0.999, %v219_v51 }
 0x102   :  { %v1755_v56 = vmul.f32 0.001, %v1243_v52  ;;  %2776 = vst [vmem:[#allocation5 + $0x5d8] sm:$0xff] %v2264_v49  ;;  %v1244_v58 = vld [vmem:[%s7866_s0 + $0x5f8] sm:$0xff]  ;;  %v221_v59 = vld [vmem:[#allocation2 + $0x600] sm:$0xff]  ;;  %v222_v1 = vld [vmem:[#allocation2 + $0x608] sm:$0xff] }
 0x103   :  { %2777 = vst [vmem:[#allocation5 + $0x5e0] sm:$0xff] %v2265_v53  ;;  %v2266_v60 = vadd.f32 %v1754_v54, %v730_v48  ;;  %v732_v62 = vmul.f32 0.999, %v220_v57  ;;  %v1756_v63 = vmul.f32 0.001, %v1244_v58  ;;  %v1245_v0 = vld [vmem:[%s7866_s0 + $0x600] sm:$0xff] }
 0x104   :  { %v2267_v61 = vadd.f32 %v1755_v56, %v731_v55  ;;  %v733_v2 = vmul.f32 0.999, %v221_v59  ;;  %v1757_v3 = vmul.f32 0.001, %v1245_v0  ;;  %v734_v4 = vmul.f32 0.999, %v222_v1 }
 0x105   :  { %2778 = vst [vmem:[#allocation5 + $0x5e8] sm:$0xff] %v2266_v60  ;;  %v2268_v5 = vadd.f32 %v1756_v63, %v732_v62  ;;  %v1246_v6 = vld [vmem:[%s7866_s0 + $0x608] sm:$0xff]  ;;  %v223_v7 = vld [vmem:[#allocation2 + $0x610] sm:$0xff]  ;;  %v224_v13 = vld [vmem:[#allocation2 + $0x618] sm:$0xff] }
 0x106   :  { %2779 = vst [vmem:[#allocation5 + $0x5f0] sm:$0xff] %v2267_v61  ;;  %v1247_v8 = vld [vmem:[%s7866_s0 + $0x610] sm:$0xff]  ;;  %v2269_v9 = vadd.f32 %v1757_v3, %v733_v2  ;;  %v1758_v10 = vmul.f32 0.001, %v1246_v6  ;;  %v735_v11 = vmul.f32 0.999, %v223_v7 }
 0x107   :  { %v1759_v12 = vmul.f32 0.001, %v1247_v8  ;;  %2780 = vst [vmem:[#allocation5 + $0x5f8] sm:$0xff] %v2268_v5  ;;  %v1248_v14 = vld [vmem:[%s7866_s0 + $0x618] sm:$0xff]  ;;  %v225_v15 = vld [vmem:[#allocation2 + $0x620] sm:$0xff]  ;;  %v226_v21 = vld [vmem:[#allocation2 + $0x628] sm:$0xff] }
 0x108   :  { %2781 = vst [vmem:[#allocation5 + $0x600] sm:$0xff] %v2269_v9  ;;  %v2270_v16 = vadd.f32 %v1758_v10, %v734_v4  ;;  %v736_v18 = vmul.f32 0.999, %v224_v13  ;;  %v1760_v19 = vmul.f32 0.001, %v1248_v14  ;;  %v1249_v20 = vld [vmem:[%s7866_s0 + $0x620] sm:$0xff] }
 0x109   :  { %v2271_v17 = vadd.f32 %v1759_v12, %v735_v11  ;;  %v737_v22 = vmul.f32 0.999, %v225_v15  ;;  %v1761_v23 = vmul.f32 0.001, %v1249_v20  ;;  %v738_v24 = vmul.f32 0.999, %v226_v21 }
 0x10a   :  { %2782 = vst [vmem:[#allocation5 + $0x608] sm:$0xff] %v2270_v16  ;;  %v2272_v25 = vadd.f32 %v1760_v19, %v736_v18  ;;  %v1250_v26 = vld [vmem:[%s7866_s0 + $0x628] sm:$0xff]  ;;  %v227_v27 = vld [vmem:[#allocation2 + $0x630] sm:$0xff]  ;;  %v228_v33 = vld [vmem:[#allocation2 + $0x638] sm:$0xff] }
 0x10b   :  { %2783 = vst [vmem:[#allocation5 + $0x610] sm:$0xff] %v2271_v17  ;;  %v1251_v28 = vld [vmem:[%s7866_s0 + $0x630] sm:$0xff]  ;;  %v2273_v29 = vadd.f32 %v1761_v23, %v737_v22  ;;  %v1762_v30 = vmul.f32 0.001, %v1250_v26  ;;  %v739_v31 = vmul.f32 0.999, %v227_v27 }
 0x10c   :  { %v1763_v32 = vmul.f32 0.001, %v1251_v28  ;;  %2784 = vst [vmem:[#allocation5 + $0x618] sm:$0xff] %v2272_v25  ;;  %v1252_v34 = vld [vmem:[%s7866_s0 + $0x638] sm:$0xff]  ;;  %v229_v35 = vld [vmem:[#allocation2 + $0x640] sm:$0xff]  ;;  %v230_v41 = vld [vmem:[#allocation2 + $0x648] sm:$0xff] }
 0x10d   :  { %2785 = vst [vmem:[#allocation5 + $0x620] sm:$0xff] %v2273_v29  ;;  %v2274_v36 = vadd.f32 %v1762_v30, %v738_v24  ;;  %v740_v38 = vmul.f32 0.999, %v228_v33  ;;  %v1764_v39 = vmul.f32 0.001, %v1252_v34  ;;  %v1253_v40 = vld [vmem:[%s7866_s0 + $0x640] sm:$0xff] }
 0x10e   :  { %v2275_v37 = vadd.f32 %v1763_v32, %v739_v31  ;;  %v741_v42 = vmul.f32 0.999, %v229_v35  ;;  %v1765_v43 = vmul.f32 0.001, %v1253_v40  ;;  %v742_v44 = vmul.f32 0.999, %v230_v41 }
 0x10f   :  { %2786 = vst [vmem:[#allocation5 + $0x628] sm:$0xff] %v2274_v36  ;;  %v2276_v45 = vadd.f32 %v1764_v39, %v740_v38  ;;  %v1254_v46 = vld [vmem:[%s7866_s0 + $0x648] sm:$0xff]  ;;  %v231_v47 = vld [vmem:[#allocation2 + $0x650] sm:$0xff]  ;;  %v232_v53 = vld [vmem:[#allocation2 + $0x658] sm:$0xff] }
 0x110   :  { %2787 = vst [vmem:[#allocation5 + $0x630] sm:$0xff] %v2275_v37  ;;  %v1255_v48 = vld [vmem:[%s7866_s0 + $0x650] sm:$0xff]  ;;  %v2277_v49 = vadd.f32 %v1765_v43, %v741_v42  ;;  %v1766_v50 = vmul.f32 0.001, %v1254_v46  ;;  %v743_v51 = vmul.f32 0.999, %v231_v47 }
 0x111   :  { %v1767_v52 = vmul.f32 0.001, %v1255_v48  ;;  %2788 = vst [vmem:[#allocation5 + $0x638] sm:$0xff] %v2276_v45  ;;  %v1256_v54 = vld [vmem:[%s7866_s0 + $0x658] sm:$0xff]  ;;  %v233_v55 = vld [vmem:[#allocation2 + $0x660] sm:$0xff]  ;;  %v234_v61 = vld [vmem:[#allocation2 + $0x668] sm:$0xff] }
 0x112   :  { %2789 = vst [vmem:[#allocation5 + $0x640] sm:$0xff] %v2277_v49  ;;  %v2278_v56 = vadd.f32 %v1766_v50, %v742_v44  ;;  %v744_v58 = vmul.f32 0.999, %v232_v53  ;;  %v1768_v59 = vmul.f32 0.001, %v1256_v54  ;;  %v1257_v60 = vld [vmem:[%s7866_s0 + $0x660] sm:$0xff] }
 0x113   :  { %v2279_v57 = vadd.f32 %v1767_v52, %v743_v51  ;;  %v745_v62 = vmul.f32 0.999, %v233_v55  ;;  %v1769_v63 = vmul.f32 0.001, %v1257_v60  ;;  %v746_v0 = vmul.f32 0.999, %v234_v61 }
 0x114   :  { %2790 = vst [vmem:[#allocation5 + $0x648] sm:$0xff] %v2278_v56  ;;  %v2280_v1 = vadd.f32 %v1768_v59, %v744_v58  ;;  %v1258_v2 = vld [vmem:[%s7866_s0 + $0x668] sm:$0xff]  ;;  %v235_v3 = vld [vmem:[#allocation2 + $0x670] sm:$0xff]  ;;  %v236_v9 = vld [vmem:[#allocation2 + $0x678] sm:$0xff] }
 0x115   :  { %2791 = vst [vmem:[#allocation5 + $0x650] sm:$0xff] %v2279_v57  ;;  %v1259_v4 = vld [vmem:[%s7866_s0 + $0x670] sm:$0xff]  ;;  %v2281_v5 = vadd.f32 %v1769_v63, %v745_v62  ;;  %v1770_v6 = vmul.f32 0.001, %v1258_v2  ;;  %v747_v7 = vmul.f32 0.999, %v235_v3 }
 0x116   :  { %v1771_v8 = vmul.f32 0.001, %v1259_v4  ;;  %2792 = vst [vmem:[#allocation5 + $0x658] sm:$0xff] %v2280_v1  ;;  %v1260_v10 = vld [vmem:[%s7866_s0 + $0x678] sm:$0xff]  ;;  %v237_v11 = vld [vmem:[#allocation2 + $0x680] sm:$0xff]  ;;  %v238_v17 = vld [vmem:[#allocation2 + $0x688] sm:$0xff] }
 0x117   :  { %2793 = vst [vmem:[#allocation5 + $0x660] sm:$0xff] %v2281_v5  ;;  %v2282_v12 = vadd.f32 %v1770_v6, %v746_v0  ;;  %v748_v14 = vmul.f32 0.999, %v236_v9  ;;  %v1772_v15 = vmul.f32 0.001, %v1260_v10  ;;  %v1261_v16 = vld [vmem:[%s7866_s0 + $0x680] sm:$0xff] }
 0x118   :  { %v2283_v13 = vadd.f32 %v1771_v8, %v747_v7  ;;  %v749_v18 = vmul.f32 0.999, %v237_v11  ;;  %v1773_v19 = vmul.f32 0.001, %v1261_v16  ;;  %v750_v20 = vmul.f32 0.999, %v238_v17 }
 0x119   :  { %2794 = vst [vmem:[#allocation5 + $0x668] sm:$0xff] %v2282_v12  ;;  %v2284_v21 = vadd.f32 %v1772_v15, %v748_v14  ;;  %v1262_v22 = vld [vmem:[%s7866_s0 + $0x688] sm:$0xff]  ;;  %v239_v23 = vld [vmem:[#allocation2 + $0x690] sm:$0xff]  ;;  %v240_v29 = vld [vmem:[#allocation2 + $0x698] sm:$0xff] }
 0x11a   :  { %2795 = vst [vmem:[#allocation5 + $0x670] sm:$0xff] %v2283_v13  ;;  %v1263_v24 = vld [vmem:[%s7866_s0 + $0x690] sm:$0xff]  ;;  %v2285_v25 = vadd.f32 %v1773_v19, %v749_v18  ;;  %v1774_v26 = vmul.f32 0.001, %v1262_v22  ;;  %v751_v27 = vmul.f32 0.999, %v239_v23 }
 0x11b   :  { %v1775_v28 = vmul.f32 0.001, %v1263_v24  ;;  %2796 = vst [vmem:[#allocation5 + $0x678] sm:$0xff] %v2284_v21  ;;  %v1264_v30 = vld [vmem:[%s7866_s0 + $0x698] sm:$0xff]  ;;  %v241_v31 = vld [vmem:[#allocation2 + $0x6a0] sm:$0xff]  ;;  %v242_v37 = vld [vmem:[#allocation2 + $0x6a8] sm:$0xff] }
 0x11c   :  { %2797 = vst [vmem:[#allocation5 + $0x680] sm:$0xff] %v2285_v25  ;;  %v2286_v32 = vadd.f32 %v1774_v26, %v750_v20  ;;  %v752_v34 = vmul.f32 0.999, %v240_v29  ;;  %v1776_v35 = vmul.f32 0.001, %v1264_v30  ;;  %v1265_v36 = vld [vmem:[%s7866_s0 + $0x6a0] sm:$0xff] }
 0x11d   :  { %v2287_v33 = vadd.f32 %v1775_v28, %v751_v27  ;;  %v753_v38 = vmul.f32 0.999, %v241_v31  ;;  %v1777_v39 = vmul.f32 0.001, %v1265_v36  ;;  %v754_v40 = vmul.f32 0.999, %v242_v37 }
 0x11e   :  { %2798 = vst [vmem:[#allocation5 + $0x688] sm:$0xff] %v2286_v32  ;;  %v2288_v41 = vadd.f32 %v1776_v35, %v752_v34  ;;  %v1266_v42 = vld [vmem:[%s7866_s0 + $0x6a8] sm:$0xff]  ;;  %v243_v43 = vld [vmem:[#allocation2 + $0x6b0] sm:$0xff]  ;;  %v244_v49 = vld [vmem:[#allocation2 + $0x6b8] sm:$0xff] }
 0x11f   :  { %2799 = vst [vmem:[#allocation5 + $0x690] sm:$0xff] %v2287_v33  ;;  %v1267_v44 = vld [vmem:[%s7866_s0 + $0x6b0] sm:$0xff]  ;;  %v2289_v45 = vadd.f32 %v1777_v39, %v753_v38  ;;  %v1778_v46 = vmul.f32 0.001, %v1266_v42  ;;  %v755_v47 = vmul.f32 0.999, %v243_v43 }
 0x120   :  { %v1779_v48 = vmul.f32 0.001, %v1267_v44  ;;  %2800 = vst [vmem:[#allocation5 + $0x698] sm:$0xff] %v2288_v41  ;;  %v1268_v50 = vld [vmem:[%s7866_s0 + $0x6b8] sm:$0xff]  ;;  %v245_v51 = vld [vmem:[#allocation2 + $0x6c0] sm:$0xff]  ;;  %v246_v57 = vld [vmem:[#allocation2 + $0x6c8] sm:$0xff] }
 0x121   :  { %2801 = vst [vmem:[#allocation5 + $0x6a0] sm:$0xff] %v2289_v45  ;;  %v2290_v52 = vadd.f32 %v1778_v46, %v754_v40  ;;  %v756_v54 = vmul.f32 0.999, %v244_v49  ;;  %v1780_v55 = vmul.f32 0.001, %v1268_v50  ;;  %v1269_v56 = vld [vmem:[%s7866_s0 + $0x6c0] sm:$0xff] }
 0x122   :  { %v2291_v53 = vadd.f32 %v1779_v48, %v755_v47  ;;  %v757_v58 = vmul.f32 0.999, %v245_v51  ;;  %v1781_v59 = vmul.f32 0.001, %v1269_v56  ;;  %v758_v60 = vmul.f32 0.999, %v246_v57 }
 0x123   :  { %2802 = vst [vmem:[#allocation5 + $0x6a8] sm:$0xff] %v2290_v52  ;;  %v2292_v61 = vadd.f32 %v1780_v55, %v756_v54  ;;  %v1270_v62 = vld [vmem:[%s7866_s0 + $0x6c8] sm:$0xff]  ;;  %v247_v63 = vld [vmem:[#allocation2 + $0x6d0] sm:$0xff]  ;;  %v248_v5 = vld [vmem:[#allocation2 + $0x6d8] sm:$0xff] }
 0x124   :  { %2803 = vst [vmem:[#allocation5 + $0x6b0] sm:$0xff] %v2291_v53  ;;  %v1271_v0 = vld [vmem:[%s7866_s0 + $0x6d0] sm:$0xff]  ;;  %v2293_v1 = vadd.f32 %v1781_v59, %v757_v58  ;;  %v1782_v2 = vmul.f32 0.001, %v1270_v62  ;;  %v759_v3 = vmul.f32 0.999, %v247_v63 }
 0x125   :  { %v1783_v4 = vmul.f32 0.001, %v1271_v0  ;;  %2804 = vst [vmem:[#allocation5 + $0x6b8] sm:$0xff] %v2292_v61  ;;  %v1272_v6 = vld [vmem:[%s7866_s0 + $0x6d8] sm:$0xff]  ;;  %v249_v7 = vld [vmem:[#allocation2 + $0x6e0] sm:$0xff]  ;;  %v250_v13 = vld [vmem:[#allocation2 + $0x6e8] sm:$0xff] }
 0x126   :  { %2805 = vst [vmem:[#allocation5 + $0x6c0] sm:$0xff] %v2293_v1  ;;  %v2294_v8 = vadd.f32 %v1782_v2, %v758_v60  ;;  %v760_v10 = vmul.f32 0.999, %v248_v5  ;;  %v1784_v11 = vmul.f32 0.001, %v1272_v6  ;;  %v1273_v12 = vld [vmem:[%s7866_s0 + $0x6e0] sm:$0xff] }
 0x127   :  { %v2295_v9 = vadd.f32 %v1783_v4, %v759_v3  ;;  %v761_v14 = vmul.f32 0.999, %v249_v7  ;;  %v1785_v15 = vmul.f32 0.001, %v1273_v12  ;;  %v762_v16 = vmul.f32 0.999, %v250_v13 }
 0x128   :  { %2806 = vst [vmem:[#allocation5 + $0x6c8] sm:$0xff] %v2294_v8  ;;  %v2296_v17 = vadd.f32 %v1784_v11, %v760_v10  ;;  %v1274_v18 = vld [vmem:[%s7866_s0 + $0x6e8] sm:$0xff]  ;;  %v251_v19 = vld [vmem:[#allocation2 + $0x6f0] sm:$0xff]  ;;  %v252_v25 = vld [vmem:[#allocation2 + $0x6f8] sm:$0xff] }
 0x129   :  { %2807 = vst [vmem:[#allocation5 + $0x6d0] sm:$0xff] %v2295_v9  ;;  %v1275_v20 = vld [vmem:[%s7866_s0 + $0x6f0] sm:$0xff]  ;;  %v2297_v21 = vadd.f32 %v1785_v15, %v761_v14  ;;  %v1786_v22 = vmul.f32 0.001, %v1274_v18  ;;  %v763_v23 = vmul.f32 0.999, %v251_v19 }
 0x12a   :  { %v1787_v24 = vmul.f32 0.001, %v1275_v20  ;;  %2808 = vst [vmem:[#allocation5 + $0x6d8] sm:$0xff] %v2296_v17  ;;  %v1276_v26 = vld [vmem:[%s7866_s0 + $0x6f8] sm:$0xff]  ;;  %v253_v27 = vld [vmem:[#allocation2 + $0x700] sm:$0xff]  ;;  %v254_v33 = vld [vmem:[#allocation2 + $0x708] sm:$0xff] }
 0x12b   :  { %2809 = vst [vmem:[#allocation5 + $0x6e0] sm:$0xff] %v2297_v21  ;;  %v2298_v28 = vadd.f32 %v1786_v22, %v762_v16  ;;  %v764_v30 = vmul.f32 0.999, %v252_v25  ;;  %v1788_v31 = vmul.f32 0.001, %v1276_v26  ;;  %v1277_v32 = vld [vmem:[%s7866_s0 + $0x700] sm:$0xff] }
 0x12c   :  { %v2299_v29 = vadd.f32 %v1787_v24, %v763_v23  ;;  %v765_v34 = vmul.f32 0.999, %v253_v27  ;;  %v1789_v35 = vmul.f32 0.001, %v1277_v32  ;;  %v766_v36 = vmul.f32 0.999, %v254_v33 }
 0x12d   :  { %2810 = vst [vmem:[#allocation5 + $0x6e8] sm:$0xff] %v2298_v28  ;;  %v2300_v37 = vadd.f32 %v1788_v31, %v764_v30  ;;  %v1278_v38 = vld [vmem:[%s7866_s0 + $0x708] sm:$0xff]  ;;  %v255_v39 = vld [vmem:[#allocation2 + $0x710] sm:$0xff]  ;;  %v256_v45 = vld [vmem:[#allocation2 + $0x718] sm:$0xff] }
 0x12e   :  { %2811 = vst [vmem:[#allocation5 + $0x6f0] sm:$0xff] %v2299_v29  ;;  %v1279_v40 = vld [vmem:[%s7866_s0 + $0x710] sm:$0xff]  ;;  %v2301_v41 = vadd.f32 %v1789_v35, %v765_v34  ;;  %v1790_v42 = vmul.f32 0.001, %v1278_v38  ;;  %v767_v43 = vmul.f32 0.999, %v255_v39 }
 0x12f   :  { %v1791_v44 = vmul.f32 0.001, %v1279_v40  ;;  %2812 = vst [vmem:[#allocation5 + $0x6f8] sm:$0xff] %v2300_v37  ;;  %v1280_v46 = vld [vmem:[%s7866_s0 + $0x718] sm:$0xff]  ;;  %v257_v47 = vld [vmem:[#allocation2 + $0x720] sm:$0xff]  ;;  %v258_v53 = vld [vmem:[#allocation2 + $0x728] sm:$0xff] }
 0x130   :  { %2813 = vst [vmem:[#allocation5 + $0x700] sm:$0xff] %v2301_v41  ;;  %v2302_v48 = vadd.f32 %v1790_v42, %v766_v36  ;;  %v768_v50 = vmul.f32 0.999, %v256_v45  ;;  %v1792_v51 = vmul.f32 0.001, %v1280_v46  ;;  %v1281_v52 = vld [vmem:[%s7866_s0 + $0x720] sm:$0xff] }
 0x131   :  { %v2303_v49 = vadd.f32 %v1791_v44, %v767_v43  ;;  %v769_v54 = vmul.f32 0.999, %v257_v47  ;;  %v1793_v55 = vmul.f32 0.001, %v1281_v52  ;;  %v770_v56 = vmul.f32 0.999, %v258_v53 }
 0x132   :  { %2814 = vst [vmem:[#allocation5 + $0x708] sm:$0xff] %v2302_v48  ;;  %v2304_v57 = vadd.f32 %v1792_v51, %v768_v50  ;;  %v1282_v58 = vld [vmem:[%s7866_s0 + $0x728] sm:$0xff]  ;;  %v259_v59 = vld [vmem:[#allocation2 + $0x730] sm:$0xff]  ;;  %v260_v1 = vld [vmem:[#allocation2 + $0x738] sm:$0xff] }
 0x133   :  { %2815 = vst [vmem:[#allocation5 + $0x710] sm:$0xff] %v2303_v49  ;;  %v1283_v60 = vld [vmem:[%s7866_s0 + $0x730] sm:$0xff]  ;;  %v2305_v61 = vadd.f32 %v1793_v55, %v769_v54  ;;  %v1794_v62 = vmul.f32 0.001, %v1282_v58  ;;  %v771_v63 = vmul.f32 0.999, %v259_v59 }
 0x134   :  { %v1795_v0 = vmul.f32 0.001, %v1283_v60  ;;  %2816 = vst [vmem:[#allocation5 + $0x718] sm:$0xff] %v2304_v57  ;;  %v1284_v2 = vld [vmem:[%s7866_s0 + $0x738] sm:$0xff]  ;;  %v261_v3 = vld [vmem:[#allocation2 + $0x740] sm:$0xff]  ;;  %v262_v9 = vld [vmem:[#allocation2 + $0x748] sm:$0xff] }
 0x135   :  { %2817 = vst [vmem:[#allocation5 + $0x720] sm:$0xff] %v2305_v61  ;;  %v2306_v4 = vadd.f32 %v1794_v62, %v770_v56  ;;  %v772_v6 = vmul.f32 0.999, %v260_v1  ;;  %v1796_v7 = vmul.f32 0.001, %v1284_v2  ;;  %v1285_v8 = vld [vmem:[%s7866_s0 + $0x740] sm:$0xff] }
 0x136   :  { %v2307_v5 = vadd.f32 %v1795_v0, %v771_v63  ;;  %v773_v10 = vmul.f32 0.999, %v261_v3  ;;  %v1797_v11 = vmul.f32 0.001, %v1285_v8  ;;  %v774_v12 = vmul.f32 0.999, %v262_v9 }
 0x137   :  { %2818 = vst [vmem:[#allocation5 + $0x728] sm:$0xff] %v2306_v4  ;;  %v2308_v13 = vadd.f32 %v1796_v7, %v772_v6  ;;  %v1286_v14 = vld [vmem:[%s7866_s0 + $0x748] sm:$0xff]  ;;  %v263_v15 = vld [vmem:[#allocation2 + $0x750] sm:$0xff]  ;;  %v264_v21 = vld [vmem:[#allocation2 + $0x758] sm:$0xff] }
 0x138   :  { %2819 = vst [vmem:[#allocation5 + $0x730] sm:$0xff] %v2307_v5  ;;  %v1287_v16 = vld [vmem:[%s7866_s0 + $0x750] sm:$0xff]  ;;  %v2309_v17 = vadd.f32 %v1797_v11, %v773_v10  ;;  %v1798_v18 = vmul.f32 0.001, %v1286_v14  ;;  %v775_v19 = vmul.f32 0.999, %v263_v15 }
 0x139   :  { %v1799_v20 = vmul.f32 0.001, %v1287_v16  ;;  %2820 = vst [vmem:[#allocation5 + $0x738] sm:$0xff] %v2308_v13  ;;  %v1288_v22 = vld [vmem:[%s7866_s0 + $0x758] sm:$0xff]  ;;  %v265_v23 = vld [vmem:[#allocation2 + $0x760] sm:$0xff]  ;;  %v266_v29 = vld [vmem:[#allocation2 + $0x768] sm:$0xff] }
 0x13a   :  { %2821 = vst [vmem:[#allocation5 + $0x740] sm:$0xff] %v2309_v17  ;;  %v2310_v24 = vadd.f32 %v1798_v18, %v774_v12  ;;  %v776_v26 = vmul.f32 0.999, %v264_v21  ;;  %v1800_v27 = vmul.f32 0.001, %v1288_v22  ;;  %v1289_v28 = vld [vmem:[%s7866_s0 + $0x760] sm:$0xff] }
 0x13b   :  { %v2311_v25 = vadd.f32 %v1799_v20, %v775_v19  ;;  %v777_v30 = vmul.f32 0.999, %v265_v23  ;;  %v1801_v31 = vmul.f32 0.001, %v1289_v28  ;;  %v778_v32 = vmul.f32 0.999, %v266_v29 }
 0x13c   :  { %2822 = vst [vmem:[#allocation5 + $0x748] sm:$0xff] %v2310_v24  ;;  %v2312_v33 = vadd.f32 %v1800_v27, %v776_v26  ;;  %v1290_v34 = vld [vmem:[%s7866_s0 + $0x768] sm:$0xff]  ;;  %v267_v35 = vld [vmem:[#allocation2 + $0x770] sm:$0xff]  ;;  %v268_v41 = vld [vmem:[#allocation2 + $0x778] sm:$0xff] }
 0x13d   :  { %2823 = vst [vmem:[#allocation5 + $0x750] sm:$0xff] %v2311_v25  ;;  %v1291_v36 = vld [vmem:[%s7866_s0 + $0x770] sm:$0xff]  ;;  %v2313_v37 = vadd.f32 %v1801_v31, %v777_v30  ;;  %v1802_v38 = vmul.f32 0.001, %v1290_v34  ;;  %v779_v39 = vmul.f32 0.999, %v267_v35 }
 0x13e   :  { %v1803_v40 = vmul.f32 0.001, %v1291_v36  ;;  %2824 = vst [vmem:[#allocation5 + $0x758] sm:$0xff] %v2312_v33  ;;  %v1292_v42 = vld [vmem:[%s7866_s0 + $0x778] sm:$0xff]  ;;  %v269_v43 = vld [vmem:[#allocation2 + $0x780] sm:$0xff]  ;;  %v270_v49 = vld [vmem:[#allocation2 + $0x788] sm:$0xff] }
 0x13f   :  { %2825 = vst [vmem:[#allocation5 + $0x760] sm:$0xff] %v2313_v37  ;;  %v2314_v44 = vadd.f32 %v1802_v38, %v778_v32  ;;  %v780_v46 = vmul.f32 0.999, %v268_v41  ;;  %v1804_v47 = vmul.f32 0.001, %v1292_v42  ;;  %v1293_v48 = vld [vmem:[%s7866_s0 + $0x780] sm:$0xff] }
 0x140   :  { %v2315_v45 = vadd.f32 %v1803_v40, %v779_v39  ;;  %v781_v50 = vmul.f32 0.999, %v269_v43  ;;  %v1805_v51 = vmul.f32 0.001, %v1293_v48  ;;  %v782_v52 = vmul.f32 0.999, %v270_v49 }
 0x141   :  { %2826 = vst [vmem:[#allocation5 + $0x768] sm:$0xff] %v2314_v44  ;;  %v2316_v53 = vadd.f32 %v1804_v47, %v780_v46  ;;  %v1294_v54 = vld [vmem:[%s7866_s0 + $0x788] sm:$0xff]  ;;  %v271_v55 = vld [vmem:[#allocation2 + $0x790] sm:$0xff]  ;;  %v272_v61 = vld [vmem:[#allocation2 + $0x798] sm:$0xff] }
 0x142   :  { %2827 = vst [vmem:[#allocation5 + $0x770] sm:$0xff] %v2315_v45  ;;  %v1295_v56 = vld [vmem:[%s7866_s0 + $0x790] sm:$0xff]  ;;  %v2317_v57 = vadd.f32 %v1805_v51, %v781_v50  ;;  %v1806_v58 = vmul.f32 0.001, %v1294_v54  ;;  %v783_v59 = vmul.f32 0.999, %v271_v55 }
 0x143   :  { %v1807_v60 = vmul.f32 0.001, %v1295_v56  ;;  %2828 = vst [vmem:[#allocation5 + $0x778] sm:$0xff] %v2316_v53  ;;  %v1296_v62 = vld [vmem:[%s7866_s0 + $0x798] sm:$0xff]  ;;  %v273_v63 = vld [vmem:[#allocation2 + $0x7a0] sm:$0xff]  ;;  %v274_v5 = vld [vmem:[#allocation2 + $0x7a8] sm:$0xff] }
 0x144   :  { %2829 = vst [vmem:[#allocation5 + $0x780] sm:$0xff] %v2317_v57  ;;  %v2318_v0 = vadd.f32 %v1806_v58, %v782_v52  ;;  %v784_v2 = vmul.f32 0.999, %v272_v61  ;;  %v1808_v3 = vmul.f32 0.001, %v1296_v62  ;;  %v1297_v4 = vld [vmem:[%s7866_s0 + $0x7a0] sm:$0xff] }
 0x145   :  { %v2319_v1 = vadd.f32 %v1807_v60, %v783_v59  ;;  %v785_v6 = vmul.f32 0.999, %v273_v63  ;;  %v1809_v7 = vmul.f32 0.001, %v1297_v4  ;;  %v786_v8 = vmul.f32 0.999, %v274_v5 }
 0x146   :  { %2830 = vst [vmem:[#allocation5 + $0x788] sm:$0xff] %v2318_v0  ;;  %v2320_v9 = vadd.f32 %v1808_v3, %v784_v2  ;;  %v1298_v10 = vld [vmem:[%s7866_s0 + $0x7a8] sm:$0xff]  ;;  %v275_v11 = vld [vmem:[#allocation2 + $0x7b0] sm:$0xff]  ;;  %v276_v17 = vld [vmem:[#allocation2 + $0x7b8] sm:$0xff] }
 0x147   :  { %2831 = vst [vmem:[#allocation5 + $0x790] sm:$0xff] %v2319_v1  ;;  %v1299_v12 = vld [vmem:[%s7866_s0 + $0x7b0] sm:$0xff]  ;;  %v2321_v13 = vadd.f32 %v1809_v7, %v785_v6  ;;  %v1810_v14 = vmul.f32 0.001, %v1298_v10  ;;  %v787_v15 = vmul.f32 0.999, %v275_v11 }
 0x148   :  { %v1811_v16 = vmul.f32 0.001, %v1299_v12  ;;  %2832 = vst [vmem:[#allocation5 + $0x798] sm:$0xff] %v2320_v9  ;;  %v1300_v18 = vld [vmem:[%s7866_s0 + $0x7b8] sm:$0xff]  ;;  %v277_v19 = vld [vmem:[#allocation2 + $0x7c0] sm:$0xff]  ;;  %v278_v25 = vld [vmem:[#allocation2 + $0x7c8] sm:$0xff] }
 0x149   :  { %2833 = vst [vmem:[#allocation5 + $0x7a0] sm:$0xff] %v2321_v13  ;;  %v2322_v20 = vadd.f32 %v1810_v14, %v786_v8  ;;  %v788_v22 = vmul.f32 0.999, %v276_v17  ;;  %v1812_v23 = vmul.f32 0.001, %v1300_v18  ;;  %v1301_v24 = vld [vmem:[%s7866_s0 + $0x7c0] sm:$0xff] }
 0x14a   :  { %v2323_v21 = vadd.f32 %v1811_v16, %v787_v15  ;;  %v789_v26 = vmul.f32 0.999, %v277_v19  ;;  %v1813_v27 = vmul.f32 0.001, %v1301_v24  ;;  %v790_v28 = vmul.f32 0.999, %v278_v25 }
 0x14b   :  { %2834 = vst [vmem:[#allocation5 + $0x7a8] sm:$0xff] %v2322_v20  ;;  %v2324_v29 = vadd.f32 %v1812_v23, %v788_v22  ;;  %v1302_v30 = vld [vmem:[%s7866_s0 + $0x7c8] sm:$0xff]  ;;  %v279_v31 = vld [vmem:[#allocation2 + $0x7d0] sm:$0xff]  ;;  %v280_v37 = vld [vmem:[#allocation2 + $0x7d8] sm:$0xff] }
 0x14c   :  { %2835 = vst [vmem:[#allocation5 + $0x7b0] sm:$0xff] %v2323_v21  ;;  %v1303_v32 = vld [vmem:[%s7866_s0 + $0x7d0] sm:$0xff]  ;;  %v2325_v33 = vadd.f32 %v1813_v27, %v789_v26  ;;  %v1814_v34 = vmul.f32 0.001, %v1302_v30  ;;  %v791_v35 = vmul.f32 0.999, %v279_v31 }
 0x14d   :  { %v1815_v36 = vmul.f32 0.001, %v1303_v32  ;;  %2836 = vst [vmem:[#allocation5 + $0x7b8] sm:$0xff] %v2324_v29  ;;  %v1304_v38 = vld [vmem:[%s7866_s0 + $0x7d8] sm:$0xff]  ;;  %v281_v39 = vld [vmem:[#allocation2 + $0x7e0] sm:$0xff]  ;;  %v282_v45 = vld [vmem:[#allocation2 + $0x7e8] sm:$0xff] }
 0x14e   :  { %2837 = vst [vmem:[#allocation5 + $0x7c0] sm:$0xff] %v2325_v33  ;;  %v2326_v40 = vadd.f32 %v1814_v34, %v790_v28  ;;  %v792_v42 = vmul.f32 0.999, %v280_v37  ;;  %v1816_v43 = vmul.f32 0.001, %v1304_v38  ;;  %v1305_v44 = vld [vmem:[%s7866_s0 + $0x7e0] sm:$0xff] }
 0x14f   :  { %v2327_v41 = vadd.f32 %v1815_v36, %v791_v35  ;;  %v793_v46 = vmul.f32 0.999, %v281_v39  ;;  %v1817_v47 = vmul.f32 0.001, %v1305_v44  ;;  %v794_v48 = vmul.f32 0.999, %v282_v45 }
 0x150   :  { %2838 = vst [vmem:[#allocation5 + $0x7c8] sm:$0xff] %v2326_v40  ;;  %v2328_v49 = vadd.f32 %v1816_v43, %v792_v42  ;;  %v1306_v50 = vld [vmem:[%s7866_s0 + $0x7e8] sm:$0xff]  ;;  %v283_v51 = vld [vmem:[#allocation2 + $0x7f0] sm:$0xff]  ;;  %v284_v57 = vld [vmem:[#allocation2 + $0x7f8] sm:$0xff] }
 0x151   :  { %2839 = vst [vmem:[#allocation5 + $0x7d0] sm:$0xff] %v2327_v41  ;;  %v1307_v52 = vld [vmem:[%s7866_s0 + $0x7f0] sm:$0xff]  ;;  %v2329_v53 = vadd.f32 %v1817_v47, %v793_v46  ;;  %v1818_v54 = vmul.f32 0.001, %v1306_v50  ;;  %v795_v55 = vmul.f32 0.999, %v283_v51 }
 0x152   :  { %v1819_v56 = vmul.f32 0.001, %v1307_v52  ;;  %2840 = vst [vmem:[#allocation5 + $0x7d8] sm:$0xff] %v2328_v49  ;;  %v1308_v58 = vld [vmem:[%s7866_s0 + $0x7f8] sm:$0xff]  ;;  %v285_v59 = vld [vmem:[#allocation2 + $0x800] sm:$0xff]  ;;  %v286_v1 = vld [vmem:[#allocation2 + $0x808] sm:$0xff] }
 0x153   :  { %2841 = vst [vmem:[#allocation5 + $0x7e0] sm:$0xff] %v2329_v53  ;;  %v2330_v60 = vadd.f32 %v1818_v54, %v794_v48  ;;  %v796_v62 = vmul.f32 0.999, %v284_v57  ;;  %v1820_v63 = vmul.f32 0.001, %v1308_v58  ;;  %v1309_v0 = vld [vmem:[%s7866_s0 + $0x800] sm:$0xff] }
 0x154   :  { %v2331_v61 = vadd.f32 %v1819_v56, %v795_v55  ;;  %v797_v2 = vmul.f32 0.999, %v285_v59  ;;  %v1821_v3 = vmul.f32 0.001, %v1309_v0  ;;  %v798_v4 = vmul.f32 0.999, %v286_v1 }
 0x155   :  { %2842 = vst [vmem:[#allocation5 + $0x7e8] sm:$0xff] %v2330_v60  ;;  %v2332_v5 = vadd.f32 %v1820_v63, %v796_v62  ;;  %v1310_v6 = vld [vmem:[%s7866_s0 + $0x808] sm:$0xff]  ;;  %v287_v7 = vld [vmem:[#allocation2 + $0x810] sm:$0xff]  ;;  %v288_v13 = vld [vmem:[#allocation2 + $0x818] sm:$0xff] }
 0x156   :  { %2843 = vst [vmem:[#allocation5 + $0x7f0] sm:$0xff] %v2331_v61  ;;  %v1311_v8 = vld [vmem:[%s7866_s0 + $0x810] sm:$0xff]  ;;  %v2333_v9 = vadd.f32 %v1821_v3, %v797_v2  ;;  %v1822_v10 = vmul.f32 0.001, %v1310_v6  ;;  %v799_v11 = vmul.f32 0.999, %v287_v7 }
 0x157   :  { %v1823_v12 = vmul.f32 0.001, %v1311_v8  ;;  %2844 = vst [vmem:[#allocation5 + $0x7f8] sm:$0xff] %v2332_v5  ;;  %v1312_v14 = vld [vmem:[%s7866_s0 + $0x818] sm:$0xff]  ;;  %v289_v15 = vld [vmem:[#allocation2 + $0x820] sm:$0xff]  ;;  %v290_v21 = vld [vmem:[#allocation2 + $0x828] sm:$0xff] }
 0x158   :  { %2845 = vst [vmem:[#allocation5 + $0x800] sm:$0xff] %v2333_v9  ;;  %v2334_v16 = vadd.f32 %v1822_v10, %v798_v4  ;;  %v800_v18 = vmul.f32 0.999, %v288_v13  ;;  %v1824_v19 = vmul.f32 0.001, %v1312_v14  ;;  %v1313_v20 = vld [vmem:[%s7866_s0 + $0x820] sm:$0xff] }
 0x159   :  { %v2335_v17 = vadd.f32 %v1823_v12, %v799_v11  ;;  %v801_v22 = vmul.f32 0.999, %v289_v15  ;;  %v1825_v23 = vmul.f32 0.001, %v1313_v20  ;;  %v802_v24 = vmul.f32 0.999, %v290_v21 }
 0x15a   :  { %2846 = vst [vmem:[#allocation5 + $0x808] sm:$0xff] %v2334_v16  ;;  %v2336_v25 = vadd.f32 %v1824_v19, %v800_v18  ;;  %v1314_v26 = vld [vmem:[%s7866_s0 + $0x828] sm:$0xff]  ;;  %v291_v27 = vld [vmem:[#allocation2 + $0x830] sm:$0xff]  ;;  %v292_v33 = vld [vmem:[#allocation2 + $0x838] sm:$0xff] }
 0x15b   :  { %2847 = vst [vmem:[#allocation5 + $0x810] sm:$0xff] %v2335_v17  ;;  %v1315_v28 = vld [vmem:[%s7866_s0 + $0x830] sm:$0xff]  ;;  %v2337_v29 = vadd.f32 %v1825_v23, %v801_v22  ;;  %v1826_v30 = vmul.f32 0.001, %v1314_v26  ;;  %v803_v31 = vmul.f32 0.999, %v291_v27 }
 0x15c   :  { %v1827_v32 = vmul.f32 0.001, %v1315_v28  ;;  %2848 = vst [vmem:[#allocation5 + $0x818] sm:$0xff] %v2336_v25  ;;  %v1316_v34 = vld [vmem:[%s7866_s0 + $0x838] sm:$0xff]  ;;  %v293_v35 = vld [vmem:[#allocation2 + $0x840] sm:$0xff]  ;;  %v294_v41 = vld [vmem:[#allocation2 + $0x848] sm:$0xff] }
 0x15d   :  { %2849 = vst [vmem:[#allocation5 + $0x820] sm:$0xff] %v2337_v29  ;;  %v2338_v36 = vadd.f32 %v1826_v30, %v802_v24  ;;  %v804_v38 = vmul.f32 0.999, %v292_v33  ;;  %v1828_v39 = vmul.f32 0.001, %v1316_v34  ;;  %v1317_v40 = vld [vmem:[%s7866_s0 + $0x840] sm:$0xff] }
 0x15e   :  { %v2339_v37 = vadd.f32 %v1827_v32, %v803_v31  ;;  %v805_v42 = vmul.f32 0.999, %v293_v35  ;;  %v1829_v43 = vmul.f32 0.001, %v1317_v40  ;;  %v806_v44 = vmul.f32 0.999, %v294_v41 }
 0x15f   :  { %2850 = vst [vmem:[#allocation5 + $0x828] sm:$0xff] %v2338_v36  ;;  %v2340_v45 = vadd.f32 %v1828_v39, %v804_v38  ;;  %v1318_v46 = vld [vmem:[%s7866_s0 + $0x848] sm:$0xff]  ;;  %v295_v47 = vld [vmem:[#allocation2 + $0x850] sm:$0xff]  ;;  %v296_v53 = vld [vmem:[#allocation2 + $0x858] sm:$0xff] }
 0x160   :  { %2851 = vst [vmem:[#allocation5 + $0x830] sm:$0xff] %v2339_v37  ;;  %v1319_v48 = vld [vmem:[%s7866_s0 + $0x850] sm:$0xff]  ;;  %v2341_v49 = vadd.f32 %v1829_v43, %v805_v42  ;;  %v1830_v50 = vmul.f32 0.001, %v1318_v46  ;;  %v807_v51 = vmul.f32 0.999, %v295_v47 }
 0x161   :  { %v1831_v52 = vmul.f32 0.001, %v1319_v48  ;;  %2852 = vst [vmem:[#allocation5 + $0x838] sm:$0xff] %v2340_v45  ;;  %v1320_v54 = vld [vmem:[%s7866_s0 + $0x858] sm:$0xff]  ;;  %v297_v55 = vld [vmem:[#allocation2 + $0x860] sm:$0xff]  ;;  %v298_v61 = vld [vmem:[#allocation2 + $0x868] sm:$0xff] }
 0x162   :  { %2853 = vst [vmem:[#allocation5 + $0x840] sm:$0xff] %v2341_v49  ;;  %v2342_v56 = vadd.f32 %v1830_v50, %v806_v44  ;;  %v808_v58 = vmul.f32 0.999, %v296_v53  ;;  %v1832_v59 = vmul.f32 0.001, %v1320_v54  ;;  %v1321_v60 = vld [vmem:[%s7866_s0 + $0x860] sm:$0xff] }
 0x163   :  { %v2343_v57 = vadd.f32 %v1831_v52, %v807_v51  ;;  %v809_v62 = vmul.f32 0.999, %v297_v55  ;;  %v1833_v63 = vmul.f32 0.001, %v1321_v60  ;;  %v810_v0 = vmul.f32 0.999, %v298_v61 }
 0x164   :  { %2854 = vst [vmem:[#allocation5 + $0x848] sm:$0xff] %v2342_v56  ;;  %v2344_v1 = vadd.f32 %v1832_v59, %v808_v58  ;;  %v1322_v2 = vld [vmem:[%s7866_s0 + $0x868] sm:$0xff]  ;;  %v299_v3 = vld [vmem:[#allocation2 + $0x870] sm:$0xff]  ;;  %v300_v9 = vld [vmem:[#allocation2 + $0x878] sm:$0xff] }
 0x165   :  { %2855 = vst [vmem:[#allocation5 + $0x850] sm:$0xff] %v2343_v57  ;;  %v1323_v4 = vld [vmem:[%s7866_s0 + $0x870] sm:$0xff]  ;;  %v2345_v5 = vadd.f32 %v1833_v63, %v809_v62  ;;  %v1834_v6 = vmul.f32 0.001, %v1322_v2  ;;  %v811_v7 = vmul.f32 0.999, %v299_v3 }
 0x166   :  { %v1835_v8 = vmul.f32 0.001, %v1323_v4  ;;  %2856 = vst [vmem:[#allocation5 + $0x858] sm:$0xff] %v2344_v1  ;;  %v1324_v10 = vld [vmem:[%s7866_s0 + $0x878] sm:$0xff]  ;;  %v301_v11 = vld [vmem:[#allocation2 + $0x880] sm:$0xff]  ;;  %v302_v17 = vld [vmem:[#allocation2 + $0x888] sm:$0xff] }
 0x167   :  { %2857 = vst [vmem:[#allocation5 + $0x860] sm:$0xff] %v2345_v5  ;;  %v2346_v12 = vadd.f32 %v1834_v6, %v810_v0  ;;  %v812_v14 = vmul.f32 0.999, %v300_v9  ;;  %v1836_v15 = vmul.f32 0.001, %v1324_v10  ;;  %v1325_v16 = vld [vmem:[%s7866_s0 + $0x880] sm:$0xff] }
 0x168   :  { %v2347_v13 = vadd.f32 %v1835_v8, %v811_v7  ;;  %v813_v18 = vmul.f32 0.999, %v301_v11  ;;  %v1837_v19 = vmul.f32 0.001, %v1325_v16  ;;  %v814_v20 = vmul.f32 0.999, %v302_v17 }
 0x169   :  { %2858 = vst [vmem:[#allocation5 + $0x868] sm:$0xff] %v2346_v12  ;;  %v2348_v21 = vadd.f32 %v1836_v15, %v812_v14  ;;  %v1326_v22 = vld [vmem:[%s7866_s0 + $0x888] sm:$0xff]  ;;  %v303_v23 = vld [vmem:[#allocation2 + $0x890] sm:$0xff]  ;;  %v304_v29 = vld [vmem:[#allocation2 + $0x898] sm:$0xff] }
 0x16a   :  { %2859 = vst [vmem:[#allocation5 + $0x870] sm:$0xff] %v2347_v13  ;;  %v1327_v24 = vld [vmem:[%s7866_s0 + $0x890] sm:$0xff]  ;;  %v2349_v25 = vadd.f32 %v1837_v19, %v813_v18  ;;  %v1838_v26 = vmul.f32 0.001, %v1326_v22  ;;  %v815_v27 = vmul.f32 0.999, %v303_v23 }
 0x16b   :  { %v1839_v28 = vmul.f32 0.001, %v1327_v24  ;;  %2860 = vst [vmem:[#allocation5 + $0x878] sm:$0xff] %v2348_v21  ;;  %v1328_v30 = vld [vmem:[%s7866_s0 + $0x898] sm:$0xff]  ;;  %v305_v31 = vld [vmem:[#allocation2 + $0x8a0] sm:$0xff]  ;;  %v306_v37 = vld [vmem:[#allocation2 + $0x8a8] sm:$0xff] }
 0x16c   :  { %2861 = vst [vmem:[#allocation5 + $0x880] sm:$0xff] %v2349_v25  ;;  %v2350_v32 = vadd.f32 %v1838_v26, %v814_v20  ;;  %v816_v34 = vmul.f32 0.999, %v304_v29  ;;  %v1840_v35 = vmul.f32 0.001, %v1328_v30  ;;  %v1329_v36 = vld [vmem:[%s7866_s0 + $0x8a0] sm:$0xff] }
 0x16d   :  { %v2351_v33 = vadd.f32 %v1839_v28, %v815_v27  ;;  %v817_v38 = vmul.f32 0.999, %v305_v31  ;;  %v1841_v39 = vmul.f32 0.001, %v1329_v36  ;;  %v818_v40 = vmul.f32 0.999, %v306_v37 }
 0x16e   :  { %2862 = vst [vmem:[#allocation5 + $0x888] sm:$0xff] %v2350_v32  ;;  %v2352_v41 = vadd.f32 %v1840_v35, %v816_v34  ;;  %v1330_v42 = vld [vmem:[%s7866_s0 + $0x8a8] sm:$0xff]  ;;  %v307_v43 = vld [vmem:[#allocation2 + $0x8b0] sm:$0xff]  ;;  %v308_v49 = vld [vmem:[#allocation2 + $0x8b8] sm:$0xff] }
 0x16f   :  { %2863 = vst [vmem:[#allocation5 + $0x890] sm:$0xff] %v2351_v33  ;;  %v1331_v44 = vld [vmem:[%s7866_s0 + $0x8b0] sm:$0xff]  ;;  %v2353_v45 = vadd.f32 %v1841_v39, %v817_v38  ;;  %v1842_v46 = vmul.f32 0.001, %v1330_v42  ;;  %v819_v47 = vmul.f32 0.999, %v307_v43 }
 0x170   :  { %v1843_v48 = vmul.f32 0.001, %v1331_v44  ;;  %2864 = vst [vmem:[#allocation5 + $0x898] sm:$0xff] %v2352_v41  ;;  %v1332_v50 = vld [vmem:[%s7866_s0 + $0x8b8] sm:$0xff]  ;;  %v309_v51 = vld [vmem:[#allocation2 + $0x8c0] sm:$0xff]  ;;  %v310_v57 = vld [vmem:[#allocation2 + $0x8c8] sm:$0xff] }
 0x171   :  { %2865 = vst [vmem:[#allocation5 + $0x8a0] sm:$0xff] %v2353_v45  ;;  %v2354_v52 = vadd.f32 %v1842_v46, %v818_v40  ;;  %v820_v54 = vmul.f32 0.999, %v308_v49  ;;  %v1844_v55 = vmul.f32 0.001, %v1332_v50  ;;  %v1333_v56 = vld [vmem:[%s7866_s0 + $0x8c0] sm:$0xff] }
 0x172   :  { %v2355_v53 = vadd.f32 %v1843_v48, %v819_v47  ;;  %v821_v58 = vmul.f32 0.999, %v309_v51  ;;  %v1845_v59 = vmul.f32 0.001, %v1333_v56  ;;  %v822_v60 = vmul.f32 0.999, %v310_v57 }
 0x173   :  { %2866 = vst [vmem:[#allocation5 + $0x8a8] sm:$0xff] %v2354_v52  ;;  %v2356_v61 = vadd.f32 %v1844_v55, %v820_v54  ;;  %v1334_v62 = vld [vmem:[%s7866_s0 + $0x8c8] sm:$0xff]  ;;  %v311_v63 = vld [vmem:[#allocation2 + $0x8d0] sm:$0xff]  ;;  %v312_v5 = vld [vmem:[#allocation2 + $0x8d8] sm:$0xff] }
 0x174   :  { %2867 = vst [vmem:[#allocation5 + $0x8b0] sm:$0xff] %v2355_v53  ;;  %v1335_v0 = vld [vmem:[%s7866_s0 + $0x8d0] sm:$0xff]  ;;  %v2357_v1 = vadd.f32 %v1845_v59, %v821_v58  ;;  %v1846_v2 = vmul.f32 0.001, %v1334_v62  ;;  %v823_v3 = vmul.f32 0.999, %v311_v63 }
 0x175   :  { %v1847_v4 = vmul.f32 0.001, %v1335_v0  ;;  %2868 = vst [vmem:[#allocation5 + $0x8b8] sm:$0xff] %v2356_v61  ;;  %v1336_v6 = vld [vmem:[%s7866_s0 + $0x8d8] sm:$0xff]  ;;  %v313_v7 = vld [vmem:[#allocation2 + $0x8e0] sm:$0xff]  ;;  %v314_v13 = vld [vmem:[#allocation2 + $0x8e8] sm:$0xff] }
 0x176   :  { %2869 = vst [vmem:[#allocation5 + $0x8c0] sm:$0xff] %v2357_v1  ;;  %v2358_v8 = vadd.f32 %v1846_v2, %v822_v60  ;;  %v824_v10 = vmul.f32 0.999, %v312_v5  ;;  %v1848_v11 = vmul.f32 0.001, %v1336_v6  ;;  %v1337_v12 = vld [vmem:[%s7866_s0 + $0x8e0] sm:$0xff] }
 0x177   :  { %v2359_v9 = vadd.f32 %v1847_v4, %v823_v3  ;;  %v825_v14 = vmul.f32 0.999, %v313_v7  ;;  %v1849_v15 = vmul.f32 0.001, %v1337_v12  ;;  %v826_v16 = vmul.f32 0.999, %v314_v13 }
 0x178   :  { %2870 = vst [vmem:[#allocation5 + $0x8c8] sm:$0xff] %v2358_v8  ;;  %v2360_v17 = vadd.f32 %v1848_v11, %v824_v10  ;;  %v1338_v18 = vld [vmem:[%s7866_s0 + $0x8e8] sm:$0xff]  ;;  %v315_v19 = vld [vmem:[#allocation2 + $0x8f0] sm:$0xff]  ;;  %v316_v25 = vld [vmem:[#allocation2 + $0x8f8] sm:$0xff] }
 0x179   :  { %2871 = vst [vmem:[#allocation5 + $0x8d0] sm:$0xff] %v2359_v9  ;;  %v1339_v20 = vld [vmem:[%s7866_s0 + $0x8f0] sm:$0xff]  ;;  %v2361_v21 = vadd.f32 %v1849_v15, %v825_v14  ;;  %v1850_v22 = vmul.f32 0.001, %v1338_v18  ;;  %v827_v23 = vmul.f32 0.999, %v315_v19 }
 0x17a   :  { %v1851_v24 = vmul.f32 0.001, %v1339_v20  ;;  %2872 = vst [vmem:[#allocation5 + $0x8d8] sm:$0xff] %v2360_v17  ;;  %v1340_v26 = vld [vmem:[%s7866_s0 + $0x8f8] sm:$0xff]  ;;  %v317_v27 = vld [vmem:[#allocation2 + $0x900] sm:$0xff]  ;;  %v318_v33 = vld [vmem:[#allocation2 + $0x908] sm:$0xff] }
 0x17b   :  { %2873 = vst [vmem:[#allocation5 + $0x8e0] sm:$0xff] %v2361_v21  ;;  %v2362_v28 = vadd.f32 %v1850_v22, %v826_v16  ;;  %v828_v30 = vmul.f32 0.999, %v316_v25  ;;  %v1852_v31 = vmul.f32 0.001, %v1340_v26  ;;  %v1341_v32 = vld [vmem:[%s7866_s0 + $0x900] sm:$0xff] }
 0x17c   :  { %v2363_v29 = vadd.f32 %v1851_v24, %v827_v23  ;;  %v829_v34 = vmul.f32 0.999, %v317_v27  ;;  %v1853_v35 = vmul.f32 0.001, %v1341_v32  ;;  %v830_v36 = vmul.f32 0.999, %v318_v33 }
 0x17d   :  { %2874 = vst [vmem:[#allocation5 + $0x8e8] sm:$0xff] %v2362_v28  ;;  %v2364_v37 = vadd.f32 %v1852_v31, %v828_v30  ;;  %v1342_v38 = vld [vmem:[%s7866_s0 + $0x908] sm:$0xff]  ;;  %v319_v39 = vld [vmem:[#allocation2 + $0x910] sm:$0xff]  ;;  %v320_v45 = vld [vmem:[#allocation2 + $0x918] sm:$0xff] }
 0x17e   :  { %2875 = vst [vmem:[#allocation5 + $0x8f0] sm:$0xff] %v2363_v29  ;;  %v1343_v40 = vld [vmem:[%s7866_s0 + $0x910] sm:$0xff]  ;;  %v2365_v41 = vadd.f32 %v1853_v35, %v829_v34  ;;  %v1854_v42 = vmul.f32 0.001, %v1342_v38  ;;  %v831_v43 = vmul.f32 0.999, %v319_v39 }
 0x17f   :  { %v1855_v44 = vmul.f32 0.001, %v1343_v40  ;;  %2876 = vst [vmem:[#allocation5 + $0x8f8] sm:$0xff] %v2364_v37  ;;  %v1344_v46 = vld [vmem:[%s7866_s0 + $0x918] sm:$0xff]  ;;  %v321_v47 = vld [vmem:[#allocation2 + $0x920] sm:$0xff]  ;;  %v322_v53 = vld [vmem:[#allocation2 + $0x928] sm:$0xff] }
 0x180   :  { %2877 = vst [vmem:[#allocation5 + $0x900] sm:$0xff] %v2365_v41  ;;  %v2366_v48 = vadd.f32 %v1854_v42, %v830_v36  ;;  %v832_v50 = vmul.f32 0.999, %v320_v45  ;;  %v1856_v51 = vmul.f32 0.001, %v1344_v46  ;;  %v1345_v52 = vld [vmem:[%s7866_s0 + $0x920] sm:$0xff] }
 0x181   :  { %v2367_v49 = vadd.f32 %v1855_v44, %v831_v43  ;;  %v833_v54 = vmul.f32 0.999, %v321_v47  ;;  %v1857_v55 = vmul.f32 0.001, %v1345_v52  ;;  %v834_v56 = vmul.f32 0.999, %v322_v53 }
 0x182   :  { %2878 = vst [vmem:[#allocation5 + $0x908] sm:$0xff] %v2366_v48  ;;  %v2368_v57 = vadd.f32 %v1856_v51, %v832_v50  ;;  %v1346_v58 = vld [vmem:[%s7866_s0 + $0x928] sm:$0xff]  ;;  %v323_v59 = vld [vmem:[#allocation2 + $0x930] sm:$0xff]  ;;  %v324_v1 = vld [vmem:[#allocation2 + $0x938] sm:$0xff] }
 0x183   :  { %2879 = vst [vmem:[#allocation5 + $0x910] sm:$0xff] %v2367_v49  ;;  %v1347_v60 = vld [vmem:[%s7866_s0 + $0x930] sm:$0xff]  ;;  %v2369_v61 = vadd.f32 %v1857_v55, %v833_v54  ;;  %v1858_v62 = vmul.f32 0.001, %v1346_v58  ;;  %v835_v63 = vmul.f32 0.999, %v323_v59 }
 0x184   :  { %v1859_v0 = vmul.f32 0.001, %v1347_v60  ;;  %2880 = vst [vmem:[#allocation5 + $0x918] sm:$0xff] %v2368_v57  ;;  %v1348_v2 = vld [vmem:[%s7866_s0 + $0x938] sm:$0xff]  ;;  %v325_v3 = vld [vmem:[#allocation2 + $0x940] sm:$0xff]  ;;  %v326_v9 = vld [vmem:[#allocation2 + $0x948] sm:$0xff] }
 0x185   :  { %2881 = vst [vmem:[#allocation5 + $0x920] sm:$0xff] %v2369_v61  ;;  %v2370_v4 = vadd.f32 %v1858_v62, %v834_v56  ;;  %v836_v6 = vmul.f32 0.999, %v324_v1  ;;  %v1860_v7 = vmul.f32 0.001, %v1348_v2  ;;  %v1349_v8 = vld [vmem:[%s7866_s0 + $0x940] sm:$0xff] }
 0x186   :  { %v2371_v5 = vadd.f32 %v1859_v0, %v835_v63  ;;  %v837_v10 = vmul.f32 0.999, %v325_v3  ;;  %v1861_v11 = vmul.f32 0.001, %v1349_v8  ;;  %v838_v12 = vmul.f32 0.999, %v326_v9 }
 0x187   :  { %2882 = vst [vmem:[#allocation5 + $0x928] sm:$0xff] %v2370_v4  ;;  %v2372_v13 = vadd.f32 %v1860_v7, %v836_v6  ;;  %v1350_v14 = vld [vmem:[%s7866_s0 + $0x948] sm:$0xff]  ;;  %v327_v15 = vld [vmem:[#allocation2 + $0x950] sm:$0xff]  ;;  %v328_v21 = vld [vmem:[#allocation2 + $0x958] sm:$0xff] }
 0x188   :  { %2883 = vst [vmem:[#allocation5 + $0x930] sm:$0xff] %v2371_v5  ;;  %v1351_v16 = vld [vmem:[%s7866_s0 + $0x950] sm:$0xff]  ;;  %v2373_v17 = vadd.f32 %v1861_v11, %v837_v10  ;;  %v1862_v18 = vmul.f32 0.001, %v1350_v14  ;;  %v839_v19 = vmul.f32 0.999, %v327_v15 }
 0x189   :  { %v1863_v20 = vmul.f32 0.001, %v1351_v16  ;;  %2884 = vst [vmem:[#allocation5 + $0x938] sm:$0xff] %v2372_v13  ;;  %v1352_v22 = vld [vmem:[%s7866_s0 + $0x958] sm:$0xff]  ;;  %v329_v23 = vld [vmem:[#allocation2 + $0x960] sm:$0xff]  ;;  %v330_v29 = vld [vmem:[#allocation2 + $0x968] sm:$0xff] }
 0x18a   :  { %2885 = vst [vmem:[#allocation5 + $0x940] sm:$0xff] %v2373_v17  ;;  %v2374_v24 = vadd.f32 %v1862_v18, %v838_v12  ;;  %v840_v26 = vmul.f32 0.999, %v328_v21  ;;  %v1864_v27 = vmul.f32 0.001, %v1352_v22  ;;  %v1353_v28 = vld [vmem:[%s7866_s0 + $0x960] sm:$0xff] }
 0x18b   :  { %v2375_v25 = vadd.f32 %v1863_v20, %v839_v19  ;;  %v841_v30 = vmul.f32 0.999, %v329_v23  ;;  %v1865_v31 = vmul.f32 0.001, %v1353_v28  ;;  %v842_v32 = vmul.f32 0.999, %v330_v29 }
 0x18c   :  { %2886 = vst [vmem:[#allocation5 + $0x948] sm:$0xff] %v2374_v24  ;;  %v2376_v33 = vadd.f32 %v1864_v27, %v840_v26  ;;  %v1354_v34 = vld [vmem:[%s7866_s0 + $0x968] sm:$0xff]  ;;  %v331_v35 = vld [vmem:[#allocation2 + $0x970] sm:$0xff]  ;;  %v332_v41 = vld [vmem:[#allocation2 + $0x978] sm:$0xff] }
 0x18d   :  { %2887 = vst [vmem:[#allocation5 + $0x950] sm:$0xff] %v2375_v25  ;;  %v1355_v36 = vld [vmem:[%s7866_s0 + $0x970] sm:$0xff]  ;;  %v2377_v37 = vadd.f32 %v1865_v31, %v841_v30  ;;  %v1866_v38 = vmul.f32 0.001, %v1354_v34  ;;  %v843_v39 = vmul.f32 0.999, %v331_v35 }
 0x18e   :  { %v1867_v40 = vmul.f32 0.001, %v1355_v36  ;;  %2888 = vst [vmem:[#allocation5 + $0x958] sm:$0xff] %v2376_v33  ;;  %v1356_v42 = vld [vmem:[%s7866_s0 + $0x978] sm:$0xff]  ;;  %v333_v43 = vld [vmem:[#allocation2 + $0x980] sm:$0xff]  ;;  %v334_v49 = vld [vmem:[#allocation2 + $0x988] sm:$0xff] }
 0x18f   :  { %2889 = vst [vmem:[#allocation5 + $0x960] sm:$0xff] %v2377_v37  ;;  %v2378_v44 = vadd.f32 %v1866_v38, %v842_v32  ;;  %v844_v46 = vmul.f32 0.999, %v332_v41  ;;  %v1868_v47 = vmul.f32 0.001, %v1356_v42  ;;  %v1357_v48 = vld [vmem:[%s7866_s0 + $0x980] sm:$0xff] }
 0x190   :  { %v2379_v45 = vadd.f32 %v1867_v40, %v843_v39  ;;  %v845_v50 = vmul.f32 0.999, %v333_v43  ;;  %v1869_v51 = vmul.f32 0.001, %v1357_v48  ;;  %v846_v52 = vmul.f32 0.999, %v334_v49 }
 0x191   :  { %2890 = vst [vmem:[#allocation5 + $0x968] sm:$0xff] %v2378_v44  ;;  %v2380_v53 = vadd.f32 %v1868_v47, %v844_v46  ;;  %v1358_v54 = vld [vmem:[%s7866_s0 + $0x988] sm:$0xff]  ;;  %v335_v55 = vld [vmem:[#allocation2 + $0x990] sm:$0xff]  ;;  %v336_v61 = vld [vmem:[#allocation2 + $0x998] sm:$0xff] }
 0x192   :  { %2891 = vst [vmem:[#allocation5 + $0x970] sm:$0xff] %v2379_v45  ;;  %v1359_v56 = vld [vmem:[%s7866_s0 + $0x990] sm:$0xff]  ;;  %v2381_v57 = vadd.f32 %v1869_v51, %v845_v50  ;;  %v1870_v58 = vmul.f32 0.001, %v1358_v54  ;;  %v847_v59 = vmul.f32 0.999, %v335_v55 }
 0x193   :  { %v1871_v60 = vmul.f32 0.001, %v1359_v56  ;;  %2892 = vst [vmem:[#allocation5 + $0x978] sm:$0xff] %v2380_v53  ;;  %v1360_v62 = vld [vmem:[%s7866_s0 + $0x998] sm:$0xff]  ;;  %v337_v63 = vld [vmem:[#allocation2 + $0x9a0] sm:$0xff]  ;;  %v338_v5 = vld [vmem:[#allocation2 + $0x9a8] sm:$0xff] }
 0x194   :  { %2893 = vst [vmem:[#allocation5 + $0x980] sm:$0xff] %v2381_v57  ;;  %v2382_v0 = vadd.f32 %v1870_v58, %v846_v52  ;;  %v848_v2 = vmul.f32 0.999, %v336_v61  ;;  %v1872_v3 = vmul.f32 0.001, %v1360_v62  ;;  %v1361_v4 = vld [vmem:[%s7866_s0 + $0x9a0] sm:$0xff] }
 0x195   :  { %v2383_v1 = vadd.f32 %v1871_v60, %v847_v59  ;;  %v849_v6 = vmul.f32 0.999, %v337_v63  ;;  %v1873_v7 = vmul.f32 0.001, %v1361_v4  ;;  %v850_v8 = vmul.f32 0.999, %v338_v5 }
 0x196   :  { %2894 = vst [vmem:[#allocation5 + $0x988] sm:$0xff] %v2382_v0  ;;  %v2384_v9 = vadd.f32 %v1872_v3, %v848_v2  ;;  %v1362_v10 = vld [vmem:[%s7866_s0 + $0x9a8] sm:$0xff]  ;;  %v339_v11 = vld [vmem:[#allocation2 + $0x9b0] sm:$0xff]  ;;  %v340_v17 = vld [vmem:[#allocation2 + $0x9b8] sm:$0xff] }
 0x197   :  { %2895 = vst [vmem:[#allocation5 + $0x990] sm:$0xff] %v2383_v1  ;;  %v1363_v12 = vld [vmem:[%s7866_s0 + $0x9b0] sm:$0xff]  ;;  %v2385_v13 = vadd.f32 %v1873_v7, %v849_v6  ;;  %v1874_v14 = vmul.f32 0.001, %v1362_v10  ;;  %v851_v15 = vmul.f32 0.999, %v339_v11 }
 0x198   :  { %v1875_v16 = vmul.f32 0.001, %v1363_v12  ;;  %2896 = vst [vmem:[#allocation5 + $0x998] sm:$0xff] %v2384_v9  ;;  %v1364_v18 = vld [vmem:[%s7866_s0 + $0x9b8] sm:$0xff]  ;;  %v341_v19 = vld [vmem:[#allocation2 + $0x9c0] sm:$0xff]  ;;  %v342_v25 = vld [vmem:[#allocation2 + $0x9c8] sm:$0xff] }
 0x199   :  { %2897 = vst [vmem:[#allocation5 + $0x9a0] sm:$0xff] %v2385_v13  ;;  %v2386_v20 = vadd.f32 %v1874_v14, %v850_v8  ;;  %v852_v22 = vmul.f32 0.999, %v340_v17  ;;  %v1876_v23 = vmul.f32 0.001, %v1364_v18  ;;  %v1365_v24 = vld [vmem:[%s7866_s0 + $0x9c0] sm:$0xff] }
 0x19a   :  { %v2387_v21 = vadd.f32 %v1875_v16, %v851_v15  ;;  %v853_v26 = vmul.f32 0.999, %v341_v19  ;;  %v1877_v27 = vmul.f32 0.001, %v1365_v24  ;;  %v854_v28 = vmul.f32 0.999, %v342_v25 }
 0x19b   :  { %2898 = vst [vmem:[#allocation5 + $0x9a8] sm:$0xff] %v2386_v20  ;;  %v2388_v29 = vadd.f32 %v1876_v23, %v852_v22  ;;  %v1366_v30 = vld [vmem:[%s7866_s0 + $0x9c8] sm:$0xff]  ;;  %v343_v31 = vld [vmem:[#allocation2 + $0x9d0] sm:$0xff]  ;;  %v344_v37 = vld [vmem:[#allocation2 + $0x9d8] sm:$0xff] }
 0x19c   :  { %2899 = vst [vmem:[#allocation5 + $0x9b0] sm:$0xff] %v2387_v21  ;;  %v1367_v32 = vld [vmem:[%s7866_s0 + $0x9d0] sm:$0xff]  ;;  %v2389_v33 = vadd.f32 %v1877_v27, %v853_v26  ;;  %v1878_v34 = vmul.f32 0.001, %v1366_v30  ;;  %v855_v35 = vmul.f32 0.999, %v343_v31 }
 0x19d   :  { %v1879_v36 = vmul.f32 0.001, %v1367_v32  ;;  %2900 = vst [vmem:[#allocation5 + $0x9b8] sm:$0xff] %v2388_v29  ;;  %v1368_v38 = vld [vmem:[%s7866_s0 + $0x9d8] sm:$0xff]  ;;  %v345_v39 = vld [vmem:[#allocation2 + $0x9e0] sm:$0xff]  ;;  %v346_v45 = vld [vmem:[#allocation2 + $0x9e8] sm:$0xff] }
 0x19e   :  { %2901 = vst [vmem:[#allocation5 + $0x9c0] sm:$0xff] %v2389_v33  ;;  %v2390_v40 = vadd.f32 %v1878_v34, %v854_v28  ;;  %v856_v42 = vmul.f32 0.999, %v344_v37  ;;  %v1880_v43 = vmul.f32 0.001, %v1368_v38  ;;  %v1369_v44 = vld [vmem:[%s7866_s0 + $0x9e0] sm:$0xff] }
 0x19f   :  { %v2391_v41 = vadd.f32 %v1879_v36, %v855_v35  ;;  %v857_v46 = vmul.f32 0.999, %v345_v39  ;;  %v1881_v47 = vmul.f32 0.001, %v1369_v44  ;;  %v858_v48 = vmul.f32 0.999, %v346_v45 }
 0x1a0   :  { %2902 = vst [vmem:[#allocation5 + $0x9c8] sm:$0xff] %v2390_v40  ;;  %v2392_v49 = vadd.f32 %v1880_v43, %v856_v42  ;;  %v1370_v50 = vld [vmem:[%s7866_s0 + $0x9e8] sm:$0xff]  ;;  %v347_v51 = vld [vmem:[#allocation2 + $0x9f0] sm:$0xff]  ;;  %v348_v57 = vld [vmem:[#allocation2 + $0x9f8] sm:$0xff] }
 0x1a1   :  { %2903 = vst [vmem:[#allocation5 + $0x9d0] sm:$0xff] %v2391_v41  ;;  %v1371_v52 = vld [vmem:[%s7866_s0 + $0x9f0] sm:$0xff]  ;;  %v2393_v53 = vadd.f32 %v1881_v47, %v857_v46  ;;  %v1882_v54 = vmul.f32 0.001, %v1370_v50  ;;  %v859_v55 = vmul.f32 0.999, %v347_v51 }
 0x1a2   :  { %v1883_v56 = vmul.f32 0.001, %v1371_v52  ;;  %2904 = vst [vmem:[#allocation5 + $0x9d8] sm:$0xff] %v2392_v49  ;;  %v1372_v58 = vld [vmem:[%s7866_s0 + $0x9f8] sm:$0xff]  ;;  %v349_v59 = vld [vmem:[#allocation2 + $0xa00] sm:$0xff]  ;;  %v350_v1 = vld [vmem:[#allocation2 + $0xa08] sm:$0xff] }
 0x1a3   :  { %2905 = vst [vmem:[#allocation5 + $0x9e0] sm:$0xff] %v2393_v53  ;;  %v2394_v60 = vadd.f32 %v1882_v54, %v858_v48  ;;  %v860_v62 = vmul.f32 0.999, %v348_v57  ;;  %v1884_v63 = vmul.f32 0.001, %v1372_v58  ;;  %v1373_v0 = vld [vmem:[%s7866_s0 + $0xa00] sm:$0xff] }
 0x1a4   :  { %v2395_v61 = vadd.f32 %v1883_v56, %v859_v55  ;;  %v861_v2 = vmul.f32 0.999, %v349_v59  ;;  %v1885_v3 = vmul.f32 0.001, %v1373_v0  ;;  %v862_v4 = vmul.f32 0.999, %v350_v1 }
 0x1a5   :  { %2906 = vst [vmem:[#allocation5 + $0x9e8] sm:$0xff] %v2394_v60  ;;  %v2396_v5 = vadd.f32 %v1884_v63, %v860_v62  ;;  %v1374_v6 = vld [vmem:[%s7866_s0 + $0xa08] sm:$0xff]  ;;  %v351_v7 = vld [vmem:[#allocation2 + $0xa10] sm:$0xff]  ;;  %v352_v13 = vld [vmem:[#allocation2 + $0xa18] sm:$0xff] }
 0x1a6   :  { %2907 = vst [vmem:[#allocation5 + $0x9f0] sm:$0xff] %v2395_v61  ;;  %v1375_v8 = vld [vmem:[%s7866_s0 + $0xa10] sm:$0xff]  ;;  %v2397_v9 = vadd.f32 %v1885_v3, %v861_v2  ;;  %v1886_v10 = vmul.f32 0.001, %v1374_v6  ;;  %v863_v11 = vmul.f32 0.999, %v351_v7 }
 0x1a7   :  { %v1887_v12 = vmul.f32 0.001, %v1375_v8  ;;  %2908 = vst [vmem:[#allocation5 + $0x9f8] sm:$0xff] %v2396_v5  ;;  %v1376_v14 = vld [vmem:[%s7866_s0 + $0xa18] sm:$0xff]  ;;  %v353_v15 = vld [vmem:[#allocation2 + $0xa20] sm:$0xff]  ;;  %v354_v21 = vld [vmem:[#allocation2 + $0xa28] sm:$0xff] }
 0x1a8   :  { %2909 = vst [vmem:[#allocation5 + $0xa00] sm:$0xff] %v2397_v9  ;;  %v2398_v16 = vadd.f32 %v1886_v10, %v862_v4  ;;  %v864_v18 = vmul.f32 0.999, %v352_v13  ;;  %v1888_v19 = vmul.f32 0.001, %v1376_v14  ;;  %v1377_v20 = vld [vmem:[%s7866_s0 + $0xa20] sm:$0xff] }
 0x1a9   :  { %v2399_v17 = vadd.f32 %v1887_v12, %v863_v11  ;;  %v865_v22 = vmul.f32 0.999, %v353_v15  ;;  %v1889_v23 = vmul.f32 0.001, %v1377_v20  ;;  %v866_v24 = vmul.f32 0.999, %v354_v21 }
 0x1aa   :  { %2910 = vst [vmem:[#allocation5 + $0xa08] sm:$0xff] %v2398_v16  ;;  %v2400_v25 = vadd.f32 %v1888_v19, %v864_v18  ;;  %v1378_v26 = vld [vmem:[%s7866_s0 + $0xa28] sm:$0xff]  ;;  %v355_v27 = vld [vmem:[#allocation2 + $0xa30] sm:$0xff]  ;;  %v356_v33 = vld [vmem:[#allocation2 + $0xa38] sm:$0xff] }
 0x1ab   :  { %2911 = vst [vmem:[#allocation5 + $0xa10] sm:$0xff] %v2399_v17  ;;  %v1379_v28 = vld [vmem:[%s7866_s0 + $0xa30] sm:$0xff]  ;;  %v2401_v29 = vadd.f32 %v1889_v23, %v865_v22  ;;  %v1890_v30 = vmul.f32 0.001, %v1378_v26  ;;  %v867_v31 = vmul.f32 0.999, %v355_v27 }
 0x1ac   :  { %v1891_v32 = vmul.f32 0.001, %v1379_v28  ;;  %2912 = vst [vmem:[#allocation5 + $0xa18] sm:$0xff] %v2400_v25  ;;  %v1380_v34 = vld [vmem:[%s7866_s0 + $0xa38] sm:$0xff]  ;;  %v357_v35 = vld [vmem:[#allocation2 + $0xa40] sm:$0xff]  ;;  %v358_v41 = vld [vmem:[#allocation2 + $0xa48] sm:$0xff] }
 0x1ad   :  { %2913 = vst [vmem:[#allocation5 + $0xa20] sm:$0xff] %v2401_v29  ;;  %v2402_v36 = vadd.f32 %v1890_v30, %v866_v24  ;;  %v868_v38 = vmul.f32 0.999, %v356_v33  ;;  %v1892_v39 = vmul.f32 0.001, %v1380_v34  ;;  %v1381_v40 = vld [vmem:[%s7866_s0 + $0xa40] sm:$0xff] }
 0x1ae   :  { %v2403_v37 = vadd.f32 %v1891_v32, %v867_v31  ;;  %v869_v42 = vmul.f32 0.999, %v357_v35  ;;  %v1893_v43 = vmul.f32 0.001, %v1381_v40  ;;  %v870_v44 = vmul.f32 0.999, %v358_v41 }
 0x1af   :  { %2914 = vst [vmem:[#allocation5 + $0xa28] sm:$0xff] %v2402_v36  ;;  %v2404_v45 = vadd.f32 %v1892_v39, %v868_v38  ;;  %v1382_v46 = vld [vmem:[%s7866_s0 + $0xa48] sm:$0xff]  ;;  %v359_v47 = vld [vmem:[#allocation2 + $0xa50] sm:$0xff]  ;;  %v360_v53 = vld [vmem:[#allocation2 + $0xa58] sm:$0xff] }
 0x1b0   :  { %2915 = vst [vmem:[#allocation5 + $0xa30] sm:$0xff] %v2403_v37  ;;  %v1383_v48 = vld [vmem:[%s7866_s0 + $0xa50] sm:$0xff]  ;;  %v2405_v49 = vadd.f32 %v1893_v43, %v869_v42  ;;  %v1894_v50 = vmul.f32 0.001, %v1382_v46  ;;  %v871_v51 = vmul.f32 0.999, %v359_v47 }
 0x1b1   :  { %v1895_v52 = vmul.f32 0.001, %v1383_v48  ;;  %2916 = vst [vmem:[#allocation5 + $0xa38] sm:$0xff] %v2404_v45  ;;  %v1384_v54 = vld [vmem:[%s7866_s0 + $0xa58] sm:$0xff]  ;;  %v361_v55 = vld [vmem:[#allocation2 + $0xa60] sm:$0xff]  ;;  %v362_v61 = vld [vmem:[#allocation2 + $0xa68] sm:$0xff] }
 0x1b2   :  { %2917 = vst [vmem:[#allocation5 + $0xa40] sm:$0xff] %v2405_v49  ;;  %v2406_v56 = vadd.f32 %v1894_v50, %v870_v44  ;;  %v872_v58 = vmul.f32 0.999, %v360_v53  ;;  %v1896_v59 = vmul.f32 0.001, %v1384_v54  ;;  %v1385_v60 = vld [vmem:[%s7866_s0 + $0xa60] sm:$0xff] }
 0x1b3   :  { %v2407_v57 = vadd.f32 %v1895_v52, %v871_v51  ;;  %v873_v62 = vmul.f32 0.999, %v361_v55  ;;  %v1897_v63 = vmul.f32 0.001, %v1385_v60  ;;  %v874_v0 = vmul.f32 0.999, %v362_v61 }
 0x1b4   :  { %2918 = vst [vmem:[#allocation5 + $0xa48] sm:$0xff] %v2406_v56  ;;  %v2408_v1 = vadd.f32 %v1896_v59, %v872_v58  ;;  %v1386_v2 = vld [vmem:[%s7866_s0 + $0xa68] sm:$0xff]  ;;  %v363_v3 = vld [vmem:[#allocation2 + $0xa70] sm:$0xff]  ;;  %v364_v9 = vld [vmem:[#allocation2 + $0xa78] sm:$0xff] }
 0x1b5   :  { %2919 = vst [vmem:[#allocation5 + $0xa50] sm:$0xff] %v2407_v57  ;;  %v1387_v4 = vld [vmem:[%s7866_s0 + $0xa70] sm:$0xff]  ;;  %v2409_v5 = vadd.f32 %v1897_v63, %v873_v62  ;;  %v1898_v6 = vmul.f32 0.001, %v1386_v2  ;;  %v875_v7 = vmul.f32 0.999, %v363_v3 }
 0x1b6   :  { %v1899_v8 = vmul.f32 0.001, %v1387_v4  ;;  %2920 = vst [vmem:[#allocation5 + $0xa58] sm:$0xff] %v2408_v1  ;;  %v1388_v10 = vld [vmem:[%s7866_s0 + $0xa78] sm:$0xff]  ;;  %v365_v11 = vld [vmem:[#allocation2 + $0xa80] sm:$0xff]  ;;  %v366_v17 = vld [vmem:[#allocation2 + $0xa88] sm:$0xff] }
 0x1b7   :  { %2921 = vst [vmem:[#allocation5 + $0xa60] sm:$0xff] %v2409_v5  ;;  %v2410_v12 = vadd.f32 %v1898_v6, %v874_v0  ;;  %v876_v14 = vmul.f32 0.999, %v364_v9  ;;  %v1900_v15 = vmul.f32 0.001, %v1388_v10  ;;  %v1389_v16 = vld [vmem:[%s7866_s0 + $0xa80] sm:$0xff] }
 0x1b8   :  { %v2411_v13 = vadd.f32 %v1899_v8, %v875_v7  ;;  %v877_v18 = vmul.f32 0.999, %v365_v11  ;;  %v1901_v19 = vmul.f32 0.001, %v1389_v16  ;;  %v878_v20 = vmul.f32 0.999, %v366_v17 }
 0x1b9   :  { %2922 = vst [vmem:[#allocation5 + $0xa68] sm:$0xff] %v2410_v12  ;;  %v2412_v21 = vadd.f32 %v1900_v15, %v876_v14  ;;  %v1390_v22 = vld [vmem:[%s7866_s0 + $0xa88] sm:$0xff]  ;;  %v367_v23 = vld [vmem:[#allocation2 + $0xa90] sm:$0xff]  ;;  %v368_v29 = vld [vmem:[#allocation2 + $0xa98] sm:$0xff] }
 0x1ba   :  { %2923 = vst [vmem:[#allocation5 + $0xa70] sm:$0xff] %v2411_v13  ;;  %v1391_v24 = vld [vmem:[%s7866_s0 + $0xa90] sm:$0xff]  ;;  %v2413_v25 = vadd.f32 %v1901_v19, %v877_v18  ;;  %v1902_v26 = vmul.f32 0.001, %v1390_v22  ;;  %v879_v27 = vmul.f32 0.999, %v367_v23 }
 0x1bb   :  { %v1903_v28 = vmul.f32 0.001, %v1391_v24  ;;  %2924 = vst [vmem:[#allocation5 + $0xa78] sm:$0xff] %v2412_v21  ;;  %v1392_v30 = vld [vmem:[%s7866_s0 + $0xa98] sm:$0xff]  ;;  %v369_v31 = vld [vmem:[#allocation2 + $0xaa0] sm:$0xff]  ;;  %v370_v37 = vld [vmem:[#allocation2 + $0xaa8] sm:$0xff] }
 0x1bc   :  { %2925 = vst [vmem:[#allocation5 + $0xa80] sm:$0xff] %v2413_v25  ;;  %v2414_v32 = vadd.f32 %v1902_v26, %v878_v20  ;;  %v880_v34 = vmul.f32 0.999, %v368_v29  ;;  %v1904_v35 = vmul.f32 0.001, %v1392_v30  ;;  %v1393_v36 = vld [vmem:[%s7866_s0 + $0xaa0] sm:$0xff] }
 0x1bd   :  { %v2415_v33 = vadd.f32 %v1903_v28, %v879_v27  ;;  %v881_v38 = vmul.f32 0.999, %v369_v31  ;;  %v1905_v39 = vmul.f32 0.001, %v1393_v36  ;;  %v882_v40 = vmul.f32 0.999, %v370_v37 }
 0x1be   :  { %2926 = vst [vmem:[#allocation5 + $0xa88] sm:$0xff] %v2414_v32  ;;  %v2416_v41 = vadd.f32 %v1904_v35, %v880_v34  ;;  %v1394_v42 = vld [vmem:[%s7866_s0 + $0xaa8] sm:$0xff]  ;;  %v371_v43 = vld [vmem:[#allocation2 + $0xab0] sm:$0xff]  ;;  %v372_v49 = vld [vmem:[#allocation2 + $0xab8] sm:$0xff] }
 0x1bf   :  { %2927 = vst [vmem:[#allocation5 + $0xa90] sm:$0xff] %v2415_v33  ;;  %v1395_v44 = vld [vmem:[%s7866_s0 + $0xab0] sm:$0xff]  ;;  %v2417_v45 = vadd.f32 %v1905_v39, %v881_v38  ;;  %v1906_v46 = vmul.f32 0.001, %v1394_v42  ;;  %v883_v47 = vmul.f32 0.999, %v371_v43 }
 0x1c0   :  { %v1907_v48 = vmul.f32 0.001, %v1395_v44  ;;  %2928 = vst [vmem:[#allocation5 + $0xa98] sm:$0xff] %v2416_v41  ;;  %v1396_v50 = vld [vmem:[%s7866_s0 + $0xab8] sm:$0xff]  ;;  %v373_v51 = vld [vmem:[#allocation2 + $0xac0] sm:$0xff]  ;;  %v374_v57 = vld [vmem:[#allocation2 + $0xac8] sm:$0xff] }
 0x1c1   :  { %2929 = vst [vmem:[#allocation5 + $0xaa0] sm:$0xff] %v2417_v45  ;;  %v2418_v52 = vadd.f32 %v1906_v46, %v882_v40  ;;  %v884_v54 = vmul.f32 0.999, %v372_v49  ;;  %v1908_v55 = vmul.f32 0.001, %v1396_v50  ;;  %v1397_v56 = vld [vmem:[%s7866_s0 + $0xac0] sm:$0xff] }
 0x1c2   :  { %v2419_v53 = vadd.f32 %v1907_v48, %v883_v47  ;;  %v885_v58 = vmul.f32 0.999, %v373_v51  ;;  %v1909_v59 = vmul.f32 0.001, %v1397_v56  ;;  %v886_v60 = vmul.f32 0.999, %v374_v57 }
 0x1c3   :  { %2930 = vst [vmem:[#allocation5 + $0xaa8] sm:$0xff] %v2418_v52  ;;  %v2420_v61 = vadd.f32 %v1908_v55, %v884_v54  ;;  %v1398_v62 = vld [vmem:[%s7866_s0 + $0xac8] sm:$0xff]  ;;  %v375_v63 = vld [vmem:[#allocation2 + $0xad0] sm:$0xff]  ;;  %v376_v5 = vld [vmem:[#allocation2 + $0xad8] sm:$0xff] }
 0x1c4   :  { %2931 = vst [vmem:[#allocation5 + $0xab0] sm:$0xff] %v2419_v53  ;;  %v1399_v0 = vld [vmem:[%s7866_s0 + $0xad0] sm:$0xff]  ;;  %v2421_v1 = vadd.f32 %v1909_v59, %v885_v58  ;;  %v1910_v2 = vmul.f32 0.001, %v1398_v62  ;;  %v887_v3 = vmul.f32 0.999, %v375_v63 }
 0x1c5   :  { %v1911_v4 = vmul.f32 0.001, %v1399_v0  ;;  %2932 = vst [vmem:[#allocation5 + $0xab8] sm:$0xff] %v2420_v61  ;;  %v1400_v6 = vld [vmem:[%s7866_s0 + $0xad8] sm:$0xff]  ;;  %v377_v7 = vld [vmem:[#allocation2 + $0xae0] sm:$0xff]  ;;  %v378_v13 = vld [vmem:[#allocation2 + $0xae8] sm:$0xff] }
 0x1c6   :  { %2933 = vst [vmem:[#allocation5 + $0xac0] sm:$0xff] %v2421_v1  ;;  %v2422_v8 = vadd.f32 %v1910_v2, %v886_v60  ;;  %v888_v10 = vmul.f32 0.999, %v376_v5  ;;  %v1912_v11 = vmul.f32 0.001, %v1400_v6  ;;  %v1401_v12 = vld [vmem:[%s7866_s0 + $0xae0] sm:$0xff] }
 0x1c7   :  { %v2423_v9 = vadd.f32 %v1911_v4, %v887_v3  ;;  %v889_v14 = vmul.f32 0.999, %v377_v7  ;;  %v1913_v15 = vmul.f32 0.001, %v1401_v12  ;;  %v890_v16 = vmul.f32 0.999, %v378_v13 }
 0x1c8   :  { %2934 = vst [vmem:[#allocation5 + $0xac8] sm:$0xff] %v2422_v8  ;;  %v2424_v17 = vadd.f32 %v1912_v11, %v888_v10  ;;  %v1402_v18 = vld [vmem:[%s7866_s0 + $0xae8] sm:$0xff]  ;;  %v379_v19 = vld [vmem:[#allocation2 + $0xaf0] sm:$0xff]  ;;  %v380_v25 = vld [vmem:[#allocation2 + $0xaf8] sm:$0xff] }
 0x1c9   :  { %2935 = vst [vmem:[#allocation5 + $0xad0] sm:$0xff] %v2423_v9  ;;  %v1403_v20 = vld [vmem:[%s7866_s0 + $0xaf0] sm:$0xff]  ;;  %v2425_v21 = vadd.f32 %v1913_v15, %v889_v14  ;;  %v1914_v22 = vmul.f32 0.001, %v1402_v18  ;;  %v891_v23 = vmul.f32 0.999, %v379_v19 }
 0x1ca   :  { %v1915_v24 = vmul.f32 0.001, %v1403_v20  ;;  %2936 = vst [vmem:[#allocation5 + $0xad8] sm:$0xff] %v2424_v17  ;;  %v1404_v26 = vld [vmem:[%s7866_s0 + $0xaf8] sm:$0xff]  ;;  %v381_v27 = vld [vmem:[#allocation2 + $0xb00] sm:$0xff]  ;;  %v382_v33 = vld [vmem:[#allocation2 + $0xb08] sm:$0xff] }
 0x1cb   :  { %2937 = vst [vmem:[#allocation5 + $0xae0] sm:$0xff] %v2425_v21  ;;  %v2426_v28 = vadd.f32 %v1914_v22, %v890_v16  ;;  %v892_v30 = vmul.f32 0.999, %v380_v25  ;;  %v1916_v31 = vmul.f32 0.001, %v1404_v26  ;;  %v1405_v32 = vld [vmem:[%s7866_s0 + $0xb00] sm:$0xff] }
 0x1cc   :  { %v2427_v29 = vadd.f32 %v1915_v24, %v891_v23  ;;  %v893_v34 = vmul.f32 0.999, %v381_v27  ;;  %v1917_v35 = vmul.f32 0.001, %v1405_v32  ;;  %v894_v36 = vmul.f32 0.999, %v382_v33 }
 0x1cd   :  { %2938 = vst [vmem:[#allocation5 + $0xae8] sm:$0xff] %v2426_v28  ;;  %v2428_v37 = vadd.f32 %v1916_v31, %v892_v30  ;;  %v1406_v38 = vld [vmem:[%s7866_s0 + $0xb08] sm:$0xff]  ;;  %v383_v39 = vld [vmem:[#allocation2 + $0xb10] sm:$0xff]  ;;  %v384_v45 = vld [vmem:[#allocation2 + $0xb18] sm:$0xff] }
 0x1ce   :  { %2939 = vst [vmem:[#allocation5 + $0xaf0] sm:$0xff] %v2427_v29  ;;  %v1407_v40 = vld [vmem:[%s7866_s0 + $0xb10] sm:$0xff]  ;;  %v2429_v41 = vadd.f32 %v1917_v35, %v893_v34  ;;  %v1918_v42 = vmul.f32 0.001, %v1406_v38  ;;  %v895_v43 = vmul.f32 0.999, %v383_v39 }
 0x1cf   :  { %v1919_v44 = vmul.f32 0.001, %v1407_v40  ;;  %2940 = vst [vmem:[#allocation5 + $0xaf8] sm:$0xff] %v2428_v37  ;;  %v1408_v46 = vld [vmem:[%s7866_s0 + $0xb18] sm:$0xff]  ;;  %v385_v47 = vld [vmem:[#allocation2 + $0xb20] sm:$0xff]  ;;  %v386_v53 = vld [vmem:[#allocation2 + $0xb28] sm:$0xff] }
 0x1d0   :  { %2941 = vst [vmem:[#allocation5 + $0xb00] sm:$0xff] %v2429_v41  ;;  %v2430_v48 = vadd.f32 %v1918_v42, %v894_v36  ;;  %v896_v50 = vmul.f32 0.999, %v384_v45  ;;  %v1920_v51 = vmul.f32 0.001, %v1408_v46  ;;  %v1409_v52 = vld [vmem:[%s7866_s0 + $0xb20] sm:$0xff] }
 0x1d1   :  { %v2431_v49 = vadd.f32 %v1919_v44, %v895_v43  ;;  %v897_v54 = vmul.f32 0.999, %v385_v47  ;;  %v1921_v55 = vmul.f32 0.001, %v1409_v52  ;;  %v898_v56 = vmul.f32 0.999, %v386_v53 }
 0x1d2   :  { %2942 = vst [vmem:[#allocation5 + $0xb08] sm:$0xff] %v2430_v48  ;;  %v2432_v57 = vadd.f32 %v1920_v51, %v896_v50  ;;  %v1410_v58 = vld [vmem:[%s7866_s0 + $0xb28] sm:$0xff]  ;;  %v387_v59 = vld [vmem:[#allocation2 + $0xb30] sm:$0xff]  ;;  %v388_v1 = vld [vmem:[#allocation2 + $0xb38] sm:$0xff] }
 0x1d3   :  { %2943 = vst [vmem:[#allocation5 + $0xb10] sm:$0xff] %v2431_v49  ;;  %v1411_v60 = vld [vmem:[%s7866_s0 + $0xb30] sm:$0xff]  ;;  %v2433_v61 = vadd.f32 %v1921_v55, %v897_v54  ;;  %v1922_v62 = vmul.f32 0.001, %v1410_v58  ;;  %v899_v63 = vmul.f32 0.999, %v387_v59 }
 0x1d4   :  { %v1923_v0 = vmul.f32 0.001, %v1411_v60  ;;  %2944 = vst [vmem:[#allocation5 + $0xb18] sm:$0xff] %v2432_v57  ;;  %v1412_v2 = vld [vmem:[%s7866_s0 + $0xb38] sm:$0xff]  ;;  %v389_v3 = vld [vmem:[#allocation2 + $0xb40] sm:$0xff]  ;;  %v390_v9 = vld [vmem:[#allocation2 + $0xb48] sm:$0xff] }
 0x1d5   :  { %2945 = vst [vmem:[#allocation5 + $0xb20] sm:$0xff] %v2433_v61  ;;  %v2434_v4 = vadd.f32 %v1922_v62, %v898_v56  ;;  %v900_v6 = vmul.f32 0.999, %v388_v1  ;;  %v1924_v7 = vmul.f32 0.001, %v1412_v2  ;;  %v1413_v8 = vld [vmem:[%s7866_s0 + $0xb40] sm:$0xff] }
 0x1d6   :  { %v2435_v5 = vadd.f32 %v1923_v0, %v899_v63  ;;  %v901_v10 = vmul.f32 0.999, %v389_v3  ;;  %v1925_v11 = vmul.f32 0.001, %v1413_v8  ;;  %v902_v12 = vmul.f32 0.999, %v390_v9 }
 0x1d7   :  { %2946 = vst [vmem:[#allocation5 + $0xb28] sm:$0xff] %v2434_v4  ;;  %v2436_v13 = vadd.f32 %v1924_v7, %v900_v6  ;;  %v1414_v14 = vld [vmem:[%s7866_s0 + $0xb48] sm:$0xff]  ;;  %v391_v15 = vld [vmem:[#allocation2 + $0xb50] sm:$0xff]  ;;  %v392_v21 = vld [vmem:[#allocation2 + $0xb58] sm:$0xff] }
 0x1d8   :  { %2947 = vst [vmem:[#allocation5 + $0xb30] sm:$0xff] %v2435_v5  ;;  %v1415_v16 = vld [vmem:[%s7866_s0 + $0xb50] sm:$0xff]  ;;  %v2437_v17 = vadd.f32 %v1925_v11, %v901_v10  ;;  %v1926_v18 = vmul.f32 0.001, %v1414_v14  ;;  %v903_v19 = vmul.f32 0.999, %v391_v15 }
 0x1d9   :  { %v1927_v20 = vmul.f32 0.001, %v1415_v16  ;;  %2948 = vst [vmem:[#allocation5 + $0xb38] sm:$0xff] %v2436_v13  ;;  %v1416_v22 = vld [vmem:[%s7866_s0 + $0xb58] sm:$0xff]  ;;  %v393_v23 = vld [vmem:[#allocation2 + $0xb60] sm:$0xff]  ;;  %v394_v29 = vld [vmem:[#allocation2 + $0xb68] sm:$0xff] }
 0x1da   :  { %2949 = vst [vmem:[#allocation5 + $0xb40] sm:$0xff] %v2437_v17  ;;  %v2438_v24 = vadd.f32 %v1926_v18, %v902_v12  ;;  %v904_v26 = vmul.f32 0.999, %v392_v21  ;;  %v1928_v27 = vmul.f32 0.001, %v1416_v22  ;;  %v1417_v28 = vld [vmem:[%s7866_s0 + $0xb60] sm:$0xff] }
 0x1db   :  { %v2439_v25 = vadd.f32 %v1927_v20, %v903_v19  ;;  %v905_v30 = vmul.f32 0.999, %v393_v23  ;;  %v1929_v31 = vmul.f32 0.001, %v1417_v28  ;;  %v906_v32 = vmul.f32 0.999, %v394_v29 }
 0x1dc   :  { %2950 = vst [vmem:[#allocation5 + $0xb48] sm:$0xff] %v2438_v24  ;;  %v2440_v33 = vadd.f32 %v1928_v27, %v904_v26  ;;  %v1418_v34 = vld [vmem:[%s7866_s0 + $0xb68] sm:$0xff]  ;;  %v395_v35 = vld [vmem:[#allocation2 + $0xb70] sm:$0xff]  ;;  %v396_v41 = vld [vmem:[#allocation2 + $0xb78] sm:$0xff] }
 0x1dd   :  { %2951 = vst [vmem:[#allocation5 + $0xb50] sm:$0xff] %v2439_v25  ;;  %v1419_v36 = vld [vmem:[%s7866_s0 + $0xb70] sm:$0xff]  ;;  %v2441_v37 = vadd.f32 %v1929_v31, %v905_v30  ;;  %v1930_v38 = vmul.f32 0.001, %v1418_v34  ;;  %v907_v39 = vmul.f32 0.999, %v395_v35 }
 0x1de   :  { %v1931_v40 = vmul.f32 0.001, %v1419_v36  ;;  %2952 = vst [vmem:[#allocation5 + $0xb58] sm:$0xff] %v2440_v33  ;;  %v1420_v42 = vld [vmem:[%s7866_s0 + $0xb78] sm:$0xff]  ;;  %v397_v43 = vld [vmem:[#allocation2 + $0xb80] sm:$0xff]  ;;  %v398_v49 = vld [vmem:[#allocation2 + $0xb88] sm:$0xff] }
 0x1df   :  { %2953 = vst [vmem:[#allocation5 + $0xb60] sm:$0xff] %v2441_v37  ;;  %v2442_v44 = vadd.f32 %v1930_v38, %v906_v32  ;;  %v908_v46 = vmul.f32 0.999, %v396_v41  ;;  %v1932_v47 = vmul.f32 0.001, %v1420_v42  ;;  %v1421_v48 = vld [vmem:[%s7866_s0 + $0xb80] sm:$0xff] }
 0x1e0   :  { %v2443_v45 = vadd.f32 %v1931_v40, %v907_v39  ;;  %v909_v50 = vmul.f32 0.999, %v397_v43  ;;  %v1933_v51 = vmul.f32 0.001, %v1421_v48  ;;  %v910_v52 = vmul.f32 0.999, %v398_v49 }
 0x1e1   :  { %2954 = vst [vmem:[#allocation5 + $0xb68] sm:$0xff] %v2442_v44  ;;  %v2444_v53 = vadd.f32 %v1932_v47, %v908_v46  ;;  %v1422_v54 = vld [vmem:[%s7866_s0 + $0xb88] sm:$0xff]  ;;  %v399_v55 = vld [vmem:[#allocation2 + $0xb90] sm:$0xff]  ;;  %v400_v61 = vld [vmem:[#allocation2 + $0xb98] sm:$0xff] }
 0x1e2   :  { %2955 = vst [vmem:[#allocation5 + $0xb70] sm:$0xff] %v2443_v45  ;;  %v1423_v56 = vld [vmem:[%s7866_s0 + $0xb90] sm:$0xff]  ;;  %v2445_v57 = vadd.f32 %v1933_v51, %v909_v50  ;;  %v1934_v58 = vmul.f32 0.001, %v1422_v54  ;;  %v911_v59 = vmul.f32 0.999, %v399_v55 }
 0x1e3   :  { %v1935_v60 = vmul.f32 0.001, %v1423_v56  ;;  %2956 = vst [vmem:[#allocation5 + $0xb78] sm:$0xff] %v2444_v53  ;;  %v1424_v62 = vld [vmem:[%s7866_s0 + $0xb98] sm:$0xff]  ;;  %v401_v63 = vld [vmem:[#allocation2 + $0xba0] sm:$0xff]  ;;  %v402_v5 = vld [vmem:[#allocation2 + $0xba8] sm:$0xff] }
 0x1e4   :  { %2957 = vst [vmem:[#allocation5 + $0xb80] sm:$0xff] %v2445_v57  ;;  %v2446_v0 = vadd.f32 %v1934_v58, %v910_v52  ;;  %v912_v2 = vmul.f32 0.999, %v400_v61  ;;  %v1936_v3 = vmul.f32 0.001, %v1424_v62  ;;  %v1425_v4 = vld [vmem:[%s7866_s0 + $0xba0] sm:$0xff] }
 0x1e5   :  { %v2447_v1 = vadd.f32 %v1935_v60, %v911_v59  ;;  %v913_v6 = vmul.f32 0.999, %v401_v63  ;;  %v1937_v7 = vmul.f32 0.001, %v1425_v4  ;;  %v914_v8 = vmul.f32 0.999, %v402_v5 }
 0x1e6   :  { %2958 = vst [vmem:[#allocation5 + $0xb88] sm:$0xff] %v2446_v0  ;;  %v2448_v9 = vadd.f32 %v1936_v3, %v912_v2  ;;  %v1426_v10 = vld [vmem:[%s7866_s0 + $0xba8] sm:$0xff]  ;;  %v403_v11 = vld [vmem:[#allocation2 + $0xbb0] sm:$0xff]  ;;  %v404_v17 = vld [vmem:[#allocation2 + $0xbb8] sm:$0xff] }
 0x1e7   :  { %2959 = vst [vmem:[#allocation5 + $0xb90] sm:$0xff] %v2447_v1  ;;  %v1427_v12 = vld [vmem:[%s7866_s0 + $0xbb0] sm:$0xff]  ;;  %v2449_v13 = vadd.f32 %v1937_v7, %v913_v6  ;;  %v1938_v14 = vmul.f32 0.001, %v1426_v10  ;;  %v915_v15 = vmul.f32 0.999, %v403_v11 }
 0x1e8   :  { %v1939_v16 = vmul.f32 0.001, %v1427_v12  ;;  %2960 = vst [vmem:[#allocation5 + $0xb98] sm:$0xff] %v2448_v9  ;;  %v1428_v18 = vld [vmem:[%s7866_s0 + $0xbb8] sm:$0xff]  ;;  %v405_v19 = vld [vmem:[#allocation2 + $0xbc0] sm:$0xff]  ;;  %v406_v25 = vld [vmem:[#allocation2 + $0xbc8] sm:$0xff] }
 0x1e9   :  { %2961 = vst [vmem:[#allocation5 + $0xba0] sm:$0xff] %v2449_v13  ;;  %v2450_v20 = vadd.f32 %v1938_v14, %v914_v8  ;;  %v916_v22 = vmul.f32 0.999, %v404_v17  ;;  %v1940_v23 = vmul.f32 0.001, %v1428_v18  ;;  %v1429_v24 = vld [vmem:[%s7866_s0 + $0xbc0] sm:$0xff] }
 0x1ea   :  { %v2451_v21 = vadd.f32 %v1939_v16, %v915_v15  ;;  %v917_v26 = vmul.f32 0.999, %v405_v19  ;;  %v1941_v27 = vmul.f32 0.001, %v1429_v24  ;;  %v918_v28 = vmul.f32 0.999, %v406_v25 }
 0x1eb   :  { %2962 = vst [vmem:[#allocation5 + $0xba8] sm:$0xff] %v2450_v20  ;;  %v2452_v29 = vadd.f32 %v1940_v23, %v916_v22  ;;  %v1430_v30 = vld [vmem:[%s7866_s0 + $0xbc8] sm:$0xff]  ;;  %v407_v31 = vld [vmem:[#allocation2 + $0xbd0] sm:$0xff]  ;;  %v408_v37 = vld [vmem:[#allocation2 + $0xbd8] sm:$0xff] }
 0x1ec   :  { %2963 = vst [vmem:[#allocation5 + $0xbb0] sm:$0xff] %v2451_v21  ;;  %v1431_v32 = vld [vmem:[%s7866_s0 + $0xbd0] sm:$0xff]  ;;  %v2453_v33 = vadd.f32 %v1941_v27, %v917_v26  ;;  %v1942_v34 = vmul.f32 0.001, %v1430_v30  ;;  %v919_v35 = vmul.f32 0.999, %v407_v31 }
 0x1ed   :  { %v1943_v36 = vmul.f32 0.001, %v1431_v32  ;;  %2964 = vst [vmem:[#allocation5 + $0xbb8] sm:$0xff] %v2452_v29  ;;  %v1432_v38 = vld [vmem:[%s7866_s0 + $0xbd8] sm:$0xff]  ;;  %v409_v39 = vld [vmem:[#allocation2 + $0xbe0] sm:$0xff]  ;;  %v410_v45 = vld [vmem:[#allocation2 + $0xbe8] sm:$0xff] }
 0x1ee   :  { %2965 = vst [vmem:[#allocation5 + $0xbc0] sm:$0xff] %v2453_v33  ;;  %v2454_v40 = vadd.f32 %v1942_v34, %v918_v28  ;;  %v920_v42 = vmul.f32 0.999, %v408_v37  ;;  %v1944_v43 = vmul.f32 0.001, %v1432_v38  ;;  %v1433_v44 = vld [vmem:[%s7866_s0 + $0xbe0] sm:$0xff] }
 0x1ef   :  { %v2455_v41 = vadd.f32 %v1943_v36, %v919_v35  ;;  %v921_v46 = vmul.f32 0.999, %v409_v39  ;;  %v1945_v47 = vmul.f32 0.001, %v1433_v44  ;;  %v922_v48 = vmul.f32 0.999, %v410_v45 }
 0x1f0   :  { %2966 = vst [vmem:[#allocation5 + $0xbc8] sm:$0xff] %v2454_v40  ;;  %v2456_v49 = vadd.f32 %v1944_v43, %v920_v42  ;;  %v1434_v50 = vld [vmem:[%s7866_s0 + $0xbe8] sm:$0xff]  ;;  %v411_v51 = vld [vmem:[#allocation2 + $0xbf0] sm:$0xff]  ;;  %v412_v57 = vld [vmem:[#allocation2 + $0xbf8] sm:$0xff] }
 0x1f1   :  { %2967 = vst [vmem:[#allocation5 + $0xbd0] sm:$0xff] %v2455_v41  ;;  %v1435_v52 = vld [vmem:[%s7866_s0 + $0xbf0] sm:$0xff]  ;;  %v2457_v53 = vadd.f32 %v1945_v47, %v921_v46  ;;  %v1946_v54 = vmul.f32 0.001, %v1434_v50  ;;  %v923_v55 = vmul.f32 0.999, %v411_v51 }
 0x1f2   :  { %v1947_v56 = vmul.f32 0.001, %v1435_v52  ;;  %2968 = vst [vmem:[#allocation5 + $0xbd8] sm:$0xff] %v2456_v49  ;;  %v1436_v58 = vld [vmem:[%s7866_s0 + $0xbf8] sm:$0xff]  ;;  %v413_v59 = vld [vmem:[#allocation2 + $0xc00] sm:$0xff]  ;;  %v414_v1 = vld [vmem:[#allocation2 + $0xc08] sm:$0xff] }
 0x1f3   :  { %2969 = vst [vmem:[#allocation5 + $0xbe0] sm:$0xff] %v2457_v53  ;;  %v2458_v60 = vadd.f32 %v1946_v54, %v922_v48  ;;  %v924_v62 = vmul.f32 0.999, %v412_v57  ;;  %v1948_v63 = vmul.f32 0.001, %v1436_v58  ;;  %v1437_v0 = vld [vmem:[%s7866_s0 + $0xc00] sm:$0xff] }
 0x1f4   :  { %v2459_v61 = vadd.f32 %v1947_v56, %v923_v55  ;;  %v925_v2 = vmul.f32 0.999, %v413_v59  ;;  %v1949_v3 = vmul.f32 0.001, %v1437_v0  ;;  %v926_v4 = vmul.f32 0.999, %v414_v1 }
 0x1f5   :  { %2970 = vst [vmem:[#allocation5 + $0xbe8] sm:$0xff] %v2458_v60  ;;  %v2460_v5 = vadd.f32 %v1948_v63, %v924_v62  ;;  %v1438_v6 = vld [vmem:[%s7866_s0 + $0xc08] sm:$0xff]  ;;  %v415_v7 = vld [vmem:[#allocation2 + $0xc10] sm:$0xff]  ;;  %v416_v13 = vld [vmem:[#allocation2 + $0xc18] sm:$0xff] }
 0x1f6   :  { %2971 = vst [vmem:[#allocation5 + $0xbf0] sm:$0xff] %v2459_v61  ;;  %v1439_v8 = vld [vmem:[%s7866_s0 + $0xc10] sm:$0xff]  ;;  %v2461_v9 = vadd.f32 %v1949_v3, %v925_v2  ;;  %v1950_v10 = vmul.f32 0.001, %v1438_v6  ;;  %v927_v11 = vmul.f32 0.999, %v415_v7 }
 0x1f7   :  { %v1951_v12 = vmul.f32 0.001, %v1439_v8  ;;  %2972 = vst [vmem:[#allocation5 + $0xbf8] sm:$0xff] %v2460_v5  ;;  %v1440_v14 = vld [vmem:[%s7866_s0 + $0xc18] sm:$0xff]  ;;  %v417_v15 = vld [vmem:[#allocation2 + $0xc20] sm:$0xff]  ;;  %v418_v21 = vld [vmem:[#allocation2 + $0xc28] sm:$0xff] }
 0x1f8   :  { %2973 = vst [vmem:[#allocation5 + $0xc00] sm:$0xff] %v2461_v9  ;;  %v2462_v16 = vadd.f32 %v1950_v10, %v926_v4  ;;  %v928_v18 = vmul.f32 0.999, %v416_v13  ;;  %v1952_v19 = vmul.f32 0.001, %v1440_v14  ;;  %v1441_v20 = vld [vmem:[%s7866_s0 + $0xc20] sm:$0xff] }
 0x1f9   :  { %v2463_v17 = vadd.f32 %v1951_v12, %v927_v11  ;;  %v929_v22 = vmul.f32 0.999, %v417_v15  ;;  %v1953_v23 = vmul.f32 0.001, %v1441_v20  ;;  %v930_v24 = vmul.f32 0.999, %v418_v21 }
 0x1fa   :  { %2974 = vst [vmem:[#allocation5 + $0xc08] sm:$0xff] %v2462_v16  ;;  %v2464_v25 = vadd.f32 %v1952_v19, %v928_v18  ;;  %v1442_v26 = vld [vmem:[%s7866_s0 + $0xc28] sm:$0xff]  ;;  %v419_v27 = vld [vmem:[#allocation2 + $0xc30] sm:$0xff]  ;;  %v420_v33 = vld [vmem:[#allocation2 + $0xc38] sm:$0xff] }
 0x1fb   :  { %2975 = vst [vmem:[#allocation5 + $0xc10] sm:$0xff] %v2463_v17  ;;  %v1443_v28 = vld [vmem:[%s7866_s0 + $0xc30] sm:$0xff]  ;;  %v2465_v29 = vadd.f32 %v1953_v23, %v929_v22  ;;  %v1954_v30 = vmul.f32 0.001, %v1442_v26  ;;  %v931_v31 = vmul.f32 0.999, %v419_v27 }
 0x1fc   :  { %v1955_v32 = vmul.f32 0.001, %v1443_v28  ;;  %2976 = vst [vmem:[#allocation5 + $0xc18] sm:$0xff] %v2464_v25  ;;  %v1444_v34 = vld [vmem:[%s7866_s0 + $0xc38] sm:$0xff]  ;;  %v421_v35 = vld [vmem:[#allocation2 + $0xc40] sm:$0xff]  ;;  %v422_v41 = vld [vmem:[#allocation2 + $0xc48] sm:$0xff] }
 0x1fd   :  { %2977 = vst [vmem:[#allocation5 + $0xc20] sm:$0xff] %v2465_v29  ;;  %v2466_v36 = vadd.f32 %v1954_v30, %v930_v24  ;;  %v932_v38 = vmul.f32 0.999, %v420_v33  ;;  %v1956_v39 = vmul.f32 0.001, %v1444_v34  ;;  %v1445_v40 = vld [vmem:[%s7866_s0 + $0xc40] sm:$0xff] }
 0x1fe   :  { %v2467_v37 = vadd.f32 %v1955_v32, %v931_v31  ;;  %v933_v42 = vmul.f32 0.999, %v421_v35  ;;  %v1957_v43 = vmul.f32 0.001, %v1445_v40  ;;  %v934_v44 = vmul.f32 0.999, %v422_v41 }
 0x1ff   :  { %2978 = vst [vmem:[#allocation5 + $0xc28] sm:$0xff] %v2466_v36  ;;  %v2468_v45 = vadd.f32 %v1956_v39, %v932_v38  ;;  %v1446_v46 = vld [vmem:[%s7866_s0 + $0xc48] sm:$0xff]  ;;  %v423_v47 = vld [vmem:[#allocation2 + $0xc50] sm:$0xff]  ;;  %v424_v53 = vld [vmem:[#allocation2 + $0xc58] sm:$0xff] }
 0x200   :  { %2979 = vst [vmem:[#allocation5 + $0xc30] sm:$0xff] %v2467_v37  ;;  %v1447_v48 = vld [vmem:[%s7866_s0 + $0xc50] sm:$0xff]  ;;  %v2469_v49 = vadd.f32 %v1957_v43, %v933_v42  ;;  %v1958_v50 = vmul.f32 0.001, %v1446_v46  ;;  %v935_v51 = vmul.f32 0.999, %v423_v47 }
 0x201   :  { %v1959_v52 = vmul.f32 0.001, %v1447_v48  ;;  %2980 = vst [vmem:[#allocation5 + $0xc38] sm:$0xff] %v2468_v45  ;;  %v1448_v54 = vld [vmem:[%s7866_s0 + $0xc58] sm:$0xff]  ;;  %v425_v55 = vld [vmem:[#allocation2 + $0xc60] sm:$0xff]  ;;  %v426_v61 = vld [vmem:[#allocation2 + $0xc68] sm:$0xff] }
 0x202   :  { %2981 = vst [vmem:[#allocation5 + $0xc40] sm:$0xff] %v2469_v49  ;;  %v2470_v56 = vadd.f32 %v1958_v50, %v934_v44  ;;  %v936_v58 = vmul.f32 0.999, %v424_v53  ;;  %v1960_v59 = vmul.f32 0.001, %v1448_v54  ;;  %v1449_v60 = vld [vmem:[%s7866_s0 + $0xc60] sm:$0xff] }
 0x203   :  { %v2471_v57 = vadd.f32 %v1959_v52, %v935_v51  ;;  %v937_v62 = vmul.f32 0.999, %v425_v55  ;;  %v1961_v63 = vmul.f32 0.001, %v1449_v60  ;;  %v938_v0 = vmul.f32 0.999, %v426_v61 }
 0x204   :  { %2982 = vst [vmem:[#allocation5 + $0xc48] sm:$0xff] %v2470_v56  ;;  %v2472_v1 = vadd.f32 %v1960_v59, %v936_v58  ;;  %v1450_v2 = vld [vmem:[%s7866_s0 + $0xc68] sm:$0xff]  ;;  %v427_v3 = vld [vmem:[#allocation2 + $0xc70] sm:$0xff]  ;;  %v428_v9 = vld [vmem:[#allocation2 + $0xc78] sm:$0xff] }
 0x205   :  { %2983 = vst [vmem:[#allocation5 + $0xc50] sm:$0xff] %v2471_v57  ;;  %v1451_v4 = vld [vmem:[%s7866_s0 + $0xc70] sm:$0xff]  ;;  %v2473_v5 = vadd.f32 %v1961_v63, %v937_v62  ;;  %v1962_v6 = vmul.f32 0.001, %v1450_v2  ;;  %v939_v7 = vmul.f32 0.999, %v427_v3 }
 0x206   :  { %v1963_v8 = vmul.f32 0.001, %v1451_v4  ;;  %2984 = vst [vmem:[#allocation5 + $0xc58] sm:$0xff] %v2472_v1  ;;  %v1452_v10 = vld [vmem:[%s7866_s0 + $0xc78] sm:$0xff]  ;;  %v429_v11 = vld [vmem:[#allocation2 + $0xc80] sm:$0xff]  ;;  %v430_v17 = vld [vmem:[#allocation2 + $0xc88] sm:$0xff] }
 0x207   :  { %2985 = vst [vmem:[#allocation5 + $0xc60] sm:$0xff] %v2473_v5  ;;  %v2474_v12 = vadd.f32 %v1962_v6, %v938_v0  ;;  %v940_v14 = vmul.f32 0.999, %v428_v9  ;;  %v1964_v15 = vmul.f32 0.001, %v1452_v10  ;;  %v1453_v16 = vld [vmem:[%s7866_s0 + $0xc80] sm:$0xff] }
 0x208   :  { %v2475_v13 = vadd.f32 %v1963_v8, %v939_v7  ;;  %v941_v18 = vmul.f32 0.999, %v429_v11  ;;  %v1965_v19 = vmul.f32 0.001, %v1453_v16  ;;  %v942_v20 = vmul.f32 0.999, %v430_v17 }
 0x209   :  { %2986 = vst [vmem:[#allocation5 + $0xc68] sm:$0xff] %v2474_v12  ;;  %v2476_v21 = vadd.f32 %v1964_v15, %v940_v14  ;;  %v1454_v22 = vld [vmem:[%s7866_s0 + $0xc88] sm:$0xff]  ;;  %v431_v23 = vld [vmem:[#allocation2 + $0xc90] sm:$0xff]  ;;  %v432_v29 = vld [vmem:[#allocation2 + $0xc98] sm:$0xff] }
 0x20a   :  { %2987 = vst [vmem:[#allocation5 + $0xc70] sm:$0xff] %v2475_v13  ;;  %v1455_v24 = vld [vmem:[%s7866_s0 + $0xc90] sm:$0xff]  ;;  %v2477_v25 = vadd.f32 %v1965_v19, %v941_v18  ;;  %v1966_v26 = vmul.f32 0.001, %v1454_v22  ;;  %v943_v27 = vmul.f32 0.999, %v431_v23 }
 0x20b   :  { %v1967_v28 = vmul.f32 0.001, %v1455_v24  ;;  %2988 = vst [vmem:[#allocation5 + $0xc78] sm:$0xff] %v2476_v21  ;;  %v1456_v30 = vld [vmem:[%s7866_s0 + $0xc98] sm:$0xff]  ;;  %v433_v31 = vld [vmem:[#allocation2 + $0xca0] sm:$0xff]  ;;  %v434_v37 = vld [vmem:[#allocation2 + $0xca8] sm:$0xff] }
 0x20c   :  { %2989 = vst [vmem:[#allocation5 + $0xc80] sm:$0xff] %v2477_v25  ;;  %v2478_v32 = vadd.f32 %v1966_v26, %v942_v20  ;;  %v944_v34 = vmul.f32 0.999, %v432_v29  ;;  %v1968_v35 = vmul.f32 0.001, %v1456_v30  ;;  %v1457_v36 = vld [vmem:[%s7866_s0 + $0xca0] sm:$0xff] }
 0x20d   :  { %v2479_v33 = vadd.f32 %v1967_v28, %v943_v27  ;;  %v945_v38 = vmul.f32 0.999, %v433_v31  ;;  %v1969_v39 = vmul.f32 0.001, %v1457_v36  ;;  %v946_v40 = vmul.f32 0.999, %v434_v37 }
 0x20e   :  { %2990 = vst [vmem:[#allocation5 + $0xc88] sm:$0xff] %v2478_v32  ;;  %v2480_v41 = vadd.f32 %v1968_v35, %v944_v34  ;;  %v1458_v42 = vld [vmem:[%s7866_s0 + $0xca8] sm:$0xff]  ;;  %v435_v43 = vld [vmem:[#allocation2 + $0xcb0] sm:$0xff]  ;;  %v436_v49 = vld [vmem:[#allocation2 + $0xcb8] sm:$0xff] }
 0x20f   :  { %2991 = vst [vmem:[#allocation5 + $0xc90] sm:$0xff] %v2479_v33  ;;  %v1459_v44 = vld [vmem:[%s7866_s0 + $0xcb0] sm:$0xff]  ;;  %v2481_v45 = vadd.f32 %v1969_v39, %v945_v38  ;;  %v1970_v46 = vmul.f32 0.001, %v1458_v42  ;;  %v947_v47 = vmul.f32 0.999, %v435_v43 }
 0x210   :  { %v1971_v48 = vmul.f32 0.001, %v1459_v44  ;;  %2992 = vst [vmem:[#allocation5 + $0xc98] sm:$0xff] %v2480_v41  ;;  %v1460_v50 = vld [vmem:[%s7866_s0 + $0xcb8] sm:$0xff]  ;;  %v437_v51 = vld [vmem:[#allocation2 + $0xcc0] sm:$0xff]  ;;  %v438_v57 = vld [vmem:[#allocation2 + $0xcc8] sm:$0xff] }
 0x211   :  { %2993 = vst [vmem:[#allocation5 + $0xca0] sm:$0xff] %v2481_v45  ;;  %v2482_v52 = vadd.f32 %v1970_v46, %v946_v40  ;;  %v948_v54 = vmul.f32 0.999, %v436_v49  ;;  %v1972_v55 = vmul.f32 0.001, %v1460_v50  ;;  %v1461_v56 = vld [vmem:[%s7866_s0 + $0xcc0] sm:$0xff] }
 0x212   :  { %v2483_v53 = vadd.f32 %v1971_v48, %v947_v47  ;;  %v949_v58 = vmul.f32 0.999, %v437_v51  ;;  %v1973_v59 = vmul.f32 0.001, %v1461_v56  ;;  %v950_v60 = vmul.f32 0.999, %v438_v57 }
 0x213   :  { %2994 = vst [vmem:[#allocation5 + $0xca8] sm:$0xff] %v2482_v52  ;;  %v2484_v61 = vadd.f32 %v1972_v55, %v948_v54  ;;  %v1462_v62 = vld [vmem:[%s7866_s0 + $0xcc8] sm:$0xff]  ;;  %v439_v63 = vld [vmem:[#allocation2 + $0xcd0] sm:$0xff]  ;;  %v440_v5 = vld [vmem:[#allocation2 + $0xcd8] sm:$0xff] }
 0x214   :  { %2995 = vst [vmem:[#allocation5 + $0xcb0] sm:$0xff] %v2483_v53  ;;  %v1463_v0 = vld [vmem:[%s7866_s0 + $0xcd0] sm:$0xff]  ;;  %v2485_v1 = vadd.f32 %v1973_v59, %v949_v58  ;;  %v1974_v2 = vmul.f32 0.001, %v1462_v62  ;;  %v951_v3 = vmul.f32 0.999, %v439_v63 }
 0x215   :  { %v1975_v4 = vmul.f32 0.001, %v1463_v0  ;;  %2996 = vst [vmem:[#allocation5 + $0xcb8] sm:$0xff] %v2484_v61  ;;  %v1464_v6 = vld [vmem:[%s7866_s0 + $0xcd8] sm:$0xff]  ;;  %v441_v7 = vld [vmem:[#allocation2 + $0xce0] sm:$0xff]  ;;  %v442_v13 = vld [vmem:[#allocation2 + $0xce8] sm:$0xff] }
 0x216   :  { %2997 = vst [vmem:[#allocation5 + $0xcc0] sm:$0xff] %v2485_v1  ;;  %v2486_v8 = vadd.f32 %v1974_v2, %v950_v60  ;;  %v952_v10 = vmul.f32 0.999, %v440_v5  ;;  %v1976_v11 = vmul.f32 0.001, %v1464_v6  ;;  %v1465_v12 = vld [vmem:[%s7866_s0 + $0xce0] sm:$0xff] }
 0x217   :  { %v2487_v9 = vadd.f32 %v1975_v4, %v951_v3  ;;  %v953_v14 = vmul.f32 0.999, %v441_v7  ;;  %v1977_v15 = vmul.f32 0.001, %v1465_v12  ;;  %v954_v16 = vmul.f32 0.999, %v442_v13 }
 0x218   :  { %v5445_v17 = vld [vmem:[#allocation5] sm:$0xff]  ;;  %v5446_v18 = vld [vmem:[#allocation5 + $0x8] sm:$0xff]  ;;  %2998 = vst [vmem:[#allocation5 + $0xcc8] sm:$0xff] %v2486_v8  ;;  %v2488_v20 = vadd.f32 %v1976_v11, %v952_v10  ;;  %v443_v22 = vld [vmem:[#allocation2 + $0xcf0] sm:$0xff] }
 0x219   :  { %v5182_v19 = vpack.c.bf16 %v5446_v18, %v5445_v17  ;;  %2999 = vst [vmem:[#allocation5 + $0xcd0] sm:$0xff] %v2487_v9  ;;  %v1466_v21 = vld [vmem:[%s7866_s0 + $0xce8] sm:$0xff]  ;;  %v1467_v23 = vld [vmem:[%s7866_s0 + $0xcf0] sm:$0xff]  ;;  %v5448_v25 = vld [vmem:[#allocation5 + $0x18] sm:$0xff]  ;;  %v2489_v33 = vadd.f32 %v1977_v15, %v953_v14  ;;  %v955_v35 = vmul.f32 0.999, %v443_v22 }
 0x21a   :  { %v5447_v24 = vld [vmem:[#allocation5 + $0x10] sm:$0xff]  ;;  %v5449_v27 = vld [vmem:[#allocation5 + $0x20] sm:$0xff]  ;;  %v5450_v28 = vld [vmem:[#allocation5 + $0x28] sm:$0xff]  ;;  %v1978_v34 = vmul.f32 0.001, %v1466_v21  ;;  %3000 = vst [vmem:[#allocation5 + $0xcd8] sm:$0xff] %v2488_v20 }
 0x21b   :  { %v5183_v26 = vpack.c.bf16 %v5448_v25, %v5447_v24  ;;  %v5184_v29 = vpack.c.bf16 %v5450_v28, %v5449_v27  ;;  %v5451_v30 = vld [vmem:[#allocation5 + $0x30] sm:$0xff]  ;;  %v5452_v31 = vld [vmem:[#allocation5 + $0x38] sm:$0xff]  ;;  %v1979_v36 = vmul.f32 0.001, %v1467_v23  ;;  %4637 = vst [vmem:[#allocation6] sm:$0xff] %v5182_v19  ;;  %v445_v39 = vld [vmem:[#allocation2 + $0xd00] sm:$0xff] }
 0x21c   :  { %v5185_v32 = vpack.c.bf16 %v5452_v31, %v5451_v30  ;;  %v444_v37 = vld [vmem:[#allocation2 + $0xcf8] sm:$0xff]  ;;  %v5453_v40 = vld [vmem:[#allocation5 + $0x40] sm:$0xff]  ;;  %v5454_v41 = vld [vmem:[#allocation5 + $0x48] sm:$0xff]  ;;  %3001 = vst [vmem:[#allocation5 + $0xce0] sm:$0xff] %v2489_v33  ;;  %v2490_v52 = vadd.f32 %v1978_v34, %v954_v16  ;;  %v957_v58 = vmul.f32 0.999, %v445_v39 }
 0x21d   :  { %v1468_v38 = vld [vmem:[%s7866_s0 + $0xcf8] sm:$0xff]  ;;  %4638 = vst [vmem:[#allocation6 + $0x8] sm:$0xff] %v5183_v26  ;;  %4639 = vst [vmem:[#allocation6 + $0x10] sm:$0xff] %v5184_v29  ;;  %v5186_v42 = vpack.c.bf16 %v5454_v41, %v5453_v40  ;;  %v5455_v43 = vld [vmem:[#allocation5 + $0x50] sm:$0xff]  ;;  %v2491_v53 = vadd.f32 %v1979_v36, %v955_v35  ;;  %v956_v54 = vmul.f32 0.999, %v444_v37 }
 0x21e   :  { %4640 = vst [vmem:[#allocation6 + $0x18] sm:$0xff] %v5185_v32  ;;  %v5456_v44 = vld [vmem:[#allocation5 + $0x58] sm:$0xff]  ;;  %v5457_v46 = vld [vmem:[#allocation5 + $0x60] sm:$0xff]  ;;  %v5458_v47 = vld [vmem:[#allocation5 + $0x68] sm:$0xff]  ;;  %v1980_v55 = vmul.f32 0.001, %v1468_v38 }
 0x21f   :  { %v5187_v45 = vpack.c.bf16 %v5456_v44, %v5455_v43  ;;  %v5188_v48 = vpack.c.bf16 %v5458_v47, %v5457_v46  ;;  %v5459_v49 = vld [vmem:[#allocation5 + $0x70] sm:$0xff]  ;;  %v5460_v50 = vld [vmem:[#allocation5 + $0x78] sm:$0xff]  ;;  %v1469_v56 = vld [vmem:[%s7866_s0 + $0xd00] sm:$0xff]  ;;  %4641 = vst [vmem:[#allocation6 + $0x20] sm:$0xff] %v5186_v42 }
 0x220   :  { %v5189_v51 = vpack.c.bf16 %v5460_v50, %v5459_v49  ;;  %v446_v57 = vld [vmem:[#allocation2 + $0xd08] sm:$0xff]  ;;  %v1981_v59 = vmul.f32 0.001, %v1469_v56  ;;  %v5461_v61 = vld [vmem:[#allocation5 + $0x80] sm:$0xff]  ;;  %3002 = vst [vmem:[#allocation5 + $0xce8] sm:$0xff] %v2490_v52  ;;  %3003 = vst [vmem:[#allocation5 + $0xcf0] sm:$0xff] %v2491_v53  ;;  %v2492_v0 = vadd.f32 %v1980_v55, %v956_v54 }
 0x221   :  { %v958_v60 = vmul.f32 0.999, %v446_v57  ;;  %4642 = vst [vmem:[#allocation6 + $0x28] sm:$0xff] %v5187_v45  ;;  %4643 = vst [vmem:[#allocation6 + $0x30] sm:$0xff] %v5188_v48  ;;  %v5462_v62 = vld [vmem:[#allocation5 + $0x88] sm:$0xff]  ;;  %v447_v2 = vld [vmem:[#allocation2 + $0xd10] sm:$0xff] }
 0x222   :  { %4644 = vst [vmem:[#allocation6 + $0x38] sm:$0xff] %v5189_v51  ;;  %v5190_v63 = vpack.c.bf16 %v5462_v62, %v5461_v61  ;;  %v1470_v1 = vld [vmem:[%s7866_s0 + $0xd08] sm:$0xff]  ;;  %v1471_v3 = vld [vmem:[%s7866_s0 + $0xd10] sm:$0xff]  ;;  %v5464_v5 = vld [vmem:[#allocation5 + $0x98] sm:$0xff]  ;;  %v2493_v13 = vadd.f32 %v1981_v59, %v957_v58  ;;  %v959_v15 = vmul.f32 0.999, %v447_v2 }
 0x223   :  { %v5463_v4 = vld [vmem:[#allocation5 + $0x90] sm:$0xff]  ;;  %v5465_v7 = vld [vmem:[#allocation5 + $0xa0] sm:$0xff]  ;;  %v5466_v8 = vld [vmem:[#allocation5 + $0xa8] sm:$0xff]  ;;  %v1982_v14 = vmul.f32 0.001, %v1470_v1  ;;  %3004 = vst [vmem:[#allocation5 + $0xcf8] sm:$0xff] %v2492_v0 }
 0x224   :  { %v5191_v6 = vpack.c.bf16 %v5464_v5, %v5463_v4  ;;  %v5192_v9 = vpack.c.bf16 %v5466_v8, %v5465_v7  ;;  %v5467_v10 = vld [vmem:[#allocation5 + $0xb0] sm:$0xff]  ;;  %v5468_v11 = vld [vmem:[#allocation5 + $0xb8] sm:$0xff]  ;;  %v1983_v16 = vmul.f32 0.001, %v1471_v3  ;;  %4645 = vst [vmem:[#allocation6 + $0x40] sm:$0xff] %v5190_v63  ;;  %v449_v19 = vld [vmem:[#allocation2 + $0xd20] sm:$0xff] }
 0x225   :  { %v5193_v12 = vpack.c.bf16 %v5468_v11, %v5467_v10  ;;  %v448_v17 = vld [vmem:[#allocation2 + $0xd18] sm:$0xff]  ;;  %v5469_v20 = vld [vmem:[#allocation5 + $0xc0] sm:$0xff]  ;;  %v5470_v21 = vld [vmem:[#allocation5 + $0xc8] sm:$0xff]  ;;  %3005 = vst [vmem:[#allocation5 + $0xd00] sm:$0xff] %v2493_v13  ;;  %v2494_v32 = vadd.f32 %v1982_v14, %v958_v60  ;;  %v961_v38 = vmul.f32 0.999, %v449_v19 }
 0x226   :  { %v1472_v18 = vld [vmem:[%s7866_s0 + $0xd18] sm:$0xff]  ;;  %4646 = vst [vmem:[#allocation6 + $0x48] sm:$0xff] %v5191_v6  ;;  %4647 = vst [vmem:[#allocation6 + $0x50] sm:$0xff] %v5192_v9  ;;  %v5194_v22 = vpack.c.bf16 %v5470_v21, %v5469_v20  ;;  %v5471_v23 = vld [vmem:[#allocation5 + $0xd0] sm:$0xff]  ;;  %v2495_v33 = vadd.f32 %v1983_v16, %v959_v15  ;;  %v960_v34 = vmul.f32 0.999, %v448_v17 }
 0x227   :  { %4648 = vst [vmem:[#allocation6 + $0x58] sm:$0xff] %v5193_v12  ;;  %v5472_v24 = vld [vmem:[#allocation5 + $0xd8] sm:$0xff]  ;;  %v5473_v26 = vld [vmem:[#allocation5 + $0xe0] sm:$0xff]  ;;  %v5474_v27 = vld [vmem:[#allocation5 + $0xe8] sm:$0xff]  ;;  %v1984_v35 = vmul.f32 0.001, %v1472_v18 }
 0x228   :  { %v5195_v25 = vpack.c.bf16 %v5472_v24, %v5471_v23  ;;  %v5196_v28 = vpack.c.bf16 %v5474_v27, %v5473_v26  ;;  %v5475_v29 = vld [vmem:[#allocation5 + $0xf0] sm:$0xff]  ;;  %v5476_v30 = vld [vmem:[#allocation5 + $0xf8] sm:$0xff]  ;;  %v1473_v36 = vld [vmem:[%s7866_s0 + $0xd20] sm:$0xff]  ;;  %4649 = vst [vmem:[#allocation6 + $0x60] sm:$0xff] %v5194_v22 }
 0x229   :  { %v5197_v31 = vpack.c.bf16 %v5476_v30, %v5475_v29  ;;  %v450_v37 = vld [vmem:[#allocation2 + $0xd28] sm:$0xff]  ;;  %v1985_v39 = vmul.f32 0.001, %v1473_v36  ;;  %v5477_v41 = vld [vmem:[#allocation5 + $0x100] sm:$0xff]  ;;  %3006 = vst [vmem:[#allocation5 + $0xd08] sm:$0xff] %v2494_v32  ;;  %3007 = vst [vmem:[#allocation5 + $0xd10] sm:$0xff] %v2495_v33  ;;  %v2496_v44 = vadd.f32 %v1984_v35, %v960_v34 }
 0x22a   :  { %v962_v40 = vmul.f32 0.999, %v450_v37  ;;  %4650 = vst [vmem:[#allocation6 + $0x68] sm:$0xff] %v5195_v25  ;;  %4651 = vst [vmem:[#allocation6 + $0x70] sm:$0xff] %v5196_v28  ;;  %v5478_v42 = vld [vmem:[#allocation5 + $0x108] sm:$0xff]  ;;  %v451_v46 = vld [vmem:[#allocation2 + $0xd30] sm:$0xff] }
 0x22b   :  { %4652 = vst [vmem:[#allocation6 + $0x78] sm:$0xff] %v5197_v31  ;;  %v5198_v43 = vpack.c.bf16 %v5478_v42, %v5477_v41  ;;  %v1474_v45 = vld [vmem:[%s7866_s0 + $0xd28] sm:$0xff]  ;;  %v1475_v47 = vld [vmem:[%s7866_s0 + $0xd30] sm:$0xff]  ;;  %v5480_v49 = vld [vmem:[#allocation5 + $0x118] sm:$0xff]  ;;  %v2497_v57 = vadd.f32 %v1985_v39, %v961_v38  ;;  %v963_v59 = vmul.f32 0.999, %v451_v46 }
 0x22c   :  { %v5479_v48 = vld [vmem:[#allocation5 + $0x110] sm:$0xff]  ;;  %v5481_v51 = vld [vmem:[#allocation5 + $0x120] sm:$0xff]  ;;  %v5482_v52 = vld [vmem:[#allocation5 + $0x128] sm:$0xff]  ;;  %v1986_v58 = vmul.f32 0.001, %v1474_v45  ;;  %3008 = vst [vmem:[#allocation5 + $0xd18] sm:$0xff] %v2496_v44 }
 0x22d   :  { %v5199_v50 = vpack.c.bf16 %v5480_v49, %v5479_v48  ;;  %v5200_v53 = vpack.c.bf16 %v5482_v52, %v5481_v51  ;;  %v5483_v54 = vld [vmem:[#allocation5 + $0x130] sm:$0xff]  ;;  %v5484_v55 = vld [vmem:[#allocation5 + $0x138] sm:$0xff]  ;;  %v1987_v60 = vmul.f32 0.001, %v1475_v47  ;;  %4653 = vst [vmem:[#allocation6 + $0x80] sm:$0xff] %v5198_v43  ;;  %v453_v63 = vld [vmem:[#allocation2 + $0xd40] sm:$0xff] }
 0x22e   :  { %v5201_v56 = vpack.c.bf16 %v5484_v55, %v5483_v54  ;;  %v452_v61 = vld [vmem:[#allocation2 + $0xd38] sm:$0xff]  ;;  %v5485_v0 = vld [vmem:[#allocation5 + $0x140] sm:$0xff]  ;;  %v5486_v1 = vld [vmem:[#allocation5 + $0x148] sm:$0xff]  ;;  %3009 = vst [vmem:[#allocation5 + $0xd20] sm:$0xff] %v2497_v57  ;;  %v2498_v12 = vadd.f32 %v1986_v58, %v962_v40  ;;  %v965_v18 = vmul.f32 0.999, %v453_v63 }
 0x22f   :  { %v1476_v62 = vld [vmem:[%s7866_s0 + $0xd38] sm:$0xff]  ;;  %4654 = vst [vmem:[#allocation6 + $0x88] sm:$0xff] %v5199_v50  ;;  %4655 = vst [vmem:[#allocation6 + $0x90] sm:$0xff] %v5200_v53  ;;  %v5202_v2 = vpack.c.bf16 %v5486_v1, %v5485_v0  ;;  %v5487_v3 = vld [vmem:[#allocation5 + $0x150] sm:$0xff]  ;;  %v2499_v13 = vadd.f32 %v1987_v60, %v963_v59  ;;  %v964_v14 = vmul.f32 0.999, %v452_v61 }
 0x230   :  { %4656 = vst [vmem:[#allocation6 + $0x98] sm:$0xff] %v5201_v56  ;;  %v5488_v4 = vld [vmem:[#allocation5 + $0x158] sm:$0xff]  ;;  %v5489_v6 = vld [vmem:[#allocation5 + $0x160] sm:$0xff]  ;;  %v5490_v7 = vld [vmem:[#allocation5 + $0x168] sm:$0xff]  ;;  %v1988_v15 = vmul.f32 0.001, %v1476_v62 }
 0x231   :  { %v5203_v5 = vpack.c.bf16 %v5488_v4, %v5487_v3  ;;  %v5204_v8 = vpack.c.bf16 %v5490_v7, %v5489_v6  ;;  %v5491_v9 = vld [vmem:[#allocation5 + $0x170] sm:$0xff]  ;;  %v5492_v10 = vld [vmem:[#allocation5 + $0x178] sm:$0xff]  ;;  %v1477_v16 = vld [vmem:[%s7866_s0 + $0xd40] sm:$0xff]  ;;  %4657 = vst [vmem:[#allocation6 + $0xa0] sm:$0xff] %v5202_v2 }
 0x232   :  { %v5205_v11 = vpack.c.bf16 %v5492_v10, %v5491_v9  ;;  %v454_v17 = vld [vmem:[#allocation2 + $0xd48] sm:$0xff]  ;;  %v1989_v19 = vmul.f32 0.001, %v1477_v16  ;;  %v5493_v21 = vld [vmem:[#allocation5 + $0x180] sm:$0xff]  ;;  %3010 = vst [vmem:[#allocation5 + $0xd28] sm:$0xff] %v2498_v12  ;;  %3011 = vst [vmem:[#allocation5 + $0xd30] sm:$0xff] %v2499_v13  ;;  %v2500_v24 = vadd.f32 %v1988_v15, %v964_v14 }
 0x233   :  { %v966_v20 = vmul.f32 0.999, %v454_v17  ;;  %4658 = vst [vmem:[#allocation6 + $0xa8] sm:$0xff] %v5203_v5  ;;  %4659 = vst [vmem:[#allocation6 + $0xb0] sm:$0xff] %v5204_v8  ;;  %v5494_v22 = vld [vmem:[#allocation5 + $0x188] sm:$0xff]  ;;  %v455_v26 = vld [vmem:[#allocation2 + $0xd50] sm:$0xff] }
 0x234   :  { %4660 = vst [vmem:[#allocation6 + $0xb8] sm:$0xff] %v5205_v11  ;;  %v5206_v23 = vpack.c.bf16 %v5494_v22, %v5493_v21  ;;  %v1478_v25 = vld [vmem:[%s7866_s0 + $0xd48] sm:$0xff]  ;;  %v1479_v27 = vld [vmem:[%s7866_s0 + $0xd50] sm:$0xff]  ;;  %v5496_v29 = vld [vmem:[#allocation5 + $0x198] sm:$0xff]  ;;  %v2501_v37 = vadd.f32 %v1989_v19, %v965_v18  ;;  %v967_v39 = vmul.f32 0.999, %v455_v26 }
 0x235   :  { %v5495_v28 = vld [vmem:[#allocation5 + $0x190] sm:$0xff]  ;;  %v5497_v31 = vld [vmem:[#allocation5 + $0x1a0] sm:$0xff]  ;;  %v5498_v32 = vld [vmem:[#allocation5 + $0x1a8] sm:$0xff]  ;;  %v1990_v38 = vmul.f32 0.001, %v1478_v25  ;;  %3012 = vst [vmem:[#allocation5 + $0xd38] sm:$0xff] %v2500_v24 }
 0x236   :  { %v5207_v30 = vpack.c.bf16 %v5496_v29, %v5495_v28  ;;  %v5208_v33 = vpack.c.bf16 %v5498_v32, %v5497_v31  ;;  %v5499_v34 = vld [vmem:[#allocation5 + $0x1b0] sm:$0xff]  ;;  %v5500_v35 = vld [vmem:[#allocation5 + $0x1b8] sm:$0xff]  ;;  %v1991_v40 = vmul.f32 0.001, %v1479_v27  ;;  %4661 = vst [vmem:[#allocation6 + $0xc0] sm:$0xff] %v5206_v23  ;;  %v457_v43 = vld [vmem:[#allocation2 + $0xd60] sm:$0xff] }
 0x237   :  { %v5209_v36 = vpack.c.bf16 %v5500_v35, %v5499_v34  ;;  %v456_v41 = vld [vmem:[#allocation2 + $0xd58] sm:$0xff]  ;;  %v5501_v44 = vld [vmem:[#allocation5 + $0x1c0] sm:$0xff]  ;;  %v5502_v45 = vld [vmem:[#allocation5 + $0x1c8] sm:$0xff]  ;;  %3013 = vst [vmem:[#allocation5 + $0xd40] sm:$0xff] %v2501_v37  ;;  %v2502_v56 = vadd.f32 %v1990_v38, %v966_v20  ;;  %v969_v62 = vmul.f32 0.999, %v457_v43 }
 0x238   :  { %v1480_v42 = vld [vmem:[%s7866_s0 + $0xd58] sm:$0xff]  ;;  %4662 = vst [vmem:[#allocation6 + $0xc8] sm:$0xff] %v5207_v30  ;;  %4663 = vst [vmem:[#allocation6 + $0xd0] sm:$0xff] %v5208_v33  ;;  %v5210_v46 = vpack.c.bf16 %v5502_v45, %v5501_v44  ;;  %v5503_v47 = vld [vmem:[#allocation5 + $0x1d0] sm:$0xff]  ;;  %v2503_v57 = vadd.f32 %v1991_v40, %v967_v39  ;;  %v968_v58 = vmul.f32 0.999, %v456_v41 }
 0x239   :  { %4664 = vst [vmem:[#allocation6 + $0xd8] sm:$0xff] %v5209_v36  ;;  %v5504_v48 = vld [vmem:[#allocation5 + $0x1d8] sm:$0xff]  ;;  %v5505_v50 = vld [vmem:[#allocation5 + $0x1e0] sm:$0xff]  ;;  %v5506_v51 = vld [vmem:[#allocation5 + $0x1e8] sm:$0xff]  ;;  %v1992_v59 = vmul.f32 0.001, %v1480_v42 }
 0x23a   :  { %v5211_v49 = vpack.c.bf16 %v5504_v48, %v5503_v47  ;;  %v5212_v52 = vpack.c.bf16 %v5506_v51, %v5505_v50  ;;  %v5507_v53 = vld [vmem:[#allocation5 + $0x1f0] sm:$0xff]  ;;  %v5508_v54 = vld [vmem:[#allocation5 + $0x1f8] sm:$0xff]  ;;  %v1481_v60 = vld [vmem:[%s7866_s0 + $0xd60] sm:$0xff]  ;;  %4665 = vst [vmem:[#allocation6 + $0xe0] sm:$0xff] %v5210_v46 }
 0x23b   :  { %v5213_v55 = vpack.c.bf16 %v5508_v54, %v5507_v53  ;;  %v458_v61 = vld [vmem:[#allocation2 + $0xd68] sm:$0xff]  ;;  %v1993_v63 = vmul.f32 0.001, %v1481_v60  ;;  %v5509_v1 = vld [vmem:[#allocation5 + $0x200] sm:$0xff]  ;;  %3014 = vst [vmem:[#allocation5 + $0xd48] sm:$0xff] %v2502_v56  ;;  %3015 = vst [vmem:[#allocation5 + $0xd50] sm:$0xff] %v2503_v57  ;;  %v2504_v4 = vadd.f32 %v1992_v59, %v968_v58 }
 0x23c   :  { %v970_v0 = vmul.f32 0.999, %v458_v61  ;;  %4666 = vst [vmem:[#allocation6 + $0xe8] sm:$0xff] %v5211_v49  ;;  %4667 = vst [vmem:[#allocation6 + $0xf0] sm:$0xff] %v5212_v52  ;;  %v5510_v2 = vld [vmem:[#allocation5 + $0x208] sm:$0xff]  ;;  %v459_v6 = vld [vmem:[#allocation2 + $0xd70] sm:$0xff] }
 0x23d   :  { %4668 = vst [vmem:[#allocation6 + $0xf8] sm:$0xff] %v5213_v55  ;;  %v5214_v3 = vpack.c.bf16 %v5510_v2, %v5509_v1  ;;  %v1482_v5 = vld [vmem:[%s7866_s0 + $0xd68] sm:$0xff]  ;;  %v1483_v7 = vld [vmem:[%s7866_s0 + $0xd70] sm:$0xff]  ;;  %v5512_v9 = vld [vmem:[#allocation5 + $0x218] sm:$0xff]  ;;  %v2505_v17 = vadd.f32 %v1993_v63, %v969_v62  ;;  %v971_v19 = vmul.f32 0.999, %v459_v6 }
 0x23e   :  { %v5511_v8 = vld [vmem:[#allocation5 + $0x210] sm:$0xff]  ;;  %v5513_v11 = vld [vmem:[#allocation5 + $0x220] sm:$0xff]  ;;  %v5514_v12 = vld [vmem:[#allocation5 + $0x228] sm:$0xff]  ;;  %v1994_v18 = vmul.f32 0.001, %v1482_v5  ;;  %3016 = vst [vmem:[#allocation5 + $0xd58] sm:$0xff] %v2504_v4 }
 0x23f   :  { %v5215_v10 = vpack.c.bf16 %v5512_v9, %v5511_v8  ;;  %v5216_v13 = vpack.c.bf16 %v5514_v12, %v5513_v11  ;;  %v5515_v14 = vld [vmem:[#allocation5 + $0x230] sm:$0xff]  ;;  %v5516_v15 = vld [vmem:[#allocation5 + $0x238] sm:$0xff]  ;;  %v1995_v20 = vmul.f32 0.001, %v1483_v7  ;;  %4669 = vst [vmem:[#allocation6 + $0x100] sm:$0xff] %v5214_v3  ;;  %v461_v23 = vld [vmem:[#allocation2 + $0xd80] sm:$0xff] }
 0x240   :  { %v5217_v16 = vpack.c.bf16 %v5516_v15, %v5515_v14  ;;  %v460_v21 = vld [vmem:[#allocation2 + $0xd78] sm:$0xff]  ;;  %v5517_v24 = vld [vmem:[#allocation5 + $0x240] sm:$0xff]  ;;  %v5518_v25 = vld [vmem:[#allocation5 + $0x248] sm:$0xff]  ;;  %3017 = vst [vmem:[#allocation5 + $0xd60] sm:$0xff] %v2505_v17  ;;  %v2506_v36 = vadd.f32 %v1994_v18, %v970_v0  ;;  %v973_v42 = vmul.f32 0.999, %v461_v23 }
 0x241   :  { %v1484_v22 = vld [vmem:[%s7866_s0 + $0xd78] sm:$0xff]  ;;  %4670 = vst [vmem:[#allocation6 + $0x108] sm:$0xff] %v5215_v10  ;;  %4671 = vst [vmem:[#allocation6 + $0x110] sm:$0xff] %v5216_v13  ;;  %v5218_v26 = vpack.c.bf16 %v5518_v25, %v5517_v24  ;;  %v5519_v27 = vld [vmem:[#allocation5 + $0x250] sm:$0xff]  ;;  %v2507_v37 = vadd.f32 %v1995_v20, %v971_v19  ;;  %v972_v38 = vmul.f32 0.999, %v460_v21 }
 0x242   :  { %4672 = vst [vmem:[#allocation6 + $0x118] sm:$0xff] %v5217_v16  ;;  %v5520_v28 = vld [vmem:[#allocation5 + $0x258] sm:$0xff]  ;;  %v5521_v30 = vld [vmem:[#allocation5 + $0x260] sm:$0xff]  ;;  %v5522_v31 = vld [vmem:[#allocation5 + $0x268] sm:$0xff]  ;;  %v1996_v39 = vmul.f32 0.001, %v1484_v22 }
 0x243   :  { %v5219_v29 = vpack.c.bf16 %v5520_v28, %v5519_v27  ;;  %v5220_v32 = vpack.c.bf16 %v5522_v31, %v5521_v30  ;;  %v5523_v33 = vld [vmem:[#allocation5 + $0x270] sm:$0xff]  ;;  %v5524_v34 = vld [vmem:[#allocation5 + $0x278] sm:$0xff]  ;;  %v1485_v40 = vld [vmem:[%s7866_s0 + $0xd80] sm:$0xff]  ;;  %4673 = vst [vmem:[#allocation6 + $0x120] sm:$0xff] %v5218_v26 }
 0x244   :  { %v5221_v35 = vpack.c.bf16 %v5524_v34, %v5523_v33  ;;  %v462_v41 = vld [vmem:[#allocation2 + $0xd88] sm:$0xff]  ;;  %v1997_v43 = vmul.f32 0.001, %v1485_v40  ;;  %v5525_v45 = vld [vmem:[#allocation5 + $0x280] sm:$0xff]  ;;  %3018 = vst [vmem:[#allocation5 + $0xd68] sm:$0xff] %v2506_v36  ;;  %3019 = vst [vmem:[#allocation5 + $0xd70] sm:$0xff] %v2507_v37  ;;  %v2508_v48 = vadd.f32 %v1996_v39, %v972_v38 }
 0x245   :  { %v974_v44 = vmul.f32 0.999, %v462_v41  ;;  %4674 = vst [vmem:[#allocation6 + $0x128] sm:$0xff] %v5219_v29  ;;  %4675 = vst [vmem:[#allocation6 + $0x130] sm:$0xff] %v5220_v32  ;;  %v5526_v46 = vld [vmem:[#allocation5 + $0x288] sm:$0xff]  ;;  %v463_v50 = vld [vmem:[#allocation2 + $0xd90] sm:$0xff] }
 0x246   :  { %4676 = vst [vmem:[#allocation6 + $0x138] sm:$0xff] %v5221_v35  ;;  %v5222_v47 = vpack.c.bf16 %v5526_v46, %v5525_v45  ;;  %v1486_v49 = vld [vmem:[%s7866_s0 + $0xd88] sm:$0xff]  ;;  %v1487_v51 = vld [vmem:[%s7866_s0 + $0xd90] sm:$0xff]  ;;  %v5528_v53 = vld [vmem:[#allocation5 + $0x298] sm:$0xff]  ;;  %v2509_v61 = vadd.f32 %v1997_v43, %v973_v42  ;;  %v975_v63 = vmul.f32 0.999, %v463_v50 }
 0x247   :  { %v5527_v52 = vld [vmem:[#allocation5 + $0x290] sm:$0xff]  ;;  %v5529_v55 = vld [vmem:[#allocation5 + $0x2a0] sm:$0xff]  ;;  %v5530_v56 = vld [vmem:[#allocation5 + $0x2a8] sm:$0xff]  ;;  %v1998_v62 = vmul.f32 0.001, %v1486_v49  ;;  %3020 = vst [vmem:[#allocation5 + $0xd78] sm:$0xff] %v2508_v48 }
 0x248   :  { %v5223_v54 = vpack.c.bf16 %v5528_v53, %v5527_v52  ;;  %v5224_v57 = vpack.c.bf16 %v5530_v56, %v5529_v55  ;;  %v5531_v58 = vld [vmem:[#allocation5 + $0x2b0] sm:$0xff]  ;;  %v5532_v59 = vld [vmem:[#allocation5 + $0x2b8] sm:$0xff]  ;;  %v1999_v0 = vmul.f32 0.001, %v1487_v51  ;;  %4677 = vst [vmem:[#allocation6 + $0x140] sm:$0xff] %v5222_v47  ;;  %v465_v3 = vld [vmem:[#allocation2 + $0xda0] sm:$0xff] }
 0x249   :  { %v5225_v60 = vpack.c.bf16 %v5532_v59, %v5531_v58  ;;  %v464_v1 = vld [vmem:[#allocation2 + $0xd98] sm:$0xff]  ;;  %v5533_v4 = vld [vmem:[#allocation5 + $0x2c0] sm:$0xff]  ;;  %v5534_v5 = vld [vmem:[#allocation5 + $0x2c8] sm:$0xff]  ;;  %3021 = vst [vmem:[#allocation5 + $0xd80] sm:$0xff] %v2509_v61  ;;  %v2510_v16 = vadd.f32 %v1998_v62, %v974_v44  ;;  %v977_v22 = vmul.f32 0.999, %v465_v3 }
 0x24a   :  { %v1488_v2 = vld [vmem:[%s7866_s0 + $0xd98] sm:$0xff]  ;;  %4678 = vst [vmem:[#allocation6 + $0x148] sm:$0xff] %v5223_v54  ;;  %4679 = vst [vmem:[#allocation6 + $0x150] sm:$0xff] %v5224_v57  ;;  %v5226_v6 = vpack.c.bf16 %v5534_v5, %v5533_v4  ;;  %v5535_v7 = vld [vmem:[#allocation5 + $0x2d0] sm:$0xff]  ;;  %v2511_v17 = vadd.f32 %v1999_v0, %v975_v63  ;;  %v976_v18 = vmul.f32 0.999, %v464_v1 }
 0x24b   :  { %4680 = vst [vmem:[#allocation6 + $0x158] sm:$0xff] %v5225_v60  ;;  %v5536_v8 = vld [vmem:[#allocation5 + $0x2d8] sm:$0xff]  ;;  %v5537_v10 = vld [vmem:[#allocation5 + $0x2e0] sm:$0xff]  ;;  %v5538_v11 = vld [vmem:[#allocation5 + $0x2e8] sm:$0xff]  ;;  %v2000_v19 = vmul.f32 0.001, %v1488_v2 }
 0x24c   :  { %v5227_v9 = vpack.c.bf16 %v5536_v8, %v5535_v7  ;;  %v5228_v12 = vpack.c.bf16 %v5538_v11, %v5537_v10  ;;  %v5539_v13 = vld [vmem:[#allocation5 + $0x2f0] sm:$0xff]  ;;  %v5540_v14 = vld [vmem:[#allocation5 + $0x2f8] sm:$0xff]  ;;  %v1489_v20 = vld [vmem:[%s7866_s0 + $0xda0] sm:$0xff]  ;;  %4681 = vst [vmem:[#allocation6 + $0x160] sm:$0xff] %v5226_v6 }
 0x24d   :  { %v5229_v15 = vpack.c.bf16 %v5540_v14, %v5539_v13  ;;  %v466_v21 = vld [vmem:[#allocation2 + $0xda8] sm:$0xff]  ;;  %v2001_v23 = vmul.f32 0.001, %v1489_v20  ;;  %v5541_v25 = vld [vmem:[#allocation5 + $0x300] sm:$0xff]  ;;  %3022 = vst [vmem:[#allocation5 + $0xd88] sm:$0xff] %v2510_v16  ;;  %3023 = vst [vmem:[#allocation5 + $0xd90] sm:$0xff] %v2511_v17  ;;  %v2512_v28 = vadd.f32 %v2000_v19, %v976_v18 }
 0x24e   :  { %v978_v24 = vmul.f32 0.999, %v466_v21  ;;  %4682 = vst [vmem:[#allocation6 + $0x168] sm:$0xff] %v5227_v9  ;;  %4683 = vst [vmem:[#allocation6 + $0x170] sm:$0xff] %v5228_v12  ;;  %v5542_v26 = vld [vmem:[#allocation5 + $0x308] sm:$0xff]  ;;  %v467_v30 = vld [vmem:[#allocation2 + $0xdb0] sm:$0xff] }
 0x24f   :  { %4684 = vst [vmem:[#allocation6 + $0x178] sm:$0xff] %v5229_v15  ;;  %v5230_v27 = vpack.c.bf16 %v5542_v26, %v5541_v25  ;;  %v1490_v29 = vld [vmem:[%s7866_s0 + $0xda8] sm:$0xff]  ;;  %v1491_v31 = vld [vmem:[%s7866_s0 + $0xdb0] sm:$0xff]  ;;  %v5544_v33 = vld [vmem:[#allocation5 + $0x318] sm:$0xff]  ;;  %v2513_v41 = vadd.f32 %v2001_v23, %v977_v22  ;;  %v979_v43 = vmul.f32 0.999, %v467_v30 }
 0x250   :  { %v5543_v32 = vld [vmem:[#allocation5 + $0x310] sm:$0xff]  ;;  %v5545_v35 = vld [vmem:[#allocation5 + $0x320] sm:$0xff]  ;;  %v5546_v36 = vld [vmem:[#allocation5 + $0x328] sm:$0xff]  ;;  %v2002_v42 = vmul.f32 0.001, %v1490_v29  ;;  %3024 = vst [vmem:[#allocation5 + $0xd98] sm:$0xff] %v2512_v28 }
 0x251   :  { %v5231_v34 = vpack.c.bf16 %v5544_v33, %v5543_v32  ;;  %v5232_v37 = vpack.c.bf16 %v5546_v36, %v5545_v35  ;;  %v5547_v38 = vld [vmem:[#allocation5 + $0x330] sm:$0xff]  ;;  %v5548_v39 = vld [vmem:[#allocation5 + $0x338] sm:$0xff]  ;;  %v2003_v44 = vmul.f32 0.001, %v1491_v31  ;;  %4685 = vst [vmem:[#allocation6 + $0x180] sm:$0xff] %v5230_v27  ;;  %v469_v47 = vld [vmem:[#allocation2 + $0xdc0] sm:$0xff] }
 0x252   :  { %v5233_v40 = vpack.c.bf16 %v5548_v39, %v5547_v38  ;;  %v468_v45 = vld [vmem:[#allocation2 + $0xdb8] sm:$0xff]  ;;  %v5549_v48 = vld [vmem:[#allocation5 + $0x340] sm:$0xff]  ;;  %v5550_v49 = vld [vmem:[#allocation5 + $0x348] sm:$0xff]  ;;  %3025 = vst [vmem:[#allocation5 + $0xda0] sm:$0xff] %v2513_v41  ;;  %v2514_v60 = vadd.f32 %v2002_v42, %v978_v24  ;;  %v981_v2 = vmul.f32 0.999, %v469_v47 }
 0x253   :  { %v1492_v46 = vld [vmem:[%s7866_s0 + $0xdb8] sm:$0xff]  ;;  %4686 = vst [vmem:[#allocation6 + $0x188] sm:$0xff] %v5231_v34  ;;  %4687 = vst [vmem:[#allocation6 + $0x190] sm:$0xff] %v5232_v37  ;;  %v5234_v50 = vpack.c.bf16 %v5550_v49, %v5549_v48  ;;  %v5551_v51 = vld [vmem:[#allocation5 + $0x350] sm:$0xff]  ;;  %v7317_v61 = vadd.f32 %v2003_v44, %v979_v43  ;;  %v980_v62 = vmul.f32 0.999, %v468_v45 }
 0x254   :  { %4688 = vst [vmem:[#allocation6 + $0x198] sm:$0xff] %v5233_v40  ;;  %v5552_v52 = vld [vmem:[#allocation5 + $0x358] sm:$0xff]  ;;  %v5553_v54 = vld [vmem:[#allocation5 + $0x360] sm:$0xff]  ;;  %v5554_v55 = vld [vmem:[#allocation5 + $0x368] sm:$0xff]  ;;  %v2004_v63 = vmul.f32 0.001, %v1492_v46 }
 0x255   :  { %v5235_v53 = vpack.c.bf16 %v5552_v52, %v5551_v51  ;;  %v5236_v56 = vpack.c.bf16 %v5554_v55, %v5553_v54  ;;  %v5555_v57 = vld [vmem:[#allocation5 + $0x370] sm:$0xff]  ;;  %v5556_v58 = vld [vmem:[#allocation5 + $0x378] sm:$0xff]  ;;  %v1493_v0 = vld [vmem:[%s7866_s0 + $0xdc0] sm:$0xff]  ;;  %4689 = vst [vmem:[#allocation6 + $0x1a0] sm:$0xff] %v5234_v50 }
 0x256   :  { %v5237_v59 = vpack.c.bf16 %v5556_v58, %v5555_v57  ;;  %v470_v1 = vld [vmem:[#allocation2 + $0xdc8] sm:$0xff]  ;;  %v2005_v3 = vmul.f32 0.001, %v1493_v0  ;;  %v5557_v5 = vld [vmem:[#allocation5 + $0x380] sm:$0xff]  ;;  %3026 = vst [vmem:[#allocation5 + $0xda8] sm:$0xff] %v2514_v60  ;;  %3027 = vst [vmem:[#allocation5 + $0xdb0] sm:$0xff] %v7317_v61  ;;  %v7323_v8 = vadd.f32 %v2004_v63, %v980_v62 }
 0x257   :  { %v982_v4 = vmul.f32 0.999, %v470_v1  ;;  %4690 = vst [vmem:[#allocation6 + $0x1a8] sm:$0xff] %v5235_v53  ;;  %4691 = vst [vmem:[#allocation6 + $0x1b0] sm:$0xff] %v5236_v56  ;;  %v5558_v6 = vld [vmem:[#allocation5 + $0x388] sm:$0xff]  ;;  %v471_v10 = vld [vmem:[#allocation2 + $0xdd0] sm:$0xff] }
 0x258   :  { %4692 = vst [vmem:[#allocation6 + $0x1b8] sm:$0xff] %v5237_v59  ;;  %v5238_v7 = vpack.c.bf16 %v5558_v6, %v5557_v5  ;;  %v1494_v9 = vld [vmem:[%s7866_s0 + $0xdc8] sm:$0xff]  ;;  %v1495_v11 = vld [vmem:[%s7866_s0 + $0xdd0] sm:$0xff]  ;;  %v5560_v13 = vld [vmem:[#allocation5 + $0x398] sm:$0xff]  ;;  %v7331_v21 = vadd.f32 %v2005_v3, %v981_v2  ;;  %v983_v23 = vmul.f32 0.999, %v471_v10 }
 0x259   :  { %v5559_v12 = vld [vmem:[#allocation5 + $0x390] sm:$0xff]  ;;  %v5561_v15 = vld [vmem:[#allocation5 + $0x3a0] sm:$0xff]  ;;  %v5562_v16 = vld [vmem:[#allocation5 + $0x3a8] sm:$0xff]  ;;  %v2006_v22 = vmul.f32 0.001, %v1494_v9  ;;  %3028 = vst [vmem:[#allocation5 + $0xdb8] sm:$0xff] %v7323_v8 }
 0x25a   :  { %v5239_v14 = vpack.c.bf16 %v5560_v13, %v5559_v12  ;;  %v5240_v17 = vpack.c.bf16 %v5562_v16, %v5561_v15  ;;  %v5563_v18 = vld [vmem:[#allocation5 + $0x3b0] sm:$0xff]  ;;  %v5564_v19 = vld [vmem:[#allocation5 + $0x3b8] sm:$0xff]  ;;  %v2007_v24 = vmul.f32 0.001, %v1495_v11  ;;  %4693 = vst [vmem:[#allocation6 + $0x1c0] sm:$0xff] %v5238_v7  ;;  %v473_v27 = vld [vmem:[#allocation2 + $0xde0] sm:$0xff] }
 0x25b   :  { %v5241_v20 = vpack.c.bf16 %v5564_v19, %v5563_v18  ;;  %v472_v25 = vld [vmem:[#allocation2 + $0xdd8] sm:$0xff]  ;;  %v5565_v28 = vld [vmem:[#allocation5 + $0x3c0] sm:$0xff]  ;;  %v5566_v29 = vld [vmem:[#allocation5 + $0x3c8] sm:$0xff]  ;;  %3029 = vst [vmem:[#allocation5 + $0xdc0] sm:$0xff] %v7331_v21  ;;  %v7338_v40 = vadd.f32 %v2006_v22, %v982_v4  ;;  %v985_v46 = vmul.f32 0.999, %v473_v27 }
 0x25c   :  { %v1496_v26 = vld [vmem:[%s7866_s0 + $0xdd8] sm:$0xff]  ;;  %4694 = vst [vmem:[#allocation6 + $0x1c8] sm:$0xff] %v5239_v14  ;;  %4695 = vst [vmem:[#allocation6 + $0x1d0] sm:$0xff] %v5240_v17  ;;  %v5242_v30 = vpack.c.bf16 %v5566_v29, %v5565_v28  ;;  %v5567_v31 = vld [vmem:[#allocation5 + $0x3d0] sm:$0xff]  ;;  %v7340_v41 = vadd.f32 %v2007_v24, %v983_v23  ;;  %v984_v42 = vmul.f32 0.999, %v472_v25 }
 0x25d   :  { %4696 = vst [vmem:[#allocation6 + $0x1d8] sm:$0xff] %v5241_v20  ;;  %v5568_v32 = vld [vmem:[#allocation5 + $0x3d8] sm:$0xff]  ;;  %v5569_v34 = vld [vmem:[#allocation5 + $0x3e0] sm:$0xff]  ;;  %v5570_v35 = vld [vmem:[#allocation5 + $0x3e8] sm:$0xff]  ;;  %v2008_v43 = vmul.f32 0.001, %v1496_v26 }
 0x25e   :  { %v5243_v33 = vpack.c.bf16 %v5568_v32, %v5567_v31  ;;  %v5244_v36 = vpack.c.bf16 %v5570_v35, %v5569_v34  ;;  %v5571_v37 = vld [vmem:[#allocation5 + $0x3f0] sm:$0xff]  ;;  %v5572_v38 = vld [vmem:[#allocation5 + $0x3f8] sm:$0xff]  ;;  %v1497_v44 = vld [vmem:[%s7866_s0 + $0xde0] sm:$0xff]  ;;  %4697 = vst [vmem:[#allocation6 + $0x1e0] sm:$0xff] %v5242_v30 }
 0x25f   :  { %v5245_v39 = vpack.c.bf16 %v5572_v38, %v5571_v37  ;;  %v474_v45 = vld [vmem:[#allocation2 + $0xde8] sm:$0xff]  ;;  %v2009_v47 = vmul.f32 0.001, %v1497_v44  ;;  %v5573_v49 = vld [vmem:[#allocation5 + $0x400] sm:$0xff]  ;;  %3030 = vst [vmem:[#allocation5 + $0xdc8] sm:$0xff] %v7338_v40  ;;  %3031 = vst [vmem:[#allocation5 + $0xdd0] sm:$0xff] %v7340_v41  ;;  %v7347_v52 = vadd.f32 %v2008_v43, %v984_v42 }
 0x260   :  { %v986_v48 = vmul.f32 0.999, %v474_v45  ;;  %4698 = vst [vmem:[#allocation6 + $0x1e8] sm:$0xff] %v5243_v33  ;;  %4699 = vst [vmem:[#allocation6 + $0x1f0] sm:$0xff] %v5244_v36  ;;  %v5574_v50 = vld [vmem:[#allocation5 + $0x408] sm:$0xff]  ;;  %v475_v54 = vld [vmem:[#allocation2 + $0xdf0] sm:$0xff] }
 0x261   :  { %4700 = vst [vmem:[#allocation6 + $0x1f8] sm:$0xff] %v5245_v39  ;;  %v5246_v51 = vpack.c.bf16 %v5574_v50, %v5573_v49  ;;  %v1498_v53 = vld [vmem:[%s7866_s0 + $0xde8] sm:$0xff]  ;;  %v1499_v55 = vld [vmem:[%s7866_s0 + $0xdf0] sm:$0xff]  ;;  %v5576_v57 = vld [vmem:[#allocation5 + $0x418] sm:$0xff]  ;;  %v7355_v2 = vadd.f32 %v2009_v47, %v985_v46  ;;  %v987_v4 = vmul.f32 0.999, %v475_v54 }
 0x262   :  { %v5575_v56 = vld [vmem:[#allocation5 + $0x410] sm:$0xff]  ;;  %v5577_v59 = vld [vmem:[#allocation5 + $0x420] sm:$0xff]  ;;  %v5578_v60 = vld [vmem:[#allocation5 + $0x428] sm:$0xff]  ;;  %v2010_v3 = vmul.f32 0.001, %v1498_v53  ;;  %3032 = vst [vmem:[#allocation5 + $0xdd8] sm:$0xff] %v7347_v52 }
 0x263   :  { %v5247_v58 = vpack.c.bf16 %v5576_v57, %v5575_v56  ;;  %v5248_v62 = vpack.c.bf16 %v5578_v60, %v5577_v59  ;;  %v5579_v63 = vld [vmem:[#allocation5 + $0x430] sm:$0xff]  ;;  %v5580_v0 = vld [vmem:[#allocation5 + $0x438] sm:$0xff]  ;;  %v2011_v5 = vmul.f32 0.001, %v1499_v55  ;;  %4701 = vst [vmem:[#allocation6 + $0x200] sm:$0xff] %v5246_v51  ;;  %v477_v9 = vld [vmem:[#allocation2 + $0xe00] sm:$0xff] }
 0x264   :  { %v5249_v1 = vpack.c.bf16 %v5580_v0, %v5579_v63  ;;  %v476_v6 = vld [vmem:[#allocation2 + $0xdf8] sm:$0xff]  ;;  %v5581_v10 = vld [vmem:[#allocation5 + $0x440] sm:$0xff]  ;;  %v5582_v11 = vld [vmem:[#allocation5 + $0x448] sm:$0xff]  ;;  %3033 = vst [vmem:[#allocation5 + $0xde0] sm:$0xff] %v7355_v2  ;;  %v7362_v23 = vadd.f32 %v2010_v3, %v986_v48  ;;  %v989_v29 = vmul.f32 0.999, %v477_v9 }
 0x265   :  { %v1500_v7 = vld [vmem:[%s7866_s0 + $0xdf8] sm:$0xff]  ;;  %4702 = vst [vmem:[#allocation6 + $0x208] sm:$0xff] %v5247_v58  ;;  %4703 = vst [vmem:[#allocation6 + $0x210] sm:$0xff] %v5248_v62  ;;  %v5250_v12 = vpack.c.bf16 %v5582_v11, %v5581_v10  ;;  %v5583_v13 = vld [vmem:[#allocation5 + $0x450] sm:$0xff]  ;;  %v7364_v24 = vadd.f32 %v2011_v5, %v987_v4  ;;  %v988_v25 = vmul.f32 0.999, %v476_v6 }
 0x266   :  { %4704 = vst [vmem:[#allocation6 + $0x218] sm:$0xff] %v5249_v1  ;;  %v5584_v14 = vld [vmem:[#allocation5 + $0x458] sm:$0xff]  ;;  %v5585_v16 = vld [vmem:[#allocation5 + $0x460] sm:$0xff]  ;;  %v5586_v17 = vld [vmem:[#allocation5 + $0x468] sm:$0xff]  ;;  %v2012_v26 = vmul.f32 0.001, %v1500_v7 }
 0x267   :  { %v5251_v15 = vpack.c.bf16 %v5584_v14, %v5583_v13  ;;  %v5252_v18 = vpack.c.bf16 %v5586_v17, %v5585_v16  ;;  %v5587_v19 = vld [vmem:[#allocation5 + $0x470] sm:$0xff]  ;;  %v5588_v20 = vld [vmem:[#allocation5 + $0x478] sm:$0xff]  ;;  %v1501_v27 = vld [vmem:[%s7866_s0 + $0xe00] sm:$0xff]  ;;  %4705 = vst [vmem:[#allocation6 + $0x220] sm:$0xff] %v5250_v12 }
 0x268   :  { %v5253_v22 = vpack.c.bf16 %v5588_v20, %v5587_v19  ;;  %v478_v28 = vld [vmem:[#allocation2 + $0xe08] sm:$0xff]  ;;  %v2013_v30 = vmul.f32 0.001, %v1501_v27  ;;  %v5589_v32 = vld [vmem:[#allocation5 + $0x480] sm:$0xff]  ;;  %3034 = vst [vmem:[#allocation5 + $0xde8] sm:$0xff] %v7362_v23  ;;  %3035 = vst [vmem:[#allocation5 + $0xdf0] sm:$0xff] %v7364_v24  ;;  %v7371_v35 = vadd.f32 %v2012_v26, %v988_v25 }
 0x269   :  { %v990_v31 = vmul.f32 0.999, %v478_v28  ;;  %4706 = vst [vmem:[#allocation6 + $0x228] sm:$0xff] %v5251_v15  ;;  %4707 = vst [vmem:[#allocation6 + $0x230] sm:$0xff] %v5252_v18  ;;  %v5590_v33 = vld [vmem:[#allocation5 + $0x488] sm:$0xff]  ;;  %v479_v37 = vld [vmem:[#allocation2 + $0xe10] sm:$0xff] }
 0x26a   :  { %4708 = vst [vmem:[#allocation6 + $0x238] sm:$0xff] %v5253_v22  ;;  %v5254_v34 = vpack.c.bf16 %v5590_v33, %v5589_v32  ;;  %v1502_v36 = vld [vmem:[%s7866_s0 + $0xe08] sm:$0xff]  ;;  %v1503_v38 = vld [vmem:[%s7866_s0 + $0xe10] sm:$0xff]  ;;  %v5592_v42 = vld [vmem:[#allocation5 + $0x498] sm:$0xff]  ;;  %v7379_v50 = vadd.f32 %v2013_v30, %v989_v29  ;;  %v991_v53 = vmul.f32 0.999, %v479_v37 }
 0x26b   :  { %v5591_v39 = vld [vmem:[#allocation5 + $0x490] sm:$0xff]  ;;  %v5593_v44 = vld [vmem:[#allocation5 + $0x4a0] sm:$0xff]  ;;  %v5594_v45 = vld [vmem:[#allocation5 + $0x4a8] sm:$0xff]  ;;  %v2014_v51 = vmul.f32 0.001, %v1502_v36  ;;  %3036 = vst [vmem:[#allocation5 + $0xdf8] sm:$0xff] %v7371_v35 }
 0x26c   :  { %v5255_v43 = vpack.c.bf16 %v5592_v42, %v5591_v39  ;;  %v5256_v46 = vpack.c.bf16 %v5594_v45, %v5593_v44  ;;  %v5595_v47 = vld [vmem:[#allocation5 + $0x4b0] sm:$0xff]  ;;  %v5596_v48 = vld [vmem:[#allocation5 + $0x4b8] sm:$0xff]  ;;  %v2015_v54 = vmul.f32 0.001, %v1503_v38  ;;  %4709 = vst [vmem:[#allocation6 + $0x240] sm:$0xff] %v5254_v34  ;;  %v481_v57 = vld [vmem:[#allocation2 + $0xe20] sm:$0xff] }
 0x26d   :  { %v5257_v49 = vpack.c.bf16 %v5596_v48, %v5595_v47  ;;  %v480_v55 = vld [vmem:[#allocation2 + $0xe18] sm:$0xff]  ;;  %v5597_v58 = vld [vmem:[#allocation5 + $0x4c0] sm:$0xff]  ;;  %v5598_v59 = vld [vmem:[#allocation5 + $0x4c8] sm:$0xff]  ;;  %3037 = vst [vmem:[#allocation5 + $0xe00] sm:$0xff] %v7379_v50  ;;  %v7386_v9 = vadd.f32 %v2014_v51, %v990_v31  ;;  %v993_v15 = vmul.f32 0.999, %v481_v57 }
 0x26e   :  { %v1504_v56 = vld [vmem:[%s7866_s0 + $0xe18] sm:$0xff]  ;;  %4710 = vst [vmem:[#allocation6 + $0x248] sm:$0xff] %v5255_v43  ;;  %4711 = vst [vmem:[#allocation6 + $0x250] sm:$0xff] %v5256_v46  ;;  %v5258_v60 = vpack.c.bf16 %v5598_v59, %v5597_v58  ;;  %v5599_v62 = vld [vmem:[#allocation5 + $0x4d0] sm:$0xff]  ;;  %v7388_v10 = vadd.f32 %v2015_v54, %v991_v53  ;;  %v992_v11 = vmul.f32 0.999, %v480_v55 }
 0x26f   :  { %4712 = vst [vmem:[#allocation6 + $0x258] sm:$0xff] %v5257_v49  ;;  %v5600_v63 = vld [vmem:[#allocation5 + $0x4d8] sm:$0xff]  ;;  %v5601_v1 = vld [vmem:[#allocation5 + $0x4e0] sm:$0xff]  ;;  %v5602_v3 = vld [vmem:[#allocation5 + $0x4e8] sm:$0xff]  ;;  %v2016_v12 = vmul.f32 0.001, %v1504_v56 }
 0x270   :  { %v5259_v0 = vpack.c.bf16 %v5600_v63, %v5599_v62  ;;  %v5260_v4 = vpack.c.bf16 %v5602_v3, %v5601_v1  ;;  %v5603_v5 = vld [vmem:[#allocation5 + $0x4f0] sm:$0xff]  ;;  %v5604_v6 = vld [vmem:[#allocation5 + $0x4f8] sm:$0xff]  ;;  %v1505_v13 = vld [vmem:[%s7866_s0 + $0xe20] sm:$0xff]  ;;  %4713 = vst [vmem:[#allocation6 + $0x260] sm:$0xff] %v5258_v60 }
 0x271   :  { %v5261_v7 = vpack.c.bf16 %v5604_v6, %v5603_v5  ;;  %v482_v14 = vld [vmem:[#allocation2 + $0xe28] sm:$0xff]  ;;  %v2017_v16 = vmul.f32 0.001, %v1505_v13  ;;  %v5605_v18 = vld [vmem:[#allocation5 + $0x500] sm:$0xff]  ;;  %3038 = vst [vmem:[#allocation5 + $0xe08] sm:$0xff] %v7386_v9  ;;  %3039 = vst [vmem:[#allocation5 + $0xe10] sm:$0xff] %v7388_v10  ;;  %v7395_v22 = vadd.f32 %v2016_v12, %v992_v11 }
 0x272   :  { %v994_v17 = vmul.f32 0.999, %v482_v14  ;;  %4714 = vst [vmem:[#allocation6 + $0x268] sm:$0xff] %v5259_v0  ;;  %4715 = vst [vmem:[#allocation6 + $0x270] sm:$0xff] %v5260_v4  ;;  %v5606_v19 = vld [vmem:[#allocation5 + $0x508] sm:$0xff]  ;;  %v483_v26 = vld [vmem:[#allocation2 + $0xe30] sm:$0xff] }
 0x273   :  { %4716 = vst [vmem:[#allocation6 + $0x278] sm:$0xff] %v5261_v7  ;;  %v5262_v20 = vpack.c.bf16 %v5606_v19, %v5605_v18  ;;  %v1506_v25 = vld [vmem:[%s7866_s0 + $0xe28] sm:$0xff]  ;;  %v1507_v27 = vld [vmem:[%s7866_s0 + $0xe30] sm:$0xff]  ;;  %v5608_v29 = vld [vmem:[#allocation5 + $0x518] sm:$0xff]  ;;  %v7403_v38 = vadd.f32 %v2017_v16, %v993_v15  ;;  %v995_v42 = vmul.f32 0.999, %v483_v26 }
 0x274   :  { %v5607_v28 = vld [vmem:[#allocation5 + $0x510] sm:$0xff]  ;;  %v5609_v31 = vld [vmem:[#allocation5 + $0x520] sm:$0xff]  ;;  %v5610_v32 = vld [vmem:[#allocation5 + $0x528] sm:$0xff]  ;;  %v2018_v39 = vmul.f32 0.001, %v1506_v25  ;;  %3040 = vst [vmem:[#allocation5 + $0xe18] sm:$0xff] %v7395_v22 }
 0x275   :  { %v5263_v30 = vpack.c.bf16 %v5608_v29, %v5607_v28  ;;  %v5264_v33 = vpack.c.bf16 %v5610_v32, %v5609_v31  ;;  %v5611_v34 = vld [vmem:[#allocation5 + $0x530] sm:$0xff]  ;;  %v5612_v36 = vld [vmem:[#allocation5 + $0x538] sm:$0xff]  ;;  %v2019_v43 = vmul.f32 0.001, %v1507_v27  ;;  %4717 = vst [vmem:[#allocation6 + $0x280] sm:$0xff] %v5262_v20  ;;  %v485_v46 = vld [vmem:[#allocation2 + $0xe40] sm:$0xff] }
 0x276   :  { %v5265_v37 = vpack.c.bf16 %v5612_v36, %v5611_v34  ;;  %v484_v44 = vld [vmem:[#allocation2 + $0xe38] sm:$0xff]  ;;  %v5613_v47 = vld [vmem:[#allocation5 + $0x540] sm:$0xff]  ;;  %v5614_v48 = vld [vmem:[#allocation5 + $0x548] sm:$0xff]  ;;  %3041 = vst [vmem:[#allocation5 + $0xe20] sm:$0xff] %v7403_v38  ;;  %v7410_v62 = vadd.f32 %v2018_v39, %v994_v17  ;;  %v997_v5 = vmul.f32 0.999, %v485_v46 }
 0x277   :  { %v1508_v45 = vld [vmem:[%s7866_s0 + $0xe38] sm:$0xff]  ;;  %4718 = vst [vmem:[#allocation6 + $0x288] sm:$0xff] %v5263_v30  ;;  %4719 = vst [vmem:[#allocation6 + $0x290] sm:$0xff] %v5264_v33  ;;  %v5266_v49 = vpack.c.bf16 %v5614_v48, %v5613_v47  ;;  %v5615_v51 = vld [vmem:[#allocation5 + $0x550] sm:$0xff]  ;;  %v7412_v63 = vadd.f32 %v2019_v43, %v995_v42  ;;  %v996_v0 = vmul.f32 0.999, %v484_v44 }
 0x278   :  { %4720 = vst [vmem:[#allocation6 + $0x298] sm:$0xff] %v5265_v37  ;;  %v5616_v53 = vld [vmem:[#allocation5 + $0x558] sm:$0xff]  ;;  %v5617_v55 = vld [vmem:[#allocation5 + $0x560] sm:$0xff]  ;;  %v5618_v56 = vld [vmem:[#allocation5 + $0x568] sm:$0xff]  ;;  %v2020_v1 = vmul.f32 0.001, %v1508_v45 }
 0x279   :  { %v5267_v54 = vpack.c.bf16 %v5616_v53, %v5615_v51  ;;  %v5268_v57 = vpack.c.bf16 %v5618_v56, %v5617_v55  ;;  %v5619_v58 = vld [vmem:[#allocation5 + $0x570] sm:$0xff]  ;;  %v5620_v59 = vld [vmem:[#allocation5 + $0x578] sm:$0xff]  ;;  %v1509_v3 = vld [vmem:[%s7866_s0 + $0xe40] sm:$0xff]  ;;  %4721 = vst [vmem:[#allocation6 + $0x2a0] sm:$0xff] %v5266_v49 }
 0x27a   :  { %v5269_v60 = vpack.c.bf16 %v5620_v59, %v5619_v58  ;;  %v486_v4 = vld [vmem:[#allocation2 + $0xe48] sm:$0xff]  ;;  %v2021_v6 = vmul.f32 0.001, %v1509_v3  ;;  %v5621_v11 = vld [vmem:[#allocation5 + $0x580] sm:$0xff]  ;;  %3042 = vst [vmem:[#allocation5 + $0xe28] sm:$0xff] %v7410_v62  ;;  %3043 = vst [vmem:[#allocation5 + $0xe30] sm:$0xff] %v7412_v63  ;;  %v7419_v14 = vadd.f32 %v2020_v1, %v996_v0 }
 0x27b   :  { %v998_v7 = vmul.f32 0.999, %v486_v4  ;;  %4722 = vst [vmem:[#allocation6 + $0x2a8] sm:$0xff] %v5267_v54  ;;  %4723 = vst [vmem:[#allocation6 + $0x2b0] sm:$0xff] %v5268_v57  ;;  %v5622_v12 = vld [vmem:[#allocation5 + $0x588] sm:$0xff]  ;;  %v487_v16 = vld [vmem:[#allocation2 + $0xe50] sm:$0xff] }
 0x27c   :  { %4724 = vst [vmem:[#allocation6 + $0x2b8] sm:$0xff] %v5269_v60  ;;  %v5270_v13 = vpack.c.bf16 %v5622_v12, %v5621_v11  ;;  %v1510_v15 = vld [vmem:[%s7866_s0 + $0xe48] sm:$0xff]  ;;  %v1511_v17 = vld [vmem:[%s7866_s0 + $0xe50] sm:$0xff]  ;;  %v5624_v19 = vld [vmem:[#allocation5 + $0x598] sm:$0xff]  ;;  %v7427_v31 = vadd.f32 %v2021_v6, %v997_v5  ;;  %v999_v33 = vmul.f32 0.999, %v487_v16 }
 0x27d   :  { %v5623_v18 = vld [vmem:[#allocation5 + $0x590] sm:$0xff]  ;;  %v5625_v25 = vld [vmem:[#allocation5 + $0x5a0] sm:$0xff]  ;;  %v5626_v26 = vld [vmem:[#allocation5 + $0x5a8] sm:$0xff]  ;;  %v2022_v32 = vmul.f32 0.001, %v1510_v15  ;;  %3044 = vst [vmem:[#allocation5 + $0xe38] sm:$0xff] %v7419_v14 }
 0x27e   :  { %v5271_v20 = vpack.c.bf16 %v5624_v19, %v5623_v18  ;;  %v5272_v27 = vpack.c.bf16 %v5626_v26, %v5625_v25  ;;  %v5627_v28 = vld [vmem:[#allocation5 + $0x5b0] sm:$0xff]  ;;  %v5628_v29 = vld [vmem:[#allocation5 + $0x5b8] sm:$0xff]  ;;  %v2023_v34 = vmul.f32 0.001, %v1511_v17  ;;  %4725 = vst [vmem:[#allocation6 + $0x2c0] sm:$0xff] %v5270_v13  ;;  %v489_v39 = vld [vmem:[#allocation2 + $0xe60] sm:$0xff] }
 0x27f   :  { %v5273_v30 = vpack.c.bf16 %v5628_v29, %v5627_v28  ;;  %v488_v36 = vld [vmem:[#allocation2 + $0xe58] sm:$0xff]  ;;  %v5629_v42 = vld [vmem:[#allocation5 + $0x5c0] sm:$0xff]  ;;  %v5630_v43 = vld [vmem:[#allocation5 + $0x5c8] sm:$0xff]  ;;  %3045 = vst [vmem:[#allocation5 + $0xe40] sm:$0xff] %v7427_v31  ;;  %v7434_v56 = vadd.f32 %v2022_v32, %v998_v7  ;;  %v1001_v1 = vmul.f32 0.999, %v489_v39 }
 0x280   :  { %v1512_v37 = vld [vmem:[%s7866_s0 + $0xe58] sm:$0xff]  ;;  %4726 = vst [vmem:[#allocation6 + $0x2c8] sm:$0xff] %v5271_v20  ;;  %4727 = vst [vmem:[#allocation6 + $0x2d0] sm:$0xff] %v5272_v27  ;;  %v5274_v44 = vpack.c.bf16 %v5630_v43, %v5629_v42  ;;  %v5631_v45 = vld [vmem:[#allocation5 + $0x5d0] sm:$0xff]  ;;  %v7436_v57 = vadd.f32 %v2023_v34, %v999_v33  ;;  %v1000_v58 = vmul.f32 0.999, %v488_v36 }
 0x281   :  { %4728 = vst [vmem:[#allocation6 + $0x2d8] sm:$0xff] %v5273_v30  ;;  %v5632_v46 = vld [vmem:[#allocation5 + $0x5d8] sm:$0xff]  ;;  %v5633_v48 = vld [vmem:[#allocation5 + $0x5e0] sm:$0xff]  ;;  %v5634_v49 = vld [vmem:[#allocation5 + $0x5e8] sm:$0xff]  ;;  %v2024_v59 = vmul.f32 0.001, %v1512_v37 }
 0x282   :  { %v5275_v47 = vpack.c.bf16 %v5632_v46, %v5631_v45  ;;  %v5276_v51 = vpack.c.bf16 %v5634_v49, %v5633_v48  ;;  %v5635_v53 = vld [vmem:[#allocation5 + $0x5f0] sm:$0xff]  ;;  %v5636_v54 = vld [vmem:[#allocation5 + $0x5f8] sm:$0xff]  ;;  %v1513_v60 = vld [vmem:[%s7866_s0 + $0xe60] sm:$0xff]  ;;  %4729 = vst [vmem:[#allocation6 + $0x2e0] sm:$0xff] %v5274_v44 }
 0x283   :  { %v5277_v55 = vpack.c.bf16 %v5636_v54, %v5635_v53  ;;  %v490_v0 = vld [vmem:[#allocation2 + $0xe68] sm:$0xff]  ;;  %v2025_v3 = vmul.f32 0.001, %v1513_v60  ;;  %v5637_v5 = vld [vmem:[#allocation5 + $0x600] sm:$0xff]  ;;  %3046 = vst [vmem:[#allocation5 + $0xe48] sm:$0xff] %v7434_v56  ;;  %3047 = vst [vmem:[#allocation5 + $0xe50] sm:$0xff] %v7436_v57  ;;  %v7443_v11 = vadd.f32 %v2024_v59, %v1000_v58 }
 0x284   :  { %v1002_v4 = vmul.f32 0.999, %v490_v0  ;;  %4730 = vst [vmem:[#allocation6 + $0x2e8] sm:$0xff] %v5275_v47  ;;  %4731 = vst [vmem:[#allocation6 + $0x2f0] sm:$0xff] %v5276_v51  ;;  %v5638_v6 = vld [vmem:[#allocation5 + $0x608] sm:$0xff]  ;;  %v491_v13 = vld [vmem:[#allocation2 + $0xe70] sm:$0xff] }
 0x285   :  { %4732 = vst [vmem:[#allocation6 + $0x2f8] sm:$0xff] %v5277_v55  ;;  %v5278_v7 = vpack.c.bf16 %v5638_v6, %v5637_v5  ;;  %v1514_v12 = vld [vmem:[%s7866_s0 + $0xe68] sm:$0xff]  ;;  %v1515_v15 = vld [vmem:[%s7866_s0 + $0xe70] sm:$0xff]  ;;  %v5640_v17 = vld [vmem:[#allocation5 + $0x618] sm:$0xff]  ;;  %v7451_v29 = vadd.f32 %v2025_v3, %v1001_v1  ;;  %v1003_v32 = vmul.f32 0.999, %v491_v13 }
 0x286   :  { %v5639_v16 = vld [vmem:[#allocation5 + $0x610] sm:$0xff]  ;;  %v5641_v19 = vld [vmem:[#allocation5 + $0x620] sm:$0xff]  ;;  %v5642_v20 = vld [vmem:[#allocation5 + $0x628] sm:$0xff]  ;;  %v2026_v30 = vmul.f32 0.001, %v1514_v12  ;;  %3048 = vst [vmem:[#allocation5 + $0xe58] sm:$0xff] %v7443_v11 }
 0x287   :  { %v5279_v18 = vpack.c.bf16 %v5640_v17, %v5639_v16  ;;  %v5280_v25 = vpack.c.bf16 %v5642_v20, %v5641_v19  ;;  %v5643_v26 = vld [vmem:[#allocation5 + $0x630] sm:$0xff]  ;;  %v5644_v27 = vld [vmem:[#allocation5 + $0x638] sm:$0xff]  ;;  %v2027_v33 = vmul.f32 0.001, %v1515_v15  ;;  %4733 = vst [vmem:[#allocation6 + $0x300] sm:$0xff] %v5278_v7  ;;  %v493_v37 = vld [vmem:[#allocation2 + $0xe80] sm:$0xff] }
 0x288   :  { %v5281_v28 = vpack.c.bf16 %v5644_v27, %v5643_v26  ;;  %v492_v34 = vld [vmem:[#allocation2 + $0xe78] sm:$0xff]  ;;  %v5645_v39 = vld [vmem:[#allocation5 + $0x640] sm:$0xff]  ;;  %v5646_v42 = vld [vmem:[#allocation5 + $0x648] sm:$0xff]  ;;  %3049 = vst [vmem:[#allocation5 + $0xe60] sm:$0xff] %v7451_v29  ;;  %v7458_v55 = vadd.f32 %v2026_v30, %v1002_v4  ;;  %v1005_v3 = vmul.f32 0.999, %v493_v37 }
 0x289   :  { %v1516_v36 = vld [vmem:[%s7866_s0 + $0xe78] sm:$0xff]  ;;  %4734 = vst [vmem:[#allocation6 + $0x308] sm:$0xff] %v5279_v18  ;;  %4735 = vst [vmem:[#allocation6 + $0x310] sm:$0xff] %v5280_v25  ;;  %v5282_v43 = vpack.c.bf16 %v5646_v42, %v5645_v39  ;;  %v5647_v44 = vld [vmem:[#allocation5 + $0x650] sm:$0xff]  ;;  %v7460_v58 = vadd.f32 %v2027_v33, %v1003_v32  ;;  %v1004_v59 = vmul.f32 0.999, %v492_v34 }
 0x28a   :  { %4736 = vst [vmem:[#allocation6 + $0x318] sm:$0xff] %v5281_v28  ;;  %v5648_v45 = vld [vmem:[#allocation5 + $0x658] sm:$0xff]  ;;  %v5649_v47 = vld [vmem:[#allocation5 + $0x660] sm:$0xff]  ;;  %v5650_v48 = vld [vmem:[#allocation5 + $0x668] sm:$0xff]  ;;  %v2028_v60 = vmul.f32 0.001, %v1516_v36 }
 0x28b   :  { %v5283_v46 = vpack.c.bf16 %v5648_v45, %v5647_v44  ;;  %v5284_v49 = vpack.c.bf16 %v5650_v48, %v5649_v47  ;;  %v5651_v51 = vld [vmem:[#allocation5 + $0x670] sm:$0xff]  ;;  %v5652_v53 = vld [vmem:[#allocation5 + $0x678] sm:$0xff]  ;;  %v1517_v0 = vld [vmem:[%s7866_s0 + $0xe80] sm:$0xff]  ;;  %4737 = vst [vmem:[#allocation6 + $0x320] sm:$0xff] %v5282_v43 }
 0x28c   :  { %v5285_v54 = vpack.c.bf16 %v5652_v53, %v5651_v51  ;;  %v494_v1 = vld [vmem:[#allocation2 + $0xe88] sm:$0xff]  ;;  %v2029_v5 = vmul.f32 0.001, %v1517_v0  ;;  %v5653_v7 = vld [vmem:[#allocation5 + $0x680] sm:$0xff]  ;;  %3050 = vst [vmem:[#allocation5 + $0xe68] sm:$0xff] %v7458_v55  ;;  %3051 = vst [vmem:[#allocation5 + $0xe70] sm:$0xff] %v7460_v58  ;;  %v7467_v13 = vadd.f32 %v2028_v60, %v1004_v59 }
 0x28d   :  { %v1006_v6 = vmul.f32 0.999, %v494_v1  ;;  %4738 = vst [vmem:[#allocation6 + $0x328] sm:$0xff] %v5283_v46  ;;  %4739 = vst [vmem:[#allocation6 + $0x330] sm:$0xff] %v5284_v49  ;;  %v5654_v12 = vld [vmem:[#allocation5 + $0x688] sm:$0xff]  ;;  %v495_v16 = vld [vmem:[#allocation2 + $0xe90] sm:$0xff] }
 0x28e   :  { %4740 = vst [vmem:[#allocation6 + $0x338] sm:$0xff] %v5285_v54  ;;  %v5286_v4 = vpack.c.bf16 %v5654_v12, %v5653_v7  ;;  %v1518_v15 = vld [vmem:[%s7866_s0 + $0xe88] sm:$0xff]  ;;  %v1519_v17 = vld [vmem:[%s7866_s0 + $0xe90] sm:$0xff]  ;;  %v5656_v19 = vld [vmem:[#allocation5 + $0x698] sm:$0xff]  ;;  %v7475_v33 = vadd.f32 %v2029_v5, %v1005_v3  ;;  %v1007_v36 = vmul.f32 0.999, %v495_v16 }
 0x28f   :  { %v5655_v18 = vld [vmem:[#allocation5 + $0x690] sm:$0xff]  ;;  %v5657_v25 = vld [vmem:[#allocation5 + $0x6a0] sm:$0xff]  ;;  %v5658_v26 = vld [vmem:[#allocation5 + $0x6a8] sm:$0xff]  ;;  %v2030_v34 = vmul.f32 0.001, %v1518_v15  ;;  %3052 = vst [vmem:[#allocation5 + $0xe78] sm:$0xff] %v7467_v13 }
 0x290   :  { %v5287_v20 = vpack.c.bf16 %v5656_v19, %v5655_v18  ;;  %v5288_v27 = vpack.c.bf16 %v5658_v26, %v5657_v25  ;;  %v5659_v28 = vld [vmem:[#allocation5 + $0x6b0] sm:$0xff]  ;;  %v5660_v30 = vld [vmem:[#allocation5 + $0x6b8] sm:$0xff]  ;;  %v2031_v37 = vmul.f32 0.001, %v1519_v17  ;;  %4741 = vst [vmem:[#allocation6 + $0x340] sm:$0xff] %v5286_v4  ;;  %v497_v43 = vld [vmem:[#allocation2 + $0xea0] sm:$0xff] }
 0x291   :  { %v5289_v32 = vpack.c.bf16 %v5660_v30, %v5659_v28  ;;  %v496_v39 = vld [vmem:[#allocation2 + $0xe98] sm:$0xff]  ;;  %v5661_v44 = vld [vmem:[#allocation5 + $0x6c0] sm:$0xff]  ;;  %v5662_v45 = vld [vmem:[#allocation5 + $0x6c8] sm:$0xff]  ;;  %3053 = vst [vmem:[#allocation5 + $0xe80] sm:$0xff] %v7475_v33  ;;  %v7482_v1 = vadd.f32 %v2030_v34, %v1006_v6  ;;  %v1009_v15 = vmul.f32 0.999, %v497_v43 }
 0x292   :  { %v1520_v42 = vld [vmem:[%s7866_s0 + $0xe98] sm:$0xff]  ;;  %4742 = vst [vmem:[#allocation6 + $0x348] sm:$0xff] %v5287_v20  ;;  %4743 = vst [vmem:[#allocation6 + $0x350] sm:$0xff] %v5288_v27  ;;  %v5290_v46 = vpack.c.bf16 %v5662_v45, %v5661_v44  ;;  %v5663_v47 = vld [vmem:[#allocation5 + $0x6d0] sm:$0xff]  ;;  %v7484_v3 = vadd.f32 %v2031_v37, %v1007_v36  ;;  %v1008_v5 = vmul.f32 0.999, %v496_v39 }
 0x293   :  { %4744 = vst [vmem:[#allocation6 + $0x358] sm:$0xff] %v5289_v32  ;;  %v5664_v48 = vld [vmem:[#allocation5 + $0x6d8] sm:$0xff]  ;;  %v5665_v51 = vld [vmem:[#allocation5 + $0x6e0] sm:$0xff]  ;;  %v5666_v53 = vld [vmem:[#allocation5 + $0x6e8] sm:$0xff]  ;;  %v2032_v7 = vmul.f32 0.001, %v1520_v42 }
 0x294   :  { %v5291_v49 = vpack.c.bf16 %v5664_v48, %v5663_v47  ;;  %v5292_v54 = vpack.c.bf16 %v5666_v53, %v5665_v51  ;;  %v5667_v59 = vld [vmem:[#allocation5 + $0x6f0] sm:$0xff]  ;;  %v5668_v60 = vld [vmem:[#allocation5 + $0x6f8] sm:$0xff]  ;;  %v1521_v12 = vld [vmem:[%s7866_s0 + $0xea0] sm:$0xff]  ;;  %4745 = vst [vmem:[#allocation6 + $0x360] sm:$0xff] %v5290_v46 }
 0x295   :  { %v5293_v0 = vpack.c.bf16 %v5668_v60, %v5667_v59  ;;  %v498_v4 = vld [vmem:[#allocation2 + $0xea8] sm:$0xff]  ;;  %v2033_v16 = vmul.f32 0.001, %v1521_v12  ;;  %v5669_v18 = vld [vmem:[#allocation5 + $0x700] sm:$0xff]  ;;  %3054 = vst [vmem:[#allocation5 + $0xe88] sm:$0xff] %v7482_v1  ;;  %3055 = vst [vmem:[#allocation5 + $0xe90] sm:$0xff] %v7484_v3  ;;  %v7491_v20 = vadd.f32 %v2032_v7, %v1008_v5 }
 0x296   :  { %v1010_v17 = vmul.f32 0.999, %v498_v4  ;;  %4746 = vst [vmem:[#allocation6 + $0x368] sm:$0xff] %v5291_v49  ;;  %4747 = vst [vmem:[#allocation6 + $0x370] sm:$0xff] %v5292_v54  ;;  %v5670_v19 = vld [vmem:[#allocation5 + $0x708] sm:$0xff]  ;;  %v499_v26 = vld [vmem:[#allocation2 + $0xeb0] sm:$0xff] }
 0x297   :  { %4748 = vst [vmem:[#allocation6 + $0x378] sm:$0xff] %v5293_v0  ;;  %v5294_v6 = vpack.c.bf16 %v5670_v19, %v5669_v18  ;;  %v1522_v25 = vld [vmem:[%s7866_s0 + $0xea8] sm:$0xff]  ;;  %v1523_v27 = vld [vmem:[%s7866_s0 + $0xeb0] sm:$0xff]  ;;  %v5672_v30 = vld [vmem:[#allocation5 + $0x718] sm:$0xff]  ;;  %v7499_v44 = vadd.f32 %v2033_v16, %v1009_v15  ;;  %v1011_v46 = vmul.f32 0.999, %v499_v26 }
 0x298   :  { %v5671_v28 = vld [vmem:[#allocation5 + $0x710] sm:$0xff]  ;;  %v5673_v34 = vld [vmem:[#allocation5 + $0x720] sm:$0xff]  ;;  %v5674_v36 = vld [vmem:[#allocation5 + $0x728] sm:$0xff]  ;;  %v2034_v45 = vmul.f32 0.001, %v1522_v25  ;;  %3056 = vst [vmem:[#allocation5 + $0xe98] sm:$0xff] %v7491_v20 }
 0x299   :  { %v5295_v32 = vpack.c.bf16 %v5672_v30, %v5671_v28  ;;  %v5296_v37 = vpack.c.bf16 %v5674_v36, %v5673_v34  ;;  %v5675_v39 = vld [vmem:[#allocation5 + $0x730] sm:$0xff]  ;;  %v5676_v42 = vld [vmem:[#allocation5 + $0x738] sm:$0xff]  ;;  %v2035_v47 = vmul.f32 0.001, %v1523_v27  ;;  %4749 = vst [vmem:[#allocation6 + $0x380] sm:$0xff] %v5294_v6  ;;  %v501_v51 = vld [vmem:[#allocation2 + $0xec0] sm:$0xff] }
 0x29a   :  { %v5297_v43 = vpack.c.bf16 %v5676_v42, %v5675_v39  ;;  %v500_v48 = vld [vmem:[#allocation2 + $0xeb8] sm:$0xff]  ;;  %v5677_v53 = vld [vmem:[#allocation5 + $0x740] sm:$0xff]  ;;  %v5678_v54 = vld [vmem:[#allocation5 + $0x748] sm:$0xff]  ;;  %3057 = vst [vmem:[#allocation5 + $0xea0] sm:$0xff] %v7499_v44  ;;  %v7506_v19 = vadd.f32 %v2034_v45, %v1010_v17  ;;  %v1013_v30 = vmul.f32 0.999, %v501_v51 }
 0x29b   :  { %v1524_v49 = vld [vmem:[%s7866_s0 + $0xeb8] sm:$0xff]  ;;  %4750 = vst [vmem:[#allocation6 + $0x388] sm:$0xff] %v5295_v32  ;;  %4751 = vst [vmem:[#allocation6 + $0x390] sm:$0xff] %v5296_v37  ;;  %v5298_v59 = vpack.c.bf16 %v5678_v54, %v5677_v53  ;;  %v5679_v60 = vld [vmem:[#allocation5 + $0x750] sm:$0xff]  ;;  %v7508_v6 = vadd.f32 %v2035_v47, %v1011_v46  ;;  %v1012_v25 = vmul.f32 0.999, %v500_v48 }
 0x29c   :  { %4752 = vst [vmem:[#allocation6 + $0x398] sm:$0xff] %v5297_v43  ;;  %v5680_v0 = vld [vmem:[#allocation5 + $0x758] sm:$0xff]  ;;  %v5681_v7 = vld [vmem:[#allocation5 + $0x760] sm:$0xff]  ;;  %v5682_v12 = vld [vmem:[#allocation5 + $0x768] sm:$0xff]  ;;  %v2036_v26 = vmul.f32 0.001, %v1524_v49 }
 0x29d   :  { %v5299_v5 = vpack.c.bf16 %v5680_v0, %v5679_v60  ;;  %v5300_v4 = vpack.c.bf16 %v5682_v12, %v5681_v7  ;;  %v5683_v15 = vld [vmem:[#allocation5 + $0x770] sm:$0xff]  ;;  %v5684_v16 = vld [vmem:[#allocation5 + $0x778] sm:$0xff]  ;;  %v1525_v27 = vld [vmem:[%s7866_s0 + $0xec0] sm:$0xff]  ;;  %4753 = vst [vmem:[#allocation6 + $0x3a0] sm:$0xff] %v5298_v59 }
 0x29e   :  { %v5301_v18 = vpack.c.bf16 %v5684_v16, %v5683_v15  ;;  %v502_v28 = vld [vmem:[#allocation2 + $0xec8] sm:$0xff]  ;;  %v2037_v32 = vmul.f32 0.001, %v1525_v27  ;;  %v5685_v36 = vld [vmem:[#allocation5 + $0x780] sm:$0xff]  ;;  %3058 = vst [vmem:[#allocation5 + $0xea8] sm:$0xff] %v7506_v19  ;;  %3059 = vst [vmem:[#allocation5 + $0xeb0] sm:$0xff] %v7508_v6  ;;  %v7515_v39 = vadd.f32 %v2036_v26, %v1012_v25 }
 0x29f   :  { %v1014_v34 = vmul.f32 0.999, %v502_v28  ;;  %4754 = vst [vmem:[#allocation6 + $0x3a8] sm:$0xff] %v5299_v5  ;;  %4755 = vst [vmem:[#allocation6 + $0x3b0] sm:$0xff] %v5300_v4  ;;  %v5686_v37 = vld [vmem:[#allocation5 + $0x788] sm:$0xff]  ;;  %v503_v43 = vld [vmem:[#allocation2 + $0xed0] sm:$0xff] }
 0x2a0   :  { %4756 = vst [vmem:[#allocation6 + $0x3b8] sm:$0xff] %v5301_v18  ;;  %v5302_v17 = vpack.c.bf16 %v5686_v37, %v5685_v36  ;;  %v1526_v42 = vld [vmem:[%s7866_s0 + $0xec8] sm:$0xff]  ;;  %v1527_v45 = vld [vmem:[%s7866_s0 + $0xed0] sm:$0xff]  ;;  %v5688_v47 = vld [vmem:[#allocation5 + $0x798] sm:$0xff]  ;;  %v7523_v0 = vadd.f32 %v2037_v32, %v1013_v30  ;;  %v1015_v7 = vmul.f32 0.999, %v503_v43 }
 0x2a1   :  { %v5687_v46 = vld [vmem:[#allocation5 + $0x790] sm:$0xff]  ;;  %v5689_v49 = vld [vmem:[#allocation5 + $0x7a0] sm:$0xff]  ;;  %v5690_v51 = vld [vmem:[#allocation5 + $0x7a8] sm:$0xff]  ;;  %v2038_v5 = vmul.f32 0.001, %v1526_v42  ;;  %3060 = vst [vmem:[#allocation5 + $0xeb8] sm:$0xff] %v7515_v39 }
 0x2a2   :  { %v5303_v48 = vpack.c.bf16 %v5688_v47, %v5687_v46  ;;  %v5304_v53 = vpack.c.bf16 %v5690_v51, %v5689_v49  ;;  %v5691_v54 = vld [vmem:[#allocation5 + $0x7b0] sm:$0xff]  ;;  %v5692_v59 = vld [vmem:[#allocation5 + $0x7b8] sm:$0xff]  ;;  %v2039_v12 = vmul.f32 0.001, %v1527_v45  ;;  %4757 = vst [vmem:[#allocation6 + $0x3c0] sm:$0xff] %v5302_v17  ;;  %v505_v16 = vld [vmem:[#allocation2 + $0xee0] sm:$0xff] }
 0x2a3   :  { %v5305_v60 = vpack.c.bf16 %v5692_v59, %v5691_v54  ;;  %v504_v4 = vld [vmem:[#allocation2 + $0xed8] sm:$0xff]  ;;  %v5693_v18 = vld [vmem:[#allocation5 + $0x7c0] sm:$0xff]  ;;  %v5694_v25 = vld [vmem:[#allocation5 + $0x7c8] sm:$0xff]  ;;  %3061 = vst [vmem:[#allocation5 + $0xec0] sm:$0xff] %v7523_v0  ;;  %v7530_v45 = vadd.f32 %v2038_v5, %v1014_v34 }
 0x2a4   :  { %v1528_v15 = vld [vmem:[%s7866_s0 + $0xed8] sm:$0xff]  ;;  %4758 = vst [vmem:[#allocation6 + $0x3c8] sm:$0xff] %v5303_v48  ;;  %4759 = vst [vmem:[#allocation6 + $0x3d0] sm:$0xff] %v5304_v53  ;;  %v5306_v26 = vpack.c.bf16 %v5694_v25, %v5693_v18  ;;  %v5695_v27 = vld [vmem:[#allocation5 + $0x7d0] sm:$0xff]  ;;  %v7532_v46 = vadd.f32 %v2039_v12, %v1015_v7  ;;  %v1016_v47 = vmul.f32 0.999, %v504_v4 }
 0x2a5   :  { %4760 = vst [vmem:[#allocation6 + $0x3d8] sm:$0xff] %v5305_v60  ;;  %v5696_v28 = vld [vmem:[#allocation5 + $0x7d8] sm:$0xff]  ;;  %v5697_v32 = vld [vmem:[#allocation5 + $0x7e0] sm:$0xff]  ;;  %v5698_v36 = vld [vmem:[#allocation5 + $0x7e8] sm:$0xff]  ;;  %v2040_v48 = vmul.f32 0.001, %v1528_v15 }
 0x2a6   :  { %v5307_v30 = vpack.c.bf16 %v5696_v28, %v5695_v27  ;;  %v5308_v37 = vpack.c.bf16 %v5698_v36, %v5697_v32  ;;  %v5699_v17 = vld [vmem:[#allocation5 + $0x7f0] sm:$0xff]  ;;  %v5700_v42 = vld [vmem:[#allocation5 + $0x7f8] sm:$0xff]  ;;  %v1529_v49 = vld [vmem:[%s7866_s0 + $0xee0] sm:$0xff]  ;;  %v1017_v53 = vmul.f32 0.999, %v505_v16  ;;  %4761 = vst [vmem:[#allocation6 + $0x3e0] sm:$0xff] %v5306_v26 }
 0x2a7   :  { %v5309_v43 = vpack.c.bf16 %v5700_v42, %v5699_v17  ;;  %v506_v51 = vld [vmem:[#allocation2 + $0xee8] sm:$0xff]  ;;  %v2041_v54 = vmul.f32 0.001, %v1529_v49  ;;  %v5701_v60 = vld [vmem:[#allocation5 + $0x800] sm:$0xff]  ;;  %3062 = vst [vmem:[#allocation5 + $0xec8] sm:$0xff] %v7530_v45  ;;  %3063 = vst [vmem:[#allocation5 + $0xed0] sm:$0xff] %v7532_v46  ;;  %v7539_v5 = vadd.f32 %v2040_v48, %v1016_v47 }
 0x2a8   :  { %v1018_v59 = vmul.f32 0.999, %v506_v51  ;;  %4762 = vst [vmem:[#allocation6 + $0x3e8] sm:$0xff] %v5307_v30  ;;  %4763 = vst [vmem:[#allocation6 + $0x3f0] sm:$0xff] %v5308_v37  ;;  %v5702_v18 = vld [vmem:[#allocation5 + $0x808] sm:$0xff]  ;;  %v507_v12 = vld [vmem:[#allocation2 + $0xef0] sm:$0xff] }
 0x2a9   :  { %4764 = vst [vmem:[#allocation6 + $0x3f8] sm:$0xff] %v5309_v43  ;;  %v5310_v34 = vpack.c.bf16 %v5702_v18, %v5701_v60  ;;  %v1530_v7 = vld [vmem:[%s7866_s0 + $0xee8] sm:$0xff]  ;;  %v1531_v4 = vld [vmem:[%s7866_s0 + $0xef0] sm:$0xff]  ;;  %v5704_v16 = vld [vmem:[#allocation5 + $0x818] sm:$0xff]  ;;  %v7547_v37 = vadd.f32 %v2041_v54, %v1017_v53  ;;  %v1019_v42 = vmul.f32 0.999, %v507_v12 }
 0x2aa   :  { %v5703_v15 = vld [vmem:[#allocation5 + $0x810] sm:$0xff]  ;;  %v5705_v26 = vld [vmem:[#allocation5 + $0x820] sm:$0xff]  ;;  %v5706_v27 = vld [vmem:[#allocation5 + $0x828] sm:$0xff]  ;;  %v2042_v17 = vmul.f32 0.001, %v1530_v7  ;;  %3064 = vst [vmem:[#allocation5 + $0xed8] sm:$0xff] %v7539_v5 }
 0x2ab   :  { %v5311_v25 = vpack.c.bf16 %v5704_v16, %v5703_v15  ;;  %v5312_v28 = vpack.c.bf16 %v5706_v27, %v5705_v26  ;;  %v5707_v30 = vld [vmem:[#allocation5 + $0x830] sm:$0xff]  ;;  %v5708_v32 = vld [vmem:[#allocation5 + $0x838] sm:$0xff]  ;;  %v2043_v43 = vmul.f32 0.001, %v1531_v4  ;;  %4765 = vst [vmem:[#allocation6 + $0x400] sm:$0xff] %v5310_v34  ;;  %v509_v49 = vld [vmem:[#allocation2 + $0xf00] sm:$0xff] }
 0x2ac   :  { %v5313_v36 = vpack.c.bf16 %v5708_v32, %v5707_v30  ;;  %v508_v47 = vld [vmem:[#allocation2 + $0xef8] sm:$0xff]  ;;  %v5709_v51 = vld [vmem:[#allocation5 + $0x840] sm:$0xff]  ;;  %v5710_v60 = vld [vmem:[#allocation5 + $0x848] sm:$0xff]  ;;  %3065 = vst [vmem:[#allocation5 + $0xee0] sm:$0xff] %v7547_v37  ;;  %v7554_v27 = vadd.f32 %v2042_v17, %v1018_v59 }
 0x2ad   :  { %v1532_v48 = vld [vmem:[%s7866_s0 + $0xef8] sm:$0xff]  ;;  %4766 = vst [vmem:[#allocation6 + $0x408] sm:$0xff] %v5311_v25  ;;  %4767 = vst [vmem:[#allocation6 + $0x410] sm:$0xff] %v5312_v28  ;;  %v5314_v18 = vpack.c.bf16 %v5710_v60, %v5709_v51  ;;  %v5711_v53 = vld [vmem:[#allocation5 + $0x850] sm:$0xff]  ;;  %v7556_v30 = vadd.f32 %v2043_v43, %v1019_v42  ;;  %v1020_v25 = vmul.f32 0.999, %v508_v47 }
 0x2ae   :  { %4768 = vst [vmem:[#allocation6 + $0x418] sm:$0xff] %v5313_v36  ;;  %v5712_v54 = vld [vmem:[#allocation5 + $0x858] sm:$0xff]  ;;  %v5713_v12 = vld [vmem:[#allocation5 + $0x860] sm:$0xff]  ;;  %v5714_v4 = vld [vmem:[#allocation5 + $0x868] sm:$0xff]  ;;  %v2044_v28 = vmul.f32 0.001, %v1532_v48 }
 0x2af   :  { %v5315_v7 = vpack.c.bf16 %v5712_v54, %v5711_v53  ;;  %v5316_v34 = vpack.c.bf16 %v5714_v4, %v5713_v12  ;;  %v5715_v15 = vld [vmem:[#allocation5 + $0x870] sm:$0xff]  ;;  %v5716_v16 = vld [vmem:[#allocation5 + $0x878] sm:$0xff]  ;;  %7902 = vst [vmem:[#allocation11_spill] sm:$0xff] %v7554_v27  ;;  %7903 = vst [vmem:[#allocation12_spill] sm:$0xff] %v7556_v30  ;;  %v1021_v51 = vmul.f32 0.999, %v509_v49 }
 0x2b0   :  { %v5317_v26 = vpack.c.bf16 %v5716_v16, %v5715_v15  ;;  %v1533_v32 = vld [vmem:[%s7866_s0 + $0xf00] sm:$0xff]  ;;  %v510_v36 = vld [vmem:[#allocation2 + $0xf08] sm:$0xff]  ;;  %4769 = vst [vmem:[#allocation6 + $0x420] sm:$0xff] %v5314_v18  ;;  %3066 = vst [vmem:[#allocation5 + $0xee8] sm:$0xff] %v7554_v27  ;;  %v7563_v17 = vadd.f32 %v2044_v28, %v1020_v25 }
 0x2b1   :  { %v2045_v60 = vmul.f32 0.001, %v1533_v32  ;;  %v1022_v53 = vmul.f32 0.999, %v510_v36  ;;  %4770 = vst [vmem:[#allocation6 + $0x428] sm:$0xff] %v5315_v7  ;;  %4771 = vst [vmem:[#allocation6 + $0x430] sm:$0xff] %v5316_v34 }
 0x2b2   :  { %4772 = vst [vmem:[#allocation6 + $0x438] sm:$0xff] %v5317_v26  ;;  %v5717_v54 = vld [vmem:[#allocation5 + $0x880] sm:$0xff]  ;;  %v5718_v12 = vld [vmem:[#allocation5 + $0x888] sm:$0xff]  ;;  %3067 = vst [vmem:[#allocation5 + $0xef0] sm:$0xff] %v7556_v30 }
 0x2b3   :  { %v5318_v59 = vpack.c.bf16 %v5718_v12, %v5717_v54  ;;  %7904 = vst [vmem:[#allocation13_spill] sm:$0xff] %v7563_v17  ;;  %v1534_v42 = vld [vmem:[%s7866_s0 + $0xf08] sm:$0xff]  ;;  %v511_v43 = vld [vmem:[#allocation2 + $0xf10] sm:$0xff]  ;;  %v5720_v49 = vld [vmem:[#allocation5 + $0x898] sm:$0xff]  ;;  %v7571_v25 = vadd.f32 %v2045_v60, %v1021_v51 }
 0x2b4   :  { %v1535_v47 = vld [vmem:[%s7866_s0 + $0xf10] sm:$0xff]  ;;  %v5721_v7 = vld [vmem:[#allocation5 + $0x8a0] sm:$0xff]  ;;  %v5722_v4 = vld [vmem:[#allocation5 + $0x8a8] sm:$0xff]  ;;  %v2046_v28 = vmul.f32 0.001, %v1534_v42  ;;  %3068 = vst [vmem:[#allocation5 + $0xef8] sm:$0xff] %v7563_v17 }
 0x2b5   :  { %v5719_v48 = vld [vmem:[#allocation5 + $0x890] sm:$0xff]  ;;  %v5320_v34 = vpack.c.bf16 %v5722_v4, %v5721_v7  ;;  %v5724_v16 = vld [vmem:[#allocation5 + $0x8b8] sm:$0xff]  ;;  %7905 = vst [vmem:[#allocation14_spill] sm:$0xff] %v7571_v25  ;;  %v1023_v32 = vmul.f32 0.999, %v511_v43  ;;  %4773 = vst [vmem:[#allocation6 + $0x440] sm:$0xff] %v5318_v59 }
 0x2b6   :  { %v5319_v18 = vpack.c.bf16 %v5720_v49, %v5719_v48  ;;  %v5723_v15 = vld [vmem:[#allocation5 + $0x8b0] sm:$0xff]  ;;  %v2047_v36 = vmul.f32 0.001, %v1535_v47  ;;  %v512_v54 = vld [vmem:[#allocation2 + $0xf18] sm:$0xff]  ;;  %v513_v48 = vld [vmem:[#allocation2 + $0xf20] sm:$0xff]  ;;  %3069 = vst [vmem:[#allocation5 + $0xf00] sm:$0xff] %v7571_v25  ;;  %v7578_v30 = vadd.f32 %v2046_v28, %v1022_v53 }
 0x2b7   :  { %v5321_v26 = vpack.c.bf16 %v5724_v16, %v5723_v15  ;;  %v1536_v12 = vld [vmem:[%s7866_s0 + $0xf18] sm:$0xff]  ;;  %4775 = vst [vmem:[#allocation6 + $0x450] sm:$0xff] %v5320_v34  ;;  %v5725_v49 = vld [vmem:[#allocation5 + $0x8c0] sm:$0xff]  ;;  %v5726_v7 = vld [vmem:[#allocation5 + $0x8c8] sm:$0xff] }
 0x2b8   :  { %4774 = vst [vmem:[#allocation6 + $0x448] sm:$0xff] %v5319_v18  ;;  %v5322_v4 = vpack.c.bf16 %v5726_v7, %v5725_v49  ;;  %v5727_v51 = vld [vmem:[#allocation5 + $0x8d0] sm:$0xff]  ;;  %v5728_v60 = vld [vmem:[#allocation5 + $0x8d8] sm:$0xff]  ;;  %v5729_v43 = vld [vmem:[#allocation5 + $0x8e0] sm:$0xff]  ;;  %v7580_v27 = vadd.f32 %v2047_v36, %v1023_v32  ;;  %v1024_v18 = vmul.f32 0.999, %v512_v54 }
 0x2b9   :  { %4776 = vst [vmem:[#allocation6 + $0x458] sm:$0xff] %v5321_v26  ;;  %v5323_v42 = vpack.c.bf16 %v5728_v60, %v5727_v51  ;;  %v5730_v47 = vld [vmem:[#allocation5 + $0x8e8] sm:$0xff]  ;;  %v5731_v15 = vld [vmem:[#allocation5 + $0x8f0] sm:$0xff]  ;;  %v5732_v16 = vld [vmem:[#allocation5 + $0x8f8] sm:$0xff]  ;;  %v2048_v34 = vmul.f32 0.001, %v1536_v12 }
 0x2ba   :  { %v5324_v59 = vpack.c.bf16 %v5730_v47, %v5729_v43  ;;  %v5325_v17 = vpack.c.bf16 %v5732_v16, %v5731_v15  ;;  %7906 = vst [vmem:[#allocation15_spill] sm:$0xff] %v7578_v30  ;;  %7907 = vst [vmem:[#allocation16_spill] sm:$0xff] %v7580_v27  ;;  %v1537_v26 = vld [vmem:[%s7866_s0 + $0xf20] sm:$0xff]  ;;  %v514_v49 = vld [vmem:[#allocation2 + $0xf28] sm:$0xff]  ;;  %v1025_v7 = vmul.f32 0.999, %v513_v48 }
 0x2bb   :  { %v2049_v51 = vmul.f32 0.001, %v1537_v26  ;;  %v1026_v60 = vmul.f32 0.999, %v514_v49  ;;  %4777 = vst [vmem:[#allocation6 + $0x460] sm:$0xff] %v5322_v4  ;;  %4778 = vst [vmem:[#allocation6 + $0x468] sm:$0xff] %v5323_v42  ;;  %v7587_v28 = vadd.f32 %v2048_v34, %v1024_v18 }
 0x2bc   :  { %4779 = vst [vmem:[#allocation6 + $0x470] sm:$0xff] %v5324_v59  ;;  %4780 = vst [vmem:[#allocation6 + $0x478] sm:$0xff] %v5325_v17  ;;  %v5733_v43 = vld [vmem:[#allocation5 + $0x900] sm:$0xff]  ;;  %v5734_v47 = vld [vmem:[#allocation5 + $0x908] sm:$0xff] }
 0x2bd   :  { %v5326_v53 = vpack.c.bf16 %v5734_v47, %v5733_v43  ;;  %3070 = vst [vmem:[#allocation5 + $0xf08] sm:$0xff] %v7578_v30  ;;  %3071 = vst [vmem:[#allocation5 + $0xf10] sm:$0xff] %v7580_v27  ;;  %v1538_v32 = vld [vmem:[%s7866_s0 + $0xf28] sm:$0xff]  ;;  %v515_v36 = vld [vmem:[#allocation2 + $0xf30] sm:$0xff]  ;;  %v7595_v18 = vadd.f32 %v2049_v51, %v1025_v7 }
 0x2be   :  { %7908 = vst [vmem:[#allocation17_spill] sm:$0xff] %v7587_v28  ;;  %v1539_v54 = vld [vmem:[%s7866_s0 + $0xf30] sm:$0xff]  ;;  %v5736_v17 = vld [vmem:[#allocation5 + $0x918] sm:$0xff]  ;;  %v5737_v4 = vld [vmem:[#allocation5 + $0x920] sm:$0xff]  ;;  %v2050_v34 = vmul.f32 0.001, %v1538_v32 }
 0x2bf   :  { %v5735_v12 = vld [vmem:[#allocation5 + $0x910] sm:$0xff]  ;;  %v5738_v42 = vld [vmem:[#allocation5 + $0x928] sm:$0xff]  ;;  %v5740_v16 = vld [vmem:[#allocation5 + $0x938] sm:$0xff]  ;;  %7909 = vst [vmem:[#allocation18_spill] sm:$0xff] %v7595_v18  ;;  %v1027_v49 = vmul.f32 0.999, %v515_v36 }
 0x2c0   :  { %v5327_v48 = vpack.c.bf16 %v5736_v17, %v5735_v12  ;;  %v5328_v59 = vpack.c.bf16 %v5738_v42, %v5737_v4  ;;  %v5739_v15 = vld [vmem:[#allocation5 + $0x930] sm:$0xff]  ;;  %v2051_v43 = vmul.f32 0.001, %v1539_v54  ;;  %4781 = vst [vmem:[#allocation6 + $0x480] sm:$0xff] %v5326_v53  ;;  %3072 = vst [vmem:[#allocation5 + $0xf18] sm:$0xff] %v7587_v28  ;;  %v516_v47 = vld [vmem:[#allocation2 + $0xf38] sm:$0xff]  ;;  %v7602_v30 = vadd.f32 %v2050_v34, %v1026_v60 }
 0x2c1   :  { %v5329_v26 = vpack.c.bf16 %v5740_v16, %v5739_v15  ;;  %v1540_v27 = vld [vmem:[%s7866_s0 + $0xf38] sm:$0xff]  ;;  %v517_v12 = vld [vmem:[#allocation2 + $0xf40] sm:$0xff]  ;;  %v5742_v4 = vld [vmem:[#allocation5 + $0x948] sm:$0xff]  ;;  %3073 = vst [vmem:[#allocation5 + $0xf20] sm:$0xff] %v7595_v18 }
 0x2c2   :  { %4782 = vst [vmem:[#allocation6 + $0x488] sm:$0xff] %v5327_v48  ;;  %4783 = vst [vmem:[#allocation6 + $0x490] sm:$0xff] %v5328_v59  ;;  %v5741_v17 = vld [vmem:[#allocation5 + $0x940] sm:$0xff]  ;;  %v5743_v7 = vld [vmem:[#allocation5 + $0x950] sm:$0xff]  ;;  %v7604_v25 = vadd.f32 %v2051_v43, %v1027_v49  ;;  %v1028_v48 = vmul.f32 0.999, %v516_v47 }
 0x2c3   :  { %4784 = vst [vmem:[#allocation6 + $0x498] sm:$0xff] %v5329_v26  ;;  %v5330_v42 = vpack.c.bf16 %v5742_v4, %v5741_v17  ;;  %v5744_v51 = vld [vmem:[#allocation5 + $0x958] sm:$0xff]  ;;  %v5745_v36 = vld [vmem:[#allocation5 + $0x960] sm:$0xff]  ;;  %v5746_v54 = vld [vmem:[#allocation5 + $0x968] sm:$0xff]  ;;  %v2052_v59 = vmul.f32 0.001, %v1540_v27 }
 0x2c4   :  { %v5331_v32 = vpack.c.bf16 %v5744_v51, %v5743_v7  ;;  %v5332_v53 = vpack.c.bf16 %v5746_v54, %v5745_v36  ;;  %v5747_v15 = vld [vmem:[#allocation5 + $0x970] sm:$0xff]  ;;  %v5748_v16 = vld [vmem:[#allocation5 + $0x978] sm:$0xff]  ;;  %7910 = vst [vmem:[#allocation19_spill] sm:$0xff] %v7602_v30  ;;  %7911 = vst [vmem:[#allocation20_spill] sm:$0xff] %v7604_v25  ;;  %v1029_v4 = vmul.f32 0.999, %v517_v12 }
 0x2c5   :  { %v5333_v28 = vpack.c.bf16 %v5748_v16, %v5747_v15  ;;  %v1541_v26 = vld [vmem:[%s7866_s0 + $0xf40] sm:$0xff]  ;;  %v518_v17 = vld [vmem:[#allocation2 + $0xf48] sm:$0xff]  ;;  %4785 = vst [vmem:[#allocation6 + $0x4a0] sm:$0xff] %v5330_v42  ;;  %3074 = vst [vmem:[#allocation5 + $0xf28] sm:$0xff] %v7602_v30  ;;  %v7611_v27 = vadd.f32 %v2052_v59, %v1028_v48 }
 0x2c6   :  { %v2053_v7 = vmul.f32 0.001, %v1541_v26  ;;  %v1030_v51 = vmul.f32 0.999, %v518_v17  ;;  %4786 = vst [vmem:[#allocation6 + $0x4a8] sm:$0xff] %v5331_v32  ;;  %4787 = vst [vmem:[#allocation6 + $0x4b0] sm:$0xff] %v5332_v53 }
 0x2c7   :  { %4788 = vst [vmem:[#allocation6 + $0x4b8] sm:$0xff] %v5333_v28  ;;  %v5749_v36 = vld [vmem:[#allocation5 + $0x980] sm:$0xff]  ;;  %v5750_v54 = vld [vmem:[#allocation5 + $0x988] sm:$0xff]  ;;  %3075 = vst [vmem:[#allocation5 + $0xf30] sm:$0xff] %v7604_v25 }
 0x2c8   :  { %v5334_v60 = vpack.c.bf16 %v5750_v54, %v5749_v36  ;;  %7912 = vst [vmem:[#allocation21_spill] sm:$0xff] %v7611_v27  ;;  %v1542_v34 = vld [vmem:[%s7866_s0 + $0xf48] sm:$0xff]  ;;  %v519_v49 = vld [vmem:[#allocation2 + $0xf50] sm:$0xff]  ;;  %v5752_v28 = vld [vmem:[#allocation5 + $0x998] sm:$0xff]  ;;  %v7619_v48 = vadd.f32 %v2053_v7, %v1029_v4 }
 0x2c9   :  { %v1543_v43 = vld [vmem:[%s7866_s0 + $0xf50] sm:$0xff]  ;;  %v5753_v42 = vld [vmem:[#allocation5 + $0x9a0] sm:$0xff]  ;;  %v5754_v32 = vld [vmem:[#allocation5 + $0x9a8] sm:$0xff]  ;;  %v2054_v59 = vmul.f32 0.001, %v1542_v34  ;;  %3076 = vst [vmem:[#allocation5 + $0xf38] sm:$0xff] %v7611_v27 }
 0x2ca   :  { %v5751_v47 = vld [vmem:[#allocation5 + $0x990] sm:$0xff]  ;;  %v5336_v53 = vpack.c.bf16 %v5754_v32, %v5753_v42  ;;  %v5756_v16 = vld [vmem:[#allocation5 + $0x9b8] sm:$0xff]  ;;  %7913 = vst [vmem:[#allocation22_spill] sm:$0xff] %v7619_v48  ;;  %v1031_v17 = vmul.f32 0.999, %v519_v49  ;;  %4789 = vst [vmem:[#allocation6 + $0x4c0] sm:$0xff] %v5334_v60 }
 0x2cb   :  { %v5335_v12 = vpack.c.bf16 %v5752_v28, %v5751_v47  ;;  %v5755_v15 = vld [vmem:[#allocation5 + $0x9b0] sm:$0xff]  ;;  %v2055_v36 = vmul.f32 0.001, %v1543_v43  ;;  %v520_v54 = vld [vmem:[#allocation2 + $0xf58] sm:$0xff]  ;;  %v521_v47 = vld [vmem:[#allocation2 + $0xf60] sm:$0xff]  ;;  %3077 = vst [vmem:[#allocation5 + $0xf40] sm:$0xff] %v7619_v48  ;;  %v7626_v30 = vadd.f32 %v2054_v59, %v1030_v51 }
 0x2cc   :  { %v5337_v26 = vpack.c.bf16 %v5756_v16, %v5755_v15  ;;  %v1544_v25 = vld [vmem:[%s7866_s0 + $0xf58] sm:$0xff]  ;;  %4791 = vst [vmem:[#allocation6 + $0x4d0] sm:$0xff] %v5336_v53  ;;  %v5757_v28 = vld [vmem:[#allocation5 + $0x9c0] sm:$0xff]  ;;  %v5758_v42 = vld [vmem:[#allocation5 + $0x9c8] sm:$0xff] }
 0x2cd   :  { %4790 = vst [vmem:[#allocation6 + $0x4c8] sm:$0xff] %v5335_v12  ;;  %v5338_v32 = vpack.c.bf16 %v5758_v42, %v5757_v28  ;;  %v5759_v4 = vld [vmem:[#allocation5 + $0x9d0] sm:$0xff]  ;;  %v5760_v7 = vld [vmem:[#allocation5 + $0x9d8] sm:$0xff]  ;;  %v5761_v49 = vld [vmem:[#allocation5 + $0x9e0] sm:$0xff]  ;;  %v7628_v18 = vadd.f32 %v2055_v36, %v1031_v17  ;;  %v1032_v12 = vmul.f32 0.999, %v520_v54 }
 0x2ce   :  { %4792 = vst [vmem:[#allocation6 + $0x4d8] sm:$0xff] %v5337_v26  ;;  %v5339_v34 = vpack.c.bf16 %v5760_v7, %v5759_v4  ;;  %v5762_v43 = vld [vmem:[#allocation5 + $0x9e8] sm:$0xff]  ;;  %v5763_v15 = vld [vmem:[#allocation5 + $0x9f0] sm:$0xff]  ;;  %v5764_v16 = vld [vmem:[#allocation5 + $0x9f8] sm:$0xff]  ;;  %v2056_v53 = vmul.f32 0.001, %v1544_v25 }
 0x2cf   :  { %v5340_v60 = vpack.c.bf16 %v5762_v43, %v5761_v49  ;;  %v5341_v27 = vpack.c.bf16 %v5764_v16, %v5763_v15  ;;  %7914 = vst [vmem:[#allocation23_spill] sm:$0xff] %v7626_v30  ;;  %7915 = vst [vmem:[#allocation24_spill] sm:$0xff] %v7628_v18  ;;  %v1545_v26 = vld [vmem:[%s7866_s0 + $0xf60] sm:$0xff]  ;;  %v522_v28 = vld [vmem:[#allocation2 + $0xf68] sm:$0xff]  ;;  %v1033_v42 = vmul.f32 0.999, %v521_v47 }
 0x2d0   :  { %v2057_v4 = vmul.f32 0.001, %v1545_v26  ;;  %v1034_v7 = vmul.f32 0.999, %v522_v28  ;;  %4793 = vst [vmem:[#allocation6 + $0x4e0] sm:$0xff] %v5338_v32  ;;  %4794 = vst [vmem:[#allocation6 + $0x4e8] sm:$0xff] %v5339_v34  ;;  %v7635_v25 = vadd.f32 %v2056_v53, %v1032_v12 }
 0x2d1   :  { %4795 = vst [vmem:[#allocation6 + $0x4f0] sm:$0xff] %v5340_v60  ;;  %4796 = vst [vmem:[#allocation6 + $0x4f8] sm:$0xff] %v5341_v27  ;;  %v5765_v49 = vld [vmem:[#allocation5 + $0xa00] sm:$0xff]  ;;  %v5766_v43 = vld [vmem:[#allocation5 + $0xa08] sm:$0xff] }
 0x2d2   :  { %v5342_v51 = vpack.c.bf16 %v5766_v43, %v5765_v49  ;;  %3078 = vst [vmem:[#allocation5 + $0xf48] sm:$0xff] %v7626_v30  ;;  %3079 = vst [vmem:[#allocation5 + $0xf50] sm:$0xff] %v7628_v18  ;;  %v1546_v59 = vld [vmem:[%s7866_s0 + $0xf68] sm:$0xff]  ;;  %v523_v17 = vld [vmem:[#allocation2 + $0xf70] sm:$0xff]  ;;  %v7643_v12 = vadd.f32 %v2057_v4, %v1033_v42 }
 0x2d3   :  { %7916 = vst [vmem:[#allocation25_spill] sm:$0xff] %v7635_v25  ;;  %v1547_v36 = vld [vmem:[%s7866_s0 + $0xf70] sm:$0xff]  ;;  %v5768_v27 = vld [vmem:[#allocation5 + $0xa18] sm:$0xff]  ;;  %v5769_v32 = vld [vmem:[#allocation5 + $0xa20] sm:$0xff]  ;;  %v2058_v53 = vmul.f32 0.001, %v1546_v59 }
 0x2d4   :  { %v5767_v54 = vld [vmem:[#allocation5 + $0xa10] sm:$0xff]  ;;  %v5770_v34 = vld [vmem:[#allocation5 + $0xa28] sm:$0xff]  ;;  %v5772_v16 = vld [vmem:[#allocation5 + $0xa38] sm:$0xff]  ;;  %7917 = vst [vmem:[#allocation26_spill] sm:$0xff] %v7643_v12  ;;  %v1035_v28 = vmul.f32 0.999, %v523_v17 }
 0x2d5   :  { %v5343_v47 = vpack.c.bf16 %v5768_v27, %v5767_v54  ;;  %v5344_v60 = vpack.c.bf16 %v5770_v34, %v5769_v32  ;;  %v5771_v15 = vld [vmem:[#allocation5 + $0xa30] sm:$0xff]  ;;  %v2059_v49 = vmul.f32 0.001, %v1547_v36  ;;  %4797 = vst [vmem:[#allocation6 + $0x500] sm:$0xff] %v5342_v51  ;;  %3080 = vst [vmem:[#allocation5 + $0xf58] sm:$0xff] %v7635_v25  ;;  %v524_v43 = vld [vmem:[#allocation2 + $0xf78] sm:$0xff]  ;;  %v7650_v30 = vadd.f32 %v2058_v53, %v1034_v7 }
 0x2d6   :  { %v5345_v26 = vpack.c.bf16 %v5772_v16, %v5771_v15  ;;  %v1548_v18 = vld [vmem:[%s7866_s0 + $0xf78] sm:$0xff]  ;;  %v525_v54 = vld [vmem:[#allocation2 + $0xf80] sm:$0xff]  ;;  %v5774_v32 = vld [vmem:[#allocation5 + $0xa48] sm:$0xff]  ;;  %3081 = vst [vmem:[#allocation5 + $0xf60] sm:$0xff] %v7643_v12 }
 0x2d7   :  { %4798 = vst [vmem:[#allocation6 + $0x508] sm:$0xff] %v5343_v47  ;;  %4799 = vst [vmem:[#allocation6 + $0x510] sm:$0xff] %v5344_v60  ;;  %v5773_v27 = vld [vmem:[#allocation5 + $0xa40] sm:$0xff]  ;;  %v5775_v42 = vld [vmem:[#allocation5 + $0xa50] sm:$0xff]  ;;  %v7652_v48 = vadd.f32 %v2059_v49, %v1035_v28  ;;  %v1036_v47 = vmul.f32 0.999, %v524_v43 }
 0x2d8   :  { %4800 = vst [vmem:[#allocation6 + $0x518] sm:$0xff] %v5345_v26  ;;  %v5346_v34 = vpack.c.bf16 %v5774_v32, %v5773_v27  ;;  %v5776_v4 = vld [vmem:[#allocation5 + $0xa58] sm:$0xff]  ;;  %v5777_v17 = vld [vmem:[#allocation5 + $0xa60] sm:$0xff]  ;;  %v5778_v36 = vld [vmem:[#allocation5 + $0xa68] sm:$0xff]  ;;  %v2060_v60 = vmul.f32 0.001, %v1548_v18 }
 0x2d9   :  { %v5347_v59 = vpack.c.bf16 %v5776_v4, %v5775_v42  ;;  %v5348_v51 = vpack.c.bf16 %v5778_v36, %v5777_v17  ;;  %v5779_v15 = vld [vmem:[#allocation5 + $0xa70] sm:$0xff]  ;;  %v5780_v16 = vld [vmem:[#allocation5 + $0xa78] sm:$0xff]  ;;  %7918 = vst [vmem:[#allocation27_spill] sm:$0xff] %v7650_v30  ;;  %7919 = vst [vmem:[#allocation28_spill] sm:$0xff] %v7652_v48  ;;  %v1037_v32 = vmul.f32 0.999, %v525_v54 }
 0x2da   :  { %v5349_v25 = vpack.c.bf16 %v5780_v16, %v5779_v15  ;;  %v1549_v26 = vld [vmem:[%s7866_s0 + $0xf80] sm:$0xff]  ;;  %v526_v27 = vld [vmem:[#allocation2 + $0xf88] sm:$0xff]  ;;  %4801 = vst [vmem:[#allocation6 + $0x520] sm:$0xff] %v5346_v34  ;;  %3082 = vst [vmem:[#allocation5 + $0xf68] sm:$0xff] %v7650_v30  ;;  %v7659_v18 = vadd.f32 %v2060_v60, %v1036_v47 }
 0x2db   :  { %v2061_v42 = vmul.f32 0.001, %v1549_v26  ;;  %v1038_v4 = vmul.f32 0.999, %v526_v27  ;;  %4802 = vst [vmem:[#allocation6 + $0x528] sm:$0xff] %v5347_v59  ;;  %4803 = vst [vmem:[#allocation6 + $0x530] sm:$0xff] %v5348_v51 }
 0x2dc   :  { %4804 = vst [vmem:[#allocation6 + $0x538] sm:$0xff] %v5349_v25  ;;  %v5781_v17 = vld [vmem:[#allocation5 + $0xa80] sm:$0xff]  ;;  %v5782_v36 = vld [vmem:[#allocation5 + $0xa88] sm:$0xff]  ;;  %3083 = vst [vmem:[#allocation5 + $0xf70] sm:$0xff] %v7652_v48 }
 0x2dd   :  { %v5350_v7 = vpack.c.bf16 %v5782_v36, %v5781_v17  ;;  %7920 = vst [vmem:[#allocation29_spill] sm:$0xff] %v7659_v18  ;;  %v1550_v53 = vld [vmem:[%s7866_s0 + $0xf88] sm:$0xff]  ;;  %v527_v28 = vld [vmem:[#allocation2 + $0xf90] sm:$0xff]  ;;  %v5784_v25 = vld [vmem:[#allocation5 + $0xa98] sm:$0xff]  ;;  %v7667_v47 = vadd.f32 %v2061_v42, %v1037_v32 }
 0x2de   :  { %v1551_v49 = vld [vmem:[%s7866_s0 + $0xf90] sm:$0xff]  ;;  %v5785_v34 = vld [vmem:[#allocation5 + $0xaa0] sm:$0xff]  ;;  %v5786_v59 = vld [vmem:[#allocation5 + $0xaa8] sm:$0xff]  ;;  %v2062_v60 = vmul.f32 0.001, %v1550_v53  ;;  %3084 = vst [vmem:[#allocation5 + $0xf78] sm:$0xff] %v7659_v18 }
 0x2df   :  { %v5783_v43 = vld [vmem:[#allocation5 + $0xa90] sm:$0xff]  ;;  %v5352_v51 = vpack.c.bf16 %v5786_v59, %v5785_v34  ;;  %v5788_v16 = vld [vmem:[#allocation5 + $0xab8] sm:$0xff]  ;;  %7921 = vst [vmem:[#allocation30_spill] sm:$0xff] %v7667_v47  ;;  %v1039_v27 = vmul.f32 0.999, %v527_v28  ;;  %4805 = vst [vmem:[#allocation6 + $0x540] sm:$0xff] %v5350_v7 }
 0x2e0   :  { %v5351_v54 = vpack.c.bf16 %v5784_v25, %v5783_v43  ;;  %v5787_v15 = vld [vmem:[#allocation5 + $0xab0] sm:$0xff]  ;;  %v2063_v17 = vmul.f32 0.001, %v1551_v49  ;;  %v528_v36 = vld [vmem:[#allocation2 + $0xf98] sm:$0xff]  ;;  %v529_v43 = vld [vmem:[#allocation2 + $0xfa0] sm:$0xff]  ;;  %3085 = vst [vmem:[#allocation5 + $0xf80] sm:$0xff] %v7667_v47  ;;  %v7674_v30 = vadd.f32 %v2062_v60, %v1038_v4 }
 0x2e1   :  { %v5353_v26 = vpack.c.bf16 %v5788_v16, %v5787_v15  ;;  %v1552_v48 = vld [vmem:[%s7866_s0 + $0xf98] sm:$0xff]  ;;  %4807 = vst [vmem:[#allocation6 + $0x550] sm:$0xff] %v5352_v51  ;;  %v5789_v25 = vld [vmem:[#allocation5 + $0xac0] sm:$0xff]  ;;  %v5790_v34 = vld [vmem:[#allocation5 + $0xac8] sm:$0xff] }
 0x2e2   :  { %4806 = vst [vmem:[#allocation6 + $0x548] sm:$0xff] %v5351_v54  ;;  %v5354_v59 = vpack.c.bf16 %v5790_v34, %v5789_v25  ;;  %v5791_v32 = vld [vmem:[#allocation5 + $0xad0] sm:$0xff]  ;;  %v5792_v42 = vld [vmem:[#allocation5 + $0xad8] sm:$0xff]  ;;  %v5793_v28 = vld [vmem:[#allocation5 + $0xae0] sm:$0xff]  ;;  %v7676_v12 = vadd.f32 %v2063_v17, %v1039_v27  ;;  %v1040_v54 = vmul.f32 0.999, %v528_v36 }
 0x2e3   :  { %4808 = vst [vmem:[#allocation6 + $0x558] sm:$0xff] %v5353_v26  ;;  %v5355_v53 = vpack.c.bf16 %v5792_v42, %v5791_v32  ;;  %v5794_v49 = vld [vmem:[#allocation5 + $0xae8] sm:$0xff]  ;;  %v5795_v15 = vld [vmem:[#allocation5 + $0xaf0] sm:$0xff]  ;;  %v5796_v16 = vld [vmem:[#allocation5 + $0xaf8] sm:$0xff]  ;;  %v2064_v51 = vmul.f32 0.001, %v1552_v48 }
 0x2e4   :  { %v5356_v7 = vpack.c.bf16 %v5794_v49, %v5793_v28  ;;  %v5357_v18 = vpack.c.bf16 %v5796_v16, %v5795_v15  ;;  %7922 = vst [vmem:[#allocation31_spill] sm:$0xff] %v7674_v30  ;;  %7923 = vst [vmem:[#allocation32_spill] sm:$0xff] %v7676_v12  ;;  %v1553_v26 = vld [vmem:[%s7866_s0 + $0xfa0] sm:$0xff]  ;;  %v530_v25 = vld [vmem:[#allocation2 + $0xfa8] sm:$0xff]  ;;  %v1041_v34 = vmul.f32 0.999, %v529_v43 }
 0x2e5   :  { %v2065_v32 = vmul.f32 0.001, %v1553_v26  ;;  %v1042_v42 = vmul.f32 0.999, %v530_v25  ;;  %4809 = vst [vmem:[#allocation6 + $0x560] sm:$0xff] %v5354_v59  ;;  %4810 = vst [vmem:[#allocation6 + $0x568] sm:$0xff] %v5355_v53  ;;  %v7683_v48 = vadd.f32 %v2064_v51, %v1040_v54 }
 0x2e6   :  { %4811 = vst [vmem:[#allocation6 + $0x570] sm:$0xff] %v5356_v7  ;;  %4812 = vst [vmem:[#allocation6 + $0x578] sm:$0xff] %v5357_v18  ;;  %v5797_v28 = vld [vmem:[#allocation5 + $0xb00] sm:$0xff]  ;;  %v5798_v49 = vld [vmem:[#allocation5 + $0xb08] sm:$0xff] }
 0x2e7   :  { %v5358_v4 = vpack.c.bf16 %v5798_v49, %v5797_v28  ;;  %3086 = vst [vmem:[#allocation5 + $0xf88] sm:$0xff] %v7674_v30  ;;  %3087 = vst [vmem:[#allocation5 + $0xf90] sm:$0xff] %v7676_v12  ;;  %v1554_v60 = vld [vmem:[%s7866_s0 + $0xfa8] sm:$0xff]  ;;  %v531_v27 = vld [vmem:[#allocation2 + $0xfb0] sm:$0xff]  ;;  %v7691_v54 = vadd.f32 %v2065_v32, %v1041_v34 }
 0x2e8   :  { %7924 = vst [vmem:[#allocation33_spill] sm:$0xff] %v7683_v48  ;;  %v1555_v17 = vld [vmem:[%s7866_s0 + $0xfb0] sm:$0xff]  ;;  %v5800_v18 = vld [vmem:[#allocation5 + $0xb18] sm:$0xff]  ;;  %v5801_v59 = vld [vmem:[#allocation5 + $0xb20] sm:$0xff]  ;;  %v2066_v51 = vmul.f32 0.001, %v1554_v60 }
 0x2e9   :  { %v5799_v36 = vld [vmem:[#allocation5 + $0xb10] sm:$0xff]  ;;  %v5802_v53 = vld [vmem:[#allocation5 + $0xb28] sm:$0xff]  ;;  %v5804_v16 = vld [vmem:[#allocation5 + $0xb38] sm:$0xff]  ;;  %7925 = vst [vmem:[#allocation34_spill] sm:$0xff] %v7691_v54  ;;  %v1043_v25 = vmul.f32 0.999, %v531_v27 }
 0x2ea   :  { %v5359_v43 = vpack.c.bf16 %v5800_v18, %v5799_v36  ;;  %v5360_v7 = vpack.c.bf16 %v5802_v53, %v5801_v59  ;;  %v5803_v15 = vld [vmem:[#allocation5 + $0xb30] sm:$0xff]  ;;  %v2067_v28 = vmul.f32 0.001, %v1555_v17  ;;  %4813 = vst [vmem:[#allocation6 + $0x580] sm:$0xff] %v5358_v4  ;;  %3088 = vst [vmem:[#allocation5 + $0xf98] sm:$0xff] %v7683_v48  ;;  %v532_v49 = vld [vmem:[#allocation2 + $0xfb8] sm:$0xff]  ;;  %v7698_v30 = vadd.f32 %v2066_v51, %v1042_v42 }
 0x2eb   :  { %v5361_v26 = vpack.c.bf16 %v5804_v16, %v5803_v15  ;;  %v1556_v12 = vld [vmem:[%s7866_s0 + $0xfb8] sm:$0xff]  ;;  %v533_v36 = vld [vmem:[#allocation2 + $0xfc0] sm:$0xff]  ;;  %v5806_v59 = vld [vmem:[#allocation5 + $0xb48] sm:$0xff]  ;;  %3089 = vst [vmem:[#allocation5 + $0xfa0] sm:$0xff] %v7691_v54 }
 0x2ec   :  { %4814 = vst [vmem:[#allocation6 + $0x588] sm:$0xff] %v5359_v43  ;;  %4815 = vst [vmem:[#allocation6 + $0x590] sm:$0xff] %v5360_v7  ;;  %v5805_v18 = vld [vmem:[#allocation5 + $0xb40] sm:$0xff]  ;;  %v5807_v34 = vld [vmem:[#allocation5 + $0xb50] sm:$0xff]  ;;  %v7700_v47 = vadd.f32 %v2067_v28, %v1043_v25  ;;  %v1044_v43 = vmul.f32 0.999, %v532_v49 }
 0x2ed   :  { %4816 = vst [vmem:[#allocation6 + $0x598] sm:$0xff] %v5361_v26  ;;  %v5362_v53 = vpack.c.bf16 %v5806_v59, %v5805_v18  ;;  %v5808_v32 = vld [vmem:[#allocation5 + $0xb58] sm:$0xff]  ;;  %v5809_v27 = vld [vmem:[#allocation5 + $0xb60] sm:$0xff]  ;;  %v5810_v17 = vld [vmem:[#allocation5 + $0xb68] sm:$0xff]  ;;  %v2068_v7 = vmul.f32 0.001, %v1556_v12 }
 0x2ee   :  { %v5363_v60 = vpack.c.bf16 %v5808_v32, %v5807_v34  ;;  %v5364_v4 = vpack.c.bf16 %v5810_v17, %v5809_v27  ;;  %v5811_v15 = vld [vmem:[#allocation5 + $0xb70] sm:$0xff]  ;;  %v5812_v16 = vld [vmem:[#allocation5 + $0xb78] sm:$0xff]  ;;  %7926 = vst [vmem:[#allocation35_spill] sm:$0xff] %v7698_v30  ;;  %7927 = vst [vmem:[#allocation36_spill] sm:$0xff] %v7700_v47  ;;  %v1045_v59 = vmul.f32 0.999, %v533_v36 }
 0x2ef   :  { %v5365_v48 = vpack.c.bf16 %v5812_v16, %v5811_v15  ;;  %v1557_v26 = vld [vmem:[%s7866_s0 + $0xfc0] sm:$0xff]  ;;  %v534_v18 = vld [vmem:[#allocation2 + $0xfc8] sm:$0xff]  ;;  %4817 = vst [vmem:[#allocation6 + $0x5a0] sm:$0xff] %v5362_v53  ;;  %3090 = vst [vmem:[#allocation5 + $0xfa8] sm:$0xff] %v7698_v30  ;;  %v7707_v12 = vadd.f32 %v2068_v7, %v1044_v43 }
 0x2f0   :  { %v2069_v34 = vmul.f32 0.001, %v1557_v26  ;;  %v1046_v32 = vmul.f32 0.999, %v534_v18  ;;  %4818 = vst [vmem:[#allocation6 + $0x5a8] sm:$0xff] %v5363_v60  ;;  %4819 = vst [vmem:[#allocation6 + $0x5b0] sm:$0xff] %v5364_v4 }
 0x2f1   :  { %4820 = vst [vmem:[#allocation6 + $0x5b8] sm:$0xff] %v5365_v48  ;;  %v5813_v27 = vld [vmem:[#allocation5 + $0xb80] sm:$0xff]  ;;  %v5814_v17 = vld [vmem:[#allocation5 + $0xb88] sm:$0xff]  ;;  %3091 = vst [vmem:[#allocation5 + $0xfb0] sm:$0xff] %v7700_v47 }
 0x2f2   :  { %v5366_v42 = vpack.c.bf16 %v5814_v17, %v5813_v27  ;;  %7928 = vst [vmem:[#allocation37_spill] sm:$0xff] %v7707_v12  ;;  %v1558_v51 = vld [vmem:[%s7866_s0 + $0xfc8] sm:$0xff]  ;;  %v535_v25 = vld [vmem:[#allocation2 + $0xfd0] sm:$0xff]  ;;  %v5816_v48 = vld [vmem:[#allocation5 + $0xb98] sm:$0xff]  ;;  %v7715_v43 = vadd.f32 %v2069_v34, %v1045_v59 }
 0x2f3   :  { %v1559_v28 = vld [vmem:[%s7866_s0 + $0xfd0] sm:$0xff]  ;;  %v5817_v53 = vld [vmem:[#allocation5 + $0xba0] sm:$0xff]  ;;  %v5818_v60 = vld [vmem:[#allocation5 + $0xba8] sm:$0xff]  ;;  %v2070_v7 = vmul.f32 0.001, %v1558_v51  ;;  %3092 = vst [vmem:[#allocation5 + $0xfb8] sm:$0xff] %v7707_v12 }
 0x2f4   :  { %v5815_v49 = vld [vmem:[#allocation5 + $0xb90] sm:$0xff]  ;;  %v5368_v4 = vpack.c.bf16 %v5818_v60, %v5817_v53  ;;  %v5820_v16 = vld [vmem:[#allocation5 + $0xbb8] sm:$0xff]  ;;  %v1047_v18 = vmul.f32 0.999, %v535_v25  ;;  %v2071_v27 = vmul.f32 0.001, %v1559_v28 }
 0x2f5   :  { %v5367_v36 = vpack.c.bf16 %v5816_v48, %v5815_v49  ;;  %v5819_v15 = vld [vmem:[#allocation5 + $0xbb0] sm:$0xff]  ;;  %4821 = vst [vmem:[#allocation6 + $0x5c0] sm:$0xff] %v5366_v42  ;;  %v536_v17 = vld [vmem:[#allocation2 + $0xfd8] sm:$0xff]  ;;  %v537_v49 = vld [vmem:[#allocation2 + $0xfe0] sm:$0xff]  ;;  %v7722_v30 = vadd.f32 %v2070_v7, %v1046_v32 }
 0x2f6   :  { %v5369_v26 = vpack.c.bf16 %v5820_v16, %v5819_v15  ;;  %v1560_v47 = vld [vmem:[%s7866_s0 + $0xfd8] sm:$0xff]  ;;  %4823 = vst [vmem:[#allocation6 + $0x5d0] sm:$0xff] %v5368_v4  ;;  %v5821_v48 = vld [vmem:[#allocation5 + $0xbc0] sm:$0xff]  ;;  %v5822_v53 = vld [vmem:[#allocation5 + $0xbc8] sm:$0xff]  ;;  %v7724_v54 = vadd.f32 %v2071_v27, %v1047_v18 }
 0x2f7   :  { %4822 = vst [vmem:[#allocation6 + $0x5c8] sm:$0xff] %v5367_v36  ;;  %v5370_v60 = vpack.c.bf16 %v5822_v53, %v5821_v48  ;;  %v5823_v59 = vld [vmem:[#allocation5 + $0xbd0] sm:$0xff]  ;;  %v5824_v34 = vld [vmem:[#allocation5 + $0xbd8] sm:$0xff]  ;;  %v5825_v25 = vld [vmem:[#allocation5 + $0xbe0] sm:$0xff]  ;;  %v1048_v36 = vmul.f32 0.999, %v536_v17 }
 0x2f8   :  { %4824 = vst [vmem:[#allocation6 + $0x5d8] sm:$0xff] %v5369_v26  ;;  %v5371_v51 = vpack.c.bf16 %v5824_v34, %v5823_v59  ;;  %v5826_v28 = vld [vmem:[#allocation5 + $0xbe8] sm:$0xff]  ;;  %v5827_v15 = vld [vmem:[#allocation5 + $0xbf0] sm:$0xff]  ;;  %v5828_v16 = vld [vmem:[#allocation5 + $0xbf8] sm:$0xff]  ;;  %v2072_v4 = vmul.f32 0.001, %v1560_v47 }
 0x2f9   :  { %v5372_v42 = vpack.c.bf16 %v5826_v28, %v5825_v25  ;;  %v5373_v12 = vpack.c.bf16 %v5828_v16, %v5827_v15  ;;  %3093 = vst [vmem:[#allocation5 + $0xfc0] sm:$0xff] %v7715_v43  ;;  %7929 = vst [vmem:[#allocation38_spill] sm:$0xff] %v7722_v30  ;;  %v1561_v26 = vld [vmem:[%s7866_s0 + $0xfe0] sm:$0xff]  ;;  %v538_v48 = vld [vmem:[#allocation2 + $0xfe8] sm:$0xff]  ;;  %v1049_v53 = vmul.f32 0.999, %v537_v49 }
 0x2fa   :  { %7930 = vst [vmem:[#allocation39_spill] sm:$0xff] %v7724_v54  ;;  %v2073_v59 = vmul.f32 0.001, %v1561_v26  ;;  %v1050_v34 = vmul.f32 0.999, %v538_v48  ;;  %4825 = vst [vmem:[#allocation6 + $0x5e0] sm:$0xff] %v5370_v60  ;;  %v7731_v47 = vadd.f32 %v2072_v4, %v1048_v36 }
 0x2fb   :  { %4826 = vst [vmem:[#allocation6 + $0x5e8] sm:$0xff] %v5371_v51  ;;  %4827 = vst [vmem:[#allocation6 + $0x5f0] sm:$0xff] %v5372_v42  ;;  %v5829_v25 = vld [vmem:[#allocation5 + $0xc00] sm:$0xff]  ;;  %v5830_v28 = vld [vmem:[#allocation5 + $0xc08] sm:$0xff] }
 0x2fc   :  { %4828 = vst [vmem:[#allocation6 + $0x5f8] sm:$0xff] %v5373_v12  ;;  %v5374_v32 = vpack.c.bf16 %v5830_v28, %v5829_v25  ;;  %3094 = vst [vmem:[#allocation5 + $0xfc8] sm:$0xff] %v7722_v30  ;;  %v1562_v7 = vld [vmem:[%s7866_s0 + $0xfe8] sm:$0xff]  ;;  %v539_v18 = vld [vmem:[#allocation2 + $0xff0] sm:$0xff]  ;;  %v7739_v36 = vadd.f32 %v2073_v59, %v1049_v53 }
 0x2fd   :  { %3095 = vst [vmem:[#allocation5 + $0xfd0] sm:$0xff] %v7724_v54  ;;  %7931 = vst [vmem:[#allocation40_spill] sm:$0xff] %v7731_v47  ;;  %v1563_v27 = vld [vmem:[%s7866_s0 + $0xff0] sm:$0xff]  ;;  %v5832_v12 = vld [vmem:[#allocation5 + $0xc18] sm:$0xff]  ;;  %v2074_v4 = vmul.f32 0.001, %v1562_v7 }
 0x2fe   :  { %v5831_v17 = vld [vmem:[#allocation5 + $0xc10] sm:$0xff]  ;;  %v5833_v60 = vld [vmem:[#allocation5 + $0xc20] sm:$0xff]  ;;  %v5834_v51 = vld [vmem:[#allocation5 + $0xc28] sm:$0xff]  ;;  %v1051_v48 = vmul.f32 0.999, %v539_v18  ;;  %4829 = vst [vmem:[#allocation6 + $0x600] sm:$0xff] %v5374_v32 }
 0x2ff   :  { %v5375_v49 = vpack.c.bf16 %v5832_v12, %v5831_v17  ;;  %v5376_v42 = vpack.c.bf16 %v5834_v51, %v5833_v60  ;;  %v5835_v15 = vld [vmem:[#allocation5 + $0xc30] sm:$0xff]  ;;  %v5836_v16 = vld [vmem:[#allocation5 + $0xc38] sm:$0xff]  ;;  %v2075_v25 = vmul.f32 0.001, %v1563_v27  ;;  %3096 = vst [vmem:[#allocation5 + $0xfd8] sm:$0xff] %v7731_v47  ;;  %v5837_v17 = vld [vmem:[#allocation5 + $0xc40] sm:$0xff] }
 0x300   :  { %v5377_v26 = vpack.c.bf16 %v5836_v16, %v5835_v15  ;;  %v540_v28 = vld [vmem:[#allocation2 + $0xff8] sm:$0xff]  ;;  %v5838_v12 = vld [vmem:[#allocation5 + $0xc48] sm:$0xff]  ;;  %v5839_v51 = vld [vmem:[#allocation5 + $0xc50] sm:$0xff]  ;;  %3097 = vst [vmem:[#allocation5 + $0xfe0] sm:$0xff] %v7739_v36 }
 0x301   :  { %v1564_v54 = vld [vmem:[%s7866_s0 + $0xff8] sm:$0xff]  ;;  %4830 = vst [vmem:[#allocation6 + $0x608] sm:$0xff] %v5375_v49  ;;  %4831 = vst [vmem:[#allocation6 + $0x610] sm:$0xff] %v5376_v42  ;;  %v5378_v60 = vpack.c.bf16 %v5838_v12, %v5837_v17  ;;  %v5841_v7 = vld [vmem:[#allocation5 + $0xc60] sm:$0xff]  ;;  %v7748_v49 = vadd.f32 %v2074_v4, %v1050_v34  ;;  %v7750_v42 = vadd.f32 %v2075_v25, %v1051_v48  ;;  %s5905_s0 = scalar_lea.vmem %s7757_s9, 65536 }
 0x302   :  { %4832 = vst [vmem:[#allocation6 + $0x618] sm:$0xff] %v5377_v26  ;;  %v5840_v53 = vld [vmem:[#allocation5 + $0xc58] sm:$0xff]  ;;  %v5842_v18 = vld [vmem:[#allocation5 + $0xc68] sm:$0xff]  ;;  %v5843_v32 = vld [vmem:[#allocation5 + $0xc70] sm:$0xff]  ;;  %v1052_v26 = vmul.f32 0.999, %v540_v28  ;;  %p5906_p8 = scmp.ne.s32.totalorder %s7757_s9, %s5905_s0  ;;  %p5911_p10 = scmp.lt.s32.totalorder %s5905_s0, %s5905_s0 }
 0x303   :  { %v5379_v59 = vpack.c.bf16 %v5840_v53, %v5839_v51  ;;  %v5380_v27 = vpack.c.bf16 %v5842_v18, %v5841_v7  ;;  %v5844_v15 = vld [vmem:[#allocation5 + $0xc78] sm:$0xff]  ;;  %7932 = vst [vmem:[#allocation41_spill] sm:$0xff] %v7748_v49  ;;  %7933 = vst [vmem:[#allocation42_spill] sm:$0xff] %v7750_v42  ;;  %v2076_v17 = vmul.f32 0.001, %v1564_v54  ;;  %v5845_v12 = vld [vmem:[#allocation5 + $0xc80] sm:$0xff] }
 0x304   :  { %v5381_v16 = vpack.c.bf16 %v5844_v15, %v5843_v32  ;;  %4833 = vst [vmem:[#allocation6 + $0x620] sm:$0xff] %v5378_v60  ;;  %v5846_v51 = vld [vmem:[#allocation5 + $0xc88] sm:$0xff]  ;;  %v5847_v7 = vld [vmem:[#allocation5 + $0xc90] sm:$0xff]  ;;  %v5848_v18 = vld [vmem:[#allocation5 + $0xc98] sm:$0xff]  ;;  %p5912_p11 = por %p5911_p10, %p5910_p9 }
 0x305   :  { %4834 = vst [vmem:[#allocation6 + $0x628] sm:$0xff] %v5379_v59  ;;  %4835 = vst [vmem:[#allocation6 + $0x630] sm:$0xff] %v5380_v27  ;;  %v5382_v53 = vpack.c.bf16 %v5846_v51, %v5845_v12  ;;  %v5383_v32 = vpack.c.bf16 %v5848_v18, %v5847_v7  ;;  %v5849_v15 = vld [vmem:[#allocation5 + $0xca0] sm:$0xff]  ;;  %v5850_v47 = vld [vmem:[#allocation5 + $0xca8] sm:$0xff]  ;;  %v7754_v54 = vadd.f32 %v2076_v17, %v1052_v26 }
 0x306   :  { %4836 = vst [vmem:[#allocation6 + $0x638] sm:$0xff] %v5381_v16  ;;  %v5384_v30 = vpack.c.bf16 %v5850_v47, %v5849_v15  ;;  %v5851_v34 = vld [vmem:[#allocation5 + $0xcb0] sm:$0xff]  ;;  %v5852_v4 = vld [vmem:[#allocation5 + $0xcb8] sm:$0xff]  ;;  %3098 = vst [vmem:[#allocation5 + $0xfe8] sm:$0xff] %v7748_v49  ;;  %p5913_p12 = pnand %p5912_p11, %p5906_p8 }
 0x307   :  { %v5385_v48 = vpack.c.bf16 %v5852_v4, %v5851_v34  ;;  %3099 = vst [vmem:[#allocation5 + $0xff0] sm:$0xff] %v7750_v42  ;;  %v5853_v25 = vld [vmem:[#allocation5 + $0xcc0] sm:$0xff]  ;;  %v5854_v28 = vld [vmem:[#allocation5 + $0xcc8] sm:$0xff]  ;;  %v5855_v59 = vld [vmem:[#allocation5 + $0xcd0] sm:$0xff] }
 0x308   :  { %v5386_v60 = vpack.c.bf16 %v5854_v28, %v5853_v25  ;;  %v5856_v27 = vld [vmem:[#allocation5 + $0xcd8] sm:$0xff]  ;;  %v5857_v12 = vld [vmem:[#allocation5 + $0xce0] sm:$0xff]  ;;  %v5858_v51 = vld [vmem:[#allocation5 + $0xce8] sm:$0xff]  ;;  %4837 = vst [vmem:[#allocation6 + $0x640] sm:$0xff] %v5382_v53 }
 0x309   :  { %v5387_v16 = vpack.c.bf16 %v5856_v27, %v5855_v59  ;;  %v5388_v7 = vpack.c.bf16 %v5858_v51, %v5857_v12  ;;  %4838 = vst [vmem:[#allocation6 + $0x648] sm:$0xff] %v5383_v32  ;;  %4839 = vst [vmem:[#allocation6 + $0x650] sm:$0xff] %v5384_v30  ;;  %v5859_v47 = vld [vmem:[#allocation5 + $0xcf0] sm:$0xff]  ;;  %v5860_v18 = vld [vmem:[#allocation5 + $0xcf8] sm:$0xff] }
 0x30a   :  { %4840 = vst [vmem:[#allocation6 + $0x658] sm:$0xff] %v5385_v48  ;;  %v5389_v15 = vpack.c.bf16 %v5860_v18, %v5859_v47  ;;  %v5861_v26 = vld [vmem:[#allocation5 + $0xd00] sm:$0xff]  ;;  %v5862_v17 = vld [vmem:[#allocation5 + $0xd08] sm:$0xff]  ;;  %v5863_v4 = vld [vmem:[#allocation5 + $0xd10] sm:$0xff] }
 0x30b   :  { %v5390_v34 = vpack.c.bf16 %v5862_v17, %v5861_v26  ;;  %v5864_v25 = vld [vmem:[#allocation5 + $0xd18] sm:$0xff]  ;;  %v5865_v42 = vld [vmem:[#allocation5 + $0xd20] sm:$0xff]  ;;  %v5866_v59 = vld [vmem:[#allocation5 + $0xd28] sm:$0xff]  ;;  %3100 = vst [vmem:[#allocation5 + $0xff8] sm:$0xff] %v7754_v54 }
 0x30c   :  { %v5391_v28 = vpack.c.bf16 %v5864_v25, %v5863_v4  ;;  %v5392_v27 = vpack.c.bf16 %v5866_v59, %v5865_v42  ;;  %4841 = vst [vmem:[#allocation6 + $0x660] sm:$0xff] %v5386_v60  ;;  %4842 = vst [vmem:[#allocation6 + $0x668] sm:$0xff] %v5387_v16  ;;  %v5867_v53 = vld [vmem:[#allocation5 + $0xd30] sm:$0xff]  ;;  %v5868_v30 = vld [vmem:[#allocation5 + $0xd38] sm:$0xff] }
 0x30d   :  { %4843 = vst [vmem:[#allocation6 + $0x670] sm:$0xff] %v5388_v7  ;;  %v5393_v32 = vpack.c.bf16 %v5868_v30, %v5867_v53  ;;  %v5869_v48 = vld [vmem:[#allocation5 + $0xd40] sm:$0xff]  ;;  %v5870_v12 = vld [vmem:[#allocation5 + $0xd48] sm:$0xff]  ;;  %v5871_v47 = vld [vmem:[#allocation5 + $0xd50] sm:$0xff] }
 0x30e   :  { %v5394_v51 = vpack.c.bf16 %v5870_v12, %v5869_v48  ;;  %v5872_v18 = vld [vmem:[#allocation5 + $0xd58] sm:$0xff]  ;;  %v5873_v17 = vld [vmem:[#allocation5 + $0xd60] sm:$0xff]  ;;  %v5874_v49 = vld [vmem:[#allocation5 + $0xd68] sm:$0xff]  ;;  %4844 = vst [vmem:[#allocation6 + $0x678] sm:$0xff] %v5389_v15 }
 0x30f   :  { %v5395_v26 = vpack.c.bf16 %v5872_v18, %v5871_v47  ;;  %v5396_v4 = vpack.c.bf16 %v5874_v49, %v5873_v17  ;;  %4845 = vst [vmem:[#allocation6 + $0x680] sm:$0xff] %v5390_v34  ;;  %4846 = vst [vmem:[#allocation6 + $0x688] sm:$0xff] %v5391_v28  ;;  %v5875_v42 = vld [vmem:[#allocation5 + $0xd70] sm:$0xff]  ;;  %v5876_v60 = vld [vmem:[#allocation5 + $0xd78] sm:$0xff] }
 0x310   :  { %4847 = vst [vmem:[#allocation6 + $0x690] sm:$0xff] %v5392_v27  ;;  %v5397_v16 = vpack.c.bf16 %v5876_v60, %v5875_v42  ;;  %v5877_v7 = vld [vmem:[#allocation5 + $0xd80] sm:$0xff]  ;;  %v5878_v25 = vld [vmem:[#allocation5 + $0xd88] sm:$0xff]  ;;  %v5879_v53 = vld [vmem:[#allocation5 + $0xd90] sm:$0xff] }
 0x311   :  { %v5398_v59 = vpack.c.bf16 %v5878_v25, %v5877_v7  ;;  %v5880_v30 = vld [vmem:[#allocation5 + $0xd98] sm:$0xff]  ;;  %v5881_v12 = vld [vmem:[#allocation5 + $0xda0] sm:$0xff]  ;;  %v5882_v47 = vld [vmem:[#allocation5 + $0xda8] sm:$0xff] }
 0x312   :  { %v5399_v48 = vpack.c.bf16 %v5880_v30, %v5879_v53  ;;  %v5400_v18 = vpack.c.bf16 %v5882_v47, %v5881_v12 }
 0x313   :  { %5916 = shalt.err (!%p5913_p12)
}
 0x314   :  { %s5917_s12 = scalar_lea.hbm %s7868_s2, 65536 }
 0x315   :  { %p5918_p13 = scmp.ne.s32.totalorder %s7868_s2, %s5917_s12  ;;  %p5921_p0 = scmp.lt.u32.totalorder %s5917_s12, %s7868_s2 }
 0x317   :  { %p5923_p1 = pnand %p5921_p0, %p5918_p13 }
 0x319   :  { %5926 = shalt.err (!%p5923_p1)
}
 0x31a   :  { %4904 = dma.vmem_to_hbm [thread:$0]  %s7757_s9, 65536, %s7868_s2, [#allocation4], %s5956_s22, %s5956_s22, %s5957_s23   ;;  %4848 = vst [vmem:[#allocation6 + $0x698] sm:$0xff] %v5393_v32  ;;  %4849 = vst [vmem:[#allocation6 + $0x6a0] sm:$0xff] %v5394_v51  ;;  %v5401_v49 = vpack.c.bf16 %v7323_v8, %v7317_v61  ;;  %v5402_v15 = vpack.c.bf16 %v7338_v40, %v7331_v21  ;;  %v5403_v34 = vpack.c.bf16 %v7347_v52, %v7340_v41  ;;  %v7951_v51 = vld [vmem:[#allocation28_spill] sm:$0xff]  ;;  %v7954_v42 = vld [vmem:[#allocation31_spill] sm:$0xff] }
 0x31b   :  { %4850 = vst [vmem:[#allocation6 + $0x6a8] sm:$0xff] %v5395_v26  ;;  %4851 = vst [vmem:[#allocation6 + $0x6b0] sm:$0xff] %v5396_v4  ;;  %v5404_v28 = vpack.c.bf16 %v7362_v23, %v7355_v2  ;;  %v5405_v27 = vpack.c.bf16 %v7371_v35, %v7364_v24  ;;  %v5406_v32 = vpack.c.bf16 %v7386_v9, %v7379_v50  ;;  %s5959_s2 = smov [#allocation6]   ;;  %v7952_v26 = vld [vmem:[#allocation29_spill] sm:$0xff]  ;;  %v7953_v4 = vld [vmem:[#allocation30_spill] sm:$0xff] }
 0x31c   :  { %4852 = vst [vmem:[#allocation6 + $0x6b8] sm:$0xff] %v5397_v16  ;;  %4853 = vst [vmem:[#allocation6 + $0x6c0] sm:$0xff] %v5398_v59  ;;  %v5407_v61 = vpack.c.bf16 %v7395_v22, %v7388_v10  ;;  %v5408_v8 = vpack.c.bf16 %v7410_v62, %v7403_v38  ;;  %v5409_v21 = vpack.c.bf16 %v7419_v14, %v7412_v63  ;;  %v7934_v22 = vld [vmem:[#allocation11_spill] sm:$0xff]  ;;  %v7935_v62 = vld [vmem:[#allocation12_spill] sm:$0xff]  ;;  %s4910_s22 = sshll.u32 %s5959_s2, 4  ;;  %s4911_s22 = int_to_ptr.vmem [resolvable:$true] %s4910_s22 }
 0x31d   :  { %4854 = vst [vmem:[#allocation6 + $0x6c8] sm:$0xff] %v5399_v48  ;;  %4855 = vst [vmem:[#allocation6 + $0x6d0] sm:$0xff] %v5400_v18  ;;  %v5410_v40 = vpack.c.bf16 %v7434_v56, %v7427_v31  ;;  %v5411_v41 = vpack.c.bf16 %v7443_v11, %v7436_v57  ;;  %v5412_v52 = vpack.c.bf16 %v7458_v55, %v7451_v29  ;;  %v7936_v63 = vld [vmem:[#allocation13_spill] sm:$0xff]  ;;  %v7937_v31 = vld [vmem:[#allocation14_spill] sm:$0xff]  ;;  %s5927_s23 = scalar_lea.vmem %s4911_s22, 32768  ;;  %p5932_p3 = scmp.lt.s32.totalorder %s4911_s22, %s4911_s22 }
 0x31e   :  { %4856 = vst [vmem:[#allocation6 + $0x6d8] sm:$0xff] %v5401_v49  ;;  %4857 = vst [vmem:[#allocation6 + $0x6e0] sm:$0xff] %v5402_v15  ;;  %v5413_v2 = vpack.c.bf16 %v7467_v13, %v7460_v58  ;;  %v5414_v23 = vpack.c.bf16 %v7482_v1, %v7475_v33  ;;  %v5415_v24 = vpack.c.bf16 %v7491_v20, %v7484_v3  ;;  %v7938_v56 = vld [vmem:[#allocation15_spill] sm:$0xff]  ;;  %v7939_v11 = vld [vmem:[#allocation16_spill] sm:$0xff]  ;;  %p5928_p2 = scmp.ne.s32.totalorder %s4911_s22, %s5927_s23  ;;  %p5933_p4 = scmp.lt.s32.totalorder %s5927_s23, %s5927_s23 }
 0x31f   :  { %4858 = vst [vmem:[#allocation6 + $0x6e8] sm:$0xff] %v5403_v34  ;;  %4859 = vst [vmem:[#allocation6 + $0x6f0] sm:$0xff] %v5404_v28  ;;  %v5416_v35 = vpack.c.bf16 %v7506_v19, %v7499_v44  ;;  %v5417_v50 = vpack.c.bf16 %v7515_v39, %v7508_v6  ;;  %v5418_v9 = vpack.c.bf16 %v7530_v45, %v7523_v0  ;;  %v7940_v29 = vld [vmem:[#allocation17_spill] sm:$0xff]  ;;  %v7941_v58 = vld [vmem:[#allocation18_spill] sm:$0xff] }
 0x320   :  { %4860 = vst [vmem:[#allocation6 + $0x6f8] sm:$0xff] %v5405_v27  ;;  %4861 = vst [vmem:[#allocation6 + $0x700] sm:$0xff] %v5406_v32  ;;  %v5419_v10 = vpack.c.bf16 %v7539_v5, %v7532_v46  ;;  %v5420_v38 = vpack.c.bf16 %v7934_v22, %v7547_v37  ;;  %v5421_v14 = vpack.c.bf16 %v7936_v63, %v7935_v62  ;;  %v7942_v13 = vld [vmem:[#allocation19_spill] sm:$0xff]  ;;  %v7943_v1 = vld [vmem:[#allocation20_spill] sm:$0xff]  ;;  %p5934_p5 = por %p5933_p4, %p5932_p3 }
 0x321   :  { %4862 = vst [vmem:[#allocation6 + $0x708] sm:$0xff] %v5407_v61  ;;  %4863 = vst [vmem:[#allocation6 + $0x710] sm:$0xff] %v5408_v8  ;;  %v5422_v57 = vpack.c.bf16 %v7938_v56, %v7937_v31  ;;  %v5423_v55 = vpack.c.bf16 %v7940_v29, %v7939_v11  ;;  %v5424_v33 = vpack.c.bf16 %v7942_v13, %v7941_v58  ;;  %v7944_v3 = vld [vmem:[#allocation21_spill] sm:$0xff]  ;;  %v7945_v44 = vld [vmem:[#allocation22_spill] sm:$0xff] }
 0x322   :  { %4864 = vst [vmem:[#allocation6 + $0x718] sm:$0xff] %v5409_v21  ;;  %4865 = vst [vmem:[#allocation6 + $0x720] sm:$0xff] %v5410_v40  ;;  %v5425_v20 = vpack.c.bf16 %v7944_v3, %v7943_v1  ;;  %v7946_v19 = vld [vmem:[#allocation23_spill] sm:$0xff]  ;;  %v7947_v39 = vld [vmem:[#allocation24_spill] sm:$0xff]  ;;  %v5429_v17 = vpack.c.bf16 %v7952_v26, %v7951_v51  ;;  %v5430_v60 = vpack.c.bf16 %v7954_v42, %v7953_v4  ;;  %p5935_p6 = pnand %p5934_p5, %p5928_p2 }
 0x323   :  { %4866 = vst [vmem:[#allocation6 + $0x728] sm:$0xff] %v5411_v41  ;;  %4867 = vst [vmem:[#allocation6 + $0x730] sm:$0xff] %v5412_v52  ;;  %v5426_v6 = vpack.c.bf16 %v7946_v19, %v7945_v44  ;;  %v7948_v0 = vld [vmem:[#allocation25_spill] sm:$0xff]  ;;  %v7949_v46 = vld [vmem:[#allocation26_spill] sm:$0xff] }
 0x324   :  { %4868 = vst [vmem:[#allocation6 + $0x738] sm:$0xff] %v5413_v2  ;;  %4869 = vst [vmem:[#allocation6 + $0x740] sm:$0xff] %v5414_v23  ;;  %v5427_v45 = vpack.c.bf16 %v7948_v0, %v7947_v39  ;;  %v7950_v5 = vld [vmem:[#allocation27_spill] sm:$0xff]  ;;  %v7955_v16 = vld [vmem:[#allocation32_spill] sm:$0xff] }
 0x325   :  { %4870 = vst [vmem:[#allocation6 + $0x748] sm:$0xff] %v5415_v24  ;;  %4871 = vst [vmem:[#allocation6 + $0x750] sm:$0xff] %v5416_v35  ;;  %v5428_v37 = vpack.c.bf16 %v7950_v5, %v7949_v46  ;;  %v7956_v7 = vld [vmem:[#allocation33_spill] sm:$0xff]  ;;  %v7957_v59 = vld [vmem:[#allocation34_spill] sm:$0xff] }
 0x326   :  { %4872 = vst [vmem:[#allocation6 + $0x758] sm:$0xff] %v5417_v50  ;;  %4873 = vst [vmem:[#allocation6 + $0x760] sm:$0xff] %v5418_v9  ;;  %v5431_v25 = vpack.c.bf16 %v7956_v7, %v7955_v16  ;;  %v7958_v53 = vld [vmem:[#allocation35_spill] sm:$0xff]  ;;  %v7959_v48 = vld [vmem:[#allocation36_spill] sm:$0xff] }
 0x327   :  { %4874 = vst [vmem:[#allocation6 + $0x768] sm:$0xff] %v5419_v10  ;;  %4875 = vst [vmem:[#allocation6 + $0x770] sm:$0xff] %v5420_v38  ;;  %v5432_v30 = vpack.c.bf16 %v7958_v53, %v7957_v59  ;;  %v7960_v12 = vld [vmem:[#allocation37_spill] sm:$0xff]  ;;  %v7961_v18 = vld [vmem:[#allocation38_spill] sm:$0xff] }
 0x328   :  { %4876 = vst [vmem:[#allocation6 + $0x778] sm:$0xff] %v5421_v14  ;;  %4877 = vst [vmem:[#allocation6 + $0x780] sm:$0xff] %v5422_v57  ;;  %v5433_v47 = vpack.c.bf16 %v7960_v12, %v7959_v48  ;;  %v5434_v49 = vpack.c.bf16 %v7961_v18, %v7715_v43  ;;  %v7962_v15 = vld [vmem:[#allocation39_spill] sm:$0xff]  ;;  %v7963_v34 = vld [vmem:[#allocation40_spill] sm:$0xff] }
 0x329   :  { %4878 = vst [vmem:[#allocation6 + $0x788] sm:$0xff] %v5423_v55  ;;  %4879 = vst [vmem:[#allocation6 + $0x790] sm:$0xff] %v5424_v33  ;;  %v5435_v28 = vpack.c.bf16 %v7963_v34, %v7962_v15  ;;  %v7964_v27 = vld [vmem:[#allocation41_spill] sm:$0xff]  ;;  %v7965_v61 = vld [vmem:[#allocation42_spill] sm:$0xff] }
 0x32a   :  { %4880 = vst [vmem:[#allocation6 + $0x798] sm:$0xff] %v5425_v20  ;;  %4881 = vst [vmem:[#allocation6 + $0x7a0] sm:$0xff] %v5426_v6  ;;  %v5436_v32 = vpack.c.bf16 %v7964_v27, %v7739_v36  ;;  %v5437_v8 = vpack.c.bf16 %v7754_v54, %v7965_v61 }
 0x32b   :  { %4882 = vst [vmem:[#allocation6 + $0x7a8] sm:$0xff] %v5427_v45  ;;  %4883 = vst [vmem:[#allocation6 + $0x7b0] sm:$0xff] %v5428_v37 }
 0x32c   :  { %4884 = vst [vmem:[#allocation6 + $0x7b8] sm:$0xff] %v5429_v17  ;;  %4885 = vst [vmem:[#allocation6 + $0x7c0] sm:$0xff] %v5430_v60 }
 0x32d   :  { %4886 = vst [vmem:[#allocation6 + $0x7c8] sm:$0xff] %v5431_v25  ;;  %4887 = vst [vmem:[#allocation6 + $0x7d0] sm:$0xff] %v5432_v30 }
 0x32e   :  { %4888 = vst [vmem:[#allocation6 + $0x7d8] sm:$0xff] %v5433_v47  ;;  %4889 = vst [vmem:[#allocation6 + $0x7e0] sm:$0xff] %v5434_v49 }
 0x32f   :  { %4890 = vst [vmem:[#allocation6 + $0x7e8] sm:$0xff] %v5435_v28  ;;  %4891 = vst [vmem:[#allocation6 + $0x7f0] sm:$0xff] %v5436_v32 }
 0x330   :  { %4892 = vst [vmem:[#allocation6 + $0x7f8] sm:$0xff] %v5437_v8 }
 0x331   :  { %5938 = shalt.err (!%p5935_p6)
}
 0x332   :  { %s5939_s21 = scalar_lea.hbm %s7869_s3, 32768 }
 0x333   :  { %p5940_p7 = scmp.ne.s32.totalorder %s7869_s3, %s5939_s21  ;;  %p5943_p8 = scmp.lt.u32.totalorder %s5939_s21, %s7869_s3 }
 0x335   :  { %p5945_p9 = pnand %p5943_p8, %p5940_p7 }
 0x337   :  { %5948 = shalt.err (!%p5945_p9)
}
 0x338   :  { %s5960_s28 = smov 512   ;;  %s5961_s29 = smov 32  }
 0x339   :  { %4916 = dma.vmem_to_hbm [thread:$0]  %s4911_s22, 32768, %s7869_s3, [#allocation7], %s5960_s28, %s5960_s28, %s5961_s29  }
 0x33a   :  { %5951 = dma.done.wait [#allocation4], 65536  }
 0x33b   :  { %5952 = vsyncadd [#allocation4], 4294901760 }
 0x33c   :  { %5953 = dma.done.wait [#allocation7], 32768  }
 0x33d   :  { %5954 = vsyncadd [#allocation7], 4294934528 }
 0x33e   :  { %4923 = vsyncpa [#allocation3], 1 }
 0x33f   :  { %4924 = vsyncpa [#allocation4], 1 }
 0x340   :  { %4925 = vsyncpa [#allocation7], 1 }

</bundles_post_ra>
